<compile_context>
chip_gen: v6e
topology: v6e:2x2x1
jax: 0.10.0
libtpu: 0.0.40
codegen_flags: <defaults>
</compile_context>

<pallas_src>
import functools

import numpy as np
import jax
import jax.numpy as jnp
from jax.experimental import pallas as pl
from jax.experimental.pallas import tpu as pltpu

_BN_EPS = 1e-5
_ACT_DTYPE = jnp.bfloat16          # inter-kernel activation storage dtype
_MAX_TS = 8192                     # lane tile for the pointwise kernels
_VMEM_LIMIT_BYTES = 48 * 1024 * 1024   # < physical VMEM on every generation


def _cparams(sem):
    return pltpu.CompilerParams(dimension_semantics=sem,
                                vmem_limit_bytes=_VMEM_LIMIT_BYTES)


# ---------------------------------------------------------------------------
# im2col helpers for 'same' 3-D convs on a row-major flattened (D,H,W) volume
# ---------------------------------------------------------------------------
def _conv_taps(D, H, W, kd, kh, kw, pd, ph, pw):
    """Flat lane offsets and boundary-validity masks for every conv tap."""
    S = D * H * W
    p = np.arange(S)
    d = p // (H * W)
    h = (p // W) % H
    w = p % W
    offsets, masks = [], []
    for kz in range(kd):
        for ky in range(kh):
            for kx in range(kw):
                od, oh, ow = kz - pd, ky - ph, kx - pw
                offsets.append(od * H * W + oh * W + ow)
                valid = ((d + od >= 0) & (d + od < D) &
                         (h + oh >= 0) & (h + oh < H) &
                         (w + ow >= 0) & (w + ow < W))
                masks.append(valid.astype(np.float32))
    return tuple(offsets), np.stack(masks, axis=0)            # (taps, S)


def _to_wmat(kern):
    """(kd,kh,kw,cin,cout) filter -> (cout, taps*cin) im2col weight matrix."""
    kd, kh, kw, cin, cout = kern.shape
    taps = kd * kh * kw
    return jnp.transpose(kern.reshape(taps, cin, cout), (2, 0, 1)).reshape(
        cout, taps * cin)


# ---------------------------------------------------------------------------
# Kernel 1: fused 1x1x1 conv (matmul) + folded BN + ReLU, optional channel
#           split into several lane-dense outputs (x1..x4).
# ---------------------------------------------------------------------------
def _pointwise_kernel(x_ref, w_ref, s_ref, b_ref, *o_refs, apply_act):
    x = x_ref[...].astype(jnp.float32)                        # (Cin, TS)
    y = jnp.dot(w_ref[...], x, preferred_element_type=jnp.float32)
    y = y * s_ref[...] + b_ref[...]
    if apply_act:
        y = jnp.maximum(y, 0.0)
    r = 0
    for o_ref in o_refs:
        rc = o_ref.shape[0]
        o_ref[...] = y[r:r + rc, :].astype(o_ref.dtype)
        r += rc


def pointwise_conv_bn_act(x, wt, scale, bias, *, splits=None,
                          out_dtype=_ACT_DTYPE, apply_act=True):
    """act(bn(conv1x1x1(x))).  x: (N, Cin, S);  wt: (Cout, Cin)."""
    N, Cin, S = x.shape
    Cout = wt.shape[0]
    if splits is None:
        splits = (Cout,)
    assert sum(splits) == Cout
    TS = S if S <= _MAX_TS else _MAX_TS
    grid = (N, pl.cdiv(S, TS))
    in_specs = [pl.BlockSpec((None, Cin, TS), lambda n, t: (n, 0, t)),
                pl.BlockSpec((Cout, Cin), lambda n, t: (0, 0)),
                pl.BlockSpec((Cout, 1), lambda n, t: (0, 0)),
                pl.BlockSpec((Cout, 1), lambda n, t: (0, 0))]
    out_shape = tuple(jax.ShapeDtypeStruct((N, cs, S), out_dtype)
                      for cs in splits)
    out_specs = tuple(pl.BlockSpec((None, cs, TS), lambda n, t: (n, 0, t))
                      for cs in splits)
    outs = pl.pallas_call(
        functools.partial(_pointwise_kernel, apply_act=apply_act),
        out_shape=out_shape,
        grid=grid,
        in_specs=in_specs,
        out_specs=out_specs,
        compiler_params=_cparams(("parallel", "parallel")),
    )(x, wt, scale, bias)
    return outs if len(splits) > 1 else outs[0]


# ---------------------------------------------------------------------------
# Kernel 2: final 1x1x1 conv over (x + concat(x1..x4)); the add + concat are
#           fused in-kernel (single K = Cout matmul), BN + ReLU fused.
# ---------------------------------------------------------------------------
def _branch_sum_kernel(x_ref, b1_ref, b2_ref, b3_ref, b4_ref, w_ref, s_ref,
                       b_ref, o_ref, *, apply_act):
    cat = jnp.concatenate([b1_ref[...].astype(jnp.float32),
                           b2_ref[...].astype(jnp.float32),
                           b3_ref[...].astype(jnp.float32),
                           b4_ref[...].astype(jnp.float32)], axis=0)
    xs = x_ref[...].astype(jnp.float32) + cat                 # (Cin, TS)
    y = jnp.dot(w_ref[...], xs, preferred_element_type=jnp.float32)
    y = y * s_ref[...] + b_ref[...]
    if apply_act:
        y = jnp.maximum(y, 0.0)
    o_ref[...] = y.astype(o_ref.dtype)


def branch_sum_pointwise(x, branches, wt, scale, bias, *, apply_act=True,
                         out_dtype=jnp.float32):
    """act(bn((x + concat(branches)) 1x1x1-conv)) with add+concat fused away."""
    N, Cx, S = x.shape
    c = branches[0].shape[1]
    Cout = wt.shape[0]
    assert len(branches) == 4 and Cx == 4 * c == wt.shape[1]
    TS = S if S <= _MAX_TS else _MAX_TS
    grid = (N, pl.cdiv(S, TS))
    in_specs = ([pl.BlockSpec((None, Cx, TS), lambda n, t: (n, 0, t))]
                + [pl.BlockSpec((None, c, TS), lambda n, t: (n, 0, t))] * 4
                + [pl.BlockSpec((Cout, Cx), lambda n, t: (0, 0)),
                   pl.BlockSpec((Cout, 1), lambda n, t: (0, 0)),
                   pl.BlockSpec((Cout, 1), lambda n, t: (0, 0))])
    return pl.pallas_call(
        functools.partial(_branch_sum_kernel, apply_act=apply_act),
        out_shape=jax.ShapeDtypeStruct((N, Cout, S), out_dtype),
        grid=grid,
        in_specs=in_specs,
        out_specs=pl.BlockSpec((None, Cout, TS), lambda n, t: (n, 0, t)),
        compiler_params=_cparams(("parallel", "parallel")),
    )(x, *branches, wt, scale, bias)


# ---------------------------------------------------------------------------
# Kernel 3: whole Partial_conv3 block fused, one grid step per batch element.
#           Each of the three small convs is a single im2col matmul; tap
#           shifts are lane-offset reads of a zero-halo'd flat VMEM row.
# ---------------------------------------------------------------------------
def _partial_conv3_kernel(*refs, dc, fused_add, offsA, offsB, offsC, pad):
    i = 0
    xa_ref = refs[i]; i += 1
    if fused_add:
        xb_ref = refs[i]; i += 1
    (wA_ref, wB_ref, wC_ref,
     mA_ref, mB_ref, mC_ref, s_ref, bias_ref) = refs[i:i + 8]
    o_ref = refs[i + 8]
    vpad_ref = refs[i + 9]                     # VMEM scratch (c, S + 2*pad)

    c = o_ref.shape[0]
    S = o_ref.shape[1]

    # Zero only the halo columns; the interior is fully overwritten before
    # every read.  Done every grid step (2*c*pad elements, negligible) so the
    # kernel stays correct if the "parallel" N axis is split across cores.
    zero_halo = jnp.zeros((c, pad), jnp.float32)
    vpad_ref[:, 0:pad] = zero_halo
    vpad_ref[:, pad + S:2 * pad + S] = zero_halo

    def conv(v, w_ref, m_ref, offs):
        """'same' conv of v (ch, S) against im2col weights w_ref (cout, taps*ch)."""
        ch = v.shape[0]
        vpad_ref[0:ch, pad:pad + S] = v
        rows = []
        for t, o in enumerate(offs):
            shifted = vpad_ref[0:ch, pad + o:pad + o + S]   # lane-offset read
            rows.append(shifted * m_ref[t:t + 1, :])        # boundary mask
        col = jnp.concatenate(rows, axis=0)                 # (taps*ch, S)
        return jnp.dot(w_ref[...], col, preferred_element_type=jnp.float32)

    x = xa_ref[...].astype(jnp.float32)
    if fused_add:
        x = x + xb_ref[...].astype(jnp.float32)             # fused "x3 + x2"

    # conv(x1) * weight1   (weight1 pre-folded into wA)
    y1 = conv(x[0:dc, :], wA_ref, mA_ref, offsA)            # (dc, S)
    # conv1(cat(conv(x1), x2 * weight2)) + BN + ReLU  (weight2 folded into wB)
    xcat = jnp.concatenate([y1, x[dc:, :]], axis=0)         # (c, S)
    z = conv(xcat, wB_ref, mB_ref, offsB)                   # (c, S)
    z = jnp.maximum(z * s_ref[...] + bias_ref[...], 0.0)
    # conv2(z) + residual (the summed block input)
    y = conv(z, wC_ref, mC_ref, offsC) + x
    o_ref[...] = y.astype(o_ref.dtype)


def partial_conv3_apply(p, spatial, xa, xb=None):
    """Fused Partial_conv3 forward.  xa, xb: (N, c, S);  returns (N, c, S)."""
    D, H, W = spatial
    N, c, S = xa.shape
    assert S == D * H * W
    dc = p["dim_conv3"]
    du = p["dim_untouched"]
    pad = H * W + W + 1                  # max |tap offset| over the 3 convs

    offsA, maskA = _conv_taps(D, H, W, 3, 3, 3, 1, 1, 1)
    offsB, maskB = _conv_taps(D, H, W, 3, 3, 1, 1, 1, 0)
    offsC, maskC = _conv_taps(D, H, W, 1, 3, 3, 0, 1, 1)

    # weight1 folded into the 3x3x3 filter; weight2 into conv1's columns that
    # read the untouched channels (both exact, the convs are linear).
    wA = _to_wmat(p["conv_w"] * p["weight1"])
    ch_scale = jnp.concatenate([jnp.ones((dc,), jnp.float32),
                                jnp.ones((du,), jnp.float32) * p["weight2"]])
    wB = _to_wmat(p["conv1_w"] * ch_scale[None, None, None, :, None])
    wC = _to_wmat(p["conv2_w"])
    scale, bias = p["bn"]

    fused_add = xb is not None
    acts = [xa] + ([xb] if fused_add else [])
    consts = [wA, wB, wC, jnp.asarray(maskA), jnp.asarray(maskB),
              jnp.asarray(maskC), scale, bias]

    act_spec = pl.BlockSpec((None, c, S), lambda n: (n, 0, 0))
    in_specs = ([act_spec] * len(acts)
                + [pl.BlockSpec(a.shape, lambda n: (0, 0)) for a in consts])

    kernel = functools.partial(_partial_conv3_kernel, dc=dc,
                               fused_add=fused_add, offsA=offsA, offsB=offsB,
                               offsC=offsC, pad=pad)
    return pl.pallas_call(
        kernel,
        out_shape=jax.ShapeDtypeStruct((N, c, S), _ACT_DTYPE),
        grid=(N,),
        in_specs=in_specs,
        out_specs=pl.BlockSpec((None, c, S), lambda n: (n, 0, 0)),
        scratch_shapes=[pltpu.VMEM((c, S + 2 * pad), jnp.float32)],
        compiler_params=_cparams(("parallel",)),
    )(*acts, *consts)


# ---------------------------------------------------------------------------
# Parameters (deterministic) + module composition
# ---------------------------------------------------------------------------
def _bn_params(dim):
    gamma = jnp.ones((dim,), jnp.float32)
    beta = jnp.zeros((dim,), jnp.float32)
    running_mean = jnp.zeros((dim,), jnp.float32)
    running_var = jnp.ones((dim,), jnp.float32)
    scale = gamma / jnp.sqrt(running_var + _BN_EPS)
    bias = beta - running_mean * scale
    return scale.reshape(dim, 1), bias.reshape(dim, 1)


def _conv_w(key, shape, fan_in):
    bound = 1.0 / np.sqrt(float(fan_in))
    return jax.random.uniform(key, shape, jnp.float32, -bound, bound)


def init_partial_conv3(key, in_dim, out_dim):
    dc = in_dim // 4
    du = in_dim - dc
    k1, k2, k3 = jax.random.split(key, 3)
    return {
        "dim_conv3": dc,
        "dim_untouched": du,
        "conv_w": _conv_w(k1, (3, 3, 3, dc, dc), 27 * dc),                 # 3x3x3, pad (1,1,1)
        "conv1_w": _conv_w(k2, (3, 3, 1, in_dim, out_dim), 9 * in_dim),    # (3,3,1), pad (1,1,0)
        "conv2_w": _conv_w(k3, (1, 3, 3, out_dim, out_dim), 9 * out_dim),  # (1,3,3), pad (0,1,1)
        "weight1": jnp.ones((), jnp.float32),
        "weight2": jnp.ones((), jnp.float32),
        "bn": _bn_params(out_dim),
    }


class PHDCModulePallas:
    def __init__(self, in_dim, out_dim, key):
        assert out_dim % 4 == 0
        self.in_dim = in_dim
        self.out_dim = out_dim
        self.out_inter_dim = out_dim // 4
        keys = jax.random.split(key, 6)
        self.w_1x1_1 = _conv_w(keys[0], (out_dim, in_dim), in_dim)
        self.bn1 = _bn_params(out_dim)
        self.w_1x1_2 = _conv_w(keys[1], (out_dim, out_dim), out_dim)
        self.bn2 = _bn_params(out_dim)
        if in_dim > out_dim:
            self.w_1x1_3 = _conv_w(keys[2], (out_dim, in_dim), in_dim)
            self.bn3 = _bn_params(out_dim)
        c = self.out_inter_dim
        self.pc1 = init_partial_conv3(keys[3], c, c)
        self.pc2 = init_partial_conv3(keys[4], c, c)
        self.pc3 = init_partial_conv3(keys[5], c, c)

    def __call__(self, x_ncdhw):
        N, C, D, H, W = x_ncdhw.shape
        S = D * H * W
        c = self.out_inter_dim
        # NCDHW -> (N, C, D*H*W): channels on sublanes, spatial on lanes.
        # Free contiguous reshape, no boundary transpose.
        x = x_ncdhw.reshape(N, C, S).astype(jnp.float32)

        # 1x1x1 conv + BN + ReLU; x1..x4 written as four separate lane-dense
        # outputs (no strided channel slices in the wrapper).
        x1, x2, x3, x4 = pointwise_conv_bn_act(
            x, self.w_1x1_1, *self.bn1, splits=(c, c, c, c))

        # Partial_conv3 chain; the "x3 + x2" / "x4 + x3" adds are fused into
        # the next block's kernel.
        x2 = partial_conv3_apply(self.pc1, (D, H, W), x2)
        x3 = partial_conv3_apply(self.pc2, (D, H, W), x3, x2)
        x4 = partial_conv3_apply(self.pc3, (D, H, W), x4, x3)

        if self.in_dim > self.out_dim:
            x = pointwise_conv_bn_act(x, self.w_1x1_3, *self.bn3)

        # Final 1x1x1 conv over (x + cat(x1..x4)); add + concat fused.
        out = branch_sum_pointwise(x, (x1, x2, x3, x4), self.w_1x1_2,
                                   *self.bn2)
        return out.reshape(N, self.out_dim, D, H, W)


if __name__ == "__main__":
    key = jax.random.PRNGKey(0)
    pkey, xkey = jax.random.split(key)

    # small shapes: N=2, in_dim=out_dim=16 (out_inter_dim=4, dim_conv3=1),
    # volume D=H=W=8  ->  flattened spatial S=512 (lane-dense).
    N, C, D, H, W = 2, 16, 8, 8, 8
    module = PHDCModulePallas(in_dim=C, out_dim=16, key=pkey)

    x = jax.random.normal(xkey, (N, C, D, H, W), jnp.float32)
    fwd = jax.jit(module.__call__)
    out = fwd(x)
    jax.block_until_ready(out)
    assert out.shape == (N, 16, D, H, W), out.shape
    assert bool(jnp.all(jnp.isfinite(out)))
    print("KERNEL_OK")
</pallas_src>

<mosaic_0001>
module attributes {stable_mosaic.version = 11 : i64} {
  func.func @_pointwise_kernel(%arg0: i32, %arg1: i32, %arg2: memref<1x16x512xf32, #tpu.memory_space<vmem>>, %arg3: memref<16x16xf32, #tpu.memory_space<vmem>>, %arg4: memref<16x1xf32, #tpu.memory_space<vmem>>, %arg5: memref<16x1xf32, #tpu.memory_space<vmem>>, %arg6: memref<1x4x512xbf16, #tpu.memory_space<vmem>>, %arg7: memref<1x4x512xbf16, #tpu.memory_space<vmem>>, %arg8: memref<1x4x512xbf16, #tpu.memory_space<vmem>>, %arg9: memref<1x4x512xbf16, #tpu.memory_space<vmem>>) attributes {dimension_semantics = [#tpu.dimension_semantics<parallel>, #tpu.dimension_semantics<parallel>], iteration_bounds = array<i64: 2, 1>, scalar_prefetch = 0 : i64, scratch_operands = 0 : i64, tpu.core_type = #tpu.core_type<tc>, window_params = [{transform_indices = @transform_0, window_bounds = array<i64: 1, 16, 512>}, {pipeline_mode = #tpu.pipeline_mode<synchronous>, transform_indices = @transform_1, window_bounds = array<i64: 16, 16>}, {pipeline_mode = #tpu.pipeline_mode<synchronous>, transform_indices = @transform_2, window_bounds = array<i64: 16, 1>}, {pipeline_mode = #tpu.pipeline_mode<synchronous>, transform_indices = @transform_3, window_bounds = array<i64: 16, 1>}, {transform_indices = @transform_4, window_bounds = array<i64: 1, 4, 512>}, {transform_indices = @transform_5, window_bounds = array<i64: 1, 4, 512>}, {transform_indices = @transform_6, window_bounds = array<i64: 1, 4, 512>}, {transform_indices = @transform_7, window_bounds = array<i64: 1, 4, 512>}]} {
    %c0 = arith.constant 0 : index
    %c0_0 = arith.constant 0 : index
    %c0_1 = arith.constant 0 : index
    %0 = vector.load %arg2[%c0, %c0_0, %c0_1] : memref<1x16x512xf32, #tpu.memory_space<vmem>>, vector<1x16x512xf32>
    %1 = vector.shape_cast %0 : vector<1x16x512xf32> to vector<16x512xf32>
    %c0_2 = arith.constant 0 : index
    %c0_3 = arith.constant 0 : index
    %2 = vector.load %arg3[%c0_2, %c0_3] : memref<16x16xf32, #tpu.memory_space<vmem>>, vector<16x16xf32>
    %cst = arith.constant dense<0.000000e+00> : vector<16x512xf32>
    %3 = tpu.matmul %2, %1, %cst {dimension_numbers = #tpu.dot_dimension_numbers<[1], [0], [0], [1], [0, 0, 1, 1], [], []>} : vector<16x16xf32>, vector<16x512xf32>, vector<16x512xf32> -> vector<16x512xf32>
    %c0_4 = arith.constant 0 : index
    %c0_5 = arith.constant 0 : index
    %4 = vector.load %arg4[%c0_4, %c0_5] : memref<16x1xf32, #tpu.memory_space<vmem>>, vector<16x1xf32>
    %5 = vector.broadcast %4 : vector<16x1xf32> to vector<16x512xf32>
    %6 = arith.mulf %3, %5 : vector<16x512xf32>
    %c0_6 = arith.constant 0 : index
    %c0_7 = arith.constant 0 : index
    %7 = vector.load %arg5[%c0_6, %c0_7] : memref<16x1xf32, #tpu.memory_space<vmem>>, vector<16x1xf32>
    %8 = vector.broadcast %7 : vector<16x1xf32> to vector<16x512xf32>
    %9 = arith.addf %6, %8 : vector<16x512xf32>
    %cst_8 = arith.constant 0.000000e+00 : f32
    %10 = vector.broadcast %cst_8 : f32 to vector<16x512xf32>
    %11 = arith.maximumf %9, %10 : vector<16x512xf32>
    %12 = vector.extract_strided_slice %11 {offsets = [0, 0], sizes = [4, 512], strides = [1, 1]} : vector<16x512xf32> to vector<4x512xf32>
    %13 = arith.truncf %12 : vector<4x512xf32> to vector<4x512xbf16>
    %c0_9 = arith.constant 0 : index
    %c0_10 = arith.constant 0 : index
    %c0_11 = arith.constant 0 : index
    %14 = vector.load %arg6[%c0_9, %c0_10, %c0_11] : memref<1x4x512xbf16, #tpu.memory_space<vmem>>, vector<1x4x512xbf16>
    %15 = vector.shape_cast %14 : vector<1x4x512xbf16> to vector<4x512xbf16>
    %16 = vector.shape_cast %13 : vector<4x512xbf16> to vector<1x4x512xbf16>
    tpu.vector_store %arg6[%c0_9, %c0_10, %c0_11], %16 {strides = array<i32>} : memref<1x4x512xbf16, #tpu.memory_space<vmem>>, vector<1x4x512xbf16>,
    %17 = vector.extract_strided_slice %11 {offsets = [4, 0], sizes = [4, 512], strides = [1, 1]} : vector<16x512xf32> to vector<4x512xf32>
    %18 = arith.truncf %17 : vector<4x512xf32> to vector<4x512xbf16>
    %c0_12 = arith.constant 0 : index
    %c0_13 = arith.constant 0 : index
    %c0_14 = arith.constant 0 : index
    %19 = vector.load %arg7[%c0_12, %c0_13, %c0_14] : memref<1x4x512xbf16, #tpu.memory_space<vmem>>, vector<1x4x512xbf16>
    %20 = vector.shape_cast %19 : vector<1x4x512xbf16> to vector<4x512xbf16>
    %21 = vector.shape_cast %18 : vector<4x512xbf16> to vector<1x4x512xbf16>
    tpu.vector_store %arg7[%c0_12, %c0_13, %c0_14], %21 {strides = array<i32>} : memref<1x4x512xbf16, #tpu.memory_space<vmem>>, vector<1x4x512xbf16>,
    %22 = vector.extract_strided_slice %11 {offsets = [8, 0], sizes = [4, 512], strides = [1, 1]} : vector<16x512xf32> to vector<4x512xf32>
    %23 = arith.truncf %22 : vector<4x512xf32> to vector<4x512xbf16>
    %c0_15 = arith.constant 0 : index
    %c0_16 = arith.constant 0 : index
    %c0_17 = arith.constant 0 : index
    %24 = vector.load %arg8[%c0_15, %c0_16, %c0_17] : memref<1x4x512xbf16, #tpu.memory_space<vmem>>, vector<1x4x512xbf16>
    %25 = vector.shape_cast %24 : vector<1x4x512xbf16> to vector<4x512xbf16>
    %26 = vector.shape_cast %23 : vector<4x512xbf16> to vector<1x4x512xbf16>
    tpu.vector_store %arg8[%c0_15, %c0_16, %c0_17], %26 {strides = array<i32>} : memref<1x4x512xbf16, #tpu.memory_space<vmem>>, vector<1x4x512xbf16>,
    %27 = vector.extract_strided_slice %11 {offsets = [12, 0], sizes = [4, 512], strides = [1, 1]} : vector<16x512xf32> to vector<4x512xf32>
    %28 = arith.truncf %27 : vector<4x512xf32> to vector<4x512xbf16>
    %c0_18 = arith.constant 0 : index
    %c0_19 = arith.constant 0 : index
    %c0_20 = arith.constant 0 : index
    %29 = vector.load %arg9[%c0_18, %c0_19, %c0_20] : memref<1x4x512xbf16, #tpu.memory_space<vmem>>, vector<1x4x512xbf16>
    %30 = vector.shape_cast %29 : vector<1x4x512xbf16> to vector<4x512xbf16>
    %31 = vector.shape_cast %28 : vector<4x512xbf16> to vector<1x4x512xbf16>
    tpu.vector_store %arg9[%c0_18, %c0_19, %c0_20], %31 {strides = array<i32>} : memref<1x4x512xbf16, #tpu.memory_space<vmem>>, vector<1x4x512xbf16>,
    return
  }
  func.func @transform_0(%arg0: i32, %arg1: i32) -> (i32, i32, i32) {
    %c0_i32 = arith.constant 0 : i32
    %c0_i32_0 = arith.constant 0 : i32
    return %arg0, %c0_i32, %arg1 : i32, i32, i32
  }
  func.func @transform_1(%arg0: i32, %arg1: i32) -> (i32, i32) {
    %c0_i32 = arith.constant 0 : i32
    %c0_i32_0 = arith.constant 0 : i32
    %c0_i32_1 = arith.constant 0 : i32
    return %c0_i32, %c0_i32_0 : i32, i32
  }
  func.func @transform_2(%arg0: i32, %arg1: i32) -> (i32, i32) {
    %c0_i32 = arith.constant 0 : i32
    %c0_i32_0 = arith.constant 0 : i32
    %c0_i32_1 = arith.constant 0 : i32
    return %c0_i32, %c0_i32_0 : i32, i32
  }
  func.func @transform_3(%arg0: i32, %arg1: i32) -> (i32, i32) {
    %c0_i32 = arith.constant 0 : i32
    %c0_i32_0 = arith.constant 0 : i32
    %c0_i32_1 = arith.constant 0 : i32
    return %c0_i32, %c0_i32_0 : i32, i32
  }
  func.func @transform_4(%arg0: i32, %arg1: i32) -> (i32, i32, i32) {
    %c0_i32 = arith.constant 0 : i32
    %c0_i32_0 = arith.constant 0 : i32
    return %arg0, %c0_i32, %arg1 : i32, i32, i32
  }
  func.func @transform_5(%arg0: i32, %arg1: i32) -> (i32, i32, i32) {
    %c0_i32 = arith.constant 0 : i32
    %c0_i32_0 = arith.constant 0 : i32
    return %arg0, %c0_i32, %arg1 : i32, i32, i32
  }
  func.func @transform_6(%arg0: i32, %arg1: i32) -> (i32, i32, i32) {
    %c0_i32 = arith.constant 0 : i32
    %c0_i32_0 = arith.constant 0 : i32
    return %arg0, %c0_i32, %arg1 : i32, i32, i32
  }
  func.func @transform_7(%arg0: i32, %arg1: i32) -> (i32, i32, i32) {
    %c0_i32 = arith.constant 0 : i32
    %c0_i32_0 = arith.constant 0 : i32
    return %arg0, %c0_i32, %arg1 : i32, i32, i32
  }
}

module attributes {stable_mosaic.version = 11 : i64} {
  func.func @_branch_sum_kernel(%arg0: i32, %arg1: i32, %arg2: memref<1x16x512xf32, #tpu.memory_space<vmem>>, %arg3: memref<1x4x512xbf16, #tpu.memory_space<vmem>>, %arg4: memref<1x4x512xbf16, #tpu.memory_space<vmem>>, %arg5: memref<1x4x512xbf16, #tpu.memory_space<vmem>>, %arg6: memref<1x4x512xbf16, #tpu.memory_space<vmem>>, %arg7: memref<16x16xf32, #tpu.memory_space<vmem>>, %arg8: memref<16x1xf32, #tpu.memory_space<vmem>>, %arg9: memref<16x1xf32, #tpu.memory_space<vmem>>, %arg10: memref<1x16x512xf32, #tpu.memory_space<vmem>>) attributes {dimension_semantics = [#tpu.dimension_semantics<parallel>, #tpu.dimension_semantics<parallel>], iteration_bounds = array<i64: 2, 1>, scalar_prefetch = 0 : i64, scratch_operands = 0 : i64, tpu.core_type = #tpu.core_type<tc>, window_params = [{transform_indices = @transform_0, window_bounds = array<i64: 1, 16, 512>}, {transform_indices = @transform_1, window_bounds = array<i64: 1, 4, 512>}, {transform_indices = @transform_2, window_bounds = array<i64: 1, 4, 512>}, {transform_indices = @transform_3, window_bounds = array<i64: 1, 4, 512>}, {transform_indices = @transform_4, window_bounds = array<i64: 1, 4, 512>}, {pipeline_mode = #tpu.pipeline_mode<synchronous>, transform_indices = @transform_5, window_bounds = array<i64: 16, 16>}, {pipeline_mode = #tpu.pipeline_mode<synchronous>, transform_indices = @transform_6, window_bounds = array<i64: 16, 1>}, {pipeline_mode = #tpu.pipeline_mode<synchronous>, transform_indices = @transform_7, window_bounds = array<i64: 16, 1>}, {transform_indices = @transform_8, window_bounds = array<i64: 1, 16, 512>}]} {
    %c0 = arith.constant 0 : index
    %c0_0 = arith.constant 0 : index
    %c0_1 = arith.constant 0 : index
    %0 = vector.load %arg3[%c0, %c0_0, %c0_1] : memref<1x4x512xbf16, #tpu.memory_space<vmem>>, vector<1x4x512xbf16>
    %1 = vector.shape_cast %0 : vector<1x4x512xbf16> to vector<4x512xbf16>
    %2 = arith.extf %1 : vector<4x512xbf16> to vector<4x512xf32>
    %c0_2 = arith.constant 0 : index
    %c0_3 = arith.constant 0 : index
    %c0_4 = arith.constant 0 : index
    %3 = vector.load %arg4[%c0_2, %c0_3, %c0_4] : memref<1x4x512xbf16, #tpu.memory_space<vmem>>, vector<1x4x512xbf16>
    %4 = vector.shape_cast %3 : vector<1x4x512xbf16> to vector<4x512xbf16>
    %5 = arith.extf %4 : vector<4x512xbf16> to vector<4x512xf32>
    %c0_5 = arith.constant 0 : index
    %c0_6 = arith.constant 0 : index
    %c0_7 = arith.constant 0 : index
    %6 = vector.load %arg5[%c0_5, %c0_6, %c0_7] : memref<1x4x512xbf16, #tpu.memory_space<vmem>>, vector<1x4x512xbf16>
    %7 = vector.shape_cast %6 : vector<1x4x512xbf16> to vector<4x512xbf16>
    %8 = arith.extf %7 : vector<4x512xbf16> to vector<4x512xf32>
    %c0_8 = arith.constant 0 : index
    %c0_9 = arith.constant 0 : index
    %c0_10 = arith.constant 0 : index
    %9 = vector.load %arg6[%c0_8, %c0_9, %c0_10] : memref<1x4x512xbf16, #tpu.memory_space<vmem>>, vector<1x4x512xbf16>
    %10 = vector.shape_cast %9 : vector<1x4x512xbf16> to vector<4x512xbf16>
    %11 = arith.extf %10 : vector<4x512xbf16> to vector<4x512xf32>
    %12 = tpu.concatenate %2, %5, %8, %11 in 0 : vector<4x512xf32>, vector<4x512xf32>, vector<4x512xf32>, vector<4x512xf32> -> vector<16x512xf32>
    %c0_11 = arith.constant 0 : index
    %c0_12 = arith.constant 0 : index
    %c0_13 = arith.constant 0 : index
    %13 = vector.load %arg2[%c0_11, %c0_12, %c0_13] : memref<1x16x512xf32, #tpu.memory_space<vmem>>, vector<1x16x512xf32>
    %14 = vector.shape_cast %13 : vector<1x16x512xf32> to vector<16x512xf32>
    %15 = arith.addf %14, %12 : vector<16x512xf32>
    %c0_14 = arith.constant 0 : index
    %c0_15 = arith.constant 0 : index
    %16 = vector.load %arg7[%c0_14, %c0_15] : memref<16x16xf32, #tpu.memory_space<vmem>>, vector<16x16xf32>
    %cst = arith.constant dense<0.000000e+00> : vector<16x512xf32>
    %17 = tpu.matmul %16, %15, %cst {dimension_numbers = #tpu.dot_dimension_numbers<[1], [0], [0], [1], [0, 0, 1, 1], [], []>} : vector<16x16xf32>, vector<16x512xf32>, vector<16x512xf32> -> vector<16x512xf32>
    %c0_16 = arith.constant 0 : index
    %c0_17 = arith.constant 0 : index
    %18 = vector.load %arg8[%c0_16, %c0_17] : memref<16x1xf32, #tpu.memory_space<vmem>>, vector<16x1xf32>
    %19 = vector.broadcast %18 : vector<16x1xf32> to vector<16x512xf32>
    %20 = arith.mulf %17, %19 : vector<16x512xf32>
    %c0_18 = arith.constant 0 : index
    %c0_19 = arith.constant 0 : index
    %21 = vector.load %arg9[%c0_18, %c0_19] : memref<16x1xf32, #tpu.memory_space<vmem>>, vector<16x1xf32>
    %22 = vector.broadcast %21 : vector<16x1xf32> to vector<16x512xf32>
    %23 = arith.addf %20, %22 : vector<16x512xf32>
    %cst_20 = arith.constant 0.000000e+00 : f32
    %24 = vector.broadcast %cst_20 : f32 to vector<16x512xf32>
    %25 = arith.maximumf %23, %24 : vector<16x512xf32>
    %c0_21 = arith.constant 0 : index
    %c0_22 = arith.constant 0 : index
    %c0_23 = arith.constant 0 : index
    %26 = vector.load %arg10[%c0_21, %c0_22, %c0_23] : memref<1x16x512xf32, #tpu.memory_space<vmem>>, vector<1x16x512xf32>
    %27 = vector.shape_cast %26 : vector<1x16x512xf32> to vector<16x512xf32>
    %28 = vector.shape_cast %25 : vector<16x512xf32> to vector<1x16x512xf32>
    tpu.vector_store %arg10[%c0_21, %c0_22, %c0_23], %28 {strides = array<i32>} : memref<1x16x512xf32, #tpu.memory_space<vmem>>, vector<1x16x512xf32>,
    return
  }
  func.func @transform_0(%arg0: i32, %arg1: i32) -> (i32, i32, i32) {
    %c0_i32 = arith.constant 0 : i32
    %c0_i32_0 = arith.constant 0 : i32
    return %arg0, %c0_i32, %arg1 : i32, i32, i32
  }
  func.func @transform_1(%arg0: i32, %arg1: i32) -> (i32, i32, i32) {
    %c0_i32 = arith.constant 0 : i32
    %c0_i32_0 = arith.constant 0 : i32
    return %arg0, %c0_i32, %arg1 : i32, i32, i32
  }
  func.func @transform_2(%arg0: i32, %arg1: i32) -> (i32, i32, i32) {
    %c0_i32 = arith.constant 0 : i32
    %c0_i32_0 = arith.constant 0 : i32
    return %arg0, %c0_i32, %arg1 : i32, i32, i32
  }
  func.func @transform_3(%arg0: i32, %arg1: i32) -> (i32, i32, i32) {
    %c0_i32 = arith.constant 0 : i32
    %c0_i32_0 = arith.constant 0 : i32
    return %arg0, %c0_i32, %arg1 : i32, i32, i32
  }
  func.func @transform_4(%arg0: i32, %arg1: i32) -> (i32, i32, i32) {
    %c0_i32 = arith.constant 0 : i32
    %c0_i32_0 = arith.constant 0 : i32
    return %arg0, %c0_i32, %arg1 : i32, i32, i32
  }
  func.func @transform_5(%arg0: i32, %arg1: i32) -> (i32, i32) {
    %c0_i32 = arith.constant 0 : i32
    %c0_i32_0 = arith.constant 0 : i32
    %c0_i32_1 = arith.constant 0 : i32
    return %c0_i32, %c0_i32_0 : i32, i32
  }
  func.func @transform_6(%arg0: i32, %arg1: i32) -> (i32, i32) {
    %c0_i32 = arith.constant 0 : i32
    %c0_i32_0 = arith.constant 0 : i32
    %c0_i32_1 = arith.constant 0 : i32
    return %c0_i32, %c0_i32_0 : i32, i32
  }
  func.func @transform_7(%arg0: i32, %arg1: i32) -> (i32, i32) {
    %c0_i32 = arith.constant 0 : i32
    %c0_i32_0 = arith.constant 0 : i32
    %c0_i32_1 = arith.constant 0 : i32
    return %c0_i32, %c0_i32_0 : i32, i32
  }
  func.func @transform_8(%arg0: i32, %arg1: i32) -> (i32, i32, i32) {
    %c0_i32 = arith.constant 0 : i32
    %c0_i32_0 = arith.constant 0 : i32
    return %arg0, %c0_i32, %arg1 : i32, i32, i32
  }
}

module attributes {stable_mosaic.version = 11 : i64} {
  func.func @_partial_conv3_kernel(%arg0: i32, %arg1: memref<1x4x512xbf16, #tpu.memory_space<vmem>>, %arg2: memref<1x4x512xbf16, #tpu.memory_space<vmem>>, %arg3: memref<1x27xf32, #tpu.memory_space<vmem>>, %arg4: memref<4x36xf32, #tpu.memory_space<vmem>>, %arg5: memref<4x36xf32, #tpu.memory_space<vmem>>, %arg6: memref<27x512xf32, #tpu.memory_space<vmem>>, %arg7: memref<9x512xf32, #tpu.memory_space<vmem>>, %arg8: memref<9x512xf32, #tpu.memory_space<vmem>>, %arg9: memref<4x1xf32, #tpu.memory_space<vmem>>, %arg10: memref<4x1xf32, #tpu.memory_space<vmem>>, %arg11: memref<1x4x512xbf16, #tpu.memory_space<vmem>>, %arg12: memref<4x658xf32, #tpu.memory_space<vmem>>) attributes {dimension_semantics = [#tpu.dimension_semantics<parallel>], iteration_bounds = array<i64: 2>, scalar_prefetch = 0 : i64, scratch_operands = 1 : i64, tpu.core_type = #tpu.core_type<tc>, window_params = [{transform_indices = @transform_0, window_bounds = array<i64: 1, 4, 512>}, {transform_indices = @transform_1, window_bounds = array<i64: 1, 4, 512>}, {pipeline_mode = #tpu.pipeline_mode<synchronous>, transform_indices = @transform_2, window_bounds = array<i64: 1, 27>}, {pipeline_mode = #tpu.pipeline_mode<synchronous>, transform_indices = @transform_3, window_bounds = array<i64: 4, 36>}, {pipeline_mode = #tpu.pipeline_mode<synchronous>, transform_indices = @transform_4, window_bounds = array<i64: 4, 36>}, {pipeline_mode = #tpu.pipeline_mode<synchronous>, transform_indices = @transform_5, window_bounds = array<i64: 27, 512>}, {pipeline_mode = #tpu.pipeline_mode<synchronous>, transform_indices = @transform_6, window_bounds = array<i64: 9, 512>}, {pipeline_mode = #tpu.pipeline_mode<synchronous>, transform_indices = @transform_7, window_bounds = array<i64: 9, 512>}, {pipeline_mode = #tpu.pipeline_mode<synchronous>, transform_indices = @transform_8, window_bounds = array<i64: 4, 1>}, {pipeline_mode = #tpu.pipeline_mode<synchronous>, transform_indices = @transform_9, window_bounds = array<i64: 4, 1>}, {transform_indices = @transform_10, window_bounds = array<i64: 1, 4, 512>}]} {
    %cst = arith.constant 0.000000e+00 : f32
    %0 = vector.broadcast %cst : f32 to vector<4x73xf32>
    %c0 = arith.constant 0 : index
    %c0_0 = arith.constant 0 : index
    %1 = vector.load %arg12[%c0, %c0_0] : memref<4x658xf32, #tpu.memory_space<vmem>>, vector<4x73xf32>
    tpu.vector_store %arg12[%c0, %c0_0], %0 {strides = array<i32>} : memref<4x658xf32, #tpu.memory_space<vmem>>, vector<4x73xf32>,
    %c0_1 = arith.constant 0 : index
    %c585 = arith.constant 585 : index
    %2 = vector.load %arg12[%c0_1, %c585] : memref<4x658xf32, #tpu.memory_space<vmem>>, vector<4x73xf32>
    tpu.vector_store %arg12[%c0_1, %c585], %0 {strides = array<i32>} : memref<4x658xf32, #tpu.memory_space<vmem>>, vector<4x73xf32>,
    %c0_2 = arith.constant 0 : index
    %c0_3 = arith.constant 0 : index
    %c0_4 = arith.constant 0 : index
    %3 = vector.load %arg1[%c0_2, %c0_3, %c0_4] : memref<1x4x512xbf16, #tpu.memory_space<vmem>>, vector<1x4x512xbf16>
    %4 = vector.shape_cast %3 : vector<1x4x512xbf16> to vector<4x512xbf16>
    %5 = arith.extf %4 : vector<4x512xbf16> to vector<4x512xf32>
    %c0_5 = arith.constant 0 : index
    %c0_6 = arith.constant 0 : index
    %c0_7 = arith.constant 0 : index
    %6 = vector.load %arg2[%c0_5, %c0_6, %c0_7] : memref<1x4x512xbf16, #tpu.memory_space<vmem>>, vector<1x4x512xbf16>
    %7 = vector.shape_cast %6 : vector<1x4x512xbf16> to vector<4x512xbf16>
    %8 = arith.extf %7 : vector<4x512xbf16> to vector<4x512xf32>
    %9 = arith.addf %5, %8 : vector<4x512xf32>
    %10 = vector.extract_strided_slice %9 {offsets = [0, 0], sizes = [1, 512], strides = [1, 1]} : vector<4x512xf32> to vector<1x512xf32>
    %c0_8 = arith.constant 0 : index
    %c73 = arith.constant 73 : index
    %11 = vector.load %arg12[%c0_8, %c73] : memref<4x658xf32, #tpu.memory_space<vmem>>, vector<1x512xf32>
    tpu.vector_store %arg12[%c0_8, %c73], %10 {strides = array<i32>} : memref<4x658xf32, #tpu.memory_space<vmem>>, vector<1x512xf32>,
    %c0_9 = arith.constant 0 : index
    %c0_10 = arith.constant 0 : index
    %12 = vector.load %arg12[%c0_9, %c0_10] : memref<4x658xf32, #tpu.memory_space<vmem>>, vector<1x512xf32>
    %c0_11 = arith.constant 0 : index
    %c0_12 = arith.constant 0 : index
    %13 = vector.load %arg6[%c0_11, %c0_12] : memref<27x512xf32, #tpu.memory_space<vmem>>, vector<1x512xf32>
    %14 = arith.mulf %12, %13 : vector<1x512xf32>
    %c0_13 = arith.constant 0 : index
    %c1 = arith.constant 1 : index
    %15 = vector.load %arg12[%c0_13, %c1] : memref<4x658xf32, #tpu.memory_space<vmem>>, vector<1x512xf32>
    %c1_14 = arith.constant 1 : index
    %c0_15 = arith.constant 0 : index
    %16 = vector.load %arg6[%c1_14, %c0_15] : memref<27x512xf32, #tpu.memory_space<vmem>>, vector<1x512xf32>
    %17 = arith.mulf %15, %16 : vector<1x512xf32>
    %c0_16 = arith.constant 0 : index
    %c2 = arith.constant 2 : index
    %18 = vector.load %arg12[%c0_16, %c2] : memref<4x658xf32, #tpu.memory_space<vmem>>, vector<1x512xf32>
    %c2_17 = arith.constant 2 : index
    %c0_18 = arith.constant 0 : index
    %19 = vector.load %arg6[%c2_17, %c0_18] : memref<27x512xf32, #tpu.memory_space<vmem>>, vector<1x512xf32>
    %20 = arith.mulf %18, %19 : vector<1x512xf32>
    %c0_19 = arith.constant 0 : index
    %c8 = arith.constant 8 : index
    %21 = vector.load %arg12[%c0_19, %c8] : memref<4x658xf32, #tpu.memory_space<vmem>>, vector<1x512xf32>
    %c3 = arith.constant 3 : index
    %c0_20 = arith.constant 0 : index
    %22 = vector.load %arg6[%c3, %c0_20] : memref<27x512xf32, #tpu.memory_space<vmem>>, vector<1x512xf32>
    %23 = arith.mulf %21, %22 : vector<1x512xf32>
    %c0_21 = arith.constant 0 : index
    %c9 = arith.constant 9 : index
    %24 = vector.load %arg12[%c0_21, %c9] : memref<4x658xf32, #tpu.memory_space<vmem>>, vector<1x512xf32>
    %c4 = arith.constant 4 : index
    %c0_22 = arith.constant 0 : index
    %25 = vector.load %arg6[%c4, %c0_22] : memref<27x512xf32, #tpu.memory_space<vmem>>, vector<1x512xf32>
    %26 = arith.mulf %24, %25 : vector<1x512xf32>
    %c0_23 = arith.constant 0 : index
    %c10 = arith.constant 10 : index
    %27 = vector.load %arg12[%c0_23, %c10] : memref<4x658xf32, #tpu.memory_space<vmem>>, vector<1x512xf32>
    %c5 = arith.constant 5 : index
    %c0_24 = arith.constant 0 : index
    %28 = vector.load %arg6[%c5, %c0_24] : memref<27x512xf32, #tpu.memory_space<vmem>>, vector<1x512xf32>
    %29 = arith.mulf %27, %28 : vector<1x512xf32>
    %c0_25 = arith.constant 0 : index
    %c16 = arith.constant 16 : index
    %30 = vector.load %arg12[%c0_25, %c16] : memref<4x658xf32, #tpu.memory_space<vmem>>, vector<1x512xf32>
    %c6 = arith.constant 6 : index
    %c0_26 = arith.constant 0 : index
    %31 = vector.load %arg6[%c6, %c0_26] : memref<27x512xf32, #tpu.memory_space<vmem>>, vector<1x512xf32>
    %32 = arith.mulf %30, %31 : vector<1x512xf32>
    %c0_27 = arith.constant 0 : index
    %c17 = arith.constant 17 : index
    %33 = vector.load %arg12[%c0_27, %c17] : memref<4x658xf32, #tpu.memory_space<vmem>>, vector<1x512xf32>
    %c7 = arith.constant 7 : index
    %c0_28 = arith.constant 0 : index
    %34 = vector.load %arg6[%c7, %c0_28] : memref<27x512xf32, #tpu.memory_space<vmem>>, vector<1x512xf32>
    %35 = arith.mulf %33, %34 : vector<1x512xf32>
    %c0_29 = arith.constant 0 : index
    %c18 = arith.constant 18 : index
    %36 = vector.load %arg12[%c0_29, %c18] : memref<4x658xf32, #tpu.memory_space<vmem>>, vector<1x512xf32>
    %c8_30 = arith.constant 8 : index
    %c0_31 = arith.constant 0 : index
    %37 = vector.load %arg6[%c8_30, %c0_31] : memref<27x512xf32, #tpu.memory_space<vmem>>, vector<1x512xf32>
    %38 = arith.mulf %36, %37 : vector<1x512xf32>
    %c0_32 = arith.constant 0 : index
    %c64 = arith.constant 64 : index
    %39 = vector.load %arg12[%c0_32, %c64] : memref<4x658xf32, #tpu.memory_space<vmem>>, vector<1x512xf32>
    %c9_33 = arith.constant 9 : index
    %c0_34 = arith.constant 0 : index
    %40 = vector.load %arg6[%c9_33, %c0_34] : memref<27x512xf32, #tpu.memory_space<vmem>>, vector<1x512xf32>
    %41 = arith.mulf %39, %40 : vector<1x512xf32>
    %c0_35 = arith.constant 0 : index
    %c65 = arith.constant 65 : index
    %42 = vector.load %arg12[%c0_35, %c65] : memref<4x658xf32, #tpu.memory_space<vmem>>, vector<1x512xf32>
    %c10_36 = arith.constant 10 : index
    %c0_37 = arith.constant 0 : index
    %43 = vector.load %arg6[%c10_36, %c0_37] : memref<27x512xf32, #tpu.memory_space<vmem>>, vector<1x512xf32>
    %44 = arith.mulf %42, %43 : vector<1x512xf32>
    %c0_38 = arith.constant 0 : index
    %c66 = arith.constant 66 : index
    %45 = vector.load %arg12[%c0_38, %c66] : memref<4x658xf32, #tpu.memory_space<vmem>>, vector<1x512xf32>
    %c11 = arith.constant 11 : index
    %c0_39 = arith.constant 0 : index
    %46 = vector.load %arg6[%c11, %c0_39] : memref<27x512xf32, #tpu.memory_space<vmem>>, vector<1x512xf32>
    %47 = arith.mulf %45, %46 : vector<1x512xf32>
    %c0_40 = arith.constant 0 : index
    %c72 = arith.constant 72 : index
    %48 = vector.load %arg12[%c0_40, %c72] : memref<4x658xf32, #tpu.memory_space<vmem>>, vector<1x512xf32>
    %c12 = arith.constant 12 : index
    %c0_41 = arith.constant 0 : index
    %49 = vector.load %arg6[%c12, %c0_41] : memref<27x512xf32, #tpu.memory_space<vmem>>, vector<1x512xf32>
    %50 = arith.mulf %48, %49 : vector<1x512xf32>
    %c0_42 = arith.constant 0 : index
    %c73_43 = arith.constant 73 : index
    %51 = vector.load %arg12[%c0_42, %c73_43] : memref<4x658xf32, #tpu.memory_space<vmem>>, vector<1x512xf32>
    %c13 = arith.constant 13 : index
    %c0_44 = arith.constant 0 : index
    %52 = vector.load %arg6[%c13, %c0_44] : memref<27x512xf32, #tpu.memory_space<vmem>>, vector<1x512xf32>
    %53 = arith.mulf %51, %52 : vector<1x512xf32>
    %c0_45 = arith.constant 0 : index
    %c74 = arith.constant 74 : index
    %54 = vector.load %arg12[%c0_45, %c74] : memref<4x658xf32, #tpu.memory_space<vmem>>, vector<1x512xf32>
    %c14 = arith.constant 14 : index
    %c0_46 = arith.constant 0 : index
    %55 = vector.load %arg6[%c14, %c0_46] : memref<27x512xf32, #tpu.memory_space<vmem>>, vector<1x512xf32>
    %56 = arith.mulf %54, %55 : vector<1x512xf32>
    %c0_47 = arith.constant 0 : index
    %c80 = arith.constant 80 : index
    %57 = vector.load %arg12[%c0_47, %c80] : memref<4x658xf32, #tpu.memory_space<vmem>>, vector<1x512xf32>
    %c15 = arith.constant 15 : index
    %c0_48 = arith.constant 0 : index
    %58 = vector.load %arg6[%c15, %c0_48] : memref<27x512xf32, #tpu.memory_space<vmem>>, vector<1x512xf32>
    %59 = arith.mulf %57, %58 : vector<1x512xf32>
    %c0_49 = arith.constant 0 : index
    %c81 = arith.constant 81 : index
    %60 = vector.load %arg12[%c0_49, %c81] : memref<4x658xf32, #tpu.memory_space<vmem>>, vector<1x512xf32>
    %c16_50 = arith.constant 16 : index
    %c0_51 = arith.constant 0 : index
    %61 = vector.load %arg6[%c16_50, %c0_51] : memref<27x512xf32, #tpu.memory_space<vmem>>, vector<1x512xf32>
    %62 = arith.mulf %60, %61 : vector<1x512xf32>
    %c0_52 = arith.constant 0 : index
    %c82 = arith.constant 82 : index
    %63 = vector.load %arg12[%c0_52, %c82] : memref<4x658xf32, #tpu.memory_space<vmem>>, vector<1x512xf32>
    %c17_53 = arith.constant 17 : index
    %c0_54 = arith.constant 0 : index
    %64 = vector.load %arg6[%c17_53, %c0_54] : memref<27x512xf32, #tpu.memory_space<vmem>>, vector<1x512xf32>
    %65 = arith.mulf %63, %64 : vector<1x512xf32>
    %c0_55 = arith.constant 0 : index
    %c128 = arith.constant 128 : index
    %66 = vector.load %arg12[%c0_55, %c128] : memref<4x658xf32, #tpu.memory_space<vmem>>, vector<1x512xf32>
    %c18_56 = arith.constant 18 : index
    %c0_57 = arith.constant 0 : index
    %67 = vector.load %arg6[%c18_56, %c0_57] : memref<27x512xf32, #tpu.memory_space<vmem>>, vector<1x512xf32>
    %68 = arith.mulf %66, %67 : vector<1x512xf32>
    %c0_58 = arith.constant 0 : index
    %c129 = arith.constant 129 : index
    %69 = vector.load %arg12[%c0_58, %c129] : memref<4x658xf32, #tpu.memory_space<vmem>>, vector<1x512xf32>
    %c19 = arith.constant 19 : index
    %c0_59 = arith.constant 0 : index
    %70 = vector.load %arg6[%c19, %c0_59] : memref<27x512xf32, #tpu.memory_space<vmem>>, vector<1x512xf32>
    %71 = arith.mulf %69, %70 : vector<1x512xf32>
    %c0_60 = arith.constant 0 : index
    %c130 = arith.constant 130 : index
    %72 = vector.load %arg12[%c0_60, %c130] : memref<4x658xf32, #tpu.memory_space<vmem>>, vector<1x512xf32>
    %c20 = arith.constant 20 : index
    %c0_61 = arith.constant 0 : index
    %73 = vector.load %arg6[%c20, %c0_61] : memref<27x512xf32, #tpu.memory_space<vmem>>, vector<1x512xf32>
    %74 = arith.mulf %72, %73 : vector<1x512xf32>
    %c0_62 = arith.constant 0 : index
    %c136 = arith.constant 136 : index
    %75 = vector.load %arg12[%c0_62, %c136] : memref<4x658xf32, #tpu.memory_space<vmem>>, vector<1x512xf32>
    %c21 = arith.constant 21 : index
    %c0_63 = arith.constant 0 : index
    %76 = vector.load %arg6[%c21, %c0_63] : memref<27x512xf32, #tpu.memory_space<vmem>>, vector<1x512xf32>
    %77 = arith.mulf %75, %76 : vector<1x512xf32>
    %c0_64 = arith.constant 0 : index
    %c137 = arith.constant 137 : index
    %78 = vector.load %arg12[%c0_64, %c137] : memref<4x658xf32, #tpu.memory_space<vmem>>, vector<1x512xf32>
    %c22 = arith.constant 22 : index
    %c0_65 = arith.constant 0 : index
    %79 = vector.load %arg6[%c22, %c0_65] : memref<27x512xf32, #tpu.memory_space<vmem>>, vector<1x512xf32>
    %80 = arith.mulf %78, %79 : vector<1x512xf32>
    %c0_66 = arith.constant 0 : index
    %c138 = arith.constant 138 : index
    %81 = vector.load %arg12[%c0_66, %c138] : memref<4x658xf32, #tpu.memory_space<vmem>>, vector<1x512xf32>
    %c23 = arith.constant 23 : index
    %c0_67 = arith.constant 0 : index
    %82 = vector.load %arg6[%c23, %c0_67] : memref<27x512xf32, #tpu.memory_space<vmem>>, vector<1x512xf32>
    %83 = arith.mulf %81, %82 : vector<1x512xf32>
    %c0_68 = arith.constant 0 : index
    %c144 = arith.constant 144 : index
    %84 = vector.load %arg12[%c0_68, %c144] : memref<4x658xf32, #tpu.memory_space<vmem>>, vector<1x512xf32>
    %c24 = arith.constant 24 : index
    %c0_69 = arith.constant 0 : index
    %85 = vector.load %arg6[%c24, %c0_69] : memref<27x512xf32, #tpu.memory_space<vmem>>, vector<1x512xf32>
    %86 = arith.mulf %84, %85 : vector<1x512xf32>
    %c0_70 = arith.constant 0 : index
    %c145 = arith.constant 145 : index
    %87 = vector.load %arg12[%c0_70, %c145] : memref<4x658xf32, #tpu.memory_space<vmem>>, vector<1x512xf32>
    %c25 = arith.constant 25 : index
    %c0_71 = arith.constant 0 : index
    %88 = vector.load %arg6[%c25, %c0_71] : memref<27x512xf32, #tpu.memory_space<vmem>>, vector<1x512xf32>
    %89 = arith.mulf %87, %88 : vector<1x512xf32>
    %c0_72 = arith.constant 0 : index
    %c146 = arith.constant 146 : index
    %90 = vector.load %arg12[%c0_72, %c146] : memref<4x658xf32, #tpu.memory_space<vmem>>, vector<1x512xf32>
    %c26 = arith.constant 26 : index
    %c0_73 = arith.constant 0 : index
    %91 = vector.load %arg6[%c26, %c0_73] : memref<27x512xf32, #tpu.memory_space<vmem>>, vector<1x512xf32>
    %92 = arith.mulf %90, %91 : vector<1x512xf32>
    %93 = tpu.concatenate %14, %17, %20, %23, %26, %29, %32, %35, %38, %41, %44, %47, %50, %53, %56, %59 in 0 : vector<1x512xf32>, vector<1x512xf32>, vector<1x512xf32>, vector<1x512xf32>, vector<1x512xf32>, vector<1x512xf32>, vector<1x512xf32>, vector<1x512xf32>, vector<1x512xf32>, vector<1x512xf32>, vector<1x512xf32>, vector<1x512xf32>, vector<1x512xf32>, vector<1x512xf32>, vector<1x512xf32>, vector<1x512xf32> -> vector<16x512xf32>
    %94 = tpu.concatenate %62, %65, %68, %71, %74, %77, %80, %83, %86, %89, %92 in 0 : vector<1x512xf32>, vector<1x512xf32>, vector<1x512xf32>, vector<1x512xf32>, vector<1x512xf32>, vector<1x512xf32>, vector<1x512xf32>, vector<1x512xf32>, vector<1x512xf32>, vector<1x512xf32>, vector<1x512xf32> -> vector<11x512xf32>
    %95 = tpu.concatenate %93, %94 in 0 : vector<16x512xf32>, vector<11x512xf32> -> vector<27x512xf32>
    %c0_74 = arith.constant 0 : index
    %c0_75 = arith.constant 0 : index
    %96 = vector.load %arg3[%c0_74, %c0_75] : memref<1x27xf32, #tpu.memory_space<vmem>>, vector<1x27xf32>
    %cst_76 = arith.constant dense<0.000000e+00> : vector<1x512xf32>
    %97 = tpu.matmul %96, %95, %cst_76 {dimension_numbers = #tpu.dot_dimension_numbers<[1], [0], [0], [1], [0, 0, 1, 1], [], []>} : vector<1x27xf32>, vector<27x512xf32>, vector<1x512xf32> -> vector<1x512xf32>
    %98 = vector.extract_strided_slice %9 {offsets = [1, 0], sizes = [3, 512], strides = [1, 1]} : vector<4x512xf32> to vector<3x512xf32>
    %99 = tpu.concatenate %97, %98 in 0 : vector<1x512xf32>, vector<3x512xf32> -> vector<4x512xf32>
    %c0_77 = arith.constant 0 : index
    %c73_78 = arith.constant 73 : index
    %100 = vector.load %arg12[%c0_77, %c73_78] : memref<4x658xf32, #tpu.memory_space<vmem>>, vector<4x512xf32>
    tpu.vector_store %arg12[%c0_77, %c73_78], %99 {strides = array<i32>} : memref<4x658xf32, #tpu.memory_space<vmem>>, vector<4x512xf32>,
    %c0_79 = arith.constant 0 : index
    %c1_80 = arith.constant 1 : index
    %101 = vector.load %arg12[%c0_79, %c1_80] : memref<4x658xf32, #tpu.memory_space<vmem>>, vector<4x512xf32>
    %c0_81 = arith.constant 0 : index
    %c0_82 = arith.constant 0 : index
    %102 = vector.load %arg7[%c0_81, %c0_82] : memref<9x512xf32, #tpu.memory_space<vmem>>, vector<1x512xf32>
    %103 = vector.broadcast %102 : vector<1x512xf32> to vector<4x512xf32>
    %104 = arith.mulf %101, %103 : vector<4x512xf32>
    %c0_83 = arith.constant 0 : index
    %c9_84 = arith.constant 9 : index
    %105 = vector.load %arg12[%c0_83, %c9_84] : memref<4x658xf32, #tpu.memory_space<vmem>>, vector<4x512xf32>
    %c1_85 = arith.constant 1 : index
    %c0_86 = arith.constant 0 : index
    %106 = vector.load %arg7[%c1_85, %c0_86] : memref<9x512xf32, #tpu.memory_space<vmem>>, vector<1x512xf32>
    %107 = vector.broadcast %106 : vector<1x512xf32> to vector<4x512xf32>
    %108 = arith.mulf %105, %107 : vector<4x512xf32>
    %c0_87 = arith.constant 0 : index
    %c17_88 = arith.constant 17 : index
    %109 = vector.load %arg12[%c0_87, %c17_88] : memref<4x658xf32, #tpu.memory_space<vmem>>, vector<4x512xf32>
    %c2_89 = arith.constant 2 : index
    %c0_90 = arith.constant 0 : index
    %110 = vector.load %arg7[%c2_89, %c0_90] : memref<9x512xf32, #tpu.memory_space<vmem>>, vector<1x512xf32>
    %111 = vector.broadcast %110 : vector<1x512xf32> to vector<4x512xf32>
    %112 = arith.mulf %109, %111 : vector<4x512xf32>
    %c0_91 = arith.constant 0 : index
    %c65_92 = arith.constant 65 : index
    %113 = vector.load %arg12[%c0_91, %c65_92] : memref<4x658xf32, #tpu.memory_space<vmem>>, vector<4x512xf32>
    %c3_93 = arith.constant 3 : index
    %c0_94 = arith.constant 0 : index
    %114 = vector.load %arg7[%c3_93, %c0_94] : memref<9x512xf32, #tpu.memory_space<vmem>>, vector<1x512xf32>
    %115 = vector.broadcast %114 : vector<1x512xf32> to vector<4x512xf32>
    %116 = arith.mulf %113, %115 : vector<4x512xf32>
    %c0_95 = arith.constant 0 : index
    %c73_96 = arith.constant 73 : index
    %117 = vector.load %arg12[%c0_95, %c73_96] : memref<4x658xf32, #tpu.memory_space<vmem>>, vector<4x512xf32>
    %c4_97 = arith.constant 4 : index
    %c0_98 = arith.constant 0 : index
    %118 = vector.load %arg7[%c4_97, %c0_98] : memref<9x512xf32, #tpu.memory_space<vmem>>, vector<1x512xf32>
    %119 = vector.broadcast %118 : vector<1x512xf32> to vector<4x512xf32>
    %120 = arith.mulf %117, %119 : vector<4x512xf32>
    %c0_99 = arith.constant 0 : index
    %c81_100 = arith.constant 81 : index
    %121 = vector.load %arg12[%c0_99, %c81_100] : memref<4x658xf32, #tpu.memory_space<vmem>>, vector<4x512xf32>
    %c5_101 = arith.constant 5 : index
    %c0_102 = arith.constant 0 : index
    %122 = vector.load %arg7[%c5_101, %c0_102] : memref<9x512xf32, #tpu.memory_space<vmem>>, vector<1x512xf32>
    %123 = vector.broadcast %122 : vector<1x512xf32> to vector<4x512xf32>
    %124 = arith.mulf %121, %123 : vector<4x512xf32>
    %c0_103 = arith.constant 0 : index
    %c129_104 = arith.constant 129 : index
    %125 = vector.load %arg12[%c0_103, %c129_104] : memref<4x658xf32, #tpu.memory_space<vmem>>, vector<4x512xf32>
    %c6_105 = arith.constant 6 : index
    %c0_106 = arith.constant 0 : index
    %126 = vector.load %arg7[%c6_105, %c0_106] : memref<9x512xf32, #tpu.memory_space<vmem>>, vector<1x512xf32>
    %127 = vector.broadcast %126 : vector<1x512xf32> to vector<4x512xf32>
    %128 = arith.mulf %125, %127 : vector<4x512xf32>
    %c0_107 = arith.constant 0 : index
    %c137_108 = arith.constant 137 : index
    %129 = vector.load %arg12[%c0_107, %c137_108] : memref<4x658xf32, #tpu.memory_space<vmem>>, vector<4x512xf32>
    %c7_109 = arith.constant 7 : index
    %c0_110 = arith.constant 0 : index
    %130 = vector.load %arg7[%c7_109, %c0_110] : memref<9x512xf32, #tpu.memory_space<vmem>>, vector<1x512xf32>
    %131 = vector.broadcast %130 : vector<1x512xf32> to vector<4x512xf32>
    %132 = arith.mulf %129, %131 : vector<4x512xf32>
    %c0_111 = arith.constant 0 : index
    %c145_112 = arith.constant 145 : index
    %133 = vector.load %arg12[%c0_111, %c145_112] : memref<4x658xf32, #tpu.memory_space<vmem>>, vector<4x512xf32>
    %c8_113 = arith.constant 8 : index
    %c0_114 = arith.constant 0 : index
    %134 = vector.load %arg7[%c8_113, %c0_114] : memref<9x512xf32, #tpu.memory_space<vmem>>, vector<1x512xf32>
    %135 = vector.broadcast %134 : vector<1x512xf32> to vector<4x512xf32>
    %136 = arith.mulf %133, %135 : vector<4x512xf32>
    %137 = tpu.concatenate %104, %108, %112, %116, %120, %124, %128, %132, %136 in 0 : vector<4x512xf32>, vector<4x512xf32>, vector<4x512xf32>, vector<4x512xf32>, vector<4x512xf32>, vector<4x512xf32>, vector<4x512xf32>, vector<4x512xf32>, vector<4x512xf32> -> vector<36x512xf32>
    %c0_115 = arith.constant 0 : index
    %c0_116 = arith.constant 0 : index
    %138 = vector.load %arg4[%c0_115, %c0_116] : memref<4x36xf32, #tpu.memory_space<vmem>>, vector<4x36xf32>
    %cst_117 = arith.constant dense<0.000000e+00> : vector<4x512xf32>
    %139 = tpu.matmul %138, %137, %cst_117 {dimension_numbers = #tpu.dot_dimension_numbers<[1], [0], [0], [1], [0, 0, 1, 1], [], []>} : vector<4x36xf32>, vector<36x512xf32>, vector<4x512xf32> -> vector<4x512xf32>
    %c0_118 = arith.constant 0 : index
    %c0_119 = arith.constant 0 : index
    %140 = vector.load %arg9[%c0_118, %c0_119] : memref<4x1xf32, #tpu.memory_space<vmem>>, vector<4x1xf32>
    %141 = vector.broadcast %140 : vector<4x1xf32> to vector<4x512xf32>
    %142 = arith.mulf %139, %141 : vector<4x512xf32>
    %c0_120 = arith.constant 0 : index
    %c0_121 = arith.constant 0 : index
    %143 = vector.load %arg10[%c0_120, %c0_121] : memref<4x1xf32, #tpu.memory_space<vmem>>, vector<4x1xf32>
    %144 = vector.broadcast %143 : vector<4x1xf32> to vector<4x512xf32>
    %145 = arith.addf %142, %144 : vector<4x512xf32>
    %cst_122 = arith.constant 0.000000e+00 : f32
    %146 = vector.broadcast %cst_122 : f32 to vector<4x512xf32>
    %147 = arith.maximumf %145, %146 : vector<4x512xf32>
    %c0_123 = arith.constant 0 : index
    %c73_124 = arith.constant 73 : index
    %148 = vector.load %arg12[%c0_123, %c73_124] : memref<4x658xf32, #tpu.memory_space<vmem>>, vector<4x512xf32>
    tpu.vector_store %arg12[%c0_123, %c73_124], %147 {strides = array<i32>} : memref<4x658xf32, #tpu.memory_space<vmem>>, vector<4x512xf32>,
    %c0_125 = arith.constant 0 : index
    %c64_126 = arith.constant 64 : index
    %149 = vector.load %arg12[%c0_125, %c64_126] : memref<4x658xf32, #tpu.memory_space<vmem>>, vector<4x512xf32>
    %c0_127 = arith.constant 0 : index
    %c0_128 = arith.constant 0 : index
    %150 = vector.load %arg8[%c0_127, %c0_128] : memref<9x512xf32, #tpu.memory_space<vmem>>, vector<1x512xf32>
    %151 = vector.broadcast %150 : vector<1x512xf32> to vector<4x512xf32>
    %152 = arith.mulf %149, %151 : vector<4x512xf32>
    %c0_129 = arith.constant 0 : index
    %c65_130 = arith.constant 65 : index
    %153 = vector.load %arg12[%c0_129, %c65_130] : memref<4x658xf32, #tpu.memory_space<vmem>>, vector<4x512xf32>
    %c1_131 = arith.constant 1 : index
    %c0_132 = arith.constant 0 : index
    %154 = vector.load %arg8[%c1_131, %c0_132] : memref<9x512xf32, #tpu.memory_space<vmem>>, vector<1x512xf32>
    %155 = vector.broadcast %154 : vector<1x512xf32> to vector<4x512xf32>
    %156 = arith.mulf %153, %155 : vector<4x512xf32>
    %c0_133 = arith.constant 0 : index
    %c66_134 = arith.constant 66 : index
    %157 = vector.load %arg12[%c0_133, %c66_134] : memref<4x658xf32, #tpu.memory_space<vmem>>, vector<4x512xf32>
    %c2_135 = arith.constant 2 : index
    %c0_136 = arith.constant 0 : index
    %158 = vector.load %arg8[%c2_135, %c0_136] : memref<9x512xf32, #tpu.memory_space<vmem>>, vector<1x512xf32>
    %159 = vector.broadcast %158 : vector<1x512xf32> to vector<4x512xf32>
    %160 = arith.mulf %157, %159 : vector<4x512xf32>
    %c0_137 = arith.constant 0 : index
    %c72_138 = arith.constant 72 : index
    %161 = vector.load %arg12[%c0_137, %c72_138] : memref<4x658xf32, #tpu.memory_space<vmem>>, vector<4x512xf32>
    %c3_139 = arith.constant 3 : index
    %c0_140 = arith.constant 0 : index
    %162 = vector.load %arg8[%c3_139, %c0_140] : memref<9x512xf32, #tpu.memory_space<vmem>>, vector<1x512xf32>
    %163 = vector.broadcast %162 : vector<1x512xf32> to vector<4x512xf32>
    %164 = arith.mulf %161, %163 : vector<4x512xf32>
    %c0_141 = arith.constant 0 : index
    %c73_142 = arith.constant 73 : index
    %165 = vector.load %arg12[%c0_141, %c73_142] : memref<4x658xf32, #tpu.memory_space<vmem>>, vector<4x512xf32>
    %c4_143 = arith.constant 4 : index
    %c0_144 = arith.constant 0 : index
    %166 = vector.load %arg8[%c4_143, %c0_144] : memref<9x512xf32, #tpu.memory_space<vmem>>, vector<1x512xf32>
    %167 = vector.broadcast %166 : vector<1x512xf32> to vector<4x512xf32>
    %168 = arith.mulf %165, %167 : vector<4x512xf32>
    %c0_145 = arith.constant 0 : index
    %c74_146 = arith.constant 74 : index
    %169 = vector.load %arg12[%c0_145, %c74_146] : memref<4x658xf32, #tpu.memory_space<vmem>>, vector<4x512xf32>
    %c5_147 = arith.constant 5 : index
    %c0_148 = arith.constant 0 : index
    %170 = vector.load %arg8[%c5_147, %c0_148] : memref<9x512xf32, #tpu.memory_space<vmem>>, vector<1x512xf32>
    %171 = vector.broadcast %170 : vector<1x512xf32> to vector<4x512xf32>
    %172 = arith.mulf %169, %171 : vector<4x512xf32>
    %c0_149 = arith.constant 0 : index
    %c80_150 = arith.constant 80 : index
    %173 = vector.load %arg12[%c0_149, %c80_150] : memref<4x658xf32, #tpu.memory_space<vmem>>, vector<4x512xf32>
    %c6_151 = arith.constant 6 : index
    %c0_152 = arith.constant 0 : index
    %174 = vector.load %arg8[%c6_151, %c0_152] : memref<9x512xf32, #tpu.memory_space<vmem>>, vector<1x512xf32>
    %175 = vector.broadcast %174 : vector<1x512xf32> to vector<4x512xf32>
    %176 = arith.mulf %173, %175 : vector<4x512xf32>
    %c0_153 = arith.constant 0 : index
    %c81_154 = arith.constant 81 : index
    %177 = vector.load %arg12[%c0_153, %c81_154] : memref<4x658xf32, #tpu.memory_space<vmem>>, vector<4x512xf32>
    %c7_155 = arith.constant 7 : index
    %c0_156 = arith.constant 0 : index
    %178 = vector.load %arg8[%c7_155, %c0_156] : memref<9x512xf32, #tpu.memory_space<vmem>>, vector<1x512xf32>
    %179 = vector.broadcast %178 : vector<1x512xf32> to vector<4x512xf32>
    %180 = arith.mulf %177, %179 : vector<4x512xf32>
    %c0_157 = arith.constant 0 : index
    %c82_158 = arith.constant 82 : index
    %181 = vector.load %arg12[%c0_157, %c82_158] : memref<4x658xf32, #tpu.memory_space<vmem>>, vector<4x512xf32>
    %c8_159 = arith.constant 8 : index
    %c0_160 = arith.constant 0 : index
    %182 = vector.load %arg8[%c8_159, %c0_160] : memref<9x512xf32, #tpu.memory_space<vmem>>, vector<1x512xf32>
    %183 = vector.broadcast %182 : vector<1x512xf32> to vector<4x512xf32>
    %184 = arith.mulf %181, %183 : vector<4x512xf32>
    %185 = tpu.concatenate %152, %156, %160, %164, %168, %172, %176, %180, %184 in 0 : vector<4x512xf32>, vector<4x512xf32>, vector<4x512xf32>, vector<4x512xf32>, vector<4x512xf32>, vector<4x512xf32>, vector<4x512xf32>, vector<4x512xf32>, vector<4x512xf32> -> vector<36x512xf32>
    %c0_161 = arith.constant 0 : index
    %c0_162 = arith.constant 0 : index
    %186 = vector.load %arg5[%c0_161, %c0_162] : memref<4x36xf32, #tpu.memory_space<vmem>>, vector<4x36xf32>
    %cst_163 = arith.constant dense<0.000000e+00> : vector<4x512xf32>
    %187 = tpu.matmul %186, %185, %cst_163 {dimension_numbers = #tpu.dot_dimension_numbers<[1], [0], [0], [1], [0, 0, 1, 1], [], []>} : vector<4x36xf32>, vector<36x512xf32>, vector<4x512xf32> -> vector<4x512xf32>
    %188 = arith.addf %187, %9 : vector<4x512xf32>
    %189 = arith.truncf %188 : vector<4x512xf32> to vector<4x512xbf16>
    %c0_164 = arith.constant 0 : index
    %c0_165 = arith.constant 0 : index
    %c0_166 = arith.constant 0 : index
    %190 = vector.load %arg11[%c0_164, %c0_165, %c0_166] : memref<1x4x512xbf16, #tpu.memory_space<vmem>>, vector<1x4x512xbf16>
    %191 = vector.shape_cast %190 : vector<1x4x512xbf16> to vector<4x512xbf16>
    %192 = vector.shape_cast %189 : vector<4x512xbf16> to vector<1x4x512xbf16>
    tpu.vector_store %arg11[%c0_164, %c0_165, %c0_166], %192 {strides = array<i32>} : memref<1x4x512xbf16, #tpu.memory_space<vmem>>, vector<1x4x512xbf16>,
    return
  }
  func.func @transform_0(%arg0: i32) -> (i32, i32, i32) {
    %c0_i32 = arith.constant 0 : i32
    %c0_i32_0 = arith.constant 0 : i32
    %c0_i32_1 = arith.constant 0 : i32
    return %arg0, %c0_i32, %c0_i32_0 : i32, i32, i32
  }
  func.func @transform_1(%arg0: i32) -> (i32, i32, i32) {
    %c0_i32 = arith.constant 0 : i32
    %c0_i32_0 = arith.constant 0 : i32
    %c0_i32_1 = arith.constant 0 : i32
    return %arg0, %c0_i32, %c0_i32_0 : i32, i32, i32
  }
  func.func @transform_2(%arg0: i32) -> (i32, i32) {
    %c0_i32 = arith.constant 0 : i32
    %c0_i32_0 = arith.constant 0 : i32
    %c0_i32_1 = arith.constant 0 : i32
    return %c0_i32, %c0_i32_0 : i32, i32
  }
  func.func @transform_3(%arg0: i32) -> (i32, i32) {
    %c0_i32 = arith.constant 0 : i32
    %c0_i32_0 = arith.constant 0 : i32
    %c0_i32_1 = arith.constant 0 : i32
    return %c0_i32, %c0_i32_0 : i32, i32
  }
  func.func @transform_4(%arg0: i32) -> (i32, i32) {
    %c0_i32 = arith.constant 0 : i32
    %c0_i32_0 = arith.constant 0 : i32
    %c0_i32_1 = arith.constant 0 : i32
    return %c0_i32, %c0_i32_0 : i32, i32
  }
  func.func @transform_5(%arg0: i32) -> (i32, i32) {
    %c0_i32 = arith.constant 0 : i32
    %c0_i32_0 = arith.constant 0 : i32
    %c0_i32_1 = arith.constant 0 : i32
    return %c0_i32, %c0_i32_0 : i32, i32
  }
  func.func @transform_6(%arg0: i32) -> (i32, i32) {
    %c0_i32 = arith.constant 0 : i32
    %c0_i32_0 = arith.constant 0 : i32
    %c0_i32_1 = arith.constant 0 : i32
    return %c0_i32, %c0_i32_0 : i32, i32
  }
  func.func @transform_7(%arg0: i32) -> (i32, i32) {
    %c0_i32 = arith.constant 0 : i32
    %c0_i32_0 = arith.constant 0 : i32
    %c0_i32_1 = arith.constant 0 : i32
    return %c0_i32, %c0_i32_0 : i32, i32
  }
  func.func @transform_8(%arg0: i32) -> (i32, i32) {
    %c0_i32 = arith.constant 0 : i32
    %c0_i32_0 = arith.constant 0 : i32
    %c0_i32_1 = arith.constant 0 : i32
    return %c0_i32, %c0_i32_0 : i32, i32
  }
  func.func @transform_9(%arg0: i32) -> (i32, i32) {
    %c0_i32 = arith.constant 0 : i32
    %c0_i32_0 = arith.constant 0 : i32
    %c0_i32_1 = arith.constant 0 : i32
    return %c0_i32, %c0_i32_0 : i32, i32
  }
  func.func @transform_10(%arg0: i32) -> (i32, i32, i32) {
    %c0_i32 = arith.constant 0 : i32
    %c0_i32_0 = arith.constant 0 : i32
    %c0_i32_1 = arith.constant 0 : i32
    return %arg0, %c0_i32, %c0_i32_0 : i32, i32, i32
  }
}

module attributes {stable_mosaic.version = 11 : i64} {
  func.func @_partial_conv3_kernel(%arg0: i32, %arg1: memref<1x4x512xbf16, #tpu.memory_space<vmem>>, %arg2: memref<1x27xf32, #tpu.memory_space<vmem>>, %arg3: memref<4x36xf32, #tpu.memory_space<vmem>>, %arg4: memref<4x36xf32, #tpu.memory_space<vmem>>, %arg5: memref<27x512xf32, #tpu.memory_space<vmem>>, %arg6: memref<9x512xf32, #tpu.memory_space<vmem>>, %arg7: memref<9x512xf32, #tpu.memory_space<vmem>>, %arg8: memref<4x1xf32, #tpu.memory_space<vmem>>, %arg9: memref<4x1xf32, #tpu.memory_space<vmem>>, %arg10: memref<1x4x512xbf16, #tpu.memory_space<vmem>>, %arg11: memref<4x658xf32, #tpu.memory_space<vmem>>) attributes {dimension_semantics = [#tpu.dimension_semantics<parallel>], iteration_bounds = array<i64: 2>, scalar_prefetch = 0 : i64, scratch_operands = 1 : i64, tpu.core_type = #tpu.core_type<tc>, window_params = [{transform_indices = @transform_0, window_bounds = array<i64: 1, 4, 512>}, {pipeline_mode = #tpu.pipeline_mode<synchronous>, transform_indices = @transform_1, window_bounds = array<i64: 1, 27>}, {pipeline_mode = #tpu.pipeline_mode<synchronous>, transform_indices = @transform_2, window_bounds = array<i64: 4, 36>}, {pipeline_mode = #tpu.pipeline_mode<synchronous>, transform_indices = @transform_3, window_bounds = array<i64: 4, 36>}, {pipeline_mode = #tpu.pipeline_mode<synchronous>, transform_indices = @transform_4, window_bounds = array<i64: 27, 512>}, {pipeline_mode = #tpu.pipeline_mode<synchronous>, transform_indices = @transform_5, window_bounds = array<i64: 9, 512>}, {pipeline_mode = #tpu.pipeline_mode<synchronous>, transform_indices = @transform_6, window_bounds = array<i64: 9, 512>}, {pipeline_mode = #tpu.pipeline_mode<synchronous>, transform_indices = @transform_7, window_bounds = array<i64: 4, 1>}, {pipeline_mode = #tpu.pipeline_mode<synchronous>, transform_indices = @transform_8, window_bounds = array<i64: 4, 1>}, {transform_indices = @transform_9, window_bounds = array<i64: 1, 4, 512>}]} {
    %cst = arith.constant 0.000000e+00 : f32
    %0 = vector.broadcast %cst : f32 to vector<4x73xf32>
    %c0 = arith.constant 0 : index
    %c0_0 = arith.constant 0 : index
    %1 = vector.load %arg11[%c0, %c0_0] : memref<4x658xf32, #tpu.memory_space<vmem>>, vector<4x73xf32>
    tpu.vector_store %arg11[%c0, %c0_0], %0 {strides = array<i32>} : memref<4x658xf32, #tpu.memory_space<vmem>>, vector<4x73xf32>,
    %c0_1 = arith.constant 0 : index
    %c585 = arith.constant 585 : index
    %2 = vector.load %arg11[%c0_1, %c585] : memref<4x658xf32, #tpu.memory_space<vmem>>, vector<4x73xf32>
    tpu.vector_store %arg11[%c0_1, %c585], %0 {strides = array<i32>} : memref<4x658xf32, #tpu.memory_space<vmem>>, vector<4x73xf32>,
    %c0_2 = arith.constant 0 : index
    %c0_3 = arith.constant 0 : index
    %c0_4 = arith.constant 0 : index
    %3 = vector.load %arg1[%c0_2, %c0_3, %c0_4] : memref<1x4x512xbf16, #tpu.memory_space<vmem>>, vector<1x4x512xbf16>
    %4 = vector.shape_cast %3 : vector<1x4x512xbf16> to vector<4x512xbf16>
    %5 = arith.extf %4 : vector<4x512xbf16> to vector<4x512xf32>
    %6 = vector.extract_strided_slice %5 {offsets = [0, 0], sizes = [1, 512], strides = [1, 1]} : vector<4x512xf32> to vector<1x512xf32>
    %c0_5 = arith.constant 0 : index
    %c73 = arith.constant 73 : index
    %7 = vector.load %arg11[%c0_5, %c73] : memref<4x658xf32, #tpu.memory_space<vmem>>, vector<1x512xf32>
    tpu.vector_store %arg11[%c0_5, %c73], %6 {strides = array<i32>} : memref<4x658xf32, #tpu.memory_space<vmem>>, vector<1x512xf32>,
    %c0_6 = arith.constant 0 : index
    %c0_7 = arith.constant 0 : index
    %8 = vector.load %arg11[%c0_6, %c0_7] : memref<4x658xf32, #tpu.memory_space<vmem>>, vector<1x512xf32>
    %c0_8 = arith.constant 0 : index
    %c0_9 = arith.constant 0 : index
    %9 = vector.load %arg5[%c0_8, %c0_9] : memref<27x512xf32, #tpu.memory_space<vmem>>, vector<1x512xf32>
    %10 = arith.mulf %8, %9 : vector<1x512xf32>
    %c0_10 = arith.constant 0 : index
    %c1 = arith.constant 1 : index
    %11 = vector.load %arg11[%c0_10, %c1] : memref<4x658xf32, #tpu.memory_space<vmem>>, vector<1x512xf32>
    %c1_11 = arith.constant 1 : index
    %c0_12 = arith.constant 0 : index
    %12 = vector.load %arg5[%c1_11, %c0_12] : memref<27x512xf32, #tpu.memory_space<vmem>>, vector<1x512xf32>
    %13 = arith.mulf %11, %12 : vector<1x512xf32>
    %c0_13 = arith.constant 0 : index
    %c2 = arith.constant 2 : index
    %14 = vector.load %arg11[%c0_13, %c2] : memref<4x658xf32, #tpu.memory_space<vmem>>, vector<1x512xf32>
    %c2_14 = arith.constant 2 : index
    %c0_15 = arith.constant 0 : index
    %15 = vector.load %arg5[%c2_14, %c0_15] : memref<27x512xf32, #tpu.memory_space<vmem>>, vector<1x512xf32>
    %16 = arith.mulf %14, %15 : vector<1x512xf32>
    %c0_16 = arith.constant 0 : index
    %c8 = arith.constant 8 : index
    %17 = vector.load %arg11[%c0_16, %c8] : memref<4x658xf32, #tpu.memory_space<vmem>>, vector<1x512xf32>
    %c3 = arith.constant 3 : index
    %c0_17 = arith.constant 0 : index
    %18 = vector.load %arg5[%c3, %c0_17] : memref<27x512xf32, #tpu.memory_space<vmem>>, vector<1x512xf32>
    %19 = arith.mulf %17, %18 : vector<1x512xf32>
    %c0_18 = arith.constant 0 : index
    %c9 = arith.constant 9 : index
    %20 = vector.load %arg11[%c0_18, %c9] : memref<4x658xf32, #tpu.memory_space<vmem>>, vector<1x512xf32>
    %c4 = arith.constant 4 : index
    %c0_19 = arith.constant 0 : index
    %21 = vector.load %arg5[%c4, %c0_19] : memref<27x512xf32, #tpu.memory_space<vmem>>, vector<1x512xf32>
    %22 = arith.mulf %20, %21 : vector<1x512xf32>
    %c0_20 = arith.constant 0 : index
    %c10 = arith.constant 10 : index
    %23 = vector.load %arg11[%c0_20, %c10] : memref<4x658xf32, #tpu.memory_space<vmem>>, vector<1x512xf32>
    %c5 = arith.constant 5 : index
    %c0_21 = arith.constant 0 : index
    %24 = vector.load %arg5[%c5, %c0_21] : memref<27x512xf32, #tpu.memory_space<vmem>>, vector<1x512xf32>
    %25 = arith.mulf %23, %24 : vector<1x512xf32>
    %c0_22 = arith.constant 0 : index
    %c16 = arith.constant 16 : index
    %26 = vector.load %arg11[%c0_22, %c16] : memref<4x658xf32, #tpu.memory_space<vmem>>, vector<1x512xf32>
    %c6 = arith.constant 6 : index
    %c0_23 = arith.constant 0 : index
    %27 = vector.load %arg5[%c6, %c0_23] : memref<27x512xf32, #tpu.memory_space<vmem>>, vector<1x512xf32>
    %28 = arith.mulf %26, %27 : vector<1x512xf32>
    %c0_24 = arith.constant 0 : index
    %c17 = arith.constant 17 : index
    %29 = vector.load %arg11[%c0_24, %c17] : memref<4x658xf32, #tpu.memory_space<vmem>>, vector<1x512xf32>
    %c7 = arith.constant 7 : index
    %c0_25 = arith.constant 0 : index
    %30 = vector.load %arg5[%c7, %c0_25] : memref<27x512xf32, #tpu.memory_space<vmem>>, vector<1x512xf32>
    %31 = arith.mulf %29, %30 : vector<1x512xf32>
    %c0_26 = arith.constant 0 : index
    %c18 = arith.constant 18 : index
    %32 = vector.load %arg11[%c0_26, %c18] : memref<4x658xf32, #tpu.memory_space<vmem>>, vector<1x512xf32>
    %c8_27 = arith.constant 8 : index
    %c0_28 = arith.constant 0 : index
    %33 = vector.load %arg5[%c8_27, %c0_28] : memref<27x512xf32, #tpu.memory_space<vmem>>, vector<1x512xf32>
    %34 = arith.mulf %32, %33 : vector<1x512xf32>
    %c0_29 = arith.constant 0 : index
    %c64 = arith.constant 64 : index
    %35 = vector.load %arg11[%c0_29, %c64] : memref<4x658xf32, #tpu.memory_space<vmem>>, vector<1x512xf32>
    %c9_30 = arith.constant 9 : index
    %c0_31 = arith.constant 0 : index
    %36 = vector.load %arg5[%c9_30, %c0_31] : memref<27x512xf32, #tpu.memory_space<vmem>>, vector<1x512xf32>
    %37 = arith.mulf %35, %36 : vector<1x512xf32>
    %c0_32 = arith.constant 0 : index
    %c65 = arith.constant 65 : index
    %38 = vector.load %arg11[%c0_32, %c65] : memref<4x658xf32, #tpu.memory_space<vmem>>, vector<1x512xf32>
    %c10_33 = arith.constant 10 : index
    %c0_34 = arith.constant 0 : index
    %39 = vector.load %arg5[%c10_33, %c0_34] : memref<27x512xf32, #tpu.memory_space<vmem>>, vector<1x512xf32>
    %40 = arith.mulf %38, %39 : vector<1x512xf32>
    %c0_35 = arith.constant 0 : index
    %c66 = arith.constant 66 : index
    %41 = vector.load %arg11[%c0_35, %c66] : memref<4x658xf32, #tpu.memory_space<vmem>>, vector<1x512xf32>
    %c11 = arith.constant 11 : index
    %c0_36 = arith.constant 0 : index
    %42 = vector.load %arg5[%c11, %c0_36] : memref<27x512xf32, #tpu.memory_space<vmem>>, vector<1x512xf32>
    %43 = arith.mulf %41, %42 : vector<1x512xf32>
    %c0_37 = arith.constant 0 : index
    %c72 = arith.constant 72 : index
    %44 = vector.load %arg11[%c0_37, %c72] : memref<4x658xf32, #tpu.memory_space<vmem>>, vector<1x512xf32>
    %c12 = arith.constant 12 : index
    %c0_38 = arith.constant 0 : index
    %45 = vector.load %arg5[%c12, %c0_38] : memref<27x512xf32, #tpu.memory_space<vmem>>, vector<1x512xf32>
    %46 = arith.mulf %44, %45 : vector<1x512xf32>
    %c0_39 = arith.constant 0 : index
    %c73_40 = arith.constant 73 : index
    %47 = vector.load %arg11[%c0_39, %c73_40] : memref<4x658xf32, #tpu.memory_space<vmem>>, vector<1x512xf32>
    %c13 = arith.constant 13 : index
    %c0_41 = arith.constant 0 : index
    %48 = vector.load %arg5[%c13, %c0_41] : memref<27x512xf32, #tpu.memory_space<vmem>>, vector<1x512xf32>
    %49 = arith.mulf %47, %48 : vector<1x512xf32>
    %c0_42 = arith.constant 0 : index
    %c74 = arith.constant 74 : index
    %50 = vector.load %arg11[%c0_42, %c74] : memref<4x658xf32, #tpu.memory_space<vmem>>, vector<1x512xf32>
    %c14 = arith.constant 14 : index
    %c0_43 = arith.constant 0 : index
    %51 = vector.load %arg5[%c14, %c0_43] : memref<27x512xf32, #tpu.memory_space<vmem>>, vector<1x512xf32>
    %52 = arith.mulf %50, %51 : vector<1x512xf32>
    %c0_44 = arith.constant 0 : index
    %c80 = arith.constant 80 : index
    %53 = vector.load %arg11[%c0_44, %c80] : memref<4x658xf32, #tpu.memory_space<vmem>>, vector<1x512xf32>
    %c15 = arith.constant 15 : index
    %c0_45 = arith.constant 0 : index
    %54 = vector.load %arg5[%c15, %c0_45] : memref<27x512xf32, #tpu.memory_space<vmem>>, vector<1x512xf32>
    %55 = arith.mulf %53, %54 : vector<1x512xf32>
    %c0_46 = arith.constant 0 : index
    %c81 = arith.constant 81 : index
    %56 = vector.load %arg11[%c0_46, %c81] : memref<4x658xf32, #tpu.memory_space<vmem>>, vector<1x512xf32>
    %c16_47 = arith.constant 16 : index
    %c0_48 = arith.constant 0 : index
    %57 = vector.load %arg5[%c16_47, %c0_48] : memref<27x512xf32, #tpu.memory_space<vmem>>, vector<1x512xf32>
    %58 = arith.mulf %56, %57 : vector<1x512xf32>
    %c0_49 = arith.constant 0 : index
    %c82 = arith.constant 82 : index
    %59 = vector.load %arg11[%c0_49, %c82] : memref<4x658xf32, #tpu.memory_space<vmem>>, vector<1x512xf32>
    %c17_50 = arith.constant 17 : index
    %c0_51 = arith.constant 0 : index
    %60 = vector.load %arg5[%c17_50, %c0_51] : memref<27x512xf32, #tpu.memory_space<vmem>>, vector<1x512xf32>
    %61 = arith.mulf %59, %60 : vector<1x512xf32>
    %c0_52 = arith.constant 0 : index
    %c128 = arith.constant 128 : index
    %62 = vector.load %arg11[%c0_52, %c128] : memref<4x658xf32, #tpu.memory_space<vmem>>, vector<1x512xf32>
    %c18_53 = arith.constant 18 : index
    %c0_54 = arith.constant 0 : index
    %63 = vector.load %arg5[%c18_53, %c0_54] : memref<27x512xf32, #tpu.memory_space<vmem>>, vector<1x512xf32>
    %64 = arith.mulf %62, %63 : vector<1x512xf32>
    %c0_55 = arith.constant 0 : index
    %c129 = arith.constant 129 : index
    %65 = vector.load %arg11[%c0_55, %c129] : memref<4x658xf32, #tpu.memory_space<vmem>>, vector<1x512xf32>
    %c19 = arith.constant 19 : index
    %c0_56 = arith.constant 0 : index
    %66 = vector.load %arg5[%c19, %c0_56] : memref<27x512xf32, #tpu.memory_space<vmem>>, vector<1x512xf32>
    %67 = arith.mulf %65, %66 : vector<1x512xf32>
    %c0_57 = arith.constant 0 : index
    %c130 = arith.constant 130 : index
    %68 = vector.load %arg11[%c0_57, %c130] : memref<4x658xf32, #tpu.memory_space<vmem>>, vector<1x512xf32>
    %c20 = arith.constant 20 : index
    %c0_58 = arith.constant 0 : index
    %69 = vector.load %arg5[%c20, %c0_58] : memref<27x512xf32, #tpu.memory_space<vmem>>, vector<1x512xf32>
    %70 = arith.mulf %68, %69 : vector<1x512xf32>
    %c0_59 = arith.constant 0 : index
    %c136 = arith.constant 136 : index
    %71 = vector.load %arg11[%c0_59, %c136] : memref<4x658xf32, #tpu.memory_space<vmem>>, vector<1x512xf32>
    %c21 = arith.constant 21 : index
    %c0_60 = arith.constant 0 : index
    %72 = vector.load %arg5[%c21, %c0_60] : memref<27x512xf32, #tpu.memory_space<vmem>>, vector<1x512xf32>
    %73 = arith.mulf %71, %72 : vector<1x512xf32>
    %c0_61 = arith.constant 0 : index
    %c137 = arith.constant 137 : index
    %74 = vector.load %arg11[%c0_61, %c137] : memref<4x658xf32, #tpu.memory_space<vmem>>, vector<1x512xf32>
    %c22 = arith.constant 22 : index
    %c0_62 = arith.constant 0 : index
    %75 = vector.load %arg5[%c22, %c0_62] : memref<27x512xf32, #tpu.memory_space<vmem>>, vector<1x512xf32>
    %76 = arith.mulf %74, %75 : vector<1x512xf32>
    %c0_63 = arith.constant 0 : index
    %c138 = arith.constant 138 : index
    %77 = vector.load %arg11[%c0_63, %c138] : memref<4x658xf32, #tpu.memory_space<vmem>>, vector<1x512xf32>
    %c23 = arith.constant 23 : index
    %c0_64 = arith.constant 0 : index
    %78 = vector.load %arg5[%c23, %c0_64] : memref<27x512xf32, #tpu.memory_space<vmem>>, vector<1x512xf32>
    %79 = arith.mulf %77, %78 : vector<1x512xf32>
    %c0_65 = arith.constant 0 : index
    %c144 = arith.constant 144 : index
    %80 = vector.load %arg11[%c0_65, %c144] : memref<4x658xf32, #tpu.memory_space<vmem>>, vector<1x512xf32>
    %c24 = arith.constant 24 : index
    %c0_66 = arith.constant 0 : index
    %81 = vector.load %arg5[%c24, %c0_66] : memref<27x512xf32, #tpu.memory_space<vmem>>, vector<1x512xf32>
    %82 = arith.mulf %80, %81 : vector<1x512xf32>
    %c0_67 = arith.constant 0 : index
    %c145 = arith.constant 145 : index
    %83 = vector.load %arg11[%c0_67, %c145] : memref<4x658xf32, #tpu.memory_space<vmem>>, vector<1x512xf32>
    %c25 = arith.constant 25 : index
    %c0_68 = arith.constant 0 : index
    %84 = vector.load %arg5[%c25, %c0_68] : memref<27x512xf32, #tpu.memory_space<vmem>>, vector<1x512xf32>
    %85 = arith.mulf %83, %84 : vector<1x512xf32>
    %c0_69 = arith.constant 0 : index
    %c146 = arith.constant 146 : index
    %86 = vector.load %arg11[%c0_69, %c146] : memref<4x658xf32, #tpu.memory_space<vmem>>, vector<1x512xf32>
    %c26 = arith.constant 26 : index
    %c0_70 = arith.constant 0 : index
    %87 = vector.load %arg5[%c26, %c0_70] : memref<27x512xf32, #tpu.memory_space<vmem>>, vector<1x512xf32>
    %88 = arith.mulf %86, %87 : vector<1x512xf32>
    %89 = tpu.concatenate %10, %13, %16, %19, %22, %25, %28, %31, %34, %37, %40, %43, %46, %49, %52, %55 in 0 : vector<1x512xf32>, vector<1x512xf32>, vector<1x512xf32>, vector<1x512xf32>, vector<1x512xf32>, vector<1x512xf32>, vector<1x512xf32>, vector<1x512xf32>, vector<1x512xf32>, vector<1x512xf32>, vector<1x512xf32>, vector<1x512xf32>, vector<1x512xf32>, vector<1x512xf32>, vector<1x512xf32>, vector<1x512xf32> -> vector<16x512xf32>
    %90 = tpu.concatenate %58, %61, %64, %67, %70, %73, %76, %79, %82, %85, %88 in 0 : vector<1x512xf32>, vector<1x512xf32>, vector<1x512xf32>, vector<1x512xf32>, vector<1x512xf32>, vector<1x512xf32>, vector<1x512xf32>, vector<1x512xf32>, vector<1x512xf32>, vector<1x512xf32>, vector<1x512xf32> -> vector<11x512xf32>
    %91 = tpu.concatenate %89, %90 in 0 : vector<16x512xf32>, vector<11x512xf32> -> vector<27x512xf32>
    %c0_71 = arith.constant 0 : index
    %c0_72 = arith.constant 0 : index
    %92 = vector.load %arg2[%c0_71, %c0_72] : memref<1x27xf32, #tpu.memory_space<vmem>>, vector<1x27xf32>
    %cst_73 = arith.constant dense<0.000000e+00> : vector<1x512xf32>
    %93 = tpu.matmul %92, %91, %cst_73 {dimension_numbers = #tpu.dot_dimension_numbers<[1], [0], [0], [1], [0, 0, 1, 1], [], []>} : vector<1x27xf32>, vector<27x512xf32>, vector<1x512xf32> -> vector<1x512xf32>
    %94 = vector.extract_strided_slice %5 {offsets = [1, 0], sizes = [3, 512], strides = [1, 1]} : vector<4x512xf32> to vector<3x512xf32>
    %95 = tpu.concatenate %93, %94 in 0 : vector<1x512xf32>, vector<3x512xf32> -> vector<4x512xf32>
    %c0_74 = arith.constant 0 : index
    %c73_75 = arith.constant 73 : index
    %96 = vector.load %arg11[%c0_74, %c73_75] : memref<4x658xf32, #tpu.memory_space<vmem>>, vector<4x512xf32>
    tpu.vector_store %arg11[%c0_74, %c73_75], %95 {strides = array<i32>} : memref<4x658xf32, #tpu.memory_space<vmem>>, vector<4x512xf32>,
    %c0_76 = arith.constant 0 : index
    %c1_77 = arith.constant 1 : index
    %97 = vector.load %arg11[%c0_76, %c1_77] : memref<4x658xf32, #tpu.memory_space<vmem>>, vector<4x512xf32>
    %c0_78 = arith.constant 0 : index
    %c0_79 = arith.constant 0 : index
    %98 = vector.load %arg6[%c0_78, %c0_79] : memref<9x512xf32, #tpu.memory_space<vmem>>, vector<1x512xf32>
    %99 = vector.broadcast %98 : vector<1x512xf32> to vector<4x512xf32>
    %100 = arith.mulf %97, %99 : vector<4x512xf32>
    %c0_80 = arith.constant 0 : index
    %c9_81 = arith.constant 9 : index
    %101 = vector.load %arg11[%c0_80, %c9_81] : memref<4x658xf32, #tpu.memory_space<vmem>>, vector<4x512xf32>
    %c1_82 = arith.constant 1 : index
    %c0_83 = arith.constant 0 : index
    %102 = vector.load %arg6[%c1_82, %c0_83] : memref<9x512xf32, #tpu.memory_space<vmem>>, vector<1x512xf32>
    %103 = vector.broadcast %102 : vector<1x512xf32> to vector<4x512xf32>
    %104 = arith.mulf %101, %103 : vector<4x512xf32>
    %c0_84 = arith.constant 0 : index
    %c17_85 = arith.constant 17 : index
    %105 = vector.load %arg11[%c0_84, %c17_85] : memref<4x658xf32, #tpu.memory_space<vmem>>, vector<4x512xf32>
    %c2_86 = arith.constant 2 : index
    %c0_87 = arith.constant 0 : index
    %106 = vector.load %arg6[%c2_86, %c0_87] : memref<9x512xf32, #tpu.memory_space<vmem>>, vector<1x512xf32>
    %107 = vector.broadcast %106 : vector<1x512xf32> to vector<4x512xf32>
    %108 = arith.mulf %105, %107 : vector<4x512xf32>
    %c0_88 = arith.constant 0 : index
    %c65_89 = arith.constant 65 : index
    %109 = vector.load %arg11[%c0_88, %c65_89] : memref<4x658xf32, #tpu.memory_space<vmem>>, vector<4x512xf32>
    %c3_90 = arith.constant 3 : index
    %c0_91 = arith.constant 0 : index
    %110 = vector.load %arg6[%c3_90, %c0_91] : memref<9x512xf32, #tpu.memory_space<vmem>>, vector<1x512xf32>
    %111 = vector.broadcast %110 : vector<1x512xf32> to vector<4x512xf32>
    %112 = arith.mulf %109, %111 : vector<4x512xf32>
    %c0_92 = arith.constant 0 : index
    %c73_93 = arith.constant 73 : index
    %113 = vector.load %arg11[%c0_92, %c73_93] : memref<4x658xf32, #tpu.memory_space<vmem>>, vector<4x512xf32>
    %c4_94 = arith.constant 4 : index
    %c0_95 = arith.constant 0 : index
    %114 = vector.load %arg6[%c4_94, %c0_95] : memref<9x512xf32, #tpu.memory_space<vmem>>, vector<1x512xf32>
    %115 = vector.broadcast %114 : vector<1x512xf32> to vector<4x512xf32>
    %116 = arith.mulf %113, %115 : vector<4x512xf32>
    %c0_96 = arith.constant 0 : index
    %c81_97 = arith.constant 81 : index
    %117 = vector.load %arg11[%c0_96, %c81_97] : memref<4x658xf32, #tpu.memory_space<vmem>>, vector<4x512xf32>
    %c5_98 = arith.constant 5 : index
    %c0_99 = arith.constant 0 : index
    %118 = vector.load %arg6[%c5_98, %c0_99] : memref<9x512xf32, #tpu.memory_space<vmem>>, vector<1x512xf32>
    %119 = vector.broadcast %118 : vector<1x512xf32> to vector<4x512xf32>
    %120 = arith.mulf %117, %119 : vector<4x512xf32>
    %c0_100 = arith.constant 0 : index
    %c129_101 = arith.constant 129 : index
    %121 = vector.load %arg11[%c0_100, %c129_101] : memref<4x658xf32, #tpu.memory_space<vmem>>, vector<4x512xf32>
    %c6_102 = arith.constant 6 : index
    %c0_103 = arith.constant 0 : index
    %122 = vector.load %arg6[%c6_102, %c0_103] : memref<9x512xf32, #tpu.memory_space<vmem>>, vector<1x512xf32>
    %123 = vector.broadcast %122 : vector<1x512xf32> to vector<4x512xf32>
    %124 = arith.mulf %121, %123 : vector<4x512xf32>
    %c0_104 = arith.constant 0 : index
    %c137_105 = arith.constant 137 : index
    %125 = vector.load %arg11[%c0_104, %c137_105] : memref<4x658xf32, #tpu.memory_space<vmem>>, vector<4x512xf32>
    %c7_106 = arith.constant 7 : index
    %c0_107 = arith.constant 0 : index
    %126 = vector.load %arg6[%c7_106, %c0_107] : memref<9x512xf32, #tpu.memory_space<vmem>>, vector<1x512xf32>
    %127 = vector.broadcast %126 : vector<1x512xf32> to vector<4x512xf32>
    %128 = arith.mulf %125, %127 : vector<4x512xf32>
    %c0_108 = arith.constant 0 : index
    %c145_109 = arith.constant 145 : index
    %129 = vector.load %arg11[%c0_108, %c145_109] : memref<4x658xf32, #tpu.memory_space<vmem>>, vector<4x512xf32>
    %c8_110 = arith.constant 8 : index
    %c0_111 = arith.constant 0 : index
    %130 = vector.load %arg6[%c8_110, %c0_111] : memref<9x512xf32, #tpu.memory_space<vmem>>, vector<1x512xf32>
    %131 = vector.broadcast %130 : vector<1x512xf32> to vector<4x512xf32>
    %132 = arith.mulf %129, %131 : vector<4x512xf32>
    %133 = tpu.concatenate %100, %104, %108, %112, %116, %120, %124, %128, %132 in 0 : vector<4x512xf32>, vector<4x512xf32>, vector<4x512xf32>, vector<4x512xf32>, vector<4x512xf32>, vector<4x512xf32>, vector<4x512xf32>, vector<4x512xf32>, vector<4x512xf32> -> vector<36x512xf32>
    %c0_112 = arith.constant 0 : index
    %c0_113 = arith.constant 0 : index
    %134 = vector.load %arg3[%c0_112, %c0_113] : memref<4x36xf32, #tpu.memory_space<vmem>>, vector<4x36xf32>
    %cst_114 = arith.constant dense<0.000000e+00> : vector<4x512xf32>
    %135 = tpu.matmul %134, %133, %cst_114 {dimension_numbers = #tpu.dot_dimension_numbers<[1], [0], [0], [1], [0, 0, 1, 1], [], []>} : vector<4x36xf32>, vector<36x512xf32>, vector<4x512xf32> -> vector<4x512xf32>
    %c0_115 = arith.constant 0 : index
    %c0_116 = arith.constant 0 : index
    %136 = vector.load %arg8[%c0_115, %c0_116] : memref<4x1xf32, #tpu.memory_space<vmem>>, vector<4x1xf32>
    %137 = vector.broadcast %136 : vector<4x1xf32> to vector<4x512xf32>
    %138 = arith.mulf %135, %137 : vector<4x512xf32>
    %c0_117 = arith.constant 0 : index
    %c0_118 = arith.constant 0 : index
    %139 = vector.load %arg9[%c0_117, %c0_118] : memref<4x1xf32, #tpu.memory_space<vmem>>, vector<4x1xf32>
    %140 = vector.broadcast %139 : vector<4x1xf32> to vector<4x512xf32>
    %141 = arith.addf %138, %140 : vector<4x512xf32>
    %cst_119 = arith.constant 0.000000e+00 : f32
    %142 = vector.broadcast %cst_119 : f32 to vector<4x512xf32>
    %143 = arith.maximumf %141, %142 : vector<4x512xf32>
    %c0_120 = arith.constant 0 : index
    %c73_121 = arith.constant 73 : index
    %144 = vector.load %arg11[%c0_120, %c73_121] : memref<4x658xf32, #tpu.memory_space<vmem>>, vector<4x512xf32>
    tpu.vector_store %arg11[%c0_120, %c73_121], %143 {strides = array<i32>} : memref<4x658xf32, #tpu.memory_space<vmem>>, vector<4x512xf32>,
    %c0_122 = arith.constant 0 : index
    %c64_123 = arith.constant 64 : index
    %145 = vector.load %arg11[%c0_122, %c64_123] : memref<4x658xf32, #tpu.memory_space<vmem>>, vector<4x512xf32>
    %c0_124 = arith.constant 0 : index
    %c0_125 = arith.constant 0 : index
    %146 = vector.load %arg7[%c0_124, %c0_125] : memref<9x512xf32, #tpu.memory_space<vmem>>, vector<1x512xf32>
    %147 = vector.broadcast %146 : vector<1x512xf32> to vector<4x512xf32>
    %148 = arith.mulf %145, %147 : vector<4x512xf32>
    %c0_126 = arith.constant 0 : index
    %c65_127 = arith.constant 65 : index
    %149 = vector.load %arg11[%c0_126, %c65_127] : memref<4x658xf32, #tpu.memory_space<vmem>>, vector<4x512xf32>
    %c1_128 = arith.constant 1 : index
    %c0_129 = arith.constant 0 : index
    %150 = vector.load %arg7[%c1_128, %c0_129] : memref<9x512xf32, #tpu.memory_space<vmem>>, vector<1x512xf32>
    %151 = vector.broadcast %150 : vector<1x512xf32> to vector<4x512xf32>
    %152 = arith.mulf %149, %151 : vector<4x512xf32>
    %c0_130 = arith.constant 0 : index
    %c66_131 = arith.constant 66 : index
    %153 = vector.load %arg11[%c0_130, %c66_131] : memref<4x658xf32, #tpu.memory_space<vmem>>, vector<4x512xf32>
    %c2_132 = arith.constant 2 : index
    %c0_133 = arith.constant 0 : index
    %154 = vector.load %arg7[%c2_132, %c0_133] : memref<9x512xf32, #tpu.memory_space<vmem>>, vector<1x512xf32>
    %155 = vector.broadcast %154 : vector<1x512xf32> to vector<4x512xf32>
    %156 = arith.mulf %153, %155 : vector<4x512xf32>
    %c0_134 = arith.constant 0 : index
    %c72_135 = arith.constant 72 : index
    %157 = vector.load %arg11[%c0_134, %c72_135] : memref<4x658xf32, #tpu.memory_space<vmem>>, vector<4x512xf32>
    %c3_136 = arith.constant 3 : index
    %c0_137 = arith.constant 0 : index
    %158 = vector.load %arg7[%c3_136, %c0_137] : memref<9x512xf32, #tpu.memory_space<vmem>>, vector<1x512xf32>
    %159 = vector.broadcast %158 : vector<1x512xf32> to vector<4x512xf32>
    %160 = arith.mulf %157, %159 : vector<4x512xf32>
    %c0_138 = arith.constant 0 : index
    %c73_139 = arith.constant 73 : index
    %161 = vector.load %arg11[%c0_138, %c73_139] : memref<4x658xf32, #tpu.memory_space<vmem>>, vector<4x512xf32>
    %c4_140 = arith.constant 4 : index
    %c0_141 = arith.constant 0 : index
    %162 = vector.load %arg7[%c4_140, %c0_141] : memref<9x512xf32, #tpu.memory_space<vmem>>, vector<1x512xf32>
    %163 = vector.broadcast %162 : vector<1x512xf32> to vector<4x512xf32>
    %164 = arith.mulf %161, %163 : vector<4x512xf32>
    %c0_142 = arith.constant 0 : index
    %c74_143 = arith.constant 74 : index
    %165 = vector.load %arg11[%c0_142, %c74_143] : memref<4x658xf32, #tpu.memory_space<vmem>>, vector<4x512xf32>
    %c5_144 = arith.constant 5 : index
    %c0_145 = arith.constant 0 : index
    %166 = vector.load %arg7[%c5_144, %c0_145] : memref<9x512xf32, #tpu.memory_space<vmem>>, vector<1x512xf32>
    %167 = vector.broadcast %166 : vector<1x512xf32> to vector<4x512xf32>
    %168 = arith.mulf %165, %167 : vector<4x512xf32>
    %c0_146 = arith.constant 0 : index
    %c80_147 = arith.constant 80 : index
    %169 = vector.load %arg11[%c0_146, %c80_147] : memref<4x658xf32, #tpu.memory_space<vmem>>, vector<4x512xf32>
    %c6_148 = arith.constant 6 : index
    %c0_149 = arith.constant 0 : index
    %170 = vector.load %arg7[%c6_148, %c0_149] : memref<9x512xf32, #tpu.memory_space<vmem>>, vector<1x512xf32>
    %171 = vector.broadcast %170 : vector<1x512xf32> to vector<4x512xf32>
    %172 = arith.mulf %169, %171 : vector<4x512xf32>
    %c0_150 = arith.constant 0 : index
    %c81_151 = arith.constant 81 : index
    %173 = vector.load %arg11[%c0_150, %c81_151] : memref<4x658xf32, #tpu.memory_space<vmem>>, vector<4x512xf32>
    %c7_152 = arith.constant 7 : index
    %c0_153 = arith.constant 0 : index
    %174 = vector.load %arg7[%c7_152, %c0_153] : memref<9x512xf32, #tpu.memory_space<vmem>>, vector<1x512xf32>
    %175 = vector.broadcast %174 : vector<1x512xf32> to vector<4x512xf32>
    %176 = arith.mulf %173, %175 : vector<4x512xf32>
    %c0_154 = arith.constant 0 : index
    %c82_155 = arith.constant 82 : index
    %177 = vector.load %arg11[%c0_154, %c82_155] : memref<4x658xf32, #tpu.memory_space<vmem>>, vector<4x512xf32>
    %c8_156 = arith.constant 8 : index
    %c0_157 = arith.constant 0 : index
    %178 = vector.load %arg7[%c8_156, %c0_157] : memref<9x512xf32, #tpu.memory_space<vmem>>, vector<1x512xf32>
    %179 = vector.broadcast %178 : vector<1x512xf32> to vector<4x512xf32>
    %180 = arith.mulf %177, %179 : vector<4x512xf32>
    %181 = tpu.concatenate %148, %152, %156, %160, %164, %168, %172, %176, %180 in 0 : vector<4x512xf32>, vector<4x512xf32>, vector<4x512xf32>, vector<4x512xf32>, vector<4x512xf32>, vector<4x512xf32>, vector<4x512xf32>, vector<4x512xf32>, vector<4x512xf32> -> vector<36x512xf32>
    %c0_158 = arith.constant 0 : index
    %c0_159 = arith.constant 0 : index
    %182 = vector.load %arg4[%c0_158, %c0_159] : memref<4x36xf32, #tpu.memory_space<vmem>>, vector<4x36xf32>
    %cst_160 = arith.constant dense<0.000000e+00> : vector<4x512xf32>
    %183 = tpu.matmul %182, %181, %cst_160 {dimension_numbers = #tpu.dot_dimension_numbers<[1], [0], [0], [1], [0, 0, 1, 1], [], []>} : vector<4x36xf32>, vector<36x512xf32>, vector<4x512xf32> -> vector<4x512xf32>
    %184 = arith.addf %183, %5 : vector<4x512xf32>
    %185 = arith.truncf %184 : vector<4x512xf32> to vector<4x512xbf16>
    %c0_161 = arith.constant 0 : index
    %c0_162 = arith.constant 0 : index
    %c0_163 = arith.constant 0 : index
    %186 = vector.load %arg10[%c0_161, %c0_162, %c0_163] : memref<1x4x512xbf16, #tpu.memory_space<vmem>>, vector<1x4x512xbf16>
    %187 = vector.shape_cast %186 : vector<1x4x512xbf16> to vector<4x512xbf16>
    %188 = vector.shape_cast %185 : vector<4x512xbf16> to vector<1x4x512xbf16>
    tpu.vector_store %arg10[%c0_161, %c0_162, %c0_163], %188 {strides = array<i32>} : memref<1x4x512xbf16, #tpu.memory_space<vmem>>, vector<1x4x512xbf16>,
    return
  }
  func.func @transform_0(%arg0: i32) -> (i32, i32, i32) {
    %c0_i32 = arith.constant 0 : i32
    %c0_i32_0 = arith.constant 0 : i32
    %c0_i32_1 = arith.constant 0 : i32
    return %arg0, %c0_i32, %c0_i32_0 : i32, i32, i32
  }
  func.func @transform_1(%arg0: i32) -> (i32, i32) {
    %c0_i32 = arith.constant 0 : i32
    %c0_i32_0 = arith.constant 0 : i32
    %c0_i32_1 = arith.constant 0 : i32
    return %c0_i32, %c0_i32_0 : i32, i32
  }
  func.func @transform_2(%arg0: i32) -> (i32, i32) {
    %c0_i32 = arith.constant 0 : i32
    %c0_i32_0 = arith.constant 0 : i32
    %c0_i32_1 = arith.constant 0 : i32
    return %c0_i32, %c0_i32_0 : i32, i32
  }
  func.func @transform_3(%arg0: i32) -> (i32, i32) {
    %c0_i32 = arith.constant 0 : i32
    %c0_i32_0 = arith.constant 0 : i32
    %c0_i32_1 = arith.constant 0 : i32
    return %c0_i32, %c0_i32_0 : i32, i32
  }
  func.func @transform_4(%arg0: i32) -> (i32, i32) {
    %c0_i32 = arith.constant 0 : i32
    %c0_i32_0 = arith.constant 0 : i32
    %c0_i32_1 = arith.constant 0 : i32
    return %c0_i32, %c0_i32_0 : i32, i32
  }
  func.func @transform_5(%arg0: i32) -> (i32, i32) {
    %c0_i32 = arith.constant 0 : i32
    %c0_i32_0 = arith.constant 0 : i32
    %c0_i32_1 = arith.constant 0 : i32
    return %c0_i32, %c0_i32_0 : i32, i32
  }
  func.func @transform_6(%arg0: i32) -> (i32, i32) {
    %c0_i32 = arith.constant 0 : i32
    %c0_i32_0 = arith.constant 0 : i32
    %c0_i32_1 = arith.constant 0 : i32
    return %c0_i32, %c0_i32_0 : i32, i32
  }
  func.func @transform_7(%arg0: i32) -> (i32, i32) {
    %c0_i32 = arith.constant 0 : i32
    %c0_i32_0 = arith.constant 0 : i32
    %c0_i32_1 = arith.constant 0 : i32
    return %c0_i32, %c0_i32_0 : i32, i32
  }
  func.func @transform_8(%arg0: i32) -> (i32, i32) {
    %c0_i32 = arith.constant 0 : i32
    %c0_i32_0 = arith.constant 0 : i32
    %c0_i32_1 = arith.constant 0 : i32
    return %c0_i32, %c0_i32_0 : i32, i32
  }
  func.func @transform_9(%arg0: i32) -> (i32, i32, i32) {
    %c0_i32 = arith.constant 0 : i32
    %c0_i32_0 = arith.constant 0 : i32
    %c0_i32_1 = arith.constant 0 : i32
    return %arg0, %c0_i32, %c0_i32_0 : i32, i32, i32
  }
}

</mosaic_0001>

<bundles_post_ra>
// kernel: a_call__.9
= control target key start
LH: loop header
LB: loop body
LE: loop exit
PB: predicated region body
PF: predicated region fallthrough
CT: control target
= control target key end

     0   :  { %s1056_s27 = smov 0   ;;  %s1058_s28 = smov 0   ;;  %s1159_s0 = inlined_call_operand.vmem [shape: f32[2,16,512], index: 0, kind: input, shape index: {}]   ;;  %s1160_s1 = inlined_call_operand.vmem [shape: bf16[2,4,512], index: 1, kind: input, shape index: {}]   ;;  %s1161_s2 = inlined_call_operand.vmem [shape: bf16[2,4,512], index: 2, kind: input, shape index: {}]   ;;  %s1162_s3 = inlined_call_operand.vmem [shape: bf16[2,4,512], index: 3, kind: input, shape index: {}]   ;;  %s1163_s4 = inlined_call_operand.vmem [shape: bf16[2,4,512], index: 4, kind: input, shape index: {}]   ;;  %s1164_s5 = inlined_call_operand.vmem [shape: f32[16,16], index: 5, kind: input, shape index: {}]   ;;  %s1165_s6 = inlined_call_operand.vmem [shape: f32[16,1], index: 6, kind: input, shape index: {}]   ;;  %s1166_s7 = inlined_call_operand.vmem [shape: f32[16,1], index: 7, kind: input, shape index: {}]   ;;  %s1167_s8 = inlined_call_operand.vmem [shape: f32[2,16,512], index: 8, kind: output, shape index: {}]  }
   0x1   :  { %s1060_s29 = smov 0  }
   0x2 LB: > { %s30_s30 = sadd.s32 1, %s1003_s28  ;;  %p932_p0 = scmp.ge.s32.totalorder %s1007_s29, 1  ;;  %s1007_s29 = sphi %s1060_s29, %s18_s29   ;;  %s1003_s28 = sphi %s1058_s28, %s1169_s28   ;;  %s999_s27 = sphi %s1056_s27, %s1168_s27  }
   0x3   : > { %p32_p1 = scmp.ge.s32.totalorder %s30_s30, 2  ;;  %p351_p2 = scmp.lt.s32.totalorder %s1007_s29, 3 }
   0x5   : > { %s1171_s30 = smov (%p32_p1, %s30_s30), 0  ;;  %p352_p3 = pnand %p932_p0, %p351_p2 }
   0x6   : > { %p430_p4 = scmp.lt.s32.totalorder (!%p352_p3), %s999_s27, 1 }
   0x7   : > { %355 = sbr.rel (%p352_p3) target bundleno = 235 (0xeb), region = 52 }
   0xc   : > { %v1009_v0 = vmov 0.0   ;;  %v713_v1 = vld [vmem:[%s1165_s6] sm:$0xff]  ;;  %s1173_s27 = smov (!%p430_p4, %s999_s27), 1  ;;  %v1010_v3 = vmov 0   ;;  %v714_v4 = vld [vmem:[%s1165_s6 + $0x8] sm:$0xff]  ;;  %vm525_vm0 = vcmask 1043456  }
   0xd   : > { %623 = vmatprep.mubr.f32.mxu0 %v1009_v0  ;;  %700 = vmatprep.mubr.f32.mxu1 %v1009_v0  ;;  %v733_v2 = vld [vmem:[%s1166_s7] sm:$0xff]  ;;  %s951_s13 = sshll.u32 %s1173_s27, 6  ;;  %s952_s14 = sshll.u32 %s1173_s27, 3  ;;  %v734_v5 = vld [vmem:[%s1166_s7 + $0x8] sm:$0xff]  ;;  %vm552_vm1 = vcmask 130048  }
   0xe   : > { %983 = vset.pattern.permute.xlu0 %v1010_v3  ;;  %984 = vset.pattern.permute.xlu1 %v1010_v3  ;;  %s467_s21 = scalar_lea.vmem %s1162_s3, %s952_s14  ;;  %s1100_s24 = scalar_lea.vmem %s1159_s0, %s951_s13  ;;  %v550_v47 = vld [vmem:[%s1164_s5] sm:$0xff]  ;;  %v551_v51 = vld [vmem:[%s1164_s5 + $0x8] sm:$0xff] }
   0xf   : > { %717 = vperm.xlu0 %983, %v713_v1   ;;  %737 = vperm.xlu1 %984, %v733_v2   ;;  %s477_s9 = scalar_lea.vmem %s1163_s4, %s952_s14  ;;  %v495_v6 = vld [vmem:[%s467_s21] sm:$0xff]  ;;  %s447_s12 = scalar_lea.vmem %s1160_s1, %s952_s14  ;;  %v539_v15 = vld [vmem:[%s1100_s24 + $0x28] sm:$0xff]  ;;  %v541_v17 = vld [vmem:[%s1100_s24 + $0x38] sm:$0xff] }
  0x10   : > { %v496_v7 = vunpack.c.l.bf16 %v495_v6  ;;  %v498_v8 = vld [vmem:[%s477_s9] sm:$0xff]  ;;  %v497_v9 = vunpack.c.h.bf16 %v495_v6  ;;  %s457_s17 = scalar_lea.vmem %s1161_s2, %s952_s14  ;;  %v540_v23 = vld [vmem:[%s1100_s24 + $0x30] sm:$0xff]  ;;  %v535_v29 = vld [vmem:[%s1100_s24 + $0x8] sm:$0xff]  ;;  %s1140_s23 = scalar_lea.vmem %s1167_s8, %s951_s13 }
  0x11   : > { %v499_v10 = vunpack.c.l.bf16 %v498_v8  ;;  %v500_v11 = vunpack.c.h.bf16 %v498_v8  ;;  %v489_v12 = vld [vmem:[%s447_s12] sm:$0xff]  ;;  %v537_v40 = vld [vmem:[%s1100_s24 + $0x18] sm:$0xff]  ;;  %v536_v44 = vld [vmem:[%s1100_s24 + $0x10] sm:$0xff] }
  0x12   : > { %v492_v13 = vld [vmem:[%s457_s17] sm:$0xff]  ;;  %v515_v14 = vcombine.high %v496_v7, %v496_v7  ;;  %v516_v16 = vcombine.high %v497_v9, %v497_v9  ;;  %v490_v18 = vunpack.c.l.bf16 %v489_v12  ;;  %v491_v24 = vunpack.c.h.bf16 %v489_v12 }
  0x13   : > { %722 = vperm.xlu0 %983, %v714_v4   ;;  %742 = vperm.xlu1 %984, %v734_v5   ;;  %v493_v19 = vunpack.c.l.bf16 %v492_v13  ;;  %v521_v20 = vcombine.low %v499_v10, %v499_v10  ;;  %v538_v21 = vld [vmem:[%s1100_s24 + $0x20] sm:$0xff]  ;;  %v522_v22 = vcombine.low %v500_v11, %v500_v11  ;;  %v494_v25 = vunpack.c.h.bf16 %v492_v13 }
  0x14   : > { %v531_v26 = vsel %vm525_vm0, %v515_v14, %v499_v10  ;;  %v533_v27 = vsel %vm525_vm0, %v516_v16, %v500_v11  ;;  %v503_v28 = vcombine.high %v490_v18, %v490_v18  ;;  %v534_v35 = vld [vmem:[%s1100_s24] sm:$0xff]  ;;  %v504_v39 = vcombine.high %v491_v24, %v491_v24 }
  0x15   : > { %v509_v30 = vcombine.low %v493_v19, %v493_v19  ;;  %v547_v31 = vadd.f32 %v539_v15, %v531_v26  ;;  %v549_v32 = vadd.f32 %v541_v17, %v533_v27  ;;  %v530_v33 = vsel %vm525_vm0, %v496_v7, %v521_v20 }
  0x16   : > { %v532_v34 = vsel %vm525_vm0, %v497_v9, %v522_v22  ;;  %v546_v36 = vadd.f32 %v538_v21, %v530_v33  ;;  %v527_v38 = vsel %vm525_vm0, %v503_v28, %v493_v19  ;;  %v510_v43 = vcombine.low %v494_v25, %v494_v25 }
  0x17   : > { %v548_v37 = vadd.f32 %v540_v23, %v532_v34  ;;  %587 = vmatprep.subr.mxu0 %v547_v31  ;;  %664 = vmatprep.subr.mxu1 %v549_v32  ;;  %v543_v41 = vadd.f32 %v535_v29, %v527_v38  ;;  %v526_v42 = vsel %vm525_vm0, %v490_v18, %v509_v30 }
  0x18   : > { %588 = vmatpush1.msra.mxu0 %v546_v36  ;;  %v529_v45 = vsel %vm525_vm0, %v504_v39, %v494_v25  ;;  %v542_v46 = vadd.f32 %v534_v35, %v526_v42  ;;  %v528_v49 = vsel %vm525_vm0, %v491_v24, %v510_v43 }
  0x19   : > { %665 = vmatpush1.msra.mxu1 %v548_v37  ;;  %589 = vmatprep.subr.mxu0 %v543_v41  ;;  %v545_v48 = vadd.f32 %v537_v40, %v529_v45  ;;  %v544_v50 = vadd.f32 %v536_v44, %v528_v49 }
  0x1a   : > { %590 = vmatpush1.msra.mxu0 %v542_v46 }
  0x1b   : > { %666 = vmatprep.subr.mxu1 %v545_v48  ;;  %945 = vmatmul.mubr.msk.f32.vlgmr.msra.gmra.mxu0 %vm552_vm1, %v550_v47 }
  0x1c   : > { %667 = vmatpush1.msra.mxu1 %v544_v50  ;;  %629 = vmatprep.mubr.f32.mxu0 %v1009_v0 }
  0x1d   : > { %947 = vmatmul.mubr.msk.f32.vlgmr.msra.gmra.mxu1 %vm552_vm1, %v550_v47 }
  0x1e   : > { %706 = vmatprep.mubr.f32.mxu1 %v1009_v0 }
  0x1f   : > { %946 = vmatmul.mubr.msk.f32.gmra.mxu0 %vm552_vm1, %v551_v51 }
  0x21   : > { %948 = vmatmul.mubr.msk.f32.gmra.mxu1 %vm552_vm1, %v551_v51 }
  0x8a   : > { %v718_v52 = vpop.permute.xlu0 %717  ;;  %v738_v54 = vpop.permute.xlu1 %737 }
  0x8e   : > { %v723_v1 = vpop.permute.xlu0 %722  ;;  %v743_v10 = vpop.permute.xlu1 %742 }
  0xdb   : > { %v625_v53 = vpop.f32.mrf.mxu0 }
  0xdc   : > { %v725_v55 = vmul.f32 %v718_v52, %v625_v53 }
  0xdd   : > { %v702_v56 = vpop.f32.mrf.mxu1  ;;  %v627_v57 = vpop.f32.mrf.mxu0 }
  0xde   : > { %v745_v58 = vadd.f32 %v738_v54, %v725_v55  ;;  %v727_v59 = vmul.f32 %v718_v52, %v702_v56  ;;  %v726_v60 = vmul.f32 %v718_v52, %v627_v57 }
  0xdf   : > { %v704_v61 = vpop.f32.mrf.mxu1  ;;  %v631_v62 = vpop.f32.mrf.mxu0 }
  0xe0   : > { %v753_v63 = vmax.f32 %v745_v58, 0.0  ;;  %v747_v0 = vadd.f32 %v738_v54, %v727_v59  ;;  %v746_v2 = vadd.f32 %v738_v54, %v726_v60  ;;  %v728_v3 = vmul.f32 %v718_v52, %v704_v61 }
  0xe1   : > { %v729_v4 = vmul.f32 %v723_v1, %v631_v62  ;;  %v708_v5 = vpop.f32.mrf.mxu1  ;;  %v633_v6 = vpop.f32.mrf.mxu0 }
  0xe2   : > { %761 = vst [vmem:[%s1140_s23] sm:$0xff] %v753_v63  ;;  %v755_v7 = vmax.f32 %v747_v0, 0.0  ;;  %v754_v8 = vmax.f32 %v746_v2, 0.0  ;;  %v748_v9 = vadd.f32 %v738_v54, %v728_v3  ;;  %v731_v11 = vmul.f32 %v723_v1, %v708_v5 }
  0xe3   : > { %v749_v12 = vadd.f32 %v743_v10, %v729_v4  ;;  %v730_v13 = vmul.f32 %v723_v1, %v633_v6  ;;  %v710_v14 = vpop.f32.mrf.mxu1 }
  0xe4   : > { %763 = vst [vmem:[%s1140_s23 + $0x10] sm:$0xff] %v755_v7  ;;  %762 = vst [vmem:[%s1140_s23 + $0x8] sm:$0xff] %v754_v8  ;;  %v756_v15 = vmax.f32 %v748_v9, 0.0  ;;  %v751_v16 = vadd.f32 %v743_v10, %v731_v11  ;;  %v732_v17 = vmul.f32 %v723_v1, %v710_v14 }
  0xe5   : > { %v757_v18 = vmax.f32 %v749_v12, 0.0  ;;  %v750_v19 = vadd.f32 %v743_v10, %v730_v13 }
  0xe6   : > { %764 = vst [vmem:[%s1140_s23 + $0x18] sm:$0xff] %v756_v15  ;;  %v759_v20 = vmax.f32 %v751_v16, 0.0  ;;  %v752_v21 = vadd.f32 %v743_v10, %v732_v17 }
  0xe7   : > { %765 = vst [vmem:[%s1140_s23 + $0x20] sm:$0xff] %v757_v18  ;;  %v758_v22 = vmax.f32 %v750_v19, 0.0 }
  0xe8   : > { %767 = vst [vmem:[%s1140_s23 + $0x30] sm:$0xff] %v759_v20  ;;  %v760_v23 = vmax.f32 %v752_v21, 0.0 }
  0xe9   : > { %766 = vst [vmem:[%s1140_s23 + $0x28] sm:$0xff] %v758_v22 }
  0xea   : > { %768 = vst [vmem:[%s1140_s23 + $0x38] sm:$0xff] %v760_v23 }
  0xeb PF: > { %s18_s29 = sadd.s32 1, %s1007_s29   ;;  %s1168_s27 = smov %s1003_s28 }
  0xec   : > { %p15_p5 = scmp.ge.s32.totalorder %s18_s29, 4   ;;  %s1169_s28 = smov %s1171_s30 }
  0xee   :  { %17 = sbr.rel (!%p15_p5) target bundleno = 2 (0x2), region = 94 }

// kernel: a_call__.5
= control target key start
LH: loop header
LB: loop body
LE: loop exit
PB: predicated region body
PF: predicated region fallthrough
CT: control target
= control target key end

     0   :  { %s1030_s24 = smov 0   ;;  %s1032_s25 = smov 0   ;;  %s1094_s0 = inlined_call_operand.vmem [shape: f32[2,16,512], index: 0, kind: input, shape index: {}]   ;;  %s1095_s1 = inlined_call_operand.vmem [shape: f32[16,16], index: 1, kind: input, shape index: {}]   ;;  %s1096_s2 = inlined_call_operand.vmem [shape: f32[16,1], index: 2, kind: input, shape index: {}]   ;;  %s1097_s3 = inlined_call_operand.vmem [shape: f32[16,1], index: 3, kind: input, shape index: {}]   ;;  %s1098_s4 = inlined_call_operand.vmem [shape: bf16[2,4,512], index: 4, kind: output, shape index: {0}]   ;;  %s1099_s5 = inlined_call_operand.vmem [shape: bf16[2,4,512], index: 5, kind: output, shape index: {1}]   ;;  %s1100_s6 = inlined_call_operand.vmem [shape: bf16[2,4,512], index: 6, kind: output, shape index: {2}]   ;;  %s1101_s7 = inlined_call_operand.vmem [shape: bf16[2,4,512], index: 7, kind: output, shape index: {3}]  }
   0x1   :  { %s1034_s26 = smov 0  }
   0x2 LB: > { %s30_s27 = sadd.s32 1, %s981_s25  ;;  %p908_p0 = scmp.ge.s32.totalorder %s985_s26, 1  ;;  %s985_s26 = sphi %s1034_s26, %s18_s26   ;;  %s981_s25 = sphi %s1032_s25, %s1103_s25   ;;  %s977_s24 = sphi %s1030_s24, %s1102_s24  }
   0x3   : > { %p32_p1 = scmp.ge.s32.totalorder %s30_s27, 2  ;;  %p271_p2 = scmp.lt.s32.totalorder %s985_s26, 3 }
   0x5   : > { %s1105_s27 = smov (%p32_p1, %s30_s27), 0  ;;  %p272_p3 = pnand %p908_p0, %p271_p2 }
   0x6   : > { %p339_p4 = scmp.lt.s32.totalorder (!%p272_p3), %s977_s24, 1 }
   0x7   : > { %275 = sbr.rel (%p272_p3) target bundleno = 232 (0xe8), region = 36 }
   0xc   : > { %v987_v0 = vmov 0.0   ;;  %v559_v1 = vld [vmem:[%s1096_s2] sm:$0xff]  ;;  %s1107_s24 = smov (!%p339_p4, %s977_s24), 1  ;;  %v988_v3 = vmov 0   ;;  %vm398_vm0 = vcmask 130048   ;;  %v560_v13 = vld [vmem:[%s1096_s2 + $0x8] sm:$0xff]  ;;  %v620_v18 = vlaneseq }
   0xd   : > { %469 = vmatprep.mubr.f32.mxu0 %v987_v0  ;;  %546 = vmatprep.mubr.f32.mxu1 %v987_v0  ;;  %v579_v2 = vld [vmem:[%s1097_s3] sm:$0xff]  ;;  %s929_s9 = sshll.u32 %s1107_s24, 6  ;;  %v580_v14 = vld [vmem:[%s1097_s3 + $0x8] sm:$0xff]  ;;  %v989_v16 = vmov 1983009808   ;;  %s930_s21 = sshll.u32 %s1107_s24, 3 }
   0xe   : > { %961 = vset.pattern.permute.xlu0 %v988_v3  ;;  %962 = vset.pattern.permute.xlu1 %v988_v3  ;;  %s346_s12 = scalar_lea.vmem %s1094_s0, %s929_s9  ;;  %v396_v12 = vld [vmem:[%s1095_s1] sm:$0xff]  ;;  %v397_v15 = vld [vmem:[%s1095_s1 + $0x8] sm:$0xff]  ;;  %v618_v17 = vunpack.c.l.s4 %v989_v16  ;;  %v621_v26 = vshrl.u32 %v620_v18, 7  ;;  %s356_s28 = scalar_lea.vmem %s1098_s4, %s930_s21 }
   0xf   : > { %563 = vperm.xlu0 %961, %v559_v1   ;;  %583 = vperm.xlu1 %962, %v579_v2   ;;  %v393_v4 = vld [vmem:[%s346_s12 + $0x28] sm:$0xff]  ;;  %v395_v5 = vld [vmem:[%s346_s12 + $0x38] sm:$0xff]  ;;  %v392_v6 = vld [vmem:[%s346_s12 + $0x20] sm:$0xff]  ;;  %s366_s8 = scalar_lea.vmem %s1099_s5, %s930_s21  ;;  %s376_s10 = scalar_lea.vmem %s1100_s6, %s930_s21 }
  0x10   : > { %433 = vmatprep.subr.mxu0 %v393_v4  ;;  %510 = vmatprep.subr.mxu1 %v395_v5  ;;  %v394_v7 = vld [vmem:[%s346_s12 + $0x30] sm:$0xff]  ;;  %v389_v8 = vld [vmem:[%s346_s12 + $0x8] sm:$0xff]  ;;  %v391_v9 = vld [vmem:[%s346_s12 + $0x18] sm:$0xff]  ;;  %v619_v25 = vunpack.c.0.s8 %v618_v17  ;;  %s386_s13 = scalar_lea.vmem %s1101_s7, %s930_s21 }
  0x11   : > { %434 = vmatpush1.msra.mxu0 %v392_v6  ;;  %511 = vmatpush1.msra.mxu1 %v394_v7  ;;  %v388_v10 = vld [vmem:[%s346_s12] sm:$0xff]  ;;  %v390_v11 = vld [vmem:[%s346_s12 + $0x10] sm:$0xff] }
  0x12   : > { %435 = vmatprep.subr.mxu0 %v389_v8  ;;  %512 = vmatprep.subr.mxu1 %v391_v9  ;;  %v622_v37 = vsub.s32 %v619_v25, %v621_v26 }
  0x13   : > { %436 = vmatpush1.msra.mxu0 %v388_v10  ;;  %513 = vmatpush1.msra.mxu1 %v390_v11 }
  0x14   : > { %919 = vmatmul.mubr.msk.f32.vlgmr.msra.gmra.mxu0 %vm398_vm0, %v396_v12  ;;  %921 = vmatmul.mubr.msk.f32.vlgmr.msra.gmra.mxu1 %vm398_vm0, %v396_v12 }
  0x15   : > { %475 = vmatprep.mubr.f32.mxu0 %v987_v0  ;;  %552 = vmatprep.mubr.f32.mxu1 %v987_v0 }
  0x16   : > { %568 = vperm.xlu0 %961, %v560_v13   ;;  %588 = vperm.xlu1 %962, %v580_v14  }
  0x18   : > { %920 = vmatmul.mubr.msk.f32.gmra.mxu0 %vm398_vm0, %v397_v15  ;;  %922 = vmatmul.mubr.msk.f32.gmra.mxu1 %vm398_vm0, %v397_v15 }
  0x8a   : > { %v564_v19 = vpop.permute.xlu0 %563  ;;  %v584_v22 = vpop.permute.xlu1 %583 }
  0x91   : > { %v569_v35 = vpop.permute.xlu0 %568  ;;  %v589_v47 = vpop.permute.xlu1 %588 }
  0xd4   : > { %v471_v20 = vpop.f32.mrf.mxu0  ;;  %v548_v21 = vpop.f32.mrf.mxu1 }
  0xd5   : > { %v571_v23 = vmul.f32 %v564_v19, %v471_v20  ;;  %v573_v24 = vmul.f32 %v564_v19, %v548_v21 }
  0xd6   : > { %v473_v27 = vpop.f32.mrf.mxu0  ;;  %v550_v28 = vpop.f32.mrf.mxu1 }
  0xd7   : > { %v591_v29 = vadd.f32 %v584_v22, %v571_v23  ;;  %v593_v30 = vadd.f32 %v584_v22, %v573_v24  ;;  %v572_v31 = vmul.f32 %v564_v19, %v473_v27  ;;  %v574_v32 = vmul.f32 %v564_v19, %v550_v28 }
  0xd8   : > { %v477_v33 = vpop.f32.mrf.mxu0  ;;  %v554_v34 = vpop.f32.mrf.mxu1 }
  0xd9   : > { %v592_v36 = vadd.f32 %v584_v22, %v572_v31  ;;  %v594_v38 = vadd.f32 %v584_v22, %v574_v32  ;;  %v599_v39 = vmax.f32 %v591_v29, 0.0  ;;  %v601_v40 = vmax.f32 %v593_v30, 0.0 }
  0xda   : > { %v575_v41 = vmul.f32 %v569_v35, %v477_v33  ;;  %v577_v42 = vmul.f32 %v569_v35, %v554_v34  ;;  %v479_v43 = vpop.f32.mrf.mxu0  ;;  %v556_v44 = vpop.f32.mrf.mxu1 }
  0xdb   : > { %v600_v45 = vmax.f32 %v592_v36, 0.0  ;;  %v602_v46 = vmax.f32 %v594_v38, 0.0  ;;  %v576_v48 = vmul.f32 %v569_v35, %v479_v43  ;;  %v578_v49 = vmul.f32 %v569_v35, %v556_v44 }
  0xdc   : > { %v595_v50 = vadd.f32 %v589_v47, %v575_v41  ;;  %v597_v51 = vadd.f32 %v589_v47, %v577_v42 }
  0xdd   : > { %v923_v52 = vpack.c.bf16 %v600_v45, %v599_v39  ;;  %v924_v53 = vpack.c.bf16 %v602_v46, %v601_v40  ;;  %v596_v54 = vadd.f32 %v589_v47, %v576_v48  ;;  %v598_v55 = vadd.f32 %v589_v47, %v578_v49 }
  0xde   : > { %v603_v56 = vmax.f32 %v595_v50, 0.0  ;;  %v605_v57 = vmax.f32 %v597_v51, 0.0 }
  0xdf   : > { %v623_v58 = vrot.slane %v923_v52, %v622_v37  ;;  %v630_v59 = vrot.slane %v924_v53, %v622_v37  ;;  %v604_v60 = vmax.f32 %v596_v54, 0.0  ;;  %v606_v61 = vmax.f32 %v598_v55, 0.0 }
  0xe1   : > { %v631_v62 = vcombine.low %v623_v58, %v630_v59  ;;  %v634_v63 = vcombine.high %v623_v58, %v630_v59  ;;  %v925_v0 = vpack.c.bf16 %v604_v60, %v603_v56  ;;  %v926_v1 = vpack.c.bf16 %v606_v61, %v605_v57 }
  0xe3   : > { %633 = vst [vmem:[%s356_s28] sm:$0xff] %v631_v62  ;;  %636 = vst [vmem:[%s366_s8] sm:$0xff] %v634_v63  ;;  %v653_v2 = vrot.slane %v925_v0, %v622_v37  ;;  %v660_v3 = vrot.slane %v926_v1, %v622_v37 }
  0xe5   : > { %v661_v4 = vcombine.low %v653_v2, %v660_v3  ;;  %v664_v5 = vcombine.high %v653_v2, %v660_v3 }
  0xe7   : > { %663 = vst [vmem:[%s376_s10] sm:$0xff] %v661_v4  ;;  %666 = vst [vmem:[%s386_s13] sm:$0xff] %v664_v5 }
  0xe8 PF: > { %s18_s26 = sadd.s32 1, %s985_s26   ;;  %s1102_s24 = smov %s981_s25 }
  0xe9   : > { %p15_p5 = scmp.ge.s32.totalorder %s18_s26, 4   ;;  %s1103_s25 = smov %s1105_s27 }
  0xeb   :  { %17 = sbr.rel (!%p15_p5) target bundleno = 2 (0x2), region = 102 }

// kernel: a_call__.7
= control target key start
LH: loop header
LB: loop body
LE: loop exit
PB: predicated region body
PF: predicated region fallthrough
CT: control target
= control target key end

     0   :  { %s4017_s13 = smov 0   ;;  %s6210_s0 = inlined_call_operand.vmem [shape: bf16[2,4,512], index: 0, kind: input, shape index: {}]   ;;  %s6211_s1 = inlined_call_operand.vmem [shape: bf16[2,4,512], index: 1, kind: input, shape index: {}]   ;;  %s6212_s2 = inlined_call_operand.vmem [shape: f32[1,27], index: 2, kind: input, shape index: {}]   ;;  %s6213_s3 = inlined_call_operand.vmem [shape: f32[4,36], index: 3, kind: input, shape index: {}]   ;;  %s6214_s4 = inlined_call_operand.vmem [shape: f32[4,36], index: 4, kind: input, shape index: {}]   ;;  %s6215_s5 = inlined_call_operand.vmem [shape: f32[27,512], index: 5, kind: input, shape index: {}]   ;;  %s6216_s6 = inlined_call_operand.vmem [shape: f32[9,512], index: 6, kind: input, shape index: {}]   ;;  %s6217_s7 = inlined_call_operand.vmem [shape: f32[9,512], index: 7, kind: input, shape index: {}]   ;;  %s6218_s8 = inlined_call_operand.vmem [shape: f32[4,1], index: 8, kind: input, shape index: {}]   ;;  %s6219_s9 = inlined_call_operand.vmem [shape: f32[4,1], index: 9, kind: input, shape index: {}]   ;;  %s6220_s10 = inlined_call_operand.vmem [shape: bf16[2,4,512], index: 10, kind: output, shape index: {}]  }
   0x1 LB: > { %s3789_s14 = sadd.s32 4294967295, %s3922_s13   ;;  %p3793_p0 = scmp.ge.s32.totalorder %s3922_s13, 1  ;;  %s3922_s13 = sphi %s4017_s13, %s20_s13  }
   0x2   : > { %p322_p1 = scmp.lt.s32.totalorder %s3922_s13, 3 }
   0x4   : > { %p323_p2 = pnand %p3793_p0, %p322_p1 }
   0x6   : > { %326 = sbr.rel (%p323_p2) target bundleno = 2071 (0x817), region = 60 }
   0xb   : > { %v3816_v0 = vld [vmem:[%s6215_s5 + $0x41] ss:$8 sm:$0xf]  ;;  %s6221_s17 = smov 82   ;;  %s6229_s20 = smov 1   ;;  %v399_v4 = vlaneseq  ;;  %vm6251_vm0 = vcmask 592896  }
   0xc   : > { %595 = vrot.lane.b32.xlu0 %v3816_v0, %s6221_s17  ;;  %v3818_v1 = vld [vmem:[%s6215_s5 + $0x43] ss:$8 sm:$0xf]  ;;  %v3823_v2 = vld [vmem:[%s6215_s5 + $0x60] ss:$8 sm:$0xf] }
   0xd   : > { %611 = vrot.lane.b32.xlu1 %v3818_v1, %s6229_s20  ;;  %v3819_v3 = vld [vmem:[%s6215_s5 + $0x44] ss:$8 sm:$0xf]  ;;  %s3926_s25 = smov 16   ;;  %s3927_s26 = smov 2   ;;  %v4048_v9 = vshrl.u32 %v399_v4, 7 }
   0xe   : > { %v3820_v5 = vld [vmem:[%s6215_s5 + $0x45] ss:$8 sm:$0xf]  ;;  %p365_p3 = scmp.lt.s32.totalorder %s3789_s14, 1  ;;  %v3928_v7 = vmov 1966171168  }
   0xf   : > { %v3824_v6 = vld [vmem:[%s6215_s5 + $0x61] ss:$8 sm:$0xf]  ;;  %v397_v8 = vunpack.c.l.s4 %v3928_v7  ;;  %6282 = vst [vmem:[#allocation3_spill] sm:$0xff] %v4048_v9  ;;  %s3929_s11 = smov 8   ;;  %s3930_s12 = smov 17  }
  0x10   : > { %656 = vrot.lane.b32.xlu0 %v3823_v2, %s3926_s25  ;;  %s6452_s14 = smov (!%p365_p3, %s3789_s14), 1  ;;  %v3821_v10 = vld [vmem:[%s6215_s5 + $0x46] ss:$8 sm:$0xf]  ;;  %s3932_s30 = smov 18   ;;  %v6231_v27 = vmov 0.0  }
  0x11   : > { %620 = vrot.lane.b32.xlu1 %v3819_v3, %s3927_s26  ;;  %s4055_s18 = sshll.u32 %s6452_s14, 3  ;;  %v398_v11 = vunpack.c.0.s8 %v397_v8  ;;  %v3825_v12 = vld [vmem:[%s6215_s5 + $0x62] ss:$8 sm:$0xf]  ;;  %s3931_s14 = smov 9   ;;  %vm6250_vm1 = vcmask 1044040   ;;  %2020 = vmatprep.mubr.f32.mxu1 %v6231_v27 }
  0x12   : > { %s369_s24 = scalar_lea.vmem %s6210_s0, %s4055_s18  ;;  %s374_s29 = scalar_lea.vmem %s6211_s1, %s4055_s18  ;;  %v3822_v20 = vld [vmem:[%s6215_s5 + $0x47] ss:$8 sm:$0xf]  ;;  %v3807_v26 = vld [vmem:[%s6215_s5 + $0x20] ss:$8 sm:$0xf]  ;;  %1949 = vmatprep.mubr.f32.mxu0 %v6231_v27 }
  0x13   : > { %v386_v13 = vld [vmem:[%s369_s24] sm:$0xff]  ;;  %v401_v15 = vsub.s32 %v398_v11, %v4048_v9  ;;  %s3933_s19 = smov 10   ;;  %381 = vst.msk [vmem:[#allocation2] sm:$0xf] %vm6251_vm0, %v6231_v27  ;;  %vm383_vm2 = vcmask 146436   ;;  %s3935_s23 = smov 73  }
  0x14   : > { %629 = vrot.lane.b32.xlu0 %v3820_v5, %s3929_s11  ;;  %v389_v14 = vld [vmem:[%s374_s29] sm:$0xff]  ;;  %v387_v16 = vunpack.c.l.bf16 %v386_v13  ;;  %v388_v17 = vunpack.c.h.bf16 %v386_v13  ;;  %vm384_vm3 = vmor %vm383_vm2, %vm6250_vm1  ;;  %s6223_s15 = smov 65   ;;  %s6225_s16 = smov 81   ;;  %vm425_vm4 = vcmp.ge.s32.totalorder %v399_v4, 73  ;;  %vm426_vm5 = vcmp.lt.s32.totalorder %v399_v4, 585 }
  0x15   : > { %665 = vrot.lane.b32.xlu1 %v3824_v6, %s3930_s12  ;;  %v390_v18 = vunpack.c.l.bf16 %v389_v14  ;;  %v391_v19 = vunpack.c.h.bf16 %v389_v14  ;;  %385 = vst.msk [vmem:[#allocation2 + $0x10] sm:$0xff] %vm384_vm3, %v6231_v27  ;;  %v3809_v29 = vld [vmem:[%s6215_s5 + $0x22] ss:$8 sm:$0xf]  ;;  %s6227_s24 = smov 66   ;;  %s3939_s27 = smov 64   ;;  %vm427_vm7 = vmand %vm425_vm4, %vm426_vm5 }
  0x16   : > { %v3815_v30 = vld [vmem:[%s6215_s5 + $0x40] ss:$8 sm:$0xf]  ;;  %v3810_v31 = vld [vmem:[%s6215_s5 + $0x23] ss:$8 sm:$0xf] }
  0x17   : > { %v4073_v21 = vadd.f32 %v390_v18, %v387_v16  ;;  %v4075_v22 = vadd.f32 %v391_v19, %v388_v17  ;;  %v3808_v32 = vld [vmem:[%s6215_s5 + $0x21] ss:$8 sm:$0xf]  ;;  %v3811_v33 = vld [vmem:[%s6215_s5 + $0x24] ss:$8 sm:$0xf] }
  0x18   : > { %638 = vrot.lane.b32.xlu0 %v3821_v10, %s3931_s14  ;;  %v3800_v34 = vld [vmem:[%s6215_s5 + $0x1] ss:$8 sm:$0xf]  ;;  %v3812_v35 = vld [vmem:[%s6215_s5 + $0x25] ss:$8 sm:$0xf] }
  0x19   : > { %674 = vrot.lane.b32.xlu1 %v3825_v12, %s3932_s30  ;;  %6283 = vst [vmem:[#allocation4_spill] sm:$0xff] %v4073_v21  ;;  %6284 = vst [vmem:[#allocation5_spill] sm:$0xff] %v4075_v22  ;;  %v402_v23 = vrot.slane %v4073_v21, %v401_v15  ;;  %v409_v24 = vrot.slane %v4075_v22, %v401_v15  ;;  %v3801_v36 = vld [vmem:[%s6215_s5 + $0x2] ss:$8 sm:$0xf]  ;;  %vm6273_vm6 = vcmask 596992  }
  0x1a   : > { %v3813_v37 = vld [vmem:[%s6215_s5 + $0x26] ss:$8 sm:$0xf]  ;;  %v3802_v38 = vld [vmem:[%s6215_s5 + $0x3] ss:$8 sm:$0xf] }
  0x1b   : > { %v410_v25 = vcombine.low %v402_v23, %v409_v24  ;;  %v3804_v39 = vld [vmem:[%s6215_s5 + $0x5] ss:$8 sm:$0xf]  ;;  %v3803_v40 = vld [vmem:[%s6215_s5 + $0x4] ss:$8 sm:$0xf] }
  0x1c   : > { %v3814_v41 = vld [vmem:[%s6215_s5 + $0x27] ss:$8 sm:$0xf]  ;;  %v3805_v42 = vld [vmem:[%s6215_s5 + $0x6] ss:$8 sm:$0xf] }
  0x1d   : > { %647 = vrot.lane.b32.xlu1 %v3822_v20, %s3933_s19  ;;  %v417_v28 = vrot.slane %v410_v25, %v401_v15  ;;  %v3806_v43 = vld [vmem:[%s6215_s5 + $0x7] ss:$8 sm:$0xf]  ;;  %vm6235_vm8 = vcmask 670720   ;;  %v4176_v61 = vsub.s32 1, %v4048_v9  ;;  %v4179_v62 = vsub.s32 2, %v4048_v9 }
  0x1e   : > { %v4188_v3 = vsub.s32 3, %v4048_v9  ;;  %v4191_v4 = vsub.s32 4, %v4048_v9  ;;  %v3817_v10 = vld [vmem:[%s6215_s5 + $0x42] ss:$8 sm:$0xf]  ;;  %v4203_v12 = vsub.s32 0, %v4048_v9 }
  0x1f   : > { %418 = vrot.lane.b32.xlu0 %v417_v28, %s3935_s23  ;;  %vm6242_vm9 = vcmask 7168   ;;  %s6286_s21 = smov 81   ;;  %vm449_vm10 = vcmask 15360   ;;  %vm459_vm11 = vcmask 64512   ;;  %vm489_vm12 = vcmask 130048   ;;  %s3944_s22 = smov 79  }
  0x20   : > { %6285 = vst [vmem:[#allocation6_spill] sm:$0xff] %v4191_v4  ;;  %vm479_vm13 = vcmask 80896   ;;  %vm6272_vm14 = vcmask 138240   ;;  %vm509_vm15 = vcmask 146432   ;;  %s3945_s28 = smov 63   ;;  %vm6245_vm2 = vcmask 72704  }
  0x21   : > { %506 = vrot.lane.b32.xlu1 %v3807_v26, %s3932_s30  ;;  %s6262_s30 = smov 72   ;;  %vm6253_vm3 = vcmask 523264   ;;  %vm6271_vm4 = vcmask 531456   ;;  %vm6234_vm5 = vcmask 539648   ;;  %s3948_s29 = smov 62   ;;  %vm6281_vm1 = vcmask 1044480  }
  0x22   : > { %s6254_s17 = smov 126   ;;  %vm6279_vm0 = vcmask 1045504  }
  0x23   : > { %585 = vrot.lane.b32.xlu0 %v3815_v30, %s6225_s16  ;;  %s6260_s16 = smov 110  }
  0x25   : > { %526 = vrot.lane.b32.xlu1 %v3809_v29, %s6223_s15  ;;  %s3942_s15 = smov 80  }
  0x27   : > { %516 = vrot.lane.b32.xlu0 %v3808_v32, %s3939_s27 }
  0x29   : > { %536 = vrot.lane.b32.xlu1 %v3810_v31, %s6227_s24  ;;  %s3943_s24 = smov 127  }
  0x2b   : > { %436 = vrot.lane.b32.xlu0 %v3800_v34, %s6229_s20  ;;  %s6264_s20 = smov 74  }
  0x2d   : > { %546 = vrot.lane.b32.xlu1 %v3811_v33, %s6262_s30 }
  0x2f   : > { %446 = vrot.lane.b32.xlu0 %v3801_v36, %s3927_s26  ;;  %s6288_s26 = smov 65  }
  0x31   : > { %556 = vrot.lane.b32.xlu1 %v3812_v35, %s3935_s23 }
  0x33   : > { %456 = vrot.lane.b32.xlu0 %v3802_v38, %s3929_s11  ;;  %s3946_s11 = smov 71  }
  0x35   : > { %565 = vrot.lane.b32.xlu1 %v3813_v37, %s6264_s20 }
  0x37   : > { %466 = vrot.lane.b32.xlu0 %v3803_v40, %s3931_s14 }
  0x39   : > { %476 = vrot.lane.b32.xlu1 %v3804_v39, %s3933_s19  ;;  %s3951_s19 = smov 120  }
  0x3b   : > { %575 = vrot.lane.b32.xlu0 %v3814_v41, %s3942_s15 }
  0x3f   : > { %486 = vrot.lane.b32.xlu0 %v3805_v42, %s3926_s25  ;;  %s3950_s25 = smov 56  }
  0x43   : > { %496 = vrot.lane.b32.xlu0 %v3806_v43, %s3930_s12 }
  0x7e   : > { %v596_v44 = vpop.permute.xlu0 %595 }
  0x7f   : > { %v612_v45 = vpop.permute.xlu1 %611  ;;  %v597_v58 = vrot.slane %v596_v44, 7 }
  0x80   : > { %v613_v16 = vrot.slane %v612_v45, 7 }
  0x81   : > { %v599_v0 = vsel %vm6235_vm8, %v597_v58, %v596_v44  ;;  %vm1310_vm8 = vcmask 1042432  }
  0x82   : > { %v4150_v46 = vpop.permute.xlu0 %656  ;;  %v614_v20 = vsel %vm6242_vm9, %v613_v16, %v612_v45 }
  0x83   : > { %v4152_v47 = vpop.permute.xlu1 %620 }
  0x84   : > { %v622_v33 = vrot.slane %v4152_v47, 7 }
  0x86   : > { %v4156_v49 = vpop.permute.xlu0 %629  ;;  %v623_v38 = vsel %vm449_vm10, %v622_v33, %v4152_v47 }
  0x87   : > { %v4154_v48 = vpop.permute.xlu1 %665 }
  0x8a   : > { %v4160_v51 = vpop.permute.xlu0 %638 }
  0x8b   : > { %v4158_v50 = vpop.permute.xlu1 %674 }
  0x8f   : > { %v4162_v52 = vpop.permute.xlu1 %647 }
  0x91   : > { %v419_v53 = vpop.permute.xlu0 %418 }
  0x92   : > { %v420_v54 = vrot.slane %v419_v53, 7 }
  0x93   : > { %v4167_v56 = vpop.permute.xlu1 %506 }
  0x94   : > { %v422_v55 = vsel %vm6273_vm6, %v420_v54, %v419_v53  ;;  %v658_v54 = vrot.slane %v4150_v46, 7 }
  0x95   : > { %428 = vst.msk [vmem:[#allocation2] ss:$4 sm:$0x1f] %vm427_vm7, %v422_v55  ;;  %v4169_v57 = vpop.permute.xlu0 %585  ;;  %vm6269_vm7 = vcmask 588800  }
  0x97   : > { %v4173_v60 = vpop.permute.xlu1 %526 }
  0x99   : > { %v4171_v59 = vpop.permute.xlu0 %516 }
  0x9b   : > { %v4193_v5 = vpop.permute.xlu1 %536 }
  0x9c   : > { %v4181_v63 = vld [vmem:[#allocation2] ss:$4 sm:$0x1f] }
  0x9d   : > { %v4184_v1 = vpop.permute.xlu0 %436  ;;  %v601_v2 = vmul.f32 %v599_v0, %v4181_v63  ;;  %v603_v8 = vld [vmem:[#allocation2 + $0x4] ss:$4 sm:$0xf] }
  0x9e   : > { %v606_v15 = vmul.f32 %v3817_v10, %v603_v8  ;;  %v4214_v23 = vld [vmem:[#allocation2 + $0x4] ss:$4 sm:$0x1f]  ;;  %v659_v10 = vsel %vm489_vm12, %v658_v54, %v4150_v46 }
  0x9f   : > { %v1401_v6 = vrot.slane %v601_v2, %v4179_v62  ;;  %v1397_v7 = vrot.slane %v601_v2, %v4176_v61  ;;  %v1409_v13 = vrot.slane %v601_v2, %v4191_v4  ;;  %v1405_v14 = vrot.slane %v601_v2, %v4188_v3  ;;  %v4207_v17 = vpop.permute.xlu1 %546 }
  0xa0   : > { %v1433_v18 = vrot.slane %v606_v15, %v4203_v12  ;;  %v1393_v19 = vrot.slane %v601_v2, %v4203_v12  ;;  %v1441_v26 = vrot.slane %v606_v15, %v4179_v62  ;;  %v1437_v28 = vrot.slane %v606_v15, %v4176_v61 }
  0xa1   : > { %1414 = vrot.lane.b32.xlu1 %v1401_v6, %s3943_s24  ;;  %1412 = vrot.lane.b32.xlu0 %v1397_v7, %s3943_s24  ;;  %v447_v11 = vpop.permute.xlu0 %446  ;;  %v616_v29 = vmul.f32 %v614_v20, %v4214_v23  ;;  %v1445_v32 = vrot.slane %v606_v15, %v4188_v3  ;;  %v625_v45 = vmul.f32 %v623_v38, %v4214_v23  ;;  %v631_v38 = vrot.slane %v4156_v49, 7 }
  0xa2   : > { %v448_v34 = vrot.slane %v447_v11, 7  ;;  %v661_v15 = vmul.f32 %v659_v10, %v4214_v23 }
  0xa3   : > { %v4218_v25 = vpop.permute.xlu1 %556  ;;  %v1466_v31 = vrot.slane %v616_v29, %v4203_v12  ;;  %v1474_v36 = vrot.slane %v616_v29, %v4179_v62  ;;  %v1470_v37 = vrot.slane %v616_v29, %v4176_v61  ;;  %v1482_v43 = vrot.slane %v616_v29, %v4191_v4 }
  0xa4   : > { %v450_v41 = vsel %vm449_vm10, %v448_v34, %v447_v11  ;;  %v1478_v44 = vrot.slane %v616_v29, %v4188_v3  ;;  %v1506_v2 = vrot.slane %v625_v45, %v4203_v12  ;;  %v1510_v6 = vrot.slane %v625_v45, %v4176_v61 }
  0xa5   : > { %1418 = vrot.lane.b32.xlu1 %v1409_v13, %s3943_s24  ;;  %1416 = vrot.lane.b32.xlu0 %v1405_v14, %s3943_s24  ;;  %v457_v24 = vpop.permute.xlu0 %456  ;;  %v4245_v53 = vmul.f32 %v450_v41, %v4181_v63  ;;  %v1514_v13 = vrot.slane %v625_v45, %v4179_v62  ;;  %v1518_v14 = vrot.slane %v625_v45, %v4188_v3  ;;  %vm6236_vm10 = vcmask 605184  }
  0xa6   : > { %v458_v39 = vrot.slane %v457_v24, 7  ;;  %v1522_v46 = vrot.slane %v625_v45, %v4191_v4  ;;  %v1668_v20 = vrot.slane %v661_v15, %v4203_v12  ;;  %v1672_v29 = vrot.slane %v661_v15, %v4176_v61 }
  0xa7   : > { %v4230_v35 = vpop.permute.xlu1 %565  ;;  %v761_v7 = vrot.slane %v4245_v53, %v4191_v4  ;;  %v1680_v34 = vrot.slane %v661_v15, %v4188_v3  ;;  %v632_v41 = vsel %vm459_vm11, %v631_v38, %v4156_v49  ;;  %v676_v45 = vrot.slane %v4158_v50, 7 }
  0xa8   : > { %v460_v47 = vsel %vm459_vm11, %v458_v39, %v457_v24  ;;  %v667_v24 = vrot.slane %v4154_v48, 7  ;;  %vm6252_vm11 = vcmask 662528  }
  0xa9   : > { %1446 = vrot.lane.b32.xlu1 %v1433_v18, %s6286_s21  ;;  %1410 = vrot.lane.b32.xlu0 %v1393_v19, %s3943_s24  ;;  %v4225_v30 = vpop.permute.xlu0 %466  ;;  %v4252_v0 = vmul.f32 %v460_v47, %v4181_v63  ;;  %v677_v49 = vsel %vm509_vm15, %v676_v45, %v4158_v50  ;;  %v640_v50 = vrot.slane %v4160_v51, 7 }
  0xab   : > { %v477_v42 = vpop.permute.xlu1 %476  ;;  %v801_v16 = vrot.slane %v4252_v0, %v4191_v4  ;;  %v785_v33 = vrot.slane %v4252_v0, %v4203_v12 }
  0xac   : > { %v478_v55 = vrot.slane %v477_v42, 7 }
  0xad   : > { %1450 = vrot.lane.b32.xlu1 %v1441_v26, %s6286_s21  ;;  %1448 = vrot.lane.b32.xlu0 %v1437_v28, %s6286_s21  ;;  %v4237_v40 = vpop.permute.xlu0 %575 }
  0xae   : > { %v480_v11 = vsel %vm479_vm13, %v478_v55, %v477_v42 }
  0xaf   : > { %v4267_v18 = vmul.f32 %v480_v11, %v4181_v63 }
  0xb1   : > { %1483 = vrot.lane.b32.xlu1 %v1466_v31, %s3942_s15  ;;  %1452 = vrot.lane.b32.xlu0 %v1445_v32, %s6286_s21  ;;  %v487_v58 = vpop.permute.xlu0 %486  ;;  %v1676_v31 = vrot.slane %v661_v15, %v4179_v62  ;;  %v668_v32 = vsel %vm6272_vm14, %v667_v24, %v4154_v48 }
  0xb2   : > { %v488_v8 = vrot.slane %v487_v58, 7 }
  0xb4   : > { %v490_v19 = vsel %vm489_vm12, %v488_v8, %v487_v58  ;;  %vm6274_vm12 = vcmask 1039360  }
  0xb5   : > { %1487 = vrot.lane.b32.xlu1 %v1474_v36, %s3942_s15  ;;  %1485 = vrot.lane.b32.xlu0 %v1470_v37, %s3942_s15  ;;  %v4274_v26 = vmul.f32 %v490_v19, %v4181_v63  ;;  %v1684_v36 = vrot.slane %v661_v15, %v4191_v4  ;;  %v670_v37 = vmul.f32 %v668_v32, %v4214_v23 }
  0xb7   : > { %6287 = vst [vmem:[#allocation7_spill] sm:$0xff] %v4274_v26  ;;  %v1708_v48 = vrot.slane %v670_v37, %v4203_v12  ;;  %v1712_v39 = vrot.slane %v670_v37, %v4176_v61  ;;  %v1716_v42 = vrot.slane %v670_v37, %v4179_v62  ;;  %v1724_v47 = vrot.slane %v670_v37, %v4191_v4 }
  0xb9   : > { %1491 = vrot.lane.b32.xlu1 %v1482_v43, %s3942_s15  ;;  %1489 = vrot.lane.b32.xlu0 %v1478_v44, %s3942_s15  ;;  %v1720_v43 = vrot.slane %v670_v37, %v4188_v3  ;;  %v634_v44 = vmul.f32 %v632_v41, %v4214_v23 }
  0xbb   : > { %v1551_v54 = vrot.slane %v634_v44, %v4176_v61  ;;  %v1547_v55 = vrot.slane %v634_v44, %v4203_v12  ;;  %v1559_v58 = vrot.slane %v634_v44, %v4188_v3  ;;  %v1563_v10 = vrot.slane %v634_v44, %v4191_v4 }
  0xbd   : > { %1523 = vrot.lane.b32.xlu1 %v1506_v2, %s3944_s22  ;;  %1525 = vrot.lane.b32.xlu0 %v1510_v6, %s3944_s22  ;;  %v679_v2 = vmul.f32 %v677_v49, %v4214_v23  ;;  %v1555_v6 = vrot.slane %v634_v44, %v4179_v62 }
  0xbf   : > { %v1748_v8 = vrot.slane %v679_v2, %v4203_v12  ;;  %v1756_v11 = vrot.slane %v679_v2, %v4179_v62  ;;  %v1764_v15 = vrot.slane %v679_v2, %v4191_v4 }
  0xc1   : > { %1527 = vrot.lane.b32.xlu1 %v1514_v13, %s3944_s22  ;;  %1529 = vrot.lane.b32.xlu0 %v1518_v14, %s3944_s22  ;;  %v641_v13 = vsel %vm6245_vm2, %v640_v50, %v4160_v51  ;;  %v1752_v14 = vrot.slane %v679_v2, %v4176_v61  ;;  %v4379_v50 = vpop.permute.xlu0 %496 }
  0xc2   : > { %v643_v19 = vmul.f32 %v641_v13, %v4214_v23  ;;  %6289 = vst [vmem:[#allocation8_spill] sm:$0xff] %v4379_v50  ;;  %v438_v13 = vrot.slane %v4184_v1, 7 }
  0xc4   : > { %v1591_v24 = vrot.slane %v643_v19, %v4176_v61  ;;  %v1587_v51 = vrot.slane %v643_v19, %v4203_v12  ;;  %v1603_v37 = vrot.slane %v643_v19, %v4191_v4 }
  0xc5   : > { %1531 = vrot.lane.b32.xlu1 %v1522_v46, %s3944_s22  ;;  %1685 = vrot.lane.b32.xlu0 %v1668_v20, %s6288_s26  ;;  %v649_v46 = vrot.slane %v4162_v52, 7  ;;  %v1760_v20 = vrot.slane %v679_v2, %v4188_v3  ;;  %s3952_s22 = smov 55  }
  0xc9   : > { %1687 = vrot.lane.b32.xlu1 %v1672_v29, %s6288_s26  ;;  %1689 = vrot.lane.b32.xlu0 %v1676_v31, %s6288_s26  ;;  %v650_v29 = vsel %vm479_vm13, %v649_v46, %v4162_v52  ;;  %v1599_v31 = vrot.slane %v643_v19, %v4188_v3  ;;  %v508_v52 = vrot.slane %v4167_v56, 7  ;;  %v440_v46 = vsel %vm6242_vm9, %v438_v13, %v4184_v1 }
  0xca   : > { %v652_v32 = vmul.f32 %v650_v29, %v4214_v23  ;;  %vm6270_vm13 = vcmask 654336   ;;  %vm1091_vm9 = vcmask 515072  }
  0xcb   : > { %v510_v23 = vsel %vm509_vm15, %v508_v52, %v4167_v56  ;;  %vm1300_vm15 = vcmask 1040384  }
  0xcc   : > { %v1635_v38 = vrot.slane %v652_v32, %v4179_v62  ;;  %v1643_v41 = vrot.slane %v652_v32, %v4191_v4 }
  0xcd   : > { %1691 = vrot.lane.b32.xlu1 %v1680_v34, %s6288_s26  ;;  %1693 = vrot.lane.b32.xlu0 %v1684_v36, %s6288_s26  ;;  %v1595_v34 = vrot.slane %v643_v19, %v4179_v62  ;;  %v1627_v36 = vrot.slane %v652_v32, %v4203_v12 }
  0xd1   : > { %1725 = vrot.lane.b32.xlu1 %v1708_v48, %s3939_s27  ;;  %1727 = vrot.lane.b32.xlu0 %v1712_v39, %s3939_s27  ;;  %v512_v48 = vmul.f32 %v510_v23, %v4181_v63  ;;  %v1631_v39 = vrot.slane %v652_v32, %v4176_v61 }
  0xd3   : > { %v993_v44 = vrot.slane %v512_v48, %v4179_v62  ;;  %v997_v49 = vrot.slane %v512_v48, %v4188_v3 }
  0xd5   : > { %1729 = vrot.lane.b32.xlu1 %v1716_v42, %s3939_s27  ;;  %1731 = vrot.lane.b32.xlu0 %v1720_v43, %s3939_s27  ;;  %v518_v42 = vrot.slane %v4171_v59, 7  ;;  %v1639_v43 = vrot.slane %v652_v32, %v4188_v3  ;;  %v538_v32 = vrot.slane %v4193_v5, 7 }
  0xd7   : > { %v520_v56 = vsel %vm6253_vm3, %v518_v42, %v4171_v59  ;;  %v528_v59 = vrot.slane %v4173_v60, 7 }
  0xd8   : > { %v522_v45 = vmul.f32 %v520_v56, %v4181_v63 }
  0xd9   : > { %1733 = vrot.lane.b32.xlu1 %v1724_v47, %s3939_s27  ;;  %1566 = vrot.lane.b32.xlu0 %v1551_v54, %s3935_s23  ;;  %v1001_v47 = vrot.slane %v512_v48, %v4191_v4  ;;  %v989_v54 = vrot.slane %v512_v48, %v4176_v61 }
  0xda   : > { %v1029_v2 = vrot.slane %v522_v45, %v4176_v61 }
  0xdd   : > { %1564 = vrot.lane.b32.xlu1 %v1547_v55, %s3935_s23  ;;  %1570 = vrot.lane.b32.xlu0 %v1559_v58, %s3935_s23  ;;  %v1033_v55 = vrot.slane %v522_v45, %v4179_v62  ;;  %v1041_v58 = vrot.slane %v522_v45, %v4191_v4 }
  0xe1   : > { %1568 = vrot.lane.b32.xlu1 %v1555_v6, %s3935_s23  ;;  %1765 = vrot.lane.b32.xlu0 %v1748_v8, %s3945_s28  ;;  %v530_v6 = vsel %vm6271_vm4, %v528_v59, %v4173_v60 }
  0xe2   : > { %v532_v8 = vmul.f32 %v530_v6, %v4181_v63 }
  0xe4   : > { %v1072_v19 = vrot.slane %v532_v8, %v4179_v62 }
  0xe5   : > { %1572 = vrot.lane.b32.xlu1 %v1563_v10, %s3935_s23  ;;  %1769 = vrot.lane.b32.xlu0 %v1756_v11, %s3945_s28  ;;  %v1037_v10 = vrot.slane %v522_v45, %v4188_v3  ;;  %v1025_v11 = vrot.slane %v522_v45, %v4203_v12 }
  0xe9   : > { %1767 = vrot.lane.b32.xlu1 %v1752_v14, %s3945_s28  ;;  %1773 = vrot.lane.b32.xlu0 %v1764_v15, %s3945_s28  ;;  %v985_v15 = vrot.slane %v512_v48, %v4203_v12 }
  0xed   : > { %1771 = vrot.lane.b32.xlu1 %v1760_v20, %s3945_s28  ;;  %1606 = vrot.lane.b32.xlu0 %v1591_v24, %s6262_s30  ;;  %v442_v20 = vmul.f32 %v440_v46, %v4181_v63 }
  0xef   : > { %v713_v52 = vrot.slane %v442_v20, %v4179_v62 }
  0xf1   : > { %1604 = vrot.lane.b32.xlu1 %v1587_v51, %s6262_s30  ;;  %1610 = vrot.lane.b32.xlu0 %v1599_v31, %s6262_s30  ;;  %v1068_v51 = vrot.slane %v532_v8, %v4176_v61  ;;  %v1080_v31 = vrot.slane %v532_v8, %v4191_v4 }
  0xf5   : > { %1608 = vrot.lane.b32.xlu1 %v1595_v34, %s6262_s30  ;;  %1644 = vrot.lane.b32.xlu0 %v1627_v36, %s3946_s11  ;;  %v1076_v36 = vrot.slane %v532_v8, %v4188_v3 }
  0xf9   : > { %1612 = vrot.lane.b32.xlu1 %v1603_v37, %s6262_s30  ;;  %1648 = vrot.lane.b32.xlu0 %v1635_v38, %s3946_s11  ;;  %v540_v37 = vsel %vm6234_vm5, %v538_v32, %v4193_v5  ;;  %v757_v32 = vrot.slane %v4245_v53, %v4188_v3  ;;  %vm1305_vm5 = vcmask 1041408  }
  0xfa   : > { %v542_v38 = vmul.f32 %v540_v37, %v4181_v63 }
  0xfc   : > { %v1112_v59 = vrot.slane %v542_v38, %v4179_v62  ;;  %v1104_v37 = vrot.slane %v542_v38, %v4203_v12 }
  0xfd   : > { %1646 = vrot.lane.b32.xlu1 %v1631_v39, %s3946_s11  ;;  %1652 = vrot.lane.b32.xlu0 %v1643_v41, %s3946_s11  ;;  %v721_v39 = vrot.slane %v442_v20, %v4191_v4  ;;  %v709_v41 = vrot.slane %v442_v20, %v4176_v61 }
 0x101   : > { %1650 = vrot.lane.b32.xlu1 %v1639_v43, %s3946_s11  ;;  %1006 = vrot.lane.b32.xlu0 %v993_v44, %s6260_s16  ;;  %v1108_v43 = vrot.slane %v542_v38, %v4176_v61  ;;  %v717_v44 = vrot.slane %v442_v20, %v4188_v3  ;;  %s3954_s11 = smov 54  }
 0x105   : > { %1010 = vrot.lane.b32.xlu0 %v1001_v47, %s6260_s16  ;;  %1004 = vrot.lane.b32.xlu1 %v989_v54, %s6260_s16  ;;  %v1116_v47 = vrot.slane %v542_v38, %v4188_v3  ;;  %v1064_v54 = vrot.slane %v532_v8, %v4203_v12 }
 0x109   : > { %1008 = vrot.lane.b32.xlu1 %v997_v49, %s6260_s16  ;;  %1046 = vrot.lane.b32.xlu0 %v1033_v55, %s3939_s27 }
 0x10d   : > { %1050 = vrot.lane.b32.xlu0 %v1041_v58, %s3939_s27  ;;  %1044 = vrot.lane.b32.xlu1 %v1029_v2, %s3939_s27  ;;  %v705_v58 = vrot.slane %v442_v20, %v4203_v12  ;;  %v548_v2 = vrot.slane %v4207_v17, 7  ;;  %v749_v20 = vrot.slane %v4245_v53, %v4176_v61 }
 0x10f   : > { %v550_v13 = vsel %vm6269_vm7, %v548_v2, %v4207_v17 }
 0x111   : > { %1048 = vrot.lane.b32.xlu1 %v1037_v10, %s3939_s27  ;;  %1042 = vrot.lane.b32.xlu0 %v1025_v11, %s3939_s27  ;;  %v1120_v10 = vrot.slane %v542_v38, %v4191_v4  ;;  %v753_v11 = vrot.slane %v4245_v53, %v4179_v62 }
 0x113   : > { %v4386_v14 = vpop.permute.xlu1 %1414  ;;  %v4388_v60 = vpop.permute.xlu0 %1412 }
 0x114   : > { %6290 = vst [vmem:[#allocation9_spill] sm:$0xff] %v4388_v60 }
 0x115   : > { %1002 = vrot.lane.b32.xlu1 %v985_v15, %s6260_s16  ;;  %1085 = vrot.lane.b32.xlu0 %v1072_v19, %s3945_s28  ;;  %v552_v15 = vmul.f32 %v550_v13, %v4181_v63  ;;  %v789_v13 = vrot.slane %v4252_v0, %v4176_v61 }
 0x117   : > { %v4397_v24 = vpop.permute.xlu1 %1418  ;;  %v4399_v29 = vpop.permute.xlu0 %1416 }
 0x118   : > { %v1422_v50 = vsel %vm6274_vm12, %v4386_v14, %v4399_v29 }
 0x119   : > { %1083 = vrot.lane.b32.xlu1 %v1068_v51, %s3945_s28  ;;  %1089 = vrot.lane.b32.xlu0 %v1080_v31, %s3945_s28  ;;  %v1148_v31 = vrot.slane %v552_v15, %v4176_v61 }
 0x11b   : > { %v4406_v1 = vpop.permute.xlu1 %1446  ;;  %v4408_v34 = vpop.permute.xlu0 %1410 }
 0x11c   : > { %6291 = vst [vmem:[#allocation10_spill] sm:$0xff] %v4406_v1  ;;  %6292 = vst [vmem:[#allocation11_spill] sm:$0xff] %v4408_v34 }
 0x11d   : > { %1087 = vrot.lane.b32.xlu1 %v1076_v36, %s3945_s28  ;;  %726 = vrot.lane.b32.xlu0 %v713_v52, %s3943_s24 }
 0x11f   : > { %v4417_v23 = vpop.permute.xlu1 %1450  ;;  %v4419_v48 = vpop.permute.xlu0 %1448 }
 0x121   : > { %730 = vrot.lane.b32.xlu0 %v721_v39, %s3943_s24  ;;  %724 = vrot.lane.b32.xlu1 %v709_v41, %s3943_s24 }
 0x123   : > { %v4425_v42 = vpop.permute.xlu1 %1483  ;;  %v4427_v5 = vpop.permute.xlu0 %1452 }
 0x125   : > { %1123 = vrot.lane.b32.xlu0 %v1108_v43, %s3948_s29  ;;  %728 = vrot.lane.b32.xlu1 %v717_v44, %s3943_s24  ;;  %v1152_v43 = vrot.slane %v552_v15, %v4179_v62  ;;  %v745_v44 = vrot.slane %v4245_v53, %v4203_v12 }
 0x127   : > { %v4433_v56 = vpop.permute.xlu1 %1487  ;;  %v4435_v45 = vpop.permute.xlu0 %1485 }
 0x129   : > { %1127 = vrot.lane.b32.xlu0 %v1116_v47, %s3948_s29  ;;  %1081 = vrot.lane.b32.xlu1 %v1064_v54, %s3945_s28  ;;  %v558_v47 = vrot.slane %v4218_v25, 7  ;;  %s6258_s28 = smov 119  }
 0x12b   : > { %v4441_v49 = vpop.permute.xlu1 %1491  ;;  %v4443_v55 = vpop.permute.xlu0 %1489  ;;  %v559_v2 = vsel %vm6273_vm6, %v558_v47, %v4218_v25 }
 0x12c   : > { %v561_v53 = vmul.f32 %v559_v2, %v4181_v63 }
 0x12d   : > { %1125 = vrot.lane.b32.xlu1 %v1112_v59, %s3948_s29  ;;  %722 = vrot.lane.b32.xlu0 %v705_v58, %s3943_s24  ;;  %v1160_v59 = vrot.slane %v552_v15, %v4191_v4  ;;  %v793_v58 = vrot.slane %v4252_v0, %v4179_v62 }
 0x12e   : > { %v1196_v47 = vrot.slane %v561_v53, %v4188_v3  ;;  %v1192_v2 = vrot.slane %v561_v53, %v4179_v62  ;;  %v1184_v28 = vrot.slane %v561_v53, %v4203_v12 }
 0x12f   : > { %v4450_v6 = vpop.permute.xlu1 %1523  ;;  %v4452_v8 = vpop.permute.xlu0 %1525 }
 0x131   : > { %1129 = vrot.lane.b32.xlu1 %v1120_v10, %s3948_s29  ;;  %766 = vrot.lane.b32.xlu0 %v753_v11, %s6254_s17 }
 0x133   : > { %v4462_v19 = vpop.permute.xlu1 %1527  ;;  %v4464_v46 = vpop.permute.xlu0 %1529 }
 0x135   : > { %770 = vrot.lane.b32.xlu0 %v761_v7, %s6254_s17  ;;  %764 = vrot.lane.b32.xlu1 %v749_v20, %s6254_s17  ;;  %v1156_v7 = vrot.slane %v552_v15, %v4188_v3  ;;  %v468_v20 = vrot.slane %v4225_v30, 7 }
 0x137   : > { %v4473_v17 = vpop.permute.xlu1 %1531  ;;  %v4475_v51 = vpop.permute.xlu0 %1685 }
 0x139   : > { %1163 = vrot.lane.b32.xlu0 %v1148_v31, %s3950_s25  ;;  %768 = vrot.lane.b32.xlu1 %v757_v32, %s6254_s17  ;;  %v1188_v32 = vrot.slane %v561_v53, %v4176_v61 }
 0x13b   : > { %v4482_v36 = vpop.permute.xlu1 %1687  ;;  %v4484_v52 = vpop.permute.xlu0 %1689 }
 0x13d   : > { %1167 = vrot.lane.b32.xlu0 %v1156_v7, %s3950_s25  ;;  %1121 = vrot.lane.b32.xlu1 %v1104_v37, %s3948_s29  ;;  %v797_v7 = vrot.slane %v4252_v0, %v4188_v3  ;;  %v470_v37 = vsel %vm6245_vm2, %v468_v20, %v4225_v30  ;;  %v567_v20 = vrot.slane %v4230_v35, 7  ;;  %vm1315_vm2 = vcmask 1043456   ;;  %s3955_s29 = smov 47  }
 0x13f   : > { %v4490_v39 = vpop.permute.xlu1 %1691  ;;  %v4492_v41 = vpop.permute.xlu0 %1693 }
 0x141   : > { %1165 = vrot.lane.b32.xlu1 %v1152_v43, %s3950_s25  ;;  %762 = vrot.lane.b32.xlu0 %v745_v44, %s6254_s17  ;;  %s3957_s17 = smov 48  }
 0x143   : > { %v4500_v38 = vpop.permute.xlu1 %1725  ;;  %v4502_v54 = vpop.permute.xlu0 %1727 }
 0x145   : > { %1169 = vrot.lane.b32.xlu1 %v1160_v59, %s3950_s25  ;;  %806 = vrot.lane.b32.xlu0 %v793_v58, %s3951_s19  ;;  %v1144_v59 = vrot.slane %v552_v15, %v4203_v12 }
 0x147   : > { %v4512_v10 = vpop.permute.xlu1 %1729  ;;  %v4514_v11 = vpop.permute.xlu0 %1731 }
 0x149   : > { %810 = vrot.lane.b32.xlu0 %v801_v16, %s3951_s19  ;;  %804 = vrot.lane.b32.xlu1 %v789_v13, %s3951_s19  ;;  %v4536_v16 = vmul.f32 %v470_v37, %v4181_v63 }
 0x14b   : > { %v4524_v25 = vpop.permute.xlu1 %1733  ;;  %v4526_v31 = vpop.permute.xlu0 %1566  ;;  %v829_v13 = vrot.slane %v4536_v16, %v4176_v61  ;;  %v837_v37 = vrot.slane %v4536_v16, %v4188_v3 }
 0x14d   : > { %1203 = vrot.lane.b32.xlu0 %v1188_v32, %s3952_s22  ;;  %808 = vrot.lane.b32.xlu1 %v797_v7, %s3951_s19  ;;  %v1200_v7 = vrot.slane %v561_v53, %v4191_v4  ;;  %v841_v53 = vrot.slane %v4536_v16, %v4191_v4 }
 0x14f   : > { %v4538_v43 = vpop.permute.xlu1 %1564  ;;  %v4540_v44 = vpop.permute.xlu0 %1570 }
 0x151   : > { %1207 = vrot.lane.b32.xlu0 %v1196_v47, %s3952_s22  ;;  %1161 = vrot.lane.b32.xlu1 %v1144_v59, %s3950_s25  ;;  %v569_v47 = vsel %vm6236_vm10, %v567_v20, %v4230_v35  ;;  %v587_v59 = vrot.slane %v4169_v57, 7  ;;  %vm1533_vm10 = vcmask 646144  }
 0x153   : > { %v4546_v30 = vpop.permute.xlu1 %1568  ;;  %v4548_v58 = vpop.permute.xlu0 %1765  ;;  %v589_v35 = vsel %vm6252_vm11, %v587_v59, %v4169_v57  ;;  %v1421_v57 = vsel %vm6274_vm12, %v4388_v60, %v4386_v14  ;;  %v1819_v14 = vsel %vm1300_vm15, %v4475_v51, %v4500_v38  ;;  %v1494_v60 = vsel %vm6270_vm13, %v4435_v45, %v4433_v56 }
 0x154   : > { %v4591_v0 = vmul.f32 %v589_v35, %v4181_v63 }
 0x155   : > { %1205 = vrot.lane.b32.xlu1 %v1192_v2, %s3952_s22  ;;  %844 = vrot.lane.b32.xlu0 %v829_v13, %s6258_s28  ;;  %v4569_v2 = vmul.f32 %v569_v47, %v4181_v63 }
 0x156   : > { %v1371_v35 = vrot.slane %v4591_v0, %v4176_v61 }
 0x157   : > { %v4556_v15 = vpop.permute.xlu1 %1572  ;;  %v4558_v32 = vpop.permute.xlu0 %1769  ;;  %v1232_v47 = vrot.slane %v4569_v2, %v4179_v62  ;;  %v1240_v59 = vrot.slane %v4569_v2, %v4191_v4  ;;  %v1228_v21 = vrot.slane %v4569_v2, %v4176_v61  ;;  %v1236_v9 = vrot.slane %v4569_v2, %v4188_v3 }
 0x158   : > { %v1785_v22 = vsel %vm1300_vm15, %v1371_v35, %v1421_v57 }
 0x159   : > { %1209 = vrot.lane.b32.xlu1 %v1200_v7, %s3952_s22  ;;  %848 = vrot.lane.b32.xlu0 %v837_v37, %s6258_s28  ;;  %v833_v37 = vrot.slane %v4536_v16, %v4179_v62 }
 0x15b   : > { %v4571_v13 = vpop.permute.xlu1 %1767  ;;  %v4573_v27 = vpop.permute.xlu0 %1773 }
 0x15d   : > { %802 = vrot.lane.b32.xlu1 %v785_v33, %s3951_s19  ;;  %1201 = vrot.lane.b32.xlu0 %v1184_v28, %s3952_s22  ;;  %s6256_s22 = smov 118  }
 0x15f   : > { %v4582_v20 = vpop.permute.xlu1 %1771  ;;  %v4584_v7 = vpop.permute.xlu0 %1606 }
 0x161   : > { %846 = vrot.lane.b32.xlu1 %v833_v37, %s6258_s28  ;;  %1245 = vrot.lane.b32.xlu0 %v1232_v47, %s3954_s11  ;;  %v1383_v37 = vrot.slane %v4591_v0, %v4191_v4  ;;  %v1375_v47 = vrot.slane %v4591_v0, %v4179_v62  ;;  %v1824_v4 = vsel %vm1305_vm5, %v1819_v14, %v4548_v58 }
 0x163   : > { %v4598_v28 = vpop.permute.xlu1 %1604  ;;  %v4600_v33 = vpop.permute.xlu0 %1610  ;;  %v1788_v26 = vsel %vm1300_vm15, %v1383_v37, %v4397_v24  ;;  %v4642_v37 = vsel %vm6274_vm12, %v4399_v29, %v4397_v24  ;;  %v1786_v34 = vsel %vm1300_vm15, %v1375_v47, %v1422_v50  ;;  %v1775_v24 = vsel %vm1091_vm9, %v4548_v58, %v4571_v13 }
 0x164   : > { %v4666_v50 = vsel %vm6252_vm11, %v4417_v23, %v4427_v5 }
 0x165   : > { %850 = vrot.lane.b32.xlu1 %v841_v53, %s6258_s28  ;;  %1249 = vrot.lane.b32.xlu0 %v1240_v59, %s3954_s11  ;;  %v1454_v53 = vsel %vm6252_vm11, %v4406_v1, %v4419_v48  ;;  %v1455_v59 = vsel %vm6252_vm11, %v4419_v48, %v4417_v23  ;;  %v1493_v1 = vsel %vm6270_vm13, %v4425_v42, %v4435_v45  ;;  %vm1654_vm11 = vcmask 580608  }
 0x166   : > { %v1735_v48 = vsel %vm6253_vm3, %v4500_v38, %v4502_v54  ;;  %v1790_v29 = vsel %vm1305_vm5, %v1785_v22, %v1454_v53  ;;  %v1791_v38 = vsel %vm1305_vm5, %v1786_v34, %v1455_v59  ;;  %v1695_v45 = vsel %vm6271_vm4, %v4475_v51, %v4482_v36 }
 0x167   : > { %v4635_v57 = vpop.permute.xlu1 %1608  ;;  %v4637_v35 = vpop.permute.xlu0 %1644  ;;  %v1795_v58 = vsel %vm1310_vm8, %v1790_v29, %v1493_v1  ;;  %v1496_v22 = vsel %vm6270_vm13, %v4443_v55, %v4441_v49  ;;  %v1820_v23 = vsel %vm1300_vm15, %v1695_v45, %v1735_v48  ;;  %v1796_v47 = vsel %vm1310_vm8, %v1791_v38, %v1494_v60 }
 0x168   : > { %v1736_v51 = vsel %vm6253_vm3, %v4502_v54, %v4512_v10  ;;  %v1825_v1 = vsel %vm1305_vm5, %v1820_v23, %v1775_v24  ;;  %v1776_v49 = vsel %vm1091_vm9, %v4571_v13, %v4558_v32  ;;  %v1777_v60 = vsel %vm1091_vm9, %v4558_v32, %v4582_v20 }
 0x169   : > { %1243 = vrot.lane.b32.xlu1 %v1228_v21, %s3954_s11  ;;  %1849 = vrot.lane.b32.xlu0 %v1824_v4, %s3955_s29  ;;  %v1793_v21 = vsel %vm1305_vm5, %v1788_v26, %v4427_v5  ;;  %v1737_v26 = vsel %vm6253_vm3, %v4512_v10, %v4514_v11  ;;  %v1495_v5 = vsel %vm6270_vm13, %v4433_v56, %v4443_v55 }
 0x16a   : > { %v1798_v54 = vsel %vm1310_vm8, %v1793_v21, %v1496_v22  ;;  %v1535_v10 = vsel %vm1533_vm10, %v4452_v8, %v4462_v19  ;;  %v1696_v56 = vsel %vm6271_vm4, %v4482_v36, %v4484_v52  ;;  %v1697_v55 = vsel %vm6271_vm4, %v4484_v52, %v4490_v39 }
 0x16b   : > { %v1613_v4 = vpop.permute.xlu1 %1612  ;;  %v4677_v34 = vpop.permute.xlu0 %1648  ;;  %v1575_v32 = vsel %vm6273_vm6, %v4526_v31, %v4546_v30  ;;  %v1822_v59 = vsel %vm1300_vm15, %v1697_v55, %v1737_v26  ;;  %v1821_v14 = vsel %vm1300_vm15, %v1696_v56, %v1736_v51  ;;  %v1738_v36 = vsel %vm6253_vm3, %v4514_v11, %v4524_v25 }
 0x16c   : > { %v1615_v52 = vsel %vm6269_vm7, %v4584_v7, %v4635_v57  ;;  %v1826_v48 = vsel %vm1305_vm5, %v1821_v14, %v1776_v49  ;;  %v1801_v24 = vsel %vm1315_vm2, %v1796_v47, %v1535_v10  ;;  %v1778_v29 = vsel %vm1091_vm9, %v4582_v20, %v4573_v27 }
 0x16d   : > { %1247 = vrot.lane.b32.xlu1 %v1236_v9, %s3954_s11  ;;  %1851 = vrot.lane.b32.xlu0 %v1825_v1, %s3955_s29  ;;  %v1534_v9 = vsel %vm1533_vm10, %v4450_v6, %v4452_v8  ;;  %v1827_v8 = vsel %vm1305_vm5, %v1822_v59, %v1777_v60  ;;  %vm6277_vm3 = vcmask 1046528   ;;  %v1537_v25 = vsel %vm1533_vm10, %v4464_v46, %v4473_v17 }
 0x16e   : > { %v1800_v11 = vsel %vm1315_vm2, %v1795_v58, %v1534_v9  ;;  %v1698_v45 = vsel %vm6271_vm4, %v4490_v39, %v4492_v41  ;;  %v1806_v27 = vsel %vm6281_vm1, %v1801_v24, %v1575_v32  ;;  %v1574_v21 = vsel %vm6273_vm6, %v4538_v43, %v4526_v31 }
 0x16f   : > { %v1647_v13 = vpop.permute.xlu1 %1646  ;;  %v1653_v53 = vpop.permute.xlu0 %1652  ;;  %v1823_v20 = vsel %vm1300_vm15, %v1698_v45, %v1738_v36  ;;  %v1577_v58 = vsel %vm6273_vm6, %v4540_v44, %v4556_v15  ;;  %v1811_v17 = vsel %vm6279_vm0, %v1806_v27, %v1615_v52  ;;  %v1614_v39 = vsel %vm6269_vm7, %v4598_v28, %v4584_v7  ;;  %v6294_v45 = vld [vmem:[#allocation9_spill] sm:$0xff]  ;;  %v6295_v27 = vld [vmem:[#allocation11_spill] sm:$0xff] }
 0x170   : > { %v1656_v38 = vsel %vm1654_vm11, %v1647_v13, %v4677_v34  ;;  %v1617_v41 = vsel %vm6269_vm7, %v4600_v33, %v1613_v4  ;;  %v1828_v47 = vsel %vm1305_vm5, %v1823_v20, %v1778_v29  ;;  %v1803_v51 = vsel %vm1315_vm2, %v1798_v54, %v1537_v25 }
 0x171   : > { %1855 = vrot.lane.b32.xlu0 %v1827_v8, %s3955_s29  ;;  %1853 = vrot.lane.b32.xlu1 %v1826_v48, %s3955_s29  ;;  %v1816_v31 = vsel %vm6277_vm3, %v1811_v17, %v1656_v38  ;;  %v1655_v15 = vsel %vm1654_vm11, %v4637_v35, %v1647_v13  ;;  %v6293_v7 = vrot.slane %v4591_v0, %v4188_v3  ;;  %v577_v59 = vrot.slane %v4237_v40, 7 }
 0x172   : > { %v1536_v1 = vsel %vm1533_vm10, %v4462_v19, %v4464_v46  ;;  %v1805_v49 = vsel %vm6281_vm1, %v1800_v11, %v1574_v21  ;;  %v1808_v60 = vsel %vm6281_vm1, %v1803_v51, %v1577_v58  ;;  %v1576_v10 = vsel %vm6273_vm6, %v4546_v30, %v4540_v44  ;;  %v6296_v21 = vld [vmem:[#allocation6_spill] sm:$0xff] }
 0x173   : > { %v1651_v22 = vpop.permute.xlu1 %1650  ;;  %v4748_v23 = vpop.permute.xlu0 %1006  ;;  %v1787_v4 = vsel %vm1300_vm15, %v6293_v7, %v4642_v37  ;;  %v1813_v56 = vsel %vm6279_vm0, %v1808_v60, %v1617_v41  ;;  %v1810_v9 = vsel %vm6279_vm0, %v1805_v49, %v1614_v39  ;;  %v1616_v46 = vsel %vm6269_vm7, %v4635_v57, %v4600_v33 }
 0x174   : > { %v1658_v26 = vsel %vm1654_vm11, %v1651_v22, %v1653_v53  ;;  %v1792_v54 = vsel %vm1305_vm5, %v1787_v4, %v4666_v50  ;;  %v1815_v50 = vsel %vm6277_vm3, %v1810_v9, %v1655_v15  ;;  %v1657_v30 = vsel %vm1654_vm11, %v4677_v34, %v1651_v22 }
 0x175   : > { %1857 = vrot.lane.b32.xlu1 %v1828_v47, %s3955_s29  ;;  %1843 = vrot.lane.b32.xlu0 %v1816_v31, %s3955_s29  ;;  %v1797_v19 = vsel %vm1310_vm8, %v1792_v54, %v1495_v5  ;;  %v1818_v32 = vsel %vm6277_vm3, %v1813_v56, %v1658_v26  ;;  %v869_v57 = vrot.slane %v4267_v18, %v4176_v61  ;;  %v6298_v31 = vld [vmem:[#allocation10_spill] sm:$0xff]  ;;  %v6300_v56 = vld [vmem:[#allocation8_spill] sm:$0xff]  ;;  %vm1859_vm10 = vcmask 384000  }
 0x176   : > { %v1802_v44 = vsel %vm1315_vm2, %v1797_v19, %v1536_v1  ;;  %v825_v52 = vrot.slane %v4536_v16, %v4203_v12  ;;  %v877_v8 = vrot.slane %v4267_v18, %v4188_v3  ;;  %v579_v48 = vsel %vm6270_vm13, %v577_v59, %v4237_v40 }
 0x177   : > { %v4780_v55 = vpop.permute.xlu1 %1004  ;;  %v4782_v37 = vpop.permute.xlu0 %1010  ;;  %v1807_v13 = vsel %vm6281_vm1, %v1802_v44, %v1576_v10  ;;  %v581_v24 = vmul.f32 %v579_v48, %v4181_v63  ;;  %v873_v11 = vrot.slane %v4267_v18, %v4179_v62  ;;  %v1224_v16 = vrot.slane %v4569_v2, %v4203_v12 }
 0x178   : > { %v1812_v33 = vsel %vm6279_vm0, %v1807_v13, %v1616_v46  ;;  %v1420_v20 = vsel %vm6274_vm12, %v6295_v27, %v6294_v45  ;;  %v6297_v58 = vrot.slane %v4267_v18, %v6296_v21  ;;  %v1367_v2 = vrot.slane %v4591_v0, %v4203_v12 }
 0x179   : > { %1841 = vrot.lane.b32.xlu1 %v1815_v50, %s3955_s29  ;;  %1847 = vrot.lane.b32.xlu0 %v1818_v32, %s3955_s29  ;;  %v1817_v14 = vsel %vm6277_vm3, %v1812_v33, %v1657_v30  ;;  %v1272_v63 = vrot.slane %v581_v24, %v4179_v62  ;;  %v1268_v39 = vrot.slane %v581_v24, %v4176_v61  ;;  %v498_v9 = vrot.slane %v6300_v56, 7  ;;  %v3915_v50 = vld [vmem:[#allocation2] ss:$4 sm:$0x1f] }
 0x17a   : > { %v1280_v41 = vrot.slane %v581_v24, %v6296_v21  ;;  %v1784_v47 = vsel %vm1300_vm15, %v1367_v2, %v1420_v20  ;;  %v1276_v26 = vrot.slane %v581_v24, %v4188_v3  ;;  %v865_v7 = vrot.slane %v4267_v18, %v4203_v12  ;;  %v6299_v18 = vld [vmem:[#allocation7_spill] sm:$0xff] }
 0x17b   : > { %v4797_v5 = vpop.permute.xlu1 %1008  ;;  %v4799_v53 = vpop.permute.xlu0 %1046  ;;  %v1789_v51 = vsel %vm1305_vm5, %v1784_v47, %v6298_v31  ;;  %v909_v19 = vrot.slane %v6299_v18, %v4176_v61  ;;  %v500_v46 = vsel %vm6272_vm14, %v498_v9, %v6300_v56  ;;  %v917_v13 = vrot.slane %v6299_v18, %v4188_v3  ;;  %v3835_v2 = vld [vmem:[%s6216_s6 + $0x4] ss:$8 sm:$0xf] }
 0x17c   : > { %v1794_v4 = vsel %vm1310_vm8, %v1789_v51, %v4425_v42  ;;  %v913_v42 = vrot.slane %v6299_v18, %v4179_v62  ;;  %v502_v32 = vmul.f32 %v3915_v50, %v500_v46  ;;  %v905_v33 = vrot.slane %v6299_v18, %v4203_v12 }
 0x17d   : > { %1845 = vrot.lane.b32.xlu1 %v1817_v14, %s3955_s29  ;;  %884 = vrot.lane.b32.xlu0 %v869_v57, %s6256_s22  ;;  %v1799_v1 = vsel %vm1315_vm2, %v1794_v4, %v4450_v6  ;;  %v1264_v14 = vrot.slane %v581_v24, %v4203_v12  ;;  %v3838_v24 = vld [vmem:[%s6216_s6 + $0x7] ss:$8 sm:$0xf]  ;;  %v2214_v4 = vrot.slane %v3835_v2, %v4176_v61  ;;  %vm6278_vm11 = vcmask 900096  }
 0x17e   : > { %v1804_v49 = vsel %vm6281_vm1, %v1799_v1, %v4538_v43  ;;  %v2321_v20 = vrot.slane %v3838_v24, %v4203_v12  ;;  %v957_v47 = vrot.slane %v502_v32, %v4188_v3  ;;  %v3836_v1 = vld [vmem:[%s6216_s6 + $0x5] ss:$8 sm:$0xf]  ;;  %v2329_v56 = vrot.slane %v3838_v24, %v4179_v62 }
 0x17f   : > { %v4808_v34 = vpop.permute.xlu1 %1044  ;;  %v4810_v36 = vpop.permute.xlu0 %1050  ;;  %v1809_v60 = vsel %vm6279_vm0, %v1804_v49, %v4598_v28  ;;  %v2333_v9 = vrot.slane %v3838_v24, %v4188_v3  ;;  %v2250_v46 = vrot.slane %v3836_v1, %v4176_v61  ;;  %vm1131_vm7 = vcmask 506880  }
 0x180   : > { %v1814_v6 = vsel %vm6277_vm3, %v1809_v60, %v4637_v35  ;;  %v6301_v35 = vrot.slane %v6299_v18, %v6296_v21  ;;  %v945_v18 = vrot.slane %v502_v32, %v4203_v12  ;;  %vm6311_vm13 = vcmask 523264  }
 0x181   : > { %842 = vrot.lane.b32.xlu1 %v825_v52, %s6258_s28  ;;  %888 = vrot.lane.b32.xlu0 %v877_v8, %s6256_s22  ;;  %v953_v52 = vrot.slane %v502_v32, %v4179_v62  ;;  %vm6312_vm4 = vmmov %vm6311_vm13  ;;  %vm1171_vm14 = vcmask 457728   ;;  %vm1211_vm6 = vcmask 449536   ;;  %vm1251_vm12 = vcmask 441344  }
 0x183   : > { %v4821_v29 = vpop.permute.xlu1 %1048  ;;  %v4823_v38 = vpop.permute.xlu0 %1042 }
 0x185   : > { %886 = vrot.lane.b32.xlu1 %v873_v11, %s6256_s22  ;;  %1241 = vrot.lane.b32.xlu0 %v1224_v16, %s3954_s11  ;;  %s3958_s11 = smov 112   ;;  %v949_v11 = vrot.slane %v502_v32, %v4176_v61  ;;  %v961_v16 = vrot.slane %v502_v32, %v6296_v21  ;;  %v2325_v21 = vrot.slane %v3838_v24, %v4176_v61 }
 0x187   : > { %v4831_v40 = vpop.permute.xlu1 %1002  ;;  %v4833_v25 = vpop.permute.xlu0 %1085 }
 0x189   : > { %890 = vrot.lane.b32.xlu1 %v6297_v58, %s6256_s22  ;;  %1285 = vrot.lane.b32.xlu0 %v1272_v63, %s3957_s17  ;;  %v3839_v63 = vld [vmem:[%s6216_s6 + $0x20] ss:$8 sm:$0xf] }
 0x18a   : > { %v2357_v45 = vrot.slane %v3839_v63, %v4203_v12  ;;  %v2361_v27 = vrot.slane %v3839_v63, %v4176_v61  ;;  %v2365_v31 = vrot.slane %v3839_v63, %v4179_v62  ;;  %v2369_v51 = vrot.slane %v3839_v63, %v4188_v3 }
 0x18b   : > { %v4846_v22 = vpop.permute.xlu1 %1083  ;;  %v4848_v17 = vpop.permute.xlu0 %1089 }
 0x18c   : > { %v2370_v58 = vcombine.low %v2357_v45, %v2361_v27  ;;  %v2254_v27 = vrot.slane %v3836_v1, %v4179_v62 }
 0x18d   : > { %1283 = vrot.lane.b32.xlu1 %v1268_v39, %s3957_s17  ;;  %1289 = vrot.lane.b32.xlu0 %v1280_v41, %s3957_s17 }
 0x18f   : > { %v4857_v15 = vpop.permute.xlu1 %1087  ;;  %v4859_v0 = vpop.permute.xlu0 %726 }
 0x191   : > { %1287 = vrot.lane.b32.xlu1 %v1276_v26, %s3957_s17  ;;  %882 = vrot.lane.b32.xlu0 %v865_v7, %s6256_s22  ;;  %v2334_v26 = vcombine.low %v2321_v20, %v2325_v21  ;;  %v2210_v7 = vrot.slane %v3835_v2, %v4203_v12  ;;  %v2258_v20 = vrot.slane %v3836_v1, %v4188_v3 }
 0x193   : > { %v4874_v54 = vpop.permute.xlu1 %724  ;;  %v4876_v10 = vpop.permute.xlu0 %730 }
 0x195   : > { %1839 = vrot.lane.b32.xlu1 %v1814_v6, %s3955_s29  ;;  %926 = vrot.lane.b32.xlu0 %v913_v42, %s3958_s11  ;;  %s3959_s29 = smov 111   ;;  %v2371_v42 = vcombine.low %v2365_v31, %v2369_v51  ;;  %v2223_v6 = vcombine.low %v2210_v7, %v2214_v4 }
 0x197   : > { %v4885_v43 = vpop.permute.xlu1 %728  ;;  %v4887_v28 = vpop.permute.xlu0 %1123 }
 0x199   : > { %924 = vrot.lane.b32.xlu1 %v909_v19, %s3958_s11  ;;  %930 = vrot.lane.b32.xlu0 %v6301_v35, %s3958_s11  ;;  %v2246_v19 = vrot.slane %v3836_v1, %v4203_v12  ;;  %v4965_v35 = vld [vmem:[%s6216_s6 + $0x2] ss:$8 sm:$0xf] }
 0x19a   : > { %6302 = vst [vmem:[#allocation9_spill] sm:$0xff] %v4965_v35 }
 0x19b   : > { %v4898_v44 = vpop.permute.xlu1 %1081  ;;  %v4900_v30 = vpop.permute.xlu0 %1127 }
 0x19d   : > { %928 = vrot.lane.b32.xlu1 %v917_v13, %s3958_s11  ;;  %922 = vrot.lane.b32.xlu0 %v905_v33, %s3958_s11  ;;  %v2335_v13 = vcombine.low %v2329_v56, %v2333_v9  ;;  %v2218_v33 = vrot.slane %v3835_v2, %v4179_v62 }
 0x19f   : > { %v4908_v57 = vpop.permute.xlu1 %1125  ;;  %v4910_v59 = vpop.permute.xlu0 %722 }
 0x1a1   : > { %1281 = vrot.lane.b32.xlu1 %v1264_v14, %s3957_s17  ;;  %966 = vrot.lane.b32.xlu0 %v953_v52, %s3959_s29  ;;  %v2222_v14 = vrot.slane %v3835_v2, %v4188_v3  ;;  %v2259_v52 = vcombine.low %v2246_v19, %v2250_v46 }
 0x1a3   : > { %v4916_v8 = vpop.permute.xlu1 %1129  ;;  %v4918_v48 = vpop.permute.xlu0 %766  ;;  %v2224_v45 = vcombine.low %v2218_v33, %v2222_v14 }
 0x1a5   : > { %964 = vrot.lane.b32.xlu1 %v949_v11, %s3959_s29  ;;  %970 = vrot.lane.b32.xlu0 %v961_v16, %s3959_s29  ;;  %v2138_v11 = vrot.slane %v4965_v35, %v4203_v12  ;;  %v2142_v16 = vrot.slane %v4965_v35, %v4176_v61 }
 0x1a7   : > { %v4937_v39 = vpop.permute.xlu1 %764  ;;  %v4939_v41 = vpop.permute.xlu0 %770 }
 0x1a9   : > { %968 = vrot.lane.b32.xlu1 %v957_v47, %s3959_s29  ;;  %2372 = vrot.lane.b32.xlu0 %v2370_v58, %s3930_s12  ;;  %v2151_v58 = vcombine.low %v2138_v11, %v2142_v16  ;;  %v2260_v47 = vcombine.low %v2254_v27, %v2258_v20 }
 0x1ab   : > { %v4951_v49 = vpop.permute.xlu1 %768  ;;  %v4953_v60 = vpop.permute.xlu0 %1163 }
 0x1ad   : > { %962 = vrot.lane.b32.xlu1 %v945_v18, %s3959_s29  ;;  %2336 = vrot.lane.b32.xlu0 %v2334_v26, %s3931_s14 }
 0x1af   : > { %v4967_v50 = vpop.permute.xlu1 %1121  ;;  %v4969_v32 = vpop.permute.xlu0 %1167 }
 0x1b1   : > { %2374 = vrot.lane.b32.xlu1 %v2371_v42, %s3930_s12  ;;  %2225 = vrot.lane.b32.xlu0 %v2223_v6, %s3935_s23 }
 0x1b3   : > { %v4979_v63 = vpop.permute.xlu1 %1165  ;;  %v4981_v24 = vpop.permute.xlu0 %762 }
 0x1b4   : > { %6303 = vst [vmem:[#allocation11_spill] sm:$0xff] %v4981_v24 }
 0x1b5   : > { %2338 = vrot.lane.b32.xlu1 %v2335_v13, %s3931_s14  ;;  %2261 = vrot.lane.b32.xlu0 %v2259_v52, %s6286_s21 }
 0x1b7   : > { %v4987_v21 = vpop.permute.xlu1 %1169  ;;  %v4989_v2 = vpop.permute.xlu0 %806 }
 0x1b9   : > { %2227 = vrot.lane.b32.xlu1 %v2224_v45, %s3935_s23  ;;  %2153 = vrot.lane.b32.xlu0 %v2151_v58, %s3930_s12 }
 0x1bb   : > { %v4993_v31 = vpop.permute.xlu1 %804  ;;  %v4995_v51 = vpop.permute.xlu0 %810 }
 0x1bc   : > { %6304 = vst [vmem:[#allocation6_spill] sm:$0xff] %v4995_v51 }
 0x1bd   : > { %2263 = vrot.lane.b32.xlu1 %v2260_v47, %s6286_s21 }
 0x1bf   : > { %v4998_v26 = vpop.permute.xlu1 %808  ;;  %v5000_v7 = vpop.permute.xlu0 %1203 }
 0x1c3   : > { %v5002_v4 = vpop.permute.xlu1 %1161  ;;  %v5004_v1 = vpop.permute.xlu0 %1207 }
 0x1c7   : > { %v5006_v18 = vpop.permute.xlu1 %1205  ;;  %v5008_v42 = vpop.permute.xlu0 %844 }
 0x1cb   : > { %v5010_v56 = vpop.permute.xlu1 %1209  ;;  %v5012_v9 = vpop.permute.xlu0 %848 }
 0x1cc   : > { %6305 = vst [vmem:[#allocation10_spill] sm:$0xff] %v5012_v9 }
 0x1cf   : > { %v5014_v6 = vpop.permute.xlu1 %802  ;;  %v5016_v19 = vpop.permute.xlu0 %1201 }
 0x1d0   : > { %6306 = vst [vmem:[#allocation7_spill] sm:$0xff] %v5014_v6 }
 0x1d3   : > { %v5018_v46 = vpop.permute.xlu1 %846  ;;  %v5020_v13 = vpop.permute.xlu0 %1245 }
 0x1d7   : > { %v5022_v33 = vpop.permute.xlu1 %850  ;;  %v5024_v14 = vpop.permute.xlu0 %1249 }
 0x1d8   : > { %6307 = vst [vmem:[#allocation8_spill] sm:$0xff] %v5022_v33 }
 0x1db   : > { %v5026_v52 = vpop.permute.xlu1 %1243  ;;  %v1850_v11 = vpop.permute.xlu0 %1849 }
 0x1df   : > { %v5028_v16 = vpop.permute.xlu1 %1247  ;;  %v1852_v45 = vpop.permute.xlu0 %1851 }
 0x1e0   : > { %v1864_v47 = vsel %vm1859_vm10, %v1850_v11, %v1852_v45 }
 0x1e3   : > { %v1854_v27 = vpop.permute.xlu1 %1853  ;;  %v1856_v20 = vpop.permute.xlu0 %1855 }
 0x1e4   : > { %v1865_v58 = vsel %vm1859_vm10, %v1852_v45, %v1854_v27  ;;  %v1866_v9 = vsel %vm1859_vm10, %v1854_v27, %v1856_v20 }
 0x1e5   : > { %3826 = vmatprep.subr.msk.mxu0 %vm1310_vm8, %v1865_v58 }
 0x1e6   : > { %3827 = vmatpush1.msk.msra.mxu0 %vm1310_vm8, %v1864_v47 }
 0x1e7   : > { %v1858_v35 = vpop.permute.xlu1 %1857  ;;  %v1844_v6 = vpop.permute.xlu0 %1843 }
 0x1e8   : > { %v1867_v33 = vsel %vm1859_vm10, %v1856_v20, %v1858_v35 }
 0x1e9   : > { %3829 = vmatprep.subr.msk.mxu1 %vm1310_vm8, %v1867_v33 }
 0x1ea   : > { %3830 = vmatpush1.msk.msra.mxu1 %vm1310_vm8, %v1866_v9 }
 0x1eb   : > { %v5038_v51 = vpop.permute.xlu1 %1841  ;;  %v1848_v24 = vpop.permute.xlu0 %1847 }
 0x1ec   : > { %v1861_v58 = vsel %vm1859_vm10, %v5038_v51, %v1844_v6 }
 0x1ed   : > { %1911 = vmatprep.subr.mxu0 %v1861_v58  ;;  %v1053_v58 = vsel %vm6311_vm13, %v4808_v34, %v4799_v53  ;;  %vm6314_vm13 = vmmov %vm6312_vm4 }
 0x1ef   : > { %v1846_v11 = vpop.permute.xlu1 %1845  ;;  %v5042_v45 = vpop.permute.xlu0 %884 }
 0x1f0   : > { %6308 = vst [vmem:[#allocation12_spill] sm:$0xff] %v5042_v45  ;;  %v1863_v47 = vsel %vm1859_vm10, %v1846_v11, %v1848_v24  ;;  %v1862_v35 = vsel %vm1859_vm10, %v1844_v6, %v1846_v11  ;;  %v1054_v24 = vsel %vm6312_vm4, %v4799_v53, %v4821_v29  ;;  %v1016_v53 = vsel %vm6278_vm11, %v4797_v5, %v4782_v37 }
 0x1f1   : > { %1982 = vmatprep.subr.mxu1 %v1863_v47  ;;  %v1014_v47 = vsel %vm6278_vm11, %v4780_v55, %v4748_v23  ;;  %vm6280_vm4 = vcmask 392192   ;;  %v1135_v37 = vsel %vm1131_vm7, %v4900_v30, %v4916_v8  ;;  %v1214_v8 = vsel %vm1211_vm6, %v5006_v18, %v5004_v1 }
 0x1f2   : > { %1983 = vmatpush1.msra.mxu1 %v1862_v35  ;;  %v1015_v35 = vsel %vm6278_vm11, %v4748_v23, %v4797_v5  ;;  %v1336_v23 = vsel %vm1300_vm15, %v1014_v47, %v1053_v58 }
 0x1f3   : > { %v5046_v33 = vpop.permute.xlu1 %842  ;;  %v5048_v27 = vpop.permute.xlu0 %888  ;;  %v1337_v45 = vsel %vm1300_vm15, %v1015_v35, %v1054_v24 }
 0x1f4   : > { %6309 = vst [vmem:[#allocation13_spill] sm:$0xff] %v5046_v33  ;;  %6310 = vst [vmem:[#allocation14_spill] sm:$0xff] %v5048_v27  ;;  %v1055_v33 = vsel %vm6314_vm13, %v4821_v29, %v4810_v36  ;;  %v1095_v27 = vsel %vm1091_vm9, %v4857_v15, %v4848_v17  ;;  %v1134_v36 = vsel %vm1131_vm7, %v4908_v57, %v4900_v30  ;;  %vm772_vm13 = vcmask 1031168  }
 0x1f5   : > { %v1338_v5 = vsel %vm1300_vm15, %v1016_v53, %v1055_v33  ;;  %v1093_v29 = vsel %vm1091_vm9, %v4846_v22, %v4833_v25  ;;  %v1174_v17 = vsel %vm1171_vm14, %v4979_v63, %v4969_v32  ;;  %v1213_v53 = vsel %vm1211_vm6, %v5000_v7, %v5006_v18 }
 0x1f6   : > { %v1342_v30 = vsel %vm1305_vm5, %v1338_v5, %v1095_v27  ;;  %v1133_v27 = vsel %vm1131_vm7, %v4887_v28, %v4908_v57  ;;  %v429_v57 = vld [vmem:[#allocation2] ss:$4 sm:$0xf] }
 0x1f7   : > { %v5050_v9 = vpop.permute.xlu1 %886  ;;  %v5052_v20 = vpop.permute.xlu0 %1241  ;;  %v1346_v35 = vsel %vm1310_vm8, %v1342_v30, %v1135_v37  ;;  %v430_v37 = vld [vmem:[%s6215_s5] ss:$8 sm:$0xf] }
 0x1fb   : > { %v5060_v6 = vpop.permute.xlu1 %890  ;;  %v1286_v11 = vpop.permute.xlu0 %1285 }
 0x1fc   : > { %6313 = vst [vmem:[#allocation15_spill] sm:$0xff] %v5060_v6  ;;  %v1094_v6 = vsel %vm1091_vm9, %v4833_v25, %v4857_v15  ;;  %v1175_v15 = vsel %vm1171_vm14, %v4969_v32, %v4987_v21  ;;  %v1215_v25 = vsel %vm1211_vm6, %v5004_v1, %v5010_v56  ;;  %v1254_v32 = vsel %vm1251_vm12, %v5020_v13, %v5028_v16 }
 0x1fd   : > { %v1341_v47 = vsel %vm1305_vm5, %v1337_v45, %v1094_v6  ;;  %v1255_v21 = vsel %vm1251_vm12, %v5028_v16, %v5024_v14  ;;  %v1340_v45 = vsel %vm1305_vm5, %v1336_v23, %v1093_v29  ;;  %v1350_v56 = vsel %vm1315_vm2, %v1346_v35, %v1175_v15 }
 0x1fe   : > { %v1345_v33 = vsel %vm1310_vm8, %v1341_v47, %v1134_v36  ;;  %v1173_v6 = vsel %vm1171_vm14, %v4953_v60, %v4979_v63  ;;  %v1354_v16 = vsel %vm6281_vm1, %v1350_v56, %v1215_v25  ;;  %v1253_v15 = vsel %vm1251_vm12, %v5026_v52, %v5020_v13 }
 0x1ff   : > { %v5098_v58 = vpop.permute.xlu1 %1283  ;;  %v1290_v24 = vpop.permute.xlu0 %1289  ;;  %v1349_v1 = vsel %vm1315_vm2, %v1345_v33, %v1174_v17  ;;  %v1358_v29 = vsel %vm6279_vm0, %v1354_v16, %v1255_v21  ;;  %v1344_v17 = vsel %vm1310_vm8, %v1340_v45, %v1133_v27 }
 0x200   : > { %v1353_v14 = vsel %vm6281_vm1, %v1349_v1, %v1214_v8  ;;  %v1348_v8 = vsel %vm1315_vm2, %v1344_v17, %v1173_v6  ;;  %v1293_v25 = vsel %vm6280_vm4, %v5098_v58, %v1286_v11  ;;  %v6321_v17 = vld [vmem:[#allocation12_spill] sm:$0xff] }
 0x201   : > { %v1357_v18 = vsel %vm6279_vm0, %v1353_v14, %v1254_v32  ;;  %v1352_v33 = vsel %vm6281_vm1, %v1348_v8, %v1213_v53 }
 0x202   : > { %v1356_v21 = vsel %vm6279_vm0, %v1352_v33, %v1253_v15  ;;  %vm852_vm0 = vcmask 973824   ;;  %v6325_v33 = vld [vmem:[#allocation11_spill] sm:$0xff] }
 0x203   : > { %v1288_v23 = vpop.permute.xlu1 %1287  ;;  %v5130_v36 = vpop.permute.xlu0 %882  ;;  %v1360_v45 = vsel %vm6277_vm3, %v1356_v21, %v1293_v25 }
 0x204   : > { %v1294_v5 = vsel %vm6280_vm4, %v1286_v11, %v1288_v23  ;;  %v1295_v63 = vsel %vm6280_vm4, %v1288_v23, %v1290_v24  ;;  %v431_v24 = vmul.f32 %v430_v37, %v429_v57  ;;  %v1013_v11 = vsel %vm6278_vm11, %v4831_v40, %v4780_v55 }
 0x205   : > { %v1362_v47 = vsel %vm6277_vm3, %v1358_v29, %v1295_v63  ;;  %v1361_v30 = vsel %vm6277_vm3, %v1357_v18, %v1294_v5  ;;  %vm812_vm3 = vcmask 982016   ;;  %vm6316_vm11 = vcmask 523264  }
 0x206   : > { %1984 = vmatprep.subr.mxu1 %v1362_v47  ;;  %v688_v27 = vrot.slane %v431_v24, %v4176_v61  ;;  %v692_v1 = vrot.slane %v431_v24, %v4179_v62  ;;  %v696_v56 = vrot.slane %v431_v24, %v4188_v3  ;;  %v684_v14 = vrot.slane %v431_v24, %v4203_v12 }
 0x207   : > { %v1840_v35 = vpop.permute.xlu1 %1839  ;;  %1985 = vmatpush1.msra.mxu1 %v1361_v30  ;;  %v5149_v32 = vpop.permute.xlu0 %926  ;;  %v1052_v55 = vsel %vm6316_vm11, %v4823_v38, %v4808_v34  ;;  %v1092_v40 = vsel %vm1091_vm9, %v4898_v44, %v4846_v22  ;;  %vm892_vm4 = vcmask 965632   ;;  %v1132_v34 = vsel %vm1131_vm7, %v4967_v50, %v4887_v28 }
 0x208   : > { %v1860_v13 = vsel %vm1859_vm10, %v1840_v35, %v5038_v51  ;;  %vm6315_vm10 = vcmask 1039360   ;;  %v1335_v16 = vsel %vm1300_vm15, %v1013_v11, %v1052_v55  ;;  %v1172_v44 = vsel %vm1171_vm14, %v5002_v4, %v4953_v60  ;;  %v6326_v35 = vld [vmem:[#allocation6_spill] sm:$0xff]  ;;  %v6330_v55 = vld [vmem:[#allocation15_spill] sm:$0xff] }
 0x209   : > { %1912 = vmatpush1.msra.mxu0 %v1860_v13  ;;  %v734_v51 = vsel %vm6315_vm10, %v4874_v54, %v4859_v0  ;;  %vm6317_vm1 = vmmov %vm6315_vm10  ;;  %vm932_vm11 = vcmask 916480   ;;  %v1212_v28 = vsel %vm1211_vm6, %v5016_v19, %v5000_v7  ;;  %v1252_v50 = vsel %vm1251_vm12, %v5052_v20, %v5026_v52  ;;  %v6327_v11 = vld [vmem:[#allocation10_spill] sm:$0xff] }
 0x20a   : > { %1913 = vmatprep.subr.mxu0 %v1360_v45  ;;  %v735_v23 = vsel %vm6317_vm1, %v4859_v0, %v4885_v43  ;;  %vm6318_vm10 = vmmov %vm6317_vm1  ;;  %v1302_v38 = vsel %vm1300_vm15, %v688_v27, %v734_v51  ;;  %v775_v5 = vsel %vm772_vm13, %v4918_v48, %v4951_v49  ;;  %v814_v7 = vsel %vm812_vm3, %v4993_v31, %v4989_v2 }
 0x20b   : > { %v5161_v6 = vpop.permute.xlu1 %924  ;;  %v5163_v53 = vpop.permute.xlu0 %930  ;;  %v736_v57 = vsel %vm6318_vm10, %v4885_v43, %v4876_v10  ;;  %vm6319_vm9 = vmmov %vm6317_vm1  ;;  %v1339_v10 = vsel %vm1305_vm5, %v1335_v16, %v1092_v40  ;;  %v774_v43 = vsel %vm772_vm13, %v4937_v39, %v4918_v48  ;;  %vm972_vm1 = vcmask 908288  }
 0x20c   : > { %v733_v22 = vsel %vm6319_vm9, %v4910_v59, %v4874_v54  ;;  %v1303_v54 = vsel %vm1300_vm15, %v692_v1, %v735_v23  ;;  %v1304_v59 = vsel %vm1300_vm15, %v696_v56, %v736_v57  ;;  %v1343_v60 = vsel %vm1310_vm8, %v1339_v10, %v1132_v34  ;;  %v6328_v1 = vld [vmem:[#allocation8_spill] sm:$0xff] }
 0x20d   : > { %v1301_v4 = vsel %vm1300_vm15, %v684_v14, %v733_v22  ;;  %v1347_v19 = vsel %vm1315_vm2, %v1343_v60, %v1172_v44  ;;  %v1307_v63 = vsel %vm1305_vm5, %v1302_v38, %v774_v43  ;;  %v776_v29 = vsel %vm772_vm13, %v4951_v49, %v4939_v41  ;;  %v6329_v14 = vld [vmem:[#allocation14_spill] sm:$0xff]  ;;  %v6333_v22 = vld [vmem:[#allocation7_spill] sm:$0xff] }
 0x20e   : > { %vm6320_vm6 = vcmask 1044480   ;;  %v854_v20 = vsel %vm852_vm0, %v5008_v42, %v5018_v46  ;;  %v815_v48 = vsel %vm812_vm3, %v4989_v2, %v4998_v26  ;;  %v894_v15 = vsel %vm892_vm4, %v6321_v17, %v5050_v9 }
 0x20f   : > { %v929_v0 = vpop.permute.xlu1 %928  ;;  %v5192_v37 = vpop.permute.xlu0 %922  ;;  %v1351_v52 = vsel %vm6320_vm6, %v1347_v19, %v1212_v28  ;;  %vm6322_vm7 = vcmask 392192   ;;  %vm6323_vm12 = vcmask 1045504   ;;  %v1308_v49 = vsel %vm1305_vm5, %v1303_v54, %v775_v5  ;;  %v6334_v28 = vld [vmem:[#allocation13_spill] sm:$0xff] }
 0x210   : > { %v1355_v41 = vsel %vm6323_vm12, %v1351_v52, %v1252_v50  ;;  %v1312_v30 = vsel %vm1310_vm8, %v1307_v63, %v814_v7  ;;  %v934_v8 = vsel %vm932_vm11, %v5161_v6, %v5149_v32  ;;  %vm6324_vm10 = vcmask 1046528   ;;  %v1872_v63 = vld [vmem:[%s6212_s2] sm:$0x1] }
 0x211   : > { %vm1873_vm9 = vcmask 220160   ;;  %v1309_v24 = vsel %vm1305_vm5, %v1304_v59, %v776_v29  ;;  %v816_v13 = vsel %vm812_vm3, %v4998_v26, %v6326_v35  ;;  %v1317_v21 = vsel %vm1315_vm2, %v1312_v30, %v854_v20 }
 0x212   : > { %v1313_v45 = vsel %vm1310_vm8, %v1308_v49, %v815_v48  ;;  %v855_v27 = vsel %vm852_vm0, %v5018_v46, %v6327_v11  ;;  %v856_v56 = vsel %vm852_vm0, %v6327_v11, %v6328_v1  ;;  %v1322_v51 = vsel %vm6320_vm6, %v1317_v21, %v894_v15  ;;  %v3834_v49 = vld [vmem:[%s6216_s6 + $0x3] ss:$8 sm:$0xf] }
 0x213   : > { %v1282_v18 = vpop.permute.xlu1 %1281  ;;  %v967_v25 = vpop.permute.xlu0 %966  ;;  %v895_v26 = vsel %vm892_vm4, %v5050_v9, %v6329_v14  ;;  %v896_v40 = vsel %vm892_vm4, %v6329_v14, %v6330_v55  ;;  %v1314_v46 = vsel %vm1310_vm8, %v1309_v24, %v816_v13  ;;  %v935_v57 = vsel %vm932_vm11, %v5149_v32, %v929_v0 }
 0x214   : > { %v1292_v47 = vsel %vm6322_vm7, %v1282_v18, %v5098_v58  ;;  %v773_v58 = vsel %vm772_vm13, %v6325_v33, %v4937_v39  ;;  %vm6331_vm7 = vmmov %vm6323_vm12  ;;  %v936_v34 = vsel %vm932_vm11, %v929_v0, %v5163_v53  ;;  %v813_v44 = vsel %vm812_vm3, %v6333_v22, %v4993_v31 }
 0x215   : > { %v1359_v2 = vsel %vm6324_vm10, %v1355_v41, %v1292_v47  ;;  %v1327_v23 = vsel %vm6331_vm7, %v1322_v51, %v934_v8  ;;  %vm6332_vm12 = vmmov %vm6324_vm10  ;;  %v1306_v9 = vsel %vm1305_vm5, %v1301_v4, %v773_v58  ;;  %v1318_v10 = vsel %vm1315_vm2, %v1313_v45, %v855_v27  ;;  %v6344_v45 = vld [vmem:[#allocation4_spill] sm:$0xff] }
 0x216   : > { %1914 = vmatpush1.msra.mxu0 %v1359_v2  ;;  %v1319_v43 = vsel %vm1315_vm2, %v1314_v46, %v856_v56  ;;  %v853_v32 = vsel %vm852_vm0, %v6334_v28, %v5008_v42  ;;  %vm6335_vm10 = vmmov %vm6320_vm6  ;;  %v893_v0 = vsel %vm892_vm4, %v5130_v36, %v6321_v17  ;;  %v1311_v42 = vsel %vm1310_vm8, %v1306_v9, %v813_v44  ;;  %v6342_v17 = vld [vmem:[#allocation9_spill] sm:$0xff] }
 0x217   : > { %v965_v39 = vpop.permute.xlu1 %964  ;;  %v1323_v54 = vsel %vm6335_vm10, %v1318_v10, %v895_v26  ;;  %v1324_v53 = vsel %vm6320_vm6, %v1319_v43, %v896_v40  ;;  %v971_v59 = vpop.permute.xlu0 %970  ;;  %vm6336_vm5 = vmmov %vm6331_vm7  ;;  %v933_v7 = vsel %vm932_vm11, %v5192_v37, %v5161_v6  ;;  %v1316_v29 = vsel %vm1315_vm2, %v1311_v42, %v853_v32  ;;  %v6343_v2 = vld [vmem:[#allocation5_spill] sm:$0xff]  ;;  %v5363_v42 = vld [vmem:[#allocation2 + $0x14] sm:$0xf] }
 0x218   : > { %v974_v16 = vsel %vm972_vm1, %v965_v39, %v967_v25  ;;  %v1329_v4 = vsel %vm6336_vm5, %v1324_v53, %v936_v34  ;;  %vm6337_vm7 = vmmov %vm6336_vm5  ;;  %v1321_v52 = vsel %vm6320_vm6, %v1316_v29, %v893_v0  ;;  %v6341_v48 = vmov 0.0   ;;  %v3832_v27 = vld [vmem:[%s6216_s6 + $0x1] ss:$8 sm:$0xf] }
 0x219   : > { %v1332_v38 = vsel %vm6332_vm12, %v1327_v23, %v974_v16  ;;  %v1328_v5 = vsel %vm6337_vm7, %v1323_v54, %v935_v57  ;;  %vm6338_vm10 = vmmov %vm6332_vm12  ;;  %v2146_v15 = vrot.slane %v6342_v17, %v4179_v62  ;;  %v2150_v47 = vrot.slane %v6342_v17, %v4188_v3  ;;  %v3837_v57 = vld [vmem:[%s6216_s6 + $0x6] ss:$8 sm:$0xf]  ;;  %v2061_v28 = vld [vmem:[%s6216_s6] ss:$8 sm:$0xf] }
 0x21a   : > { %1915 = vmatprep.subr.mxu0 %v1332_v38  ;;  %vm6339_vm8 = vmmov %vm6336_vm5  ;;  %v2174_v30 = vrot.slane %v3834_v49, %v4203_v12  ;;  %v2178_v8 = vrot.slane %v3834_v49, %v4176_v61  ;;  %v5317_v24 = vcombine.high %v6343_v2, %v6343_v2  ;;  %v2182_v35 = vrot.slane %v3834_v49, %v4179_v62 }
 0x21b   : > { %v969_v60 = vpop.permute.xlu1 %968  ;;  %v1326_v6 = vsel %vm6339_vm8, %v1321_v52, %v933_v7  ;;  %vm6340_vm5 = vmmov %vm6338_vm10  ;;  %v2152_v41 = vcombine.low %v2146_v15, %v2150_v47  ;;  %v2186_v13 = vrot.slane %v3834_v49, %v4188_v3  ;;  %v5325_v11 = vcombine.high %v6344_v45, %v6344_v45  ;;  %v5374_v52 = vpop.permute.xlu0 %2372 }
 0x21c   : > { %v975_v31 = vsel %vm972_vm1, %v967_v25, %v969_v60  ;;  %v976_v50 = vsel %vm972_vm1, %v969_v60, %v971_v59  ;;  %v2187_v25 = vcombine.low %v2174_v30, %v2178_v8  ;;  %v2102_v26 = vrot.slane %v3832_v27, %v4203_v12 }
 0x21d   : > { %v1334_v19 = vsel %vm6332_vm12, %v1329_v4, %v976_v50  ;;  %v1333_v36 = vsel %vm6338_vm10, %v1328_v5, %v975_v31  ;;  %2155 = vrot.lane.b32.xlu1 %v2152_v41, %s3930_s12  ;;  %v2188_v14 = vcombine.low %v2182_v35, %v2186_v13  ;;  %v2106_v55 = vrot.slane %v3832_v27, %v4176_v61  ;;  %s6345_s12 = smov 1  }
 0x21e   : > { %1986 = vmatprep.subr.mxu1 %v1334_v19  ;;  %2189 = vrot.lane.b32.xlu0 %v2187_v25, %s6288_s26  ;;  %v2110_v23 = vrot.slane %v3832_v27, %v4179_v62  ;;  %v2114_v46 = vrot.slane %v3832_v27, %v4188_v3  ;;  %v2285_v9 = vrot.slane %v3837_v57, %v4203_v12  ;;  %vm6347_vm7 = vcmask 1044040  }
 0x21f   : > { %v963_v20 = vpop.permute.xlu1 %962  ;;  %1987 = vmatpush1.msra.mxu1 %v1333_v36  ;;  %v2115_v38 = vcombine.low %v2102_v26, %v2106_v55  ;;  %v2289_v22 = vrot.slane %v3837_v57, %v4176_v61  ;;  %v2293_v10 = vrot.slane %v3837_v57, %v4179_v62  ;;  %v2297_v43 = vrot.slane %v3837_v57, %v4188_v3 }
 0x220   : > { %v973_v18 = vsel %vm972_vm1, %v963_v20, %v965_v39  ;;  %3831 = vmatmul.mubr.msk.f32.vlgmr.msra.gmra.mxu1 %vm1873_vm9, %v1872_v63  ;;  %v2116_v44 = vcombine.low %v2110_v23, %v2114_v46  ;;  %v2066_v53 = vrot.slane %v2061_v28, %v4203_v12  ;;  %v2070_v0 = vrot.slane %v2061_v28, %v4176_v61  ;;  %v5376_v20 = vpop.permute.xlu0 %2336 }
 0x221   : > { %v1331_v37 = vsel %vm6340_vm5, %v1326_v6, %v973_v18  ;;  %2840 = vmatprep.mubr.f32.mxu1 %v6341_v48  ;;  %v2298_v54 = vcombine.low %v2285_v9, %v2289_v22  ;;  %v2299_v59 = vcombine.low %v2293_v10, %v2297_v43  ;;  %v2074_v60 = vrot.slane %v2061_v28, %v4179_v62 }
 0x222   : > { %1916 = vmatpush1.msra.mxu0 %v1331_v37  ;;  %v2078_v31 = vrot.slane %v2061_v28, %v4188_v3  ;;  %v2079_v50 = vcombine.low %v2066_v53, %v2070_v0  ;;  %vm6350_vm10 = vcmask 596992   ;;  %vm6352_vm8 = vcmask 662528  }
 0x223   : > { %3828 = vmatmul.mubr.msk.f32.vlgmr.msra.gmra.mxu0 %vm1873_vm9, %v1872_v63  ;;  %v2375_v32 = vpop.permute.xlu1 %2374  ;;  %vm6346_vm9 = vcmask 592896   ;;  %vm6351_vm6 = vmmov %vm6350_vm10  ;;  %vm6353_vm5 = vcmask 138240  }
 0x224   : > { %2769 = vmatprep.mubr.f32.mxu0 %v6341_v48  ;;  %v2080_v5 = vcombine.low %v2074_v60, %v2078_v31  ;;  %v2377_v7 = vrot.slane %v2375_v32, 4  ;;  %v2226_v18 = vpop.permute.xlu0 %2225 }
 0x225   : > { %v2229_v26 = vrot.slane %v2226_v18, 4 }
 0x226   : > { %v2386_v36 = vmul.f32 %v2377_v7, %v5363_v42 }
 0x227   : > { %v5360_v4 = vpop.permute.xlu1 %2338 }
 0x228   : > { %v2341_v19 = vrot.slane %v5360_v4, 4  ;;  %v5378_v37 = vpop.permute.xlu0 %2261 }
 0x22a   : > { %v2350_v63 = vmul.f32 %v2341_v19, %v5363_v42 }
 0x22b   : > { %v2228_v6 = vpop.permute.xlu1 %2227 }
 0x22c   : > { %v2527_v29 = vcombine.low %v2350_v63, %v2350_v63  ;;  %v2154_v15 = vpop.permute.xlu0 %2153 }
 0x22d   : > { %v2157_v28 = vrot.slane %v2154_v15, 4 }
 0x22f   : > { %v5380_v17 = vpop.permute.xlu1 %2263 }
 0x230   : > { %v2266_v10 = vrot.slane %v5380_v17, 4 }
 0x28f   : > { %v2156_v47 = vpop.permute.xlu1 %2155 }
 0x290   : > { %v5382_v41 = vpop.permute.xlu0 %2189 }
 0x2e0   : > { %v2022_v33 = vpop.f32.mrf.mxu1 }
 0x2e1   : > { %v2033_v58 = vsel %vm1300_vm15, %v2022_v33, %v6343_v2 }
 0x2e2   : > { %v2024_v21 = vpop.f32.mrf.mxu1 }
 0x2e3   : > { %v2034_v1 = vsel %vm1300_vm15, %v2024_v21, %v5317_v24  ;;  %v1951_v56 = vpop.f32.mrf.mxu0  ;;  %v2230_v21 = vrot.slane %v2228_v6, 4 }
 0x2e4   : > { %v2040_v51 = vcombine.low %v2033_v58, %v2034_v1  ;;  %v2031_v40 = vsel %vm1300_vm15, %v1951_v56, %v6344_v45  ;;  %v2265_v1 = vrot.slane %v5378_v37, 4 }
 0x2e5   : > { %v1953_v39 = vpop.f32.mrf.mxu0  ;;  %v2232_v9 = vsel %vm1315_vm2, %v2229_v26, %v2230_v21 }
 0x2e6   : > { %v2032_v16 = vsel %vm1300_vm15, %v1953_v39, %v5325_v11  ;;  %2043 = vrot.lane.b32.xlu1 %v2040_v51, %s3935_s23  ;;  %vm2053_vm15 = vcmask 1047556   ;;  %v2376_v51 = vrot.slane %v5374_v52, 4  ;;  %v2158_v39 = vrot.slane %v2156_v47, 4 }
 0x2e7   : > { %v2039_v34 = vcombine.low %v2031_v40, %v2032_v16  ;;  %vm5386_vm12 = vmor %vm2053_vm15, %vm6347_vm7  ;;  %v2267_v55 = vsel %vm6352_vm8, %v2265_v1, %v5378_v37  ;;  %vm6356_vm7 = vcmask 531456  }
 0x2e8   : > { %v2379_v40 = vsel %vm1315_vm2, %v2376_v51, %v2377_v7  ;;  %vm6354_vm15 = vmmov %vm6351_vm6 }
 0x2e9   : > { %2041 = vrot.lane.b32.xlu0 %v2039_v34, %s3935_s23  ;;  %v2380_v57 = vsel %vm6353_vm5, %v2379_v40, %v2375_v32  ;;  %v2231_v34 = vsel %vm6354_vm15, %v2229_v26, %v2226_v18  ;;  %v2340_v18 = vrot.slane %v5376_v20, 4  ;;  %vm6359_vm8 = vmmov %vm6353_vm5 }
 0x2ea   : > { %2191 = vrot.lane.b32.xlu1 %v2188_v14, %s6288_s26 }
 0x2ed   : > { %2117 = vrot.lane.b32.xlu0 %v2115_v38, %s3931_s14  ;;  %v2193_v38 = vrot.slane %v5382_v41, 4 }
 0x2ee   : > { %2119 = vrot.lane.b32.xlu1 %v2116_v44, %s3931_s14  ;;  %s6378_s14 = smov 74  }
 0x2ef   : > { %v2195_v32 = vsel %vm6356_vm7, %v2193_v38, %v5382_v41  ;;  %vm6363_vm7 = vcmask 662528  }
 0x2f1   : > { %2300 = vrot.lane.b32.xlu0 %v2298_v54, %s6345_s12 }
 0x2f2   : > { %2302 = vrot.lane.b32.xlu1 %v2299_v59, %s6345_s12 }
 0x2f5   : > { %2081 = vrot.lane.b32.xlu0 %v2079_v50, %s6345_s12 }
 0x2f6   : > { %2083 = vrot.lane.b32.xlu1 %v2080_v5, %s6345_s12  ;;  %v2160_v5 = vsel %vm1315_vm2, %v2157_v28, %v2158_v39  ;;  %s6409_s12 = smov 118  }
 0x2fa   : > { %2560 = vrot.lane.b32.xlu1 %v2386_v36, %s3958_s11 }
 0x2fe   : > { %2536 = vrot.lane.b32.xlu1 %v2527_v29, %s3951_s19 }
 0x358   : > { %v2044_v49 = vpop.permute.xlu1 %2043 }
 0x359   : > { %v2046_v30 = vrot.slane %v2044_v49, 4 }
 0x35b   : > { %2057 = vst.msk [vmem:[#allocation2 + $0x10] sm:$0xf] %vm6346_vm9, %v2046_v30  ;;  %v2042_v8 = vpop.permute.xlu0 %2041  ;;  %vm6355_vm9 = vmmov %vm6351_vm6 }
 0x35c   : > { %v2045_v33 = vrot.slane %v2042_v8, 4  ;;  %v2233_v43 = vsel %vm6355_vm9, %v2232_v9, %v2228_v6  ;;  %v2192_v31 = vpop.permute.xlu1 %2191  ;;  %v2161_v6 = vsel %vm6359_vm8, %v2160_v5, %v2156_v47  ;;  %v2343_v47 = vsel %vm1315_vm2, %v2340_v18, %v2341_v19  ;;  %vm6362_vm9 = vmmov %vm6359_vm8 }
 0x35d   : > { %v2194_v29 = vrot.slane %v2192_v31, 4  ;;  %v2378_v19 = vsel %vm6362_vm9, %v2376_v51, %v5374_v52  ;;  %vm6366_vm8 = vcmask 7168   ;;  %vm6369_vm9 = vcmask 523264  }
 0x35e   : > { %v2047_v58 = vsel %vm6350_vm10, %v2045_v33, %v2042_v8  ;;  %v2048_v35 = vsel %vm1315_vm2, %v2045_v33, %v2046_v30  ;;  %vm6357_vm10 = vmmov %vm6353_vm5 }
 0x35f   : > { %v5393_v13 = vsel %vm6351_vm6, %v2048_v35, %v2044_v49  ;;  %2055 = vst.msk [vmem:[#allocation2] sm:$0xff] %vm5386_vm12, %v2047_v58  ;;  %v2118_v54 = vpop.permute.xlu0 %2117  ;;  %v2159_v60 = vsel %vm6357_vm10, %v2157_v28, %v2154_v15  ;;  %vm6358_vm6 = vcmask 72704   ;;  %vm6364_vm10 = vcmask 531456  }
 0x360   : > { %2056 = vst [vmem:[#allocation2 + $0x8] sm:$0xff] %v5393_v13  ;;  %v5436_v53 = vmul.f32 %v2233_v43, %v5393_v13  ;;  %v2121_v50 = vrot.slane %v2118_v54, 4  ;;  %v5456_v49 = vmul.f32 %v2161_v6, %v5393_v13  ;;  %vm6360_vm5 = vmmov %vm6358_vm6 }
 0x361   : > { %v2342_v8 = vsel %vm6360_vm5, %v2340_v18, %v5376_v20  ;;  %vm6361_vm15 = vmmov %vm6360_vm5  ;;  %v2120_v20 = vpop.permute.xlu1 %2119 }
 0x362   : > { %v5398_v27 = vld [vmem:[#allocation2 + $0x10] sm:$0xf]  ;;  %v2123_v63 = vsel %vm6358_vm6, %v2121_v50, %v2118_v54  ;;  %v2344_v35 = vsel %vm6361_vm15, %v2343_v47, %v5360_v4  ;;  %v2196_v4 = vsel %vm1315_vm2, %v2193_v38, %v2194_v29  ;;  %v2122_v40 = vrot.slane %v2120_v20, 4  ;;  %vm6365_vm6 = vmmov %vm6360_vm5 }
 0x363   : > { %v2239_v56 = vmul.f32 %v2230_v21, %v5398_v27  ;;  %v2167_v16 = vmul.f32 %v2158_v39, %v5398_v27  ;;  %v2275_v59 = vmul.f32 %v2266_v10, %v5398_v27  ;;  %v2203_v15 = vmul.f32 %v2194_v29, %v5398_v27  ;;  %vm6367_vm5 = vmmov %vm6366_vm8 }
 0x364   : > { %v2268_v39 = vsel %vm1315_vm2, %v2265_v1, %v2266_v10  ;;  %v2197_v37 = vsel %vm6364_vm10, %v2196_v4, %v2192_v31  ;;  %v2124_v1 = vsel %vm1315_vm2, %v2121_v50, %v2122_v40  ;;  %vm6368_vm15 = vmmov %vm6367_vm5 }
 0x365   : > { %2480 = vrot.lane.b32.xlu1 %v2239_v56, %s3950_s25  ;;  %v2496_v7 = vcombine.low %v2275_v59, %v2275_v59  ;;  %v2447_v33 = vcombine.low %v2203_v15, %v2203_v15  ;;  %v2202_v51 = vmul.f32 %v2197_v37, %v5393_v13  ;;  %v2303_v38 = vpop.permute.xlu1 %2302 }
 0x366   : > { %v5403_v14 = vld [vmem:[#allocation2] sm:$0xff] }
 0x367   : > { %v2273_v23 = vmul.f32 %v2267_v55, %v5403_v14  ;;  %v5413_v46 = vld [vmem:[#allocation2 + $0xc] sm:$0xff]  ;;  %v5425_v44 = vmul.f32 %v2231_v34, %v5403_v14  ;;  %v2201_v0 = vmul.f32 %v2195_v32, %v5403_v14  ;;  %v2165_v36 = vmul.f32 %v2159_v60, %v5403_v14  ;;  %v5458_v30 = vld [vmem:[#allocation2 + $0x4] sm:$0xff] }
 0x368   : > { %v5422_v22 = vmul.f32 %v2380_v57, %v5413_v46  ;;  %v5453_v41 = vmul.f32 %v2123_v63, %v5403_v14  ;;  %v2348_v58 = vmul.f32 %v2342_v8, %v5458_v30  ;;  %v2349_v56 = vmul.f32 %v2344_v35, %v5413_v46 }
 0x369   : > { %2431 = vrot.lane.b32.xlu1 %v2167_v16, %s3958_s11  ;;  %2499 = vrot.lane.b32.xlu0 %v2273_v23, %s3957_s17  ;;  %v2494_v21 = vcombine.low %v2273_v23, %v2273_v23  ;;  %v2445_v26 = vcombine.low %v2201_v0, %v2201_v0  ;;  %v2384_v55 = vmul.f32 %v2378_v19, %v5458_v30  ;;  %v5500_v43 = vpop.permute.xlu1 %2083  ;;  %v2305_v60 = vrot.slane %v2303_v38, 4 }
 0x36a   : > { %v2269_v16 = vsel %vm6363_vm7, %v2268_v39, %v5380_v17  ;;  %v2526_v23 = vcombine.low %v2349_v56, %v2349_v56  ;;  %v2525_v57 = vcombine.low %v2348_v58, %v2348_v58  ;;  %v2125_v34 = vsel %vm6365_vm6, %v2124_v1, %v2120_v20  ;;  %vm6372_vm6 = vmmov %vm6369_vm9 }
 0x36b   : > { %v2274_v52 = vmul.f32 %v2269_v16, %v5393_v13  ;;  %v2130_v17 = vmul.f32 %v2125_v34, %v5393_v13  ;;  %v2446_v10 = vcombine.low %v2202_v51, %v2202_v51  ;;  %v2470_v28 = vcombine.high %v5425_v44, %v5425_v44 }
 0x36c   : > { %v2131_v32 = vmul.f32 %v2122_v40, %v5398_v27  ;;  %v2314_v31 = vmul.f32 %v2305_v60, %v5363_v42  ;;  %v2550_v5 = vcombine.high %v2384_v55, %v2384_v55  ;;  %v2471_v63 = vcombine.high %v5436_v53, %v5436_v53 }
 0x36d   : > { %2556 = vrot.lane.b32.xlu1 %v5422_v22, %s3958_s11  ;;  %2472 = vrot.lane.b32.xlu0 %v5425_v44, %s3950_s25  ;;  %v2495_v9 = vcombine.low %v2274_v52, %v2274_v52  ;;  %v2397_v54 = vcombine.low %v2130_v17, %v2130_v17  ;;  %v5507_v59 = vpop.permute.xlu1 %2560  ;;  %v2422_v42 = vcombine.high %v5456_v49, %v5456_v49  ;;  %vm6370_vm7 = vcmask 392192  }
 0x36e   : > { %v2398_v50 = vcombine.low %v2131_v32, %v2131_v32  ;;  %v2396_v29 = vcombine.low %v5453_v41, %v5453_v41  ;;  %vm6371_vm10 = vmmov %vm6370_vm7 }
 0x371   : > { %2476 = vrot.lane.b32.xlu1 %v5436_v53, %s3950_s25  ;;  %2450 = vrot.lane.b32.xlu0 %v2201_v0, %s3939_s27  ;;  %v2421_v0 = vcombine.high %v2165_v36, %v2165_v36  ;;  %v2537_v44 = vpop.permute.xlu1 %2536 }
 0x375   : > { %2505 = vrot.lane.b32.xlu1 %v2496_v7, %s3957_s17  ;;  %2423 = vrot.lane.b32.xlu0 %v2165_v36, %s3958_s11  ;;  %v2585_v7 = vsel %vm1315_vm2, %v2314_v31, %v2537_v44  ;;  %v2551_v36 = vcombine.high %v5422_v22, %v5422_v22  ;;  %v2301_v22 = vpop.permute.xlu0 %2300 }
 0x379   : > { %2427 = vrot.lane.b32.xlu1 %v5456_v49, %s3958_s11  ;;  %2401 = vrot.lane.b32.xlu0 %v5453_v41, %s3951_s19  ;;  %v5530_v18 = vpop.permute.xlu0 %2081 }
 0x37d   : > { %2456 = vrot.lane.b32.xlu1 %v2447_v33, %s3939_s27  ;;  %2530 = vrot.lane.b32.xlu0 %v2348_v58, %s3951_s19  ;;  %v2304_v33 = vrot.slane %v2301_v22, 4 }
 0x381   : > { %2497 = vrot.lane.b32.xlu1 %v2494_v21, %s3957_s17  ;;  %2534 = vrot.lane.b32.xlu0 %v2349_v56, %s3951_s19  ;;  %v2307_v56 = vsel %vm1315_vm2, %v2304_v33, %v2305_v60 }
 0x382   : > { %v2308_v39 = vsel %vm6366_vm8, %v2307_v56, %v2303_v38  ;;  %vm6373_vm8 = vmmov %vm6370_vm7 }
 0x385   : > { %2448 = vrot.lane.b32.xlu1 %v2445_v26, %s3939_s27  ;;  %2552 = vrot.lane.b32.xlu0 %v2384_v55, %s3958_s11  ;;  %v5557_v26 = vmul.f32 %v2308_v39, %v5413_v46 }
 0x387   : > { %v2519_v16 = vcombine.high %v5557_v26, %v5557_v26 }
 0x389   : > { %2532 = vrot.lane.b32.xlu1 %v2526_v23, %s3951_s19  ;;  %2503 = vrot.lane.b32.xlu0 %v2274_v52, %s3957_s17 }
 0x38d   : > { %2528 = vrot.lane.b32.xlu1 %v2525_v57, %s3951_s19  ;;  %2454 = vrot.lane.b32.xlu0 %v2202_v51, %s3939_s27 }
 0x391   : > { %2501 = vrot.lane.b32.xlu1 %v2495_v9, %s3957_s17  ;;  %2405 = vrot.lane.b32.xlu0 %v2130_v17, %s3951_s19  ;;  %v2085_v9 = vrot.slane %v5530_v18, 4  ;;  %s6377_s17 = smov 82  }
 0x395   : > { %2452 = vrot.lane.b32.xlu1 %v2446_v10, %s3939_s27  ;;  %2474 = vrot.lane.b32.xlu0 %v2470_v28, %s3950_s25  ;;  %v2086_v10 = vrot.slane %v5500_v43, 4 }
 0x399   : > { %2403 = vrot.lane.b32.xlu1 %v2397_v54, %s3951_s19  ;;  %2425 = vrot.lane.b32.xlu0 %v2421_v0, %s3958_s11  ;;  %v2088_v54 = vsel %vm1315_vm2, %v2085_v9, %v2086_v10 }
 0x39a   : > { %v2089_v31 = vsel %vm6367_vm5, %v2088_v54, %v5500_v43  ;;  %vm6374_vm5 = vmmov %vm6372_vm6 }
 0x39d   : > { %2407 = vrot.lane.b32.xlu1 %v2398_v50, %s3951_s19  ;;  %2554 = vrot.lane.b32.xlu0 %v2550_v5, %s3958_s11  ;;  %v5588_v50 = vmul.f32 %v2089_v31, %v5393_v13  ;;  %v2306_v13 = vsel %vm6368_vm15, %v2304_v33, %v2301_v22 }
 0x3a1   : > { %2558 = vrot.lane.b32.xlu0 %v2551_v36, %s3958_s11  ;;  %2645 = vrot.lane.b32.xlu1 %v2585_v7, %s3943_s24  ;;  %v2390_v7 = vcombine.high %v5588_v50, %v5588_v50 }
 0x3a5   : > { %2478 = vrot.lane.b32.xlu0 %v2471_v63, %s3950_s25 }
 0x3a9   : > { %2429 = vrot.lane.b32.xlu0 %v2422_v42, %s3958_s11 }
 0x3ad   : > { %2399 = vrot.lane.b32.xlu0 %v2396_v29, %s3951_s19 }
 0x3b1   : > { %2655 = vrot.lane.b32.xlu0 %v5507_v59, %s3943_s24 }
 0x3d7   : > { %v5532_v6 = vpop.permute.xlu1 %2480 }
 0x3db   : > { %v5534_v53 = vpop.permute.xlu1 %2431  ;;  %v5536_v15 = vpop.permute.xlu0 %2499 }
 0x3df   : > { %v2557_v49 = vpop.permute.xlu1 %2556  ;;  %v5538_v8 = vpop.permute.xlu0 %2472 }
 0x3e3   : > { %v5540_v47 = vpop.permute.xlu1 %2476  ;;  %v5542_v41 = vpop.permute.xlu0 %2450 }
 0x3e7   : > { %v5544_v58 = vpop.permute.xlu1 %2505  ;;  %v2424_v35 = vpop.permute.xlu0 %2423 }
 0x3e8   : > { %v2580_v21 = vsel %vm1315_vm2, %v5532_v6, %v5544_v58 }
 0x3e9   : > { %2635 = vrot.lane.b32.xlu0 %v2580_v21, %s3943_s24 }
 0x3eb   : > { %v5551_v19 = vpop.permute.xlu1 %2427  ;;  %v5553_v20 = vpop.permute.xlu0 %2401 }
 0x3ef   : > { %v5559_v55 = vpop.permute.xlu1 %2456  ;;  %v2531_v4 = vpop.permute.xlu0 %2530 }
 0x3f0   : > { %v2575_v40 = vsel %vm1315_vm2, %v5534_v53, %v5559_v55 }
 0x3f1   : > { %2625 = vrot.lane.b32.xlu1 %v2575_v40, %s3943_s24 }
 0x3f3   : > { %v2498_v23 = vpop.permute.xlu1 %2497  ;;  %v2535_v52 = vpop.permute.xlu0 %2534 }
 0x3f4   : > { %v2541_v37 = vsel %vm812_vm3, %v2535_v52, %v2537_v44 }
 0x3f5   : > { %v2584_v1 = vsel %vm1315_vm2, %v2519_v16, %v2541_v37  ;;  %v2312_v16 = vmul.f32 %v2306_v13, %v5458_v30 }
 0x3f6   : > { %2643 = vrot.lane.b32.xlu0 %v2584_v1, %s3943_s24 }
 0x3f7   : > { %v2449_v46 = vpop.permute.xlu1 %2448  ;;  %v2553_v51 = vpop.permute.xlu0 %2552 }
 0x3f8   : > { %v2458_v37 = vsel %vm6369_vm9, %v2449_v46, %v5542_v41  ;;  %vm6375_vm9 = vmmov %vm6370_vm7 }
 0x3fb   : > { %v2533_v57 = vpop.permute.xlu1 %2532  ;;  %v5570_v34 = vpop.permute.xlu0 %2503 }
 0x3fc   : > { %v2539_v22 = vsel %vm812_vm3, %v2531_v4, %v2533_v57 }
 0x3ff   : > { %v2529_v38 = vpop.permute.xlu1 %2528  ;;  %v5572_v17 = vpop.permute.xlu0 %2454 }
 0x400   : > { %v2538_v30 = vsel %vm812_vm3, %v2529_v38, %v2531_v4 }
 0x403   : > { %v2502_v28 = vpop.permute.xlu1 %2501  ;;  %v5576_v32 = vpop.permute.xlu0 %2405 }
 0x407   : > { %v5583_v0 = vpop.permute.xlu1 %2452  ;;  %v2475_v60 = vpop.permute.xlu0 %2474 }
 0x408   : > { %v2482_v54 = vsel %vm1171_vm14, %v5538_v8, %v2475_v60  ;;  %v2509_v8 = vsel %vm6371_vm10, %v2502_v28, %v5570_v34 }
 0x40b   : > { %v5590_v5 = vpop.permute.xlu1 %2403  ;;  %v2426_v44 = vpop.permute.xlu0 %2425 }
 0x40c   : > { %v2433_v39 = vsel %vm932_vm11, %v2424_v35, %v2426_v44  ;;  %v2518_v35 = vcombine.high %v2312_v16, %v2312_v16 }
 0x40d   : > { %v2571_v1 = vsel %vm1315_vm2, %v2433_v39, %v2458_v37  ;;  %v2847_v39 = vld [vmem:[%s6218_s8] sm:$0xf] }
 0x40f   : > { %v5594_v36 = vpop.permute.xlu1 %2407  ;;  %v2555_v63 = vpop.permute.xlu0 %2554 }
 0x410   : > { %v2412_v42 = vsel %vm812_vm3, %v5576_v32, %v5594_v36  ;;  %v2563_v40 = vsel %vm932_vm11, %v2555_v63, %v2557_v49  ;;  %v2562_v46 = vsel %vm932_vm11, %v2553_v51, %v2555_v63  ;;  %v2540_v51 = vsel %vm812_vm3, %v2533_v57, %v2535_v52 }
 0x411   : > { %v2569_v29 = vsel %vm1315_vm2, %v2390_v7, %v2412_v42  ;;  %v2581_v7 = vsel %vm1315_vm2, %v2312_v16, %v2538_v30  ;;  %v2583_v63 = vsel %vm1315_vm2, %v5557_v26, %v2540_v51  ;;  %v2459_v52 = vsel %vm6372_vm6, %v5542_v41, %v5583_v0 }
 0x412   : > { %2613 = vrot.lane.b32.xlu1 %v2569_v29, %s3943_s24  ;;  %v2483_v29 = vsel %vm1171_vm14, %v2475_v60, %v5540_v47  ;;  %v2508_v57 = vsel %vm6373_vm8, %v5536_v15, %v2502_v28  ;;  %v2461_v41 = vsel %vm6374_vm5, %v5572_v17, %v5559_v55 }
 0x413   : > { %v2559_v21 = vpop.permute.xlu0 %2558  ;;  %v2577_v26 = vsel %vm1315_vm2, %v2483_v29, %v2508_v57 }
 0x414   : > { %v2564_v56 = vsel %vm932_vm11, %v2557_v49, %v2559_v21  ;;  %v2565_v33 = vsel %vm932_vm11, %v2559_v21, %v5507_v59  ;;  %v2582_v49 = vsel %vm1315_vm2, %v2518_v35, %v2539_v22  ;;  %v2507_v59 = vsel %vm6370_vm7, %v2498_v23, %v5536_v15  ;;  %v2857_v35 = vld [vmem:[%s6219_s9] sm:$0xf] }
 0x415   : > { %2651 = vrot.lane.b32.xlu0 %v2564_v56, %s3943_s24  ;;  %v2576_v4 = vsel %vm1315_vm2, %v2482_v54, %v2507_v59  ;;  %v2434_v23 = vsel %vm932_vm11, %v2426_v44, %v5551_v19  ;;  %v2087_v15 = vsel %vm6368_vm15, %v2085_v9, %v5530_v18  ;;  %v3960_v9 = vmov 0  }
 0x416   : > { %2649 = vrot.lane.b32.xlu1 %v2563_v40, %s3943_s24  ;;  %v2572_v44 = vsel %vm1315_vm2, %v2434_v23, %v2459_v52  ;;  %v2093_v18 = vmul.f32 %v2087_v15, %v5403_v14  ;;  %3913 = vset.pattern.permute.xlu0 %v3960_v9  ;;  %v2410_v14 = vsel %vm812_vm3, %v5553_v20, %v5590_v5  ;;  %vm6381_vm7 = vcmask 1039360  }
 0x417   : > { %v2479_v31 = vpop.permute.xlu0 %2478  ;;  %3914 = vset.pattern.permute.xlu1 %v3960_v9  ;;  %vm6382_vm10 = vmmov %vm6381_vm7 }
 0x418   : > { %v2484_v42 = vsel %vm1171_vm14, %v5540_v47, %v2479_v31  ;;  %v2485_v47 = vsel %vm1171_vm14, %v2479_v31, %v5532_v6  ;;  %v2411_v6 = vsel %vm812_vm3, %v5590_v5, %v5576_v32  ;;  %vm6376_vm14 = vmmov %vm6374_vm5 }
 0x419   : > { %2617 = vrot.lane.b32.xlu0 %v2571_v1, %s3943_s24  ;;  %v2578_v38 = vsel %vm1315_vm2, %v2484_v42, %v2509_v8  ;;  %vm6383_vm6 = vmmov %vm6381_vm7 }
 0x41a   : > { %2653 = vrot.lane.b32.xlu1 %v2565_v33, %s3943_s24  ;;  %v3852_v33 = vld [vmem:[%s6217_s7 + $0x7] ss:$8 sm:$0xf]  ;;  %vm6384_vm8 = vmmov %vm6383_vm6 }
 0x41b   : > { %v2430_v13 = vpop.permute.xlu0 %2429  ;;  %v3160_v30 = vrot.slane %v3852_v33, %v4179_v62  ;;  %v3156_v23 = vrot.slane %v3852_v33, %v4176_v61  ;;  %vm6385_vm5 = vmmov %vm6383_vm6 }
 0x41c   : > { %v2436_v21 = vsel %vm932_vm11, %v2430_v13, %v5534_v53  ;;  %v2510_v53 = vsel %vm6375_vm9, %v5570_v34, %v5544_v58  ;;  %v2435_v55 = vsel %vm932_vm11, %v5551_v19, %v2430_v13  ;;  %v2460_v58 = vsel %vm6376_vm14, %v5583_v0, %v5572_v17  ;;  %v3853_v17 = vld [vmem:[%s6217_s7 + $0x20] ss:$8 sm:$0xf]  ;;  %vm6386_vm15 = vmmov %vm6385_vm5 }
 0x41d   : > { %2639 = vrot.lane.b32.xlu0 %v2582_v49, %s3943_s24  ;;  %v2574_v28 = vsel %vm1315_vm2, %v2436_v21, %v2461_v41  ;;  %v2579_v60 = vsel %vm1315_vm2, %v2485_v47, %v2510_v53  ;;  %v2568_v34 = vsel %vm1315_vm2, %v5588_v50, %v2411_v6  ;;  %v2573_v32 = vsel %vm1315_vm2, %v2435_v55, %v2460_v58  ;;  %vm6387_vm9 = vmmov %vm6385_vm5 }
 0x41e   : > { %2647 = vrot.lane.b32.xlu1 %v2562_v46, %s3943_s24  ;;  %v2095_v19 = vmul.f32 %v2086_v10, %v5398_v27  ;;  %v2389_v0 = vcombine.high %v2093_v18, %v2093_v18  ;;  %v3196_v27 = vrot.slane %v3853_v17, %v4179_v62  ;;  %v3200_v10 = vrot.slane %v3853_v17, %v4188_v3  ;;  %vm6388_vm14 = vmmov %vm6385_vm5 }
 0x41f   : > { %v2400_v50 = vpop.permute.xlu0 %2399  ;;  %v3192_v22 = vrot.slane %v3853_v17, %v4176_v61  ;;  %v3164_v46 = vrot.slane %v3852_v33, %v4188_v3 }
 0x420   : > { %v2570_v56 = vsel %vm1315_vm2, %v2095_v19, %v5594_v36  ;;  %v2567_v43 = vsel %vm1315_vm2, %v2389_v0, %v2410_v14  ;;  %v2409_v5 = vsel %vm812_vm3, %v2400_v50, %v5553_v20  ;;  %v3851_v36 = vld [vmem:[%s6217_s7 + $0x6] ss:$8 sm:$0xf]  ;;  %v3202_v16 = vcombine.low %v3196_v27, %v3200_v10 }
 0x421   : > { %2637 = vrot.lane.b32.xlu0 %v2581_v7, %s3943_s24  ;;  %v2566_v40 = vsel %vm1315_vm2, %v2093_v18, %v2409_v5  ;;  %v3124_v37 = vrot.slane %v3851_v36, %v4179_v62  ;;  %v3128_v1 = vrot.slane %v3851_v36, %v4188_v3  ;;  %v3188_v20 = vrot.slane %v3853_v17, %v4203_v12  ;;  %v3849_v7 = vld [vmem:[%s6217_s7 + $0x4] ss:$8 sm:$0xf] }
 0x422   : > { %2627 = vrot.lane.b32.xlu1 %v2576_v4, %s3943_s24  ;;  %v3116_v31 = vrot.slane %v3851_v36, %v4203_v12  ;;  %v3120_v59 = vrot.slane %v3851_v36, %v4176_v61  ;;  %v3166_v42 = vcombine.low %v3160_v30, %v3164_v46  ;;  %v3052_v4 = vrot.slane %v3849_v7, %v4179_v62 }
 0x423   : > { %v3130_v49 = vcombine.low %v3124_v37, %v3128_v1  ;;  %v3201_v54 = vcombine.low %v3188_v20, %v3192_v22  ;;  %v3056_v51 = vrot.slane %v3849_v7, %v4188_v3  ;;  %v3048_v21 = vrot.slane %v3849_v7, %v4176_v61 }
 0x424   : > { %v3129_v8 = vcombine.low %v3116_v31, %v3120_v59 }
 0x425   : > { %2631 = vrot.lane.b32.xlu0 %v2578_v38, %s3943_s24  ;;  %v3152_v38 = vrot.slane %v3852_v33, %v4203_v12  ;;  %v3058_v29 = vcombine.low %v3052_v4, %v3056_v51 }
 0x426   : > { %2641 = vrot.lane.b32.xlu1 %v2583_v63, %s3943_s24  ;;  %v3850_v63 = vld [vmem:[%s6217_s7 + $0x5] ss:$8 sm:$0xf] }
 0x427   : > { %v3088_v13 = vrot.slane %v3850_v63, %v4179_v62  ;;  %v3092_v52 = vrot.slane %v3850_v63, %v4188_v3  ;;  %v3165_v57 = vcombine.low %v3152_v38, %v3156_v23  ;;  %v3084_v6 = vrot.slane %v3850_v63, %v4176_v61 }
 0x429   : > { %2619 = vrot.lane.b32.xlu0 %v2572_v44, %s3943_s24  ;;  %v3044_v44 = vrot.slane %v3849_v7, %v4203_v12  ;;  %v3094_v47 = vcombine.low %v3088_v13, %v3092_v52 }
 0x42a   : > { %2629 = vrot.lane.b32.xlu1 %v2577_v26, %s3943_s24  ;;  %v3847_v26 = vld [vmem:[%s6217_s7 + $0x2] ss:$8 sm:$0xf] }
 0x42b   : > { %v2980_v41 = vrot.slane %v3847_v26, %v4179_v62  ;;  %v2984_v15 = vrot.slane %v3847_v26, %v4188_v3  ;;  %v3057_v53 = vcombine.low %v3044_v44, %v3048_v21  ;;  %v2972_v9 = vrot.slane %v3847_v26, %v4203_v12 }
 0x42d   : > { %2623 = vrot.lane.b32.xlu0 %v2574_v28, %s3943_s24  ;;  %v3080_v28 = vrot.slane %v3850_v63, %v4203_v12  ;;  %v2986_v55 = vcombine.low %v2980_v41, %v2984_v15 }
 0x42e   : > { %2633 = vrot.lane.b32.xlu1 %v2579_v60, %s3943_s24  ;;  %v3848_v60 = vld [vmem:[%s6217_s7 + $0x3] ss:$8 sm:$0xf] }
 0x42f   : > { %v3016_v18 = vrot.slane %v3848_v60, %v4179_v62  ;;  %v3020_v58 = vrot.slane %v3848_v60, %v4188_v3  ;;  %v3008_v17 = vrot.slane %v3848_v60, %v4203_v12  ;;  %v3012_v0 = vrot.slane %v3848_v60, %v4176_v61 }
 0x431   : > { %2611 = vrot.lane.b32.xlu0 %v2568_v34, %s3943_s24  ;;  %v3093_v34 = vcombine.low %v3080_v28, %v3084_v6  ;;  %v3022_v19 = vcombine.low %v3016_v18, %v3020_v58  ;;  %v3021_v50 = vcombine.low %v3008_v17, %v3012_v0  ;;  %v2586_v6 = vld [vmem:[%s6213_s3] sm:$0xf] }
 0x432   : > { %2621 = vrot.lane.b32.xlu1 %v2573_v32, %s3943_s24  ;;  %v2976_v32 = vrot.slane %v3847_v26, %v4176_v61 }
 0x434   : > { %v2985_v14 = vcombine.low %v2972_v9, %v2976_v32 }
 0x435   : > { %2615 = vrot.lane.b32.xlu0 %v2570_v56, %s3943_s24  ;;  %v2656_v56 = vpop.permute.xlu0 %2655 }
 0x436   : > { %2609 = vrot.lane.b32.xlu1 %v2567_v43, %s3943_s24  ;;  %v2646_v43 = vpop.permute.xlu1 %2645 }
 0x439   : > { %2850 = vperm.xlu0 %3913, %v2847_v39  }
 0x43a   : > { %2607 = vrot.lane.b32.xlu1 %v2566_v40, %s3943_s24 }
 0x43d   : > { %3205 = vrot.lane.b32.xlu0 %v3202_v16, %s6377_s17 }
 0x43e   : > { %2860 = vperm.xlu1 %3914, %v2857_v35  }
 0x441   : > { %3133 = vrot.lane.b32.xlu0 %v3130_v49, %s3942_s15 }
 0x442   : > { %3203 = vrot.lane.b32.xlu1 %v3201_v54, %s6377_s17  ;;  %s6380_s17 = smov 72  }
 0x445   : > { %3169 = vrot.lane.b32.xlu0 %v3166_v42, %s6286_s21 }
 0x446   : > { %3131 = vrot.lane.b32.xlu1 %v3129_v8, %s3942_s15  ;;  %s6405_s15 = smov 126  }
 0x449   : > { %3061 = vrot.lane.b32.xlu0 %v3058_v29, %s3935_s23 }
 0x44a   : > { %3167 = vrot.lane.b32.xlu1 %v3165_v57, %s6286_s21  ;;  %s6379_s21 = smov 66  }
 0x44d   : > { %3097 = vrot.lane.b32.xlu0 %v3094_v47, %s6378_s14 }
 0x44e   : > { %3059 = vrot.lane.b32.xlu1 %v3057_v53, %s3935_s23 }
 0x451   : > { %2989 = vrot.lane.b32.xlu0 %v2986_v55, %s6379_s21 }
 0x452   : > { %3095 = vrot.lane.b32.xlu1 %v3093_v34, %s6378_s14  ;;  %v3846_v34 = vld [vmem:[%s6217_s7 + $0x1] ss:$8 sm:$0xf] }
 0x453   : > { %v2944_v9 = vrot.slane %v3846_v34, %v4179_v62  ;;  %v2948_v32 = vrot.slane %v3846_v34, %v4188_v3 }
 0x455   : > { %3025 = vrot.lane.b32.xlu0 %v3022_v19, %s6380_s17  ;;  %v2936_v19 = vrot.slane %v3846_v34, %v4203_v12  ;;  %v2950_v17 = vcombine.low %v2944_v9, %v2948_v32 }
 0x456   : > { %2987 = vrot.lane.b32.xlu1 %v2985_v14, %s6379_s21  ;;  %v2940_v14 = vrot.slane %v3846_v34, %v4176_v61 }
 0x458   : > { %v2949_v0 = vcombine.low %v2936_v19, %v2940_v14 }
 0x459   : > { %2953 = vrot.lane.b32.xlu0 %v2950_v17, %s6288_s26 }
 0x45a   : > { %3023 = vrot.lane.b32.xlu1 %v3021_v50, %s6380_s17 }
 0x45b   : > { %v2636_v27 = vpop.permute.xlu0 %2635 }
 0x45e   : > { %2951 = vrot.lane.b32.xlu1 %v2949_v0, %s6288_s26  ;;  %s6403_s26 = smov 119  }
 0x463   : > { %v2626_v10 = vpop.permute.xlu1 %2625 }
 0x468   : > { %v2644_v5 = vpop.permute.xlu0 %2643 }
 0x469   : > { %v2672_v35 = vsel %vm6384_vm8, %v2644_v5, %v2646_v43  ;;  %vm6392_vm8 = vmmov %vm6385_vm5 }
 0x484   : > { %v2614_v39 = vpop.permute.xlu1 %2613 }
 0x487   : > { %v2652_v36 = vpop.permute.xlu0 %2651 }
 0x488   : > { %v2650_v40 = vpop.permute.xlu1 %2649 }
 0x489   : > { %v2674_v16 = vsel %vm6381_vm7, %v2650_v40, %v2652_v36  ;;  %vm6389_vm7 = vmmov %vm6385_vm5 }
 0x48a   : > { %3840 = vmatprep.subr.msk.mxu0 %vm1315_vm2, %v2674_v16 }
 0x48b   : > { %v2618_v37 = vpop.permute.xlu0 %2617 }
 0x48c   : > { %v2654_v1 = vpop.permute.xlu1 %2653 }
 0x48d   : > { %v2675_v20 = vsel %vm6382_vm10, %v2652_v36, %v2654_v1  ;;  %v2676_v22 = vsel %vm6383_vm6, %v2654_v1, %v2656_v56  ;;  %vm6390_vm10 = vmmov %vm6385_vm5 }
 0x48e   : > { %3843 = vmatprep.subr.msk.mxu1 %vm1315_vm2, %v2676_v22  ;;  %vm6391_vm6 = vmmov %vm6385_vm5 }
 0x48f   : > { %3844 = vmatpush1.msk.msra.mxu1 %vm1315_vm2, %v2675_v20  ;;  %v2640_v33 = vpop.permute.xlu0 %2639 }
 0x490   : > { %v2648_v49 = vpop.permute.xlu1 %2647  ;;  %2800 = vmatprep.subr.mxu1 %v2672_v35 }
 0x491   : > { %v2673_v30 = vsel %vm6385_vm5, %v2648_v49, %v2650_v40 }
 0x492   : > { %3841 = vmatpush1.msk.msra.mxu0 %vm1315_vm2, %v2673_v30 }
 0x493   : > { %v2638_v46 = vpop.permute.xlu0 %2637 }
 0x494   : > { %v2628_v54 = vpop.permute.xlu1 %2627  ;;  %v2669_v4 = vsel %vm6388_vm14, %v2638_v46, %v2640_v33  ;;  %vm6395_vm14 = vmmov %vm6385_vm5 }
 0x497   : > { %v2632_v31 = vpop.permute.xlu0 %2631 }
 0x498   : > { %v2642_v59 = vpop.permute.xlu1 %2641 }
 0x499   : > { %v2670_v7 = vsel %vm6386_vm15, %v2640_v33, %v2642_v59  ;;  %v2671_v42 = vsel %vm6387_vm9, %v2642_v59, %v2644_v5  ;;  %vm6393_vm15 = vmmov %vm6385_vm5 }
 0x49a   : > { %2729 = vmatprep.subr.mxu0 %v2670_v7  ;;  %2801 = vmatpush1.msra.mxu1 %v2671_v42  ;;  %vm6394_vm9 = vmmov %vm6385_vm5 }
 0x49b   : > { %2730 = vmatpush1.msra.mxu0 %v2669_v4  ;;  %v2620_v51 = vpop.permute.xlu0 %2619 }
 0x49c   : > { %v2630_v8 = vpop.permute.xlu1 %2629  ;;  %v2661_v41 = vsel %vm6395_vm14, %v2618_v37, %v2620_v51 }
 0x49d   : > { %v2665_v38 = vsel %vm6389_vm7, %v2628_v54, %v2630_v8  ;;  %v2666_v23 = vsel %vm6390_vm10, %v2630_v8, %v2632_v31  ;;  %vm6396_vm7 = vmmov %vm6385_vm5  ;;  %vm2693_vm10 = vcmask 293888  }
 0x49e   : > { %2731 = vmatprep.subr.mxu0 %v2666_v23 }
 0x49f   : > { %2732 = vmatpush1.msra.mxu0 %v2665_v38  ;;  %v2624_v63 = vpop.permute.xlu0 %2623 }
 0x4a0   : > { %v2634_v29 = vpop.permute.xlu1 %2633  ;;  %v2664_v44 = vsel %vm6385_vm5, %v2624_v63, %v2626_v10 }
 0x4a1   : > { %v2667_v13 = vsel %vm6391_vm6, %v2632_v31, %v2634_v29  ;;  %v2668_v52 = vsel %vm6392_vm8, %v2634_v29, %v2636_v27  ;;  %vm6397_vm6 = vmmov %vm6385_vm5 }
 0x4a2   : > { %2802 = vmatprep.subr.mxu1 %v2668_v52  ;;  %vm6398_vm8 = vmmov %vm6385_vm5 }
 0x4a3   : > { %2803 = vmatpush1.msra.mxu1 %v2667_v13  ;;  %v2612_v57 = vpop.permute.xlu0 %2611 }
 0x4a4   : > { %v2622_v21 = vpop.permute.xlu1 %2621  ;;  %2804 = vmatprep.subr.mxu1 %v2664_v44  ;;  %v2659_v60 = vsel %vm6397_vm6, %v2612_v57, %v2614_v39  ;;  %vm6407_vm6 = vcmask 605184  }
 0x4a5   : > { %v2663_v26 = vsel %vm6393_vm15, %v2622_v21, %v2624_v63  ;;  %v2662_v47 = vsel %vm6394_vm9, %v2620_v51, %v2622_v21  ;;  %vm6399_vm15 = vcmask 592896   ;;  %vm6400_vm9 = vcmask 596992  }
 0x4a6   : > { %2733 = vmatprep.subr.mxu0 %v2662_v47  ;;  %2805 = vmatpush1.msra.mxu1 %v2663_v26  ;;  %vm6401_vm14 = vmmov %vm6400_vm9 }
 0x4a7   : > { %2734 = vmatpush1.msra.mxu0 %v2661_v41  ;;  %v2616_v15 = vpop.permute.xlu0 %2615 }
 0x4a8   : > { %v2610_v53 = vpop.permute.xlu1 %2609  ;;  %v2660_v28 = vsel %vm6396_vm7, %v2614_v39, %v2616_v15  ;;  %v2895_v39 = vld [vmem:[%s6217_s7] ss:$8 sm:$0xf]  ;;  %vm6406_vm7 = vcmask 662528  }
 0x4a9   : > { %2806 = vmatprep.subr.mxu1 %v2660_v28  ;;  %v2658_v55 = vsel %vm6398_vm8, %v2610_v53, %v2612_v57  ;;  %v2908_v1 = vrot.slane %v2895_v39, %v4179_v62  ;;  %v2912_v20 = vrot.slane %v2895_v39, %v4188_v3  ;;  %v2900_v54 = vrot.slane %v2895_v39, %v4203_v12 }
 0x4aa   : > { %2735 = vmatprep.subr.mxu0 %v2658_v55  ;;  %2807 = vmatpush1.msra.mxu1 %v2659_v60  ;;  %v2904_v42 = vrot.slane %v2895_v39, %v4176_v61  ;;  %vm6408_vm8 = vcmask 670720  }
 0x4ab   : > { %3845 = vmatmul.mubr.msk.f32.vlgmr.msra.gmra.mxu1 %vm2693_vm10, %v2586_v6  ;;  %v2914_v7 = vcombine.low %v2908_v1, %v2912_v20 }
 0x4ac   : > { %v2608_v18 = vpop.permute.xlu1 %2607  ;;  %3688 = vmatprep.mubr.f32.mxu1 %v6341_v48  ;;  %v2913_v62 = vcombine.low %v2900_v54, %v2904_v42 }
 0x4ad   : > { %v2657_v58 = vsel %vm6385_vm5, %v2608_v18, %v2610_v53  ;;  %vm6410_vm5 = vmmov %vm6400_vm9 }
 0x4ae   : > { %2736 = vmatpush1.msra.mxu0 %v2657_v58 }
 0x4af   : > { %3842 = vmatmul.mubr.msk.f32.vlgmr.msra.gmra.mxu0 %vm2693_vm10, %v2586_v6 }
 0x4b0   : > { %3617 = vmatprep.mubr.f32.mxu0 %v6341_v48 }
 0x4b4   : > { %v2851_v50 = vpop.permute.xlu0 %2850 }
 0x4b8   : > { %v5819_v3 = vpop.permute.xlu0 %3205 }
 0x4b9   : > { %v2861_v56 = vpop.permute.xlu1 %2860  ;;  %v3208_v18 = vrot.slane %v5819_v3, 4 }
 0x4bc   : > { %v5823_v12 = vpop.permute.xlu0 %3133 }
 0x4bd   : > { %v5821_v51 = vpop.permute.xlu1 %3203  ;;  %v3136_v19 = vrot.slane %v5823_v12, 4 }
 0x4c0   : > { %v5827_v38 = vpop.permute.xlu0 %3169 }
 0x4c1   : > { %v5825_v8 = vpop.permute.xlu1 %3131 }
 0x4c2   : > { %v3135_v17 = vrot.slane %v5825_v8, 4 }
 0x4c4   : > { %v5829_v61 = vpop.permute.xlu0 %3061 }
 0x4c5   : > { %v3168_v23 = vpop.permute.xlu1 %3167  ;;  %v3064_v58 = vrot.slane %v5829_v61, 4 }
 0x4c8   : > { %v5831_v29 = vpop.permute.xlu0 %3097 }
 0x4c9   : > { %v3060_v63 = vpop.permute.xlu1 %3059 }
 0x4ca   : > { %v3063_v20 = vrot.slane %v3060_v63, 4 }
 0x4cc   : > { %v5835_v52 = vpop.permute.xlu0 %2989 }
 0x4cd   : > { %v5833_v13 = vpop.permute.xlu1 %3095  ;;  %v2992_v14 = vrot.slane %v5835_v52, 4 }
 0x4d0   : > { %v5839_v44 = vpop.permute.xlu0 %3025 }
 0x4d1   : > { %v5837_v57 = vpop.permute.xlu1 %2987 }
 0x4d4   : > { %v5843_v26 = vpop.permute.xlu0 %2953 }
 0x4d5   : > { %v5841_v21 = vpop.permute.xlu1 %3023 }
 0x4d9   : > { %v5845_v47 = vpop.permute.xlu1 %2951 }
 0x56b   : > { %v2842_v48 = vpop.f32.mrf.mxu1 }
 0x56c   : > { %v2855_v43 = vmul.f32 %v2851_v50, %v2842_v48  ;;  %v3171_v48 = vrot.slane %v3168_v23, 4 }
 0x56d   : > { %v2844_v27 = vpop.f32.mrf.mxu1 }
 0x56e   : > { %v2865_v10 = vadd.f32 %v2861_v56, %v2855_v43  ;;  %v2856_v5 = vmul.f32 %v2851_v50, %v2844_v27  ;;  %v3173_v43 = vsel %vm6406_vm7, %v3171_v48, %v3168_v23 }
 0x56f   : > { %v2771_v36 = vpop.f32.mrf.mxu0 }
 0x570   : > { %v2866_v40 = vadd.f32 %v2861_v56, %v2856_v5  ;;  %v2853_v16 = vmul.f32 %v2851_v50, %v2771_v36  ;;  %v2869_v22 = vmax.f32 %v2865_v10, 0.0  ;;  %v3172_v10 = vrot.slane %v5827_v38, 4 }
 0x571   : > { %v2773_v37 = vpop.f32.mrf.mxu0  ;;  %v3099_v5 = vrot.slane %v5833_v13, 4  ;;  %v3207_v36 = vrot.slane %v5821_v51, 4 }
 0x572   : > { %v2870_v33 = vmax.f32 %v2866_v40, 0.0  ;;  %v2863_v35 = vadd.f32 %v2861_v56, %v2853_v16  ;;  %v2854_v49 = vmul.f32 %v2851_v50, %v2773_v37  ;;  %v3174_v1 = vsel %vm1315_vm2, %v3171_v48, %v3172_v10 }
 0x573   : > { %v3101_v40 = vsel %vm6407_vm6, %v3099_v5, %v5833_v13  ;;  %v3209_v16 = vsel %vm6408_vm8, %v3207_v36, %v5821_v51  ;;  %v3028_v13 = vrot.slane %v5839_v44, 4 }
 0x574   : > { %v2876_v30 = vcombine.low %v2869_v22, %v2870_v33  ;;  %v2864_v46 = vadd.f32 %v2861_v56, %v2854_v49  ;;  %v2867_v31 = vmax.f32 %v2863_v35, 0.0  ;;  %v3065_v33 = vsel %vm6410_vm5, %v3063_v20, %v3060_v63 }
 0x576   : > { %v2868_v59 = vmax.f32 %v2864_v46, 0.0  ;;  %2879 = vrot.lane.b32.xlu0 %v2876_v30, %s3935_s23  ;;  %v3066_v30 = vsel %vm1315_vm2, %v3063_v20, %v3064_v58  ;;  %v3027_v46 = vrot.slane %v5841_v21, 4 }
 0x578   : > { %v2875_v4 = vcombine.low %v2867_v31, %v2868_v59  ;;  %v3100_v31 = vrot.slane %v5831_v29, 4 }
 0x57a   : > { %2877 = vrot.lane.b32.xlu1 %v2875_v4, %s3935_s23  ;;  %2917 = vrot.lane.b32.xlu0 %v2914_v7, %s3939_s27  ;;  %s6402_s23 = smov 110   ;;  %v2991_v4 = vrot.slane %v5837_v57, 4 }
 0x57c   : > { %v2994_v23 = vsel %vm1315_vm2, %v2991_v4, %v2992_v14 }
 0x57e   : > { %2915 = vrot.lane.b32.xlu1 %v2913_v62, %s3939_s27 }
 0x5e8   : > { %v2880_v41 = vpop.permute.xlu0 %2879 }
 0x5e9   : > { %v2882_v15 = vrot.slane %v2880_v41, 4 }
 0x5eb   : > { %2891 = vst.msk [vmem:[#allocation2 + $0x10] sm:$0xf] %vm6399_vm15, %v2882_v15  ;;  %vm6411_vm15 = vmmov %vm6406_vm7  ;;  %vm6415_vm7 = vcmask 531456  }
 0x5ec   : > { %v2878_v53 = vpop.permute.xlu1 %2877  ;;  %v3175_v35 = vsel %vm6411_vm15, %v3174_v1, %v5827_v38  ;;  %vm6418_vm15 = vcmask 605184  }
 0x5ed   : > { %v2881_v28 = vrot.slane %v2878_v53, 4 }
 0x5ef   : > { %v2883_v6 = vsel %vm6400_vm9, %v2881_v28, %v2878_v53  ;;  %v2884_v60 = vsel %vm1315_vm2, %v2881_v28, %v2882_v15  ;;  %vm6412_vm9 = vcmask 588800  }
 0x5f0   : > { %v5851_v55 = vsel %vm6401_vm14, %v2884_v60, %v2880_v41  ;;  %2889 = vst.msk [vmem:[#allocation2] sm:$0xff] %vm5386_vm12, %v2883_v6  ;;  %vm6404_vm12 = vcmask 654336   ;;  %v3029_v59 = vsel %vm6412_vm9, %v3027_v46, %v5841_v21  ;;  %vm6413_vm14 = vmmov %vm6410_vm5  ;;  %v3138_v6 = vsel %vm1315_vm2, %v3135_v17, %v3136_v19 }
 0x5f1   : > { %2890 = vst [vmem:[#allocation2 + $0x8] sm:$0xff] %v5851_v55  ;;  %v3137_v56 = vsel %vm6404_vm12, %v3135_v17, %v5825_v8  ;;  %v5912_v54 = vmul.f32 %v3175_v35, %v5851_v55  ;;  %v3067_v7 = vsel %vm6413_vm14, %v3066_v30, %v5829_v61  ;;  %vm6414_vm12 = vcmask 539648   ;;  %vm6419_vm14 = vmmov %vm6415_vm7 }
 0x5f2   : > { %v5858_v34 = vld [vmem:[#allocation2 + $0x10] sm:$0xf]  ;;  %v5926_v62 = vmul.f32 %v3067_v7, %v5851_v55  ;;  %v2993_v8 = vsel %vm6414_vm12, %v2991_v4, %v5837_v57  ;;  %v2955_v61 = vrot.slane %v5845_v47, 4  ;;  %v3210_v57 = vsel %vm1315_vm2, %v3207_v36, %v3208_v18  ;;  %vm6416_vm6 = vmmov %vm6414_vm12 }
 0x5f3   : > { %v3217_v9 = vmul.f32 %v3208_v18, %v5858_v34  ;;  %v3073_v32 = vmul.f32 %v3064_v58, %v5858_v34  ;;  %v3145_v25 = vmul.f32 %v3136_v19, %v5858_v34  ;;  %v3001_v50 = vmul.f32 %v2992_v14, %v5858_v34 }
 0x5f4   : > { %v3109_v51 = vmul.f32 %v3100_v31, %v5858_v34  ;;  %v2957_v21 = vsel %vm6415_vm7, %v2955_v61, %v5845_v47  ;;  %v2995_v41 = vsel %vm6416_vm6, %v2994_v23, %v5835_v52  ;;  %v3037_v28 = vmul.f32 %v3028_v13, %v5858_v34 }
 0x5f5   : > { %3409 = vrot.lane.b32.xlu0 %v3217_v9, %s6402_s23  ;;  %3311 = vrot.lane.b32.xlu1 %v3073_v32, %s6403_s26  ;;  %v3000_v53 = vmul.f32 %v2995_v41, %v5851_v55  ;;  %v3211_v47 = vsel %vm6408_vm8, %v3210_v57, %v5819_v3  ;;  %vm6417_vm5 = vcmask 654336   ;;  %v3181_v3 = vmul.f32 %v3172_v10, %v5858_v34 }
 0x5f6   : > { %v3327_v63 = vcombine.low %v3109_v51, %v3109_v51  ;;  %v3216_v52 = vmul.f32 %v3211_v47, %v5851_v55  ;;  %v3278_v60 = vcombine.low %v3037_v28, %v3037_v28  ;;  %v3139_v18 = vsel %vm6417_vm5, %v3138_v6, %v5823_v12 }
 0x5f7   : > { %v5870_v0 = vld [vmem:[#allocation2] sm:$0xff]  ;;  %v3144_v58 = vmul.f32 %v3139_v18, %v5851_v55  ;;  %v3102_v32 = vsel %vm1315_vm2, %v3099_v5, %v3100_v31  ;;  %v3376_v19 = vcombine.low %v3181_v3, %v3181_v3  ;;  %v2956_v17 = vrot.slane %v5843_v26, 4 }
 0x5f8   : > { %v5879_v27 = vmul.f32 %v3137_v56, %v5870_v0  ;;  %v5884_v39 = vmul.f32 %v3173_v43, %v5870_v0  ;;  %v5896_v37 = vmul.f32 %v3101_v40, %v5870_v0  ;;  %v3215_v22 = vmul.f32 %v3209_v16, %v5870_v0 }
 0x5f9   : > { %3360 = vrot.lane.b32.xlu0 %v3145_v25, %s3958_s11  ;;  %3262 = vrot.lane.b32.xlu1 %v3001_v50, %s6405_s15  ;;  %v5907_v49 = vmul.f32 %v3065_v33, %v5870_v0  ;;  %v3035_v42 = vmul.f32 %v3029_v59, %v5870_v0  ;;  %v2999_v38 = vmul.f32 %v2993_v8, %v5870_v0  ;;  %vm6420_vm12 = vcmask 900096  }
 0x5fa   : > { %v5946_v15 = vmul.f32 %v2957_v21, %v5870_v0  ;;  %v3399_v9 = vcombine.high %v3215_v22, %v3215_v22  ;;  %v3350_v14 = vcombine.high %v5879_v27, %v5879_v27  ;;  %v3103_v12 = vsel %vm6418_vm15, %v3102_v32, %v5831_v29  ;;  %vm6421_vm7 = vmmov %vm6420_vm12 }
 0x5fb   : > { %v3030_v25 = vsel %vm1315_vm2, %v3027_v46, %v3028_v13  ;;  %v3108_v50 = vmul.f32 %v3103_v12, %v5851_v55  ;;  %v3374_v48 = vcombine.low %v5884_v39, %v5884_v39  ;;  %v2958_v29 = vsel %vm1315_vm2, %v2955_v61, %v2956_v17  ;;  %v6015_v46 = vpop.permute.xlu0 %2917  ;;  %vm6422_vm6 = vmmov %vm6421_vm7 }
 0x5fc   : > { %v3031_v56 = vsel %vm6412_vm9, %v3030_v25, %v5839_v44  ;;  %v2959_v10 = vsel %vm6419_vm14, %v2958_v29, %v5843_v26  ;;  %v3301_v44 = vcombine.high %v5907_v49, %v5907_v49  ;;  %v3400_v36 = vcombine.high %v3216_v52, %v3216_v52 }
 0x5fd   : > { %3352 = vrot.lane.b32.xlu0 %v5879_v27, %s3958_s11  ;;  %3379 = vrot.lane.b32.xlu1 %v5884_v39, %s3959_s29  ;;  %v3036_v43 = vmul.f32 %v3031_v56, %v5851_v55  ;;  %v3325_v27 = vcombine.low %v5896_v37, %v5896_v37  ;;  %v2964_v5 = vmul.f32 %v2959_v10, %v5851_v55  ;;  %vm6423_vm8 = vcmask 523264  }
 0x5fe   : > { %v3276_v39 = vcombine.low %v3035_v42, %v3035_v42  ;;  %v3252_v40 = vcombine.high %v2999_v38, %v2999_v38  ;;  %v3351_v16 = vcombine.high %v3144_v58, %v3144_v58  ;;  %v3375_v26 = vcombine.low %v5912_v54, %v5912_v54  ;;  %vm6424_vm5 = vmmov %vm6423_vm8 }
 0x5ff   : > { %v3302_v1 = vcombine.high %v5926_v62, %v5926_v62  ;;  %v3277_v20 = vcombine.low %v3036_v43, %v3036_v43  ;;  %v3228_v33 = vcombine.low %v2964_v5, %v2964_v5  ;;  %v2965_v35 = vmul.f32 %v2956_v17, %v5858_v34 }
 0x600   : > { %vm6425_vm15 = vcmask 1039360  }
 0x601   : > { %3330 = vrot.lane.b32.xlu0 %v5896_v37, %s6409_s12  ;;  %3401 = vrot.lane.b32.xlu1 %v3215_v22, %s6402_s23  ;;  %v3326_v37 = vcombine.low %v3108_v50, %v3108_v50  ;;  %v3253_v22 = vcombine.high %v3000_v53, %v3000_v53  ;;  %v3229_v30 = vcombine.low %v2965_v35, %v2965_v35  ;;  %vm6426_vm9 = vmmov %vm6425_vm15 }
 0x602   : > { %vm6427_vm14 = vmmov %vm6426_vm9 }
 0x605   : > { %3303 = vrot.lane.b32.xlu0 %v5907_v49, %s6403_s26  ;;  %3383 = vrot.lane.b32.xlu1 %v5912_v54, %s3959_s29  ;;  %v3227_v49 = vcombine.low %v5946_v15, %v5946_v15  ;;  %v6017_v54 = vpop.permute.xlu1 %2915 }
 0x609   : > { %3281 = vrot.lane.b32.xlu0 %v3035_v42, %s3951_s19  ;;  %3307 = vrot.lane.b32.xlu1 %v5926_v62, %s6403_s26 }
 0x60d   : > { %3254 = vrot.lane.b32.xlu0 %v2999_v38, %s6405_s15  ;;  %3336 = vrot.lane.b32.xlu1 %v3327_v63, %s6409_s12 }
 0x611   : > { %3232 = vrot.lane.b32.xlu0 %v5946_v15, %s3943_s24  ;;  %3258 = vrot.lane.b32.xlu1 %v3000_v53, %s6405_s15 }
 0x615   : > { %3405 = vrot.lane.b32.xlu0 %v3216_v52, %s6402_s23  ;;  %3287 = vrot.lane.b32.xlu1 %v3278_v60, %s3951_s19 }
 0x619   : > { %3356 = vrot.lane.b32.xlu0 %v3144_v58, %s3958_s11  ;;  %3403 = vrot.lane.b32.xlu1 %v3399_v9, %s6402_s23 }
 0x61d   : > { %3385 = vrot.lane.b32.xlu0 %v3376_v19, %s3959_s29  ;;  %3354 = vrot.lane.b32.xlu1 %v3350_v14, %s3958_s11 }
 0x621   : > { %3334 = vrot.lane.b32.xlu0 %v3108_v50, %s6409_s12  ;;  %3377 = vrot.lane.b32.xlu1 %v3374_v48, %s3959_s29 }
 0x625   : > { %3285 = vrot.lane.b32.xlu0 %v3036_v43, %s3951_s19  ;;  %3328 = vrot.lane.b32.xlu1 %v3325_v27, %s6409_s12 }
 0x629   : > { %3236 = vrot.lane.b32.xlu0 %v2964_v5, %s3943_s24  ;;  %3279 = vrot.lane.b32.xlu1 %v3276_v39, %s3951_s19 }
 0x62d   : > { %3305 = vrot.lane.b32.xlu0 %v3301_v44, %s6403_s26  ;;  %3407 = vrot.lane.b32.xlu1 %v3400_v36, %s6402_s23 }
 0x631   : > { %3256 = vrot.lane.b32.xlu0 %v3252_v40, %s6405_s15  ;;  %3358 = vrot.lane.b32.xlu1 %v3351_v16, %s3958_s11  ;;  %v2920_v40 = vrot.slane %v6015_v46, 4  ;;  %v2919_v16 = vrot.slane %v6017_v54, 4 }
 0x635   : > { %3381 = vrot.lane.b32.xlu0 %v3375_v26, %s3959_s29  ;;  %3332 = vrot.lane.b32.xlu1 %v3326_v37, %s6409_s12  ;;  %s379_s29 = scalar_lea.vmem %s6220_s10, %s4055_s18 }
 0x639   : > { %3309 = vrot.lane.b32.xlu0 %v3302_v1, %s6403_s26  ;;  %3283 = vrot.lane.b32.xlu1 %v3277_v20, %s3951_s19 }
 0x63d   : > { %3260 = vrot.lane.b32.xlu0 %v3253_v22, %s6405_s15  ;;  %3234 = vrot.lane.b32.xlu1 %v3228_v33, %s3943_s24  ;;  %v2921_v22 = vsel %vm6423_vm8, %v2919_v16, %v6017_v54 }
 0x63e   : > { %v2927_v54 = vmul.f32 %v2921_v22, %v5870_v0 }
 0x641   : > { %3230 = vrot.lane.b32.xlu0 %v3227_v49, %s3943_s24  ;;  %3238 = vrot.lane.b32.xlu1 %v3229_v30, %s3943_s24  ;;  %v2922_v30 = vsel %vm1315_vm2, %v2919_v16, %v2920_v40 }
 0x667   : > { %v6019_v31 = vpop.permute.xlu0 %3409  ;;  %v6021_v59 = vpop.permute.xlu1 %3311 }
 0x668   : > { %3504 = vrot.lane.b32.xlu0 %v6019_v31, %s3939_s27 }
 0x66b   : > { %v6025_v7 = vpop.permute.xlu0 %3360  ;;  %v6027_v42 = vpop.permute.xlu1 %3262 }
 0x66f   : > { %v3353_v4 = vpop.permute.xlu0 %3352  ;;  %v3380_v62 = vpop.permute.xlu1 %3379 }
 0x673   : > { %v3331_v51 = vpop.permute.xlu0 %3330  ;;  %v3402_v8 = vpop.permute.xlu1 %3401 }
 0x677   : > { %v3304_v38 = vpop.permute.xlu0 %3303  ;;  %v6029_v23 = vpop.permute.xlu1 %3383 }
 0x67b   : > { %v6031_v61 = vpop.permute.xlu0 %3281  ;;  %v6033_v63 = vpop.permute.xlu1 %3307 }
 0x67f   : > { %v3255_v13 = vpop.permute.xlu0 %3254  ;;  %v3337_v21 = vpop.permute.xlu1 %3336 }
 0x680   : > { %v3429_v57 = vsel %vm1315_vm2, %v6021_v59, %v3337_v21 }
 0x681   : > { %3484 = vrot.lane.b32.xlu0 %v3429_v57, %s3939_s27 }
 0x683   : > { %v6038_v41 = vpop.permute.xlu0 %3232  ;;  %v6040_v15 = vpop.permute.xlu1 %3258 }
 0x687   : > { %v3406_v53 = vpop.permute.xlu0 %3405  ;;  %v6042_v28 = vpop.permute.xlu1 %3287 }
 0x688   : > { %v3424_v3 = vsel %vm1315_vm2, %v6027_v42, %v6042_v28 }
 0x68b   : > { %v6044_v47 = vpop.permute.xlu0 %3356  ;;  %v3404_v6 = vpop.permute.xlu1 %3403 }
 0x68c   : > { %v3412_v19 = vsel %vm6420_vm12, %v3404_v6, %v3406_v53  ;;  %v3411_v25 = vsel %vm6421_vm7, %v3402_v8, %v3404_v6  ;;  %v2923_v6 = vsel %vm6424_vm5, %v2922_v30, %v6015_v46 }
 0x68f   : > { %v3386_v52 = vpop.permute.xlu0 %3385  ;;  %v3355_v60 = vpop.permute.xlu1 %3354 }
 0x690   : > { %v3434_v18 = vsel %vm1315_vm2, %v6025_v7, %v3386_v52  ;;  %v3362_v39 = vsel %vm932_vm11, %v3353_v4, %v3355_v60 }
 0x691   : > { %3494 = vrot.lane.b32.xlu1 %v3434_v18, %s3939_s27 }
 0x693   : > { %v3335_v58 = vpop.permute.xlu0 %3334  ;;  %v3378_v9 = vpop.permute.xlu1 %3377 }
 0x694   : > { %v3387_v10 = vsel %vm972_vm1, %v3378_v9, %v3380_v62 }
 0x695   : > { %3474 = vrot.lane.b32.xlu1 %v3424_v3, %s3939_s27  ;;  %v3430_v36 = vsel %vm1315_vm2, %v3362_v39, %v3387_v10  ;;  %v3220_v3 = vcombine.high %v2927_v54, %v2927_v54 }
 0x697   : > { %v6053_v32 = vpop.permute.xlu0 %3285  ;;  %v3329_v14 = vpop.permute.xlu1 %3328 }
 0x698   : > { %v3338_v48 = vsel %vm892_vm4, %v3329_v14, %v3331_v51 }
 0x699   : > { %3498 = vrot.lane.b32.xlu1 %v3412_v19, %s3939_s27 }
 0x69b   : > { %v6057_v12 = vpop.permute.xlu0 %3236  ;;  %v3280_v17 = vpop.permute.xlu1 %3279 }
 0x69c   : > { %v3289_v1 = vsel %vm812_vm3, %v3280_v17, %v6031_v61 }
 0x69d   : > { %3496 = vrot.lane.b32.xlu1 %v3411_v25, %s3939_s27 }
 0x69f   : > { %v3306_v50 = vpop.permute.xlu0 %3305  ;;  %v3408_v56 = vpop.permute.xlu1 %3407 }
 0x6a0   : > { %v3313_v29 = vsel %vm852_vm0, %v3304_v38, %v3306_v50  ;;  %v3413_v43 = vsel %vm6422_vm6, %v3406_v53, %v3408_v56  ;;  %v3314_v33 = vsel %vm852_vm0, %v3306_v50, %v6033_v63 }
 0x6a1   : > { %v6065_v27 = vsel %vm1315_vm2, %v3313_v29, %v3338_v48  ;;  %3500 = vrot.lane.b32.xlu0 %v3413_v43, %s3939_s27 }
 0x6a3   : > { %v3257_v5 = vpop.permute.xlu0 %3256  ;;  %v6070_v44 = vpop.permute.xlu1 %3358 }
 0x6a4   : > { %v3264_v26 = vsel %vm772_vm13, %v3255_v13, %v3257_v5  ;;  %v3363_v13 = vsel %vm932_vm11, %v3355_v60, %v6044_v47  ;;  %v3365_v0 = vsel %vm932_vm11, %v6070_v44, %v6025_v7 }
 0x6a5   : > { %3486 = vrot.lane.b32.xlu0 %v3430_v36, %s3939_s27  ;;  %v3420_v49 = vsel %vm1315_vm2, %v3264_v26, %v3289_v1 }
 0x6a7   : > { %v3382_v37 = vpop.permute.xlu0 %3381  ;;  %v3333_v20 = vpop.permute.xlu1 %3332 }
 0x6a8   : > { %v3339_v35 = vsel %vm892_vm4, %v3331_v51, %v3333_v20  ;;  %v3388_v4 = vsel %vm972_vm1, %v3380_v62, %v3382_v37  ;;  %v3341_v51 = vsel %vm892_vm4, %v3335_v58, %v3337_v21  ;;  %v2928_v21 = vmul.f32 %v2923_v6, %v5851_v55 }
 0x6a9   : > { %3466 = vrot.lane.b32.xlu0 %v3420_v49, %s3939_s27  ;;  %v3426_v8 = vsel %vm1315_vm2, %v3314_v33, %v3339_v35  ;;  %v3431_v62 = vsel %vm1315_vm2, %v3363_v13, %v3388_v4  ;;  %v3340_v55 = vsel %vm892_vm4, %v3333_v20, %v3335_v58  ;;  %vm6429_vm4 = vmmov %vm6426_vm9 }
 0x6aa   : > { %v3221_v48 = vcombine.high %v2928_v21, %v2928_v21 }
 0x6ab   : > { %v3310_v38 = vpop.permute.xlu0 %3309  ;;  %v3284_v57 = vpop.permute.xlu1 %3283 }
 0x6ac   : > { %v3316_v53 = vsel %vm852_vm0, %v3310_v38, %v6021_v59  ;;  %v3390_v59 = vsel %vm972_vm1, %v6029_v23, %v3386_v52  ;;  %v3315_v25 = vsel %vm852_vm0, %v6033_v63, %v3310_v38  ;;  %v3290_v63 = vsel %vm812_vm3, %v6031_v61, %v3284_v57  ;;  %vm6428_vm0 = vmmov %vm6422_vm6 }
 0x6ad   : > { %v3428_v18 = vsel %vm1315_vm2, %v3316_v53, %v3341_v51  ;;  %3488 = vrot.lane.b32.xlu0 %v3431_v62, %s3939_s27  ;;  %v3433_v14 = vsel %vm1315_vm2, %v3365_v0, %v3390_v59  ;;  %v3427_v43 = vsel %vm1315_vm2, %v3315_v25, %v3340_v55  ;;  %v3414_v36 = vsel %vm6428_vm0, %v3408_v56, %v6019_v31 }
 0x6ae   : > { %v3292_v61 = vsel %vm812_vm3, %v6053_v32, %v6042_v28  ;;  %v3389_v31 = vsel %vm972_vm1, %v3382_v37, %v6029_v23 }
 0x6af   : > { %v3261_v60 = vpop.permute.xlu0 %3260  ;;  %v3235_v9 = vpop.permute.xlu1 %3234 }
 0x6b0   : > { %v3241_v19 = vsel %vm6425_vm15, %v6038_v41, %v3235_v9  ;;  %v3267_v16 = vsel %vm772_vm13, %v3261_v60, %v6027_v42  ;;  %v3364_v42 = vsel %vm932_vm11, %v6044_v47, %v6070_v44  ;;  %v3266_v47 = vsel %vm772_vm13, %v6040_v15, %v3261_v60  ;;  %vm6431_vm11 = vmmov %vm6424_vm5 }
 0x6b1   : > { %3492 = vrot.lane.b32.xlu0 %v3433_v14, %s3939_s27  ;;  %v3416_v7 = vsel %vm1315_vm2, %v3220_v3, %v3241_v19  ;;  %v3423_v26 = vsel %vm1315_vm2, %v3267_v16, %v3292_v61  ;;  %v3432_v28 = vsel %vm1315_vm2, %v3364_v42, %v3389_v31  ;;  %v3961_v16 = vmov 1983009808  }
 0x6b2   : > { %v3706_v61 = vunpack.c.l.s4 %v3961_v16 }
 0x6b3   : > { %v3231_v17 = vpop.permute.xlu0 %3230  ;;  %v3239_v50 = vpop.permute.xlu1 %3238 }
 0x6b4   : > { %v3240_v52 = vsel %vm6426_vm9, %v3231_v17, %v6038_v41  ;;  %v3243_v29 = vsel %vm6427_vm14, %v6057_v12, %v3239_v50  ;;  %v3265_v41 = vsel %vm772_vm13, %v3257_v5, %v6040_v15  ;;  %v3242_v5 = vsel %vm6429_vm4, %v3235_v9, %v6057_v12  ;;  %vm6430_vm13 = vmmov %vm6424_vm5 }
 0x6b5   : > { %v3415_v10 = vsel %vm1315_vm2, %v2927_v54, %v3240_v52  ;;  %3480 = vrot.lane.b32.xlu0 %v3427_v43, %s3939_s27  ;;  %v3418_v39 = vsel %vm1315_vm2, %v3221_v48, %v3243_v29  ;;  %v3421_v58 = vsel %vm1315_vm2, %v3265_v41, %v3290_v63  ;;  %v3417_v56 = vsel %vm1315_vm2, %v2928_v21, %v3242_v5  ;;  %v3435_v43 = vld [vmem:[%s6214_s4] sm:$0xf] }
 0x6b6   : > { %3462 = vrot.lane.b32.xlu1 %v3418_v39, %s3939_s27  ;;  %v2929_v12 = vmul.f32 %v2920_v40, %v5858_v34  ;;  %v3707_v42 = vunpack.c.0.s8 %v3706_v61 }
 0x6b8   : > { %v3419_v23 = vsel %vm1315_vm2, %v2929_v12, %v3239_v50 }
 0x6b9   : > { %3468 = vrot.lane.b32.xlu0 %v3421_v58, %s3939_s27 }
 0x6ba   : > { %3502 = vrot.lane.b32.xlu1 %v3414_v36, %s3939_s27 }
 0x6bd   : > { %3472 = vrot.lane.b32.xlu0 %v3423_v26, %s3939_s27 }
 0x6be   : > { %3476 = vrot.lane.b32.xlu1 %v6065_v27, %s3939_s27  ;;  %v3291_v27 = vsel %vm812_vm3, %v3284_v57, %v6053_v32  ;;  %vm6432_vm3 = vmmov %vm6424_vm5 }
 0x6bf   : > { %v3422_v44 = vsel %vm1315_vm2, %v3266_v47, %v3291_v27  ;;  %vm6433_vm1 = vmmov %vm6432_vm3  ;;  %v6450_v47 = vld [vmem:[#allocation3_spill] sm:$0xff] }
 0x6c0   : > { %vm6434_vm12 = vmmov %vm6433_vm1  ;;  %v3710_v27 = vsub.s32 %v3707_v42, %v6450_v47 }
 0x6c1   : > { %3460 = vrot.lane.b32.xlu0 %v3417_v56, %s3939_s27  ;;  %vm6435_vm7 = vmmov %vm6433_vm1 }
 0x6c2   : > { %3490 = vrot.lane.b32.xlu1 %v3432_v28, %s3939_s27  ;;  %vm6436_vm6 = vmmov %vm6433_vm1 }
 0x6c3   : > { %vm6437_vm8 = vmmov %vm6433_vm1 }
 0x6c4   : > { %vm6438_vm5 = vmmov %vm6433_vm1 }
 0x6c5   : > { %3464 = vrot.lane.b32.xlu0 %v3419_v23, %s3939_s27  ;;  %vm6440_vm15 = vmmov %vm6433_vm1 }
 0x6c6   : > { %3478 = vrot.lane.b32.xlu1 %v3426_v8, %s3939_s27  ;;  %vm6441_vm9 = vmmov %vm6433_vm1 }
 0x6c7   : > { %vm6442_vm14 = vmmov %vm6433_vm1 }
 0x6c8   : > { %vm6443_vm0 = vmmov %vm6433_vm1 }
 0x6c9   : > { %vm6444_vm4 = vmmov %vm6443_vm0 }
 0x6ca   : > { %3482 = vrot.lane.b32.xlu1 %v3428_v18, %s3939_s27 }
 0x6ce   : > { %3470 = vrot.lane.b32.xlu1 %v3422_v44, %s3939_s27 }
 0x6d2   : > { %3458 = vrot.lane.b32.xlu1 %v3416_v7, %s3939_s27 }
 0x6d6   : > { %3456 = vrot.lane.b32.xlu1 %v3415_v10, %s3939_s27 }
 0x6da   : > { %v3505_v40 = vpop.permute.xlu0 %3504 }
 0x6f3   : > { %v3485_v1 = vpop.permute.xlu0 %3484 }
 0x703   : > { %v3495_v34 = vpop.permute.xlu1 %3494 }
 0x707   : > { %v3475_v46 = vpop.permute.xlu1 %3474 }
 0x70b   : > { %v3499_v37 = vpop.permute.xlu1 %3498 }
 0x70f   : > { %v3497_v20 = vpop.permute.xlu1 %3496 }
 0x710   : > { %v3522_v33 = vsel %vm6431_vm11, %v3497_v20, %v3499_v37  ;;  %vm6446_vm11 = vmmov %vm6443_vm0 }
 0x713   : > { %v3501_v15 = vpop.permute.xlu0 %3500 }
 0x714   : > { %v3523_v22 = vsel %vm6430_vm13, %v3499_v37, %v3501_v15  ;;  %vm6445_vm13 = vmmov %vm6443_vm0 }
 0x715   : > { %3854 = vmatprep.subr.msk.mxu0 %vm1315_vm2, %v3523_v22 }
 0x716   : > { %3855 = vmatpush1.msk.msra.mxu0 %vm1315_vm2, %v3522_v33 }
 0x717   : > { %v3487_v32 = vpop.permute.xlu0 %3486 }
 0x71b   : > { %v3467_v35 = vpop.permute.xlu0 %3466 }
 0x71f   : > { %v3489_v49 = vpop.permute.xlu0 %3488 }
 0x720   : > { %v3518_v60 = vsel %vm6437_vm8, %v3487_v32, %v3489_v49 }
 0x723   : > { %v3493_v30 = vpop.permute.xlu0 %3492 }
 0x724   : > { %v3521_v57 = vsel %vm6434_vm12, %v3493_v30, %v3495_v34  ;;  %vm6449_vm12 = vmmov %vm6443_vm0 }
 0x727   : > { %v3481_v4 = vpop.permute.xlu0 %3480 }
 0x728   : > { %v3463_v8 = vpop.permute.xlu1 %3462 }
 0x72b   : > { %v3469_v54 = vpop.permute.xlu0 %3468 }
 0x72c   : > { %v3503_v38 = vpop.permute.xlu1 %3502  ;;  %v3510_v48 = vsel %vm6445_vm13, %v3467_v35, %v3469_v54 }
 0x72d   : > { %v3524_v13 = vsel %vm6432_vm3, %v3501_v15, %v3503_v38  ;;  %v3525_v51 = vsel %vm6433_vm1, %v3503_v38, %v3505_v40  ;;  %vm6447_vm3 = vmmov %vm6443_vm0 }
 0x72e   : > { %3857 = vmatprep.subr.msk.mxu1 %vm1315_vm2, %v3525_v51 }
 0x72f   : > { %3858 = vmatpush1.msk.msra.mxu1 %vm1315_vm2, %v3524_v13  ;;  %v3473_v6 = vpop.permute.xlu0 %3472  ;;  %vm6439_vm2 = vmmov %vm6433_vm1 }
 0x730   : > { %v3477_v53 = vpop.permute.xlu1 %3476  ;;  %3648 = vmatprep.subr.mxu1 %v3521_v57  ;;  %v3513_v17 = vsel %vm6442_vm14, %v3473_v6, %v3475_v46  ;;  %vm6448_vm1 = vmmov %vm6443_vm0 }
 0x733   : > { %v3461_v3 = vpop.permute.xlu0 %3460 }
 0x734   : > { %v3491_v62 = vpop.permute.xlu1 %3490  ;;  %v3508_v10 = vsel %vm6447_vm3, %v3461_v3, %v3463_v8 }
 0x735   : > { %v3520_v18 = vsel %vm6435_vm7, %v3491_v62, %v3493_v30  ;;  %v3519_v0 = vsel %vm6436_vm6, %v3489_v49, %v3491_v62 }
 0x736   : > { %3577 = vmatprep.subr.mxu0 %v3519_v0  ;;  %3649 = vmatpush1.msra.mxu1 %v3520_v18 }
 0x737   : > { %3578 = vmatpush1.msra.mxu0 %v3518_v60  ;;  %v3465_v7 = vpop.permute.xlu0 %3464 }
 0x738   : > { %v3479_v21 = vpop.permute.xlu1 %3478  ;;  %v3509_v29 = vsel %vm6446_vm11, %v3463_v8, %v3465_v7 }
 0x739   : > { %v3514_v59 = vsel %vm6438_vm5, %v3477_v53, %v3479_v21  ;;  %v3515_v9 = vsel %vm6439_vm2, %v3479_v21, %v3481_v4 }
 0x73a   : > { %3579 = vmatprep.subr.mxu0 %v3515_v9 }
 0x73b   : > { %3580 = vmatpush1.msra.mxu0 %v3514_v59 }
 0x73c   : > { %v3483_v19 = vpop.permute.xlu1 %3482 }
 0x73d   : > { %v3516_v14 = vsel %vm6440_vm15, %v3481_v4, %v3483_v19  ;;  %v3517_v25 = vsel %vm6441_vm9, %v3483_v19, %v3485_v1 }
 0x73e   : > { %3650 = vmatprep.subr.mxu1 %v3517_v25 }
 0x73f   : > { %3651 = vmatpush1.msra.mxu1 %v3516_v14 }
 0x740   : > { %v3471_v55 = vpop.permute.xlu1 %3470  ;;  %3652 = vmatprep.subr.mxu1 %v3513_v17 }
 0x741   : > { %v3512_v50 = vsel %vm6443_vm0, %v3471_v55, %v3473_v6  ;;  %v3511_v52 = vsel %vm6444_vm4, %v3469_v54, %v3471_v55 }
 0x742   : > { %3581 = vmatprep.subr.mxu0 %v3511_v52  ;;  %3653 = vmatpush1.msra.mxu1 %v3512_v50 }
 0x743   : > { %3582 = vmatpush1.msra.mxu0 %v3510_v48  ;;  %3654 = vmatprep.subr.mxu1 %v3509_v29 }
 0x744   : > { %v3459_v63 = vpop.permute.xlu1 %3458  ;;  %3655 = vmatpush1.msra.mxu1 %v3508_v10 }
 0x745   : > { %v3507_v39 = vsel %vm6448_vm1, %v3459_v63, %v3461_v3  ;;  %3859 = vmatmul.mubr.msk.f32.vlgmr.msra.gmra.mxu1 %vm2693_vm10, %v3435_v43 }
 0x746   : > { %3583 = vmatprep.subr.mxu0 %v3507_v39 }
 0x748   : > { %v3457_v41 = vpop.permute.xlu1 %3456 }
 0x749   : > { %v3506_v58 = vsel %vm6449_vm12, %v3457_v41, %v3459_v63 }
 0x74a   : > { %3584 = vmatpush1.msra.mxu0 %v3506_v58 }
 0x74b   : > { %3856 = vmatmul.mubr.msk.f32.vlgmr.msra.gmra.mxu0 %vm2693_vm10, %v3435_v43 }
 0x805   : > { %v3690_v36 = vpop.f32.mrf.mxu1 }
 0x806   : > { %v3691_v5 = vadd.f32 %v3690_v36, %v6343_v2 }
 0x807   : > { %v3692_v26 = vpop.f32.mrf.mxu1 }
 0x808   : > { %v3693_v31 = vadd.f32 %v3692_v26, %v5317_v24 }
 0x80a   : > { %v3861_v23 = vpack.c.bf16 %v3693_v31, %v3691_v5 }
 0x80b   : > { %v3619_v56 = vpop.f32.mrf.mxu0 }
 0x80c   : > { %v3620_v12 = vadd.f32 %v3619_v56, %v6344_v45  ;;  %v3718_v46 = vrot.slane %v3861_v23, %v3710_v27 }
 0x80d   : > { %v3621_v28 = vpop.f32.mrf.mxu0 }
 0x80e   : > { %v3622_v44 = vadd.f32 %v3621_v28, %v5325_v11 }
 0x810   : > { %v3860_v34 = vpack.c.bf16 %v3622_v44, %v3620_v12 }
 0x812   : > { %v3711_v40 = vrot.slane %v3860_v34, %v3710_v27 }
 0x814   : > { %v3719_v2 = vcombine.low %v3711_v40, %v3718_v46 }
 0x816   : > { %3721 = vst [vmem:[%s379_s29] sm:$0xff] %v3719_v2 }
 0x817 PF: > { %s20_s13 = sadd.s32 1, %s3922_s13  }
 0x818   : > { %p17_p4 = scmp.ge.s32.totalorder %s20_s13, 4  }
 0x81a   :  { %19 = sbr.rel (!%p17_p4) target bundleno = 1 (0x1), region = 136 }

// kernel: a_call__.6
= control target key start
LH: loop header
LB: loop body
LE: loop exit
PB: predicated region body
PF: predicated region fallthrough
CT: control target
= control target key end

     0   :  { %s3945_s30 = smov 0   ;;  %s6124_s0 = inlined_call_operand.vmem [shape: bf16[2,4,512], index: 0, kind: input, shape index: {}]   ;;  %s6125_s1 = inlined_call_operand.vmem [shape: f32[1,27], index: 1, kind: input, shape index: {}]   ;;  %s6126_s2 = inlined_call_operand.vmem [shape: f32[4,36], index: 2, kind: input, shape index: {}]   ;;  %s6127_s3 = inlined_call_operand.vmem [shape: f32[4,36], index: 3, kind: input, shape index: {}]   ;;  %s6128_s4 = inlined_call_operand.vmem [shape: f32[27,512], index: 4, kind: input, shape index: {}]   ;;  %s6129_s5 = inlined_call_operand.vmem [shape: f32[9,512], index: 5, kind: input, shape index: {}]   ;;  %s6130_s6 = inlined_call_operand.vmem [shape: f32[9,512], index: 6, kind: input, shape index: {}]   ;;  %s6131_s7 = inlined_call_operand.vmem [shape: f32[4,1], index: 7, kind: input, shape index: {}]   ;;  %s6132_s8 = inlined_call_operand.vmem [shape: f32[4,1], index: 8, kind: input, shape index: {}]   ;;  %s6133_s9 = inlined_call_operand.vmem [shape: bf16[2,4,512], index: 9, kind: output, shape index: {}]  }
   0x1 LB: > { %s3725_s10 = sadd.s32 4294967295, %s3855_s30   ;;  %p3729_p0 = scmp.ge.s32.totalorder %s3855_s30, 1  ;;  %s3855_s30 = sphi %s3945_s30, %s19_s30  }
   0x2   : > { %p287_p1 = scmp.lt.s32.totalorder %s3855_s30, 3 }
   0x4   : > { %p288_p2 = pnand %p3729_p0, %p287_p1 }
   0x6   : > { %291 = sbr.rel (%p288_p2) target bundleno = 2067 (0x813), region = 56 }
   0xb   : > { %v3750_v0 = vld [vmem:[%s6128_s4 + $0x41] ss:$8 sm:$0xf]  ;;  %s6135_s13 = smov 82   ;;  %s6141_s16 = smov 1   ;;  %v347_v3 = vlaneseq  ;;  %vm6162_vm0 = vcmask 592896  }
   0xc   : > { %543 = vrot.lane.b32.xlu0 %v3750_v0, %s6135_s13  ;;  %v3752_v1 = vld [vmem:[%s6128_s4 + $0x43] ss:$8 sm:$0xf]  ;;  %v3757_v2 = vld [vmem:[%s6128_s4 + $0x60] ss:$8 sm:$0xf] }
   0xd   : > { %559 = vrot.lane.b32.xlu1 %v3752_v1, %s6141_s16  ;;  %v3753_v4 = vld [vmem:[%s6128_s4 + $0x44] ss:$8 sm:$0xf]  ;;  %p323_p3 = scmp.lt.s32.totalorder %s3725_s10, 1  ;;  %s3859_s21 = smov 16   ;;  %v3975_v8 = vshrl.u32 %v347_v3, 7 }
   0xe   : > { %s3860_s22 = smov 2   ;;  %v3754_v5 = vld [vmem:[%s6128_s4 + $0x45] ss:$8 sm:$0xf]  ;;  %v3861_v6 = vmov 1966171168  }
   0xf   : > { %s6361_s10 = smov (!%p323_p3, %s3725_s10), 1  ;;  %v345_v7 = vunpack.c.l.s4 %v3861_v6  ;;  %6192 = vst [vmem:[#allocation3_spill] sm:$0xff] %v3975_v8  ;;  %v3758_v9 = vld [vmem:[%s6128_s4 + $0x61] ss:$8 sm:$0xf]  ;;  %s3862_s28 = smov 8  }
  0x10   : > { %604 = vrot.lane.b32.xlu0 %v3757_v2, %s3859_s21  ;;  %s6134_s27 = sshll.u32 %s6361_s10, 3  ;;  %s3863_s14 = smov 17   ;;  %v3759_v13 = vld [vmem:[%s6128_s4 + $0x62] ss:$8 sm:$0xf]  ;;  %vm6161_vm1 = vcmask 1044040  }
  0x11   : > { %568 = vrot.lane.b32.xlu1 %v3753_v4, %s3860_s22  ;;  %v346_v10 = vunpack.c.0.s8 %v345_v7  ;;  %s327_s12 = scalar_lea.vmem %s6124_s0, %s6134_s27  ;;  %s3864_s18 = smov 18   ;;  %v3756_v19 = vld [vmem:[%s6128_s4 + $0x47] ss:$8 sm:$0xf]  ;;  %vm336_vm2 = vcmask 146436   ;;  %v6143_v23 = vmov 0.0  }
  0x12   : > { %v339_v11 = vld [vmem:[%s327_s12] sm:$0xff]  ;;  %s3865_s23 = smov 10   ;;  %s3866_s24 = smov 73   ;;  %334 = vst.msk [vmem:[#allocation2] sm:$0xf] %vm6162_vm0, %v6143_v23  ;;  %vm337_vm3 = vmor %vm336_vm2, %vm6161_vm1  ;;  %1968 = vmatprep.mubr.f32.mxu1 %v6143_v23  ;;  %1897 = vmatprep.mubr.f32.mxu0 %v6143_v23  ;;  %vm373_vm4 = vcmp.ge.s32.totalorder %v347_v3, 73 }
  0x13   : > { %v349_v12 = vsub.s32 %v346_v10, %v3975_v8  ;;  %v3992_v14 = vunpack.c.l.bf16 %v339_v11  ;;  %v3994_v15 = vunpack.c.h.bf16 %v339_v11  ;;  %v3741_v21 = vld [vmem:[%s6128_s4 + $0x20] ss:$8 sm:$0xf]  ;;  %v3755_v22 = vld [vmem:[%s6128_s4 + $0x46] ss:$8 sm:$0xf] }
  0x14   : > { %577 = vrot.lane.b32.xlu0 %v3754_v5, %s3862_s28  ;;  %338 = vst.msk [vmem:[#allocation2 + $0x10] sm:$0xff] %vm337_vm3, %v6143_v23  ;;  %s3868_s12 = smov 9   ;;  %v3743_v24 = vld [vmem:[%s6128_s4 + $0x22] ss:$8 sm:$0xf]  ;;  %s6137_s25 = smov 65  }
  0x15   : > { %613 = vrot.lane.b32.xlu1 %v3758_v9, %s3863_s14  ;;  %6193 = vst [vmem:[#allocation4_spill] sm:$0xff] %v3992_v14  ;;  %6194 = vst [vmem:[#allocation5_spill] sm:$0xff] %v3994_v15  ;;  %v350_v16 = vrot.slane %v3992_v14, %v349_v12  ;;  %v357_v17 = vrot.slane %v3994_v15, %v349_v12  ;;  %v3749_v25 = vld [vmem:[%s6128_s4 + $0x40] ss:$8 sm:$0xf]  ;;  %s3870_s26 = smov 81  }
  0x16   : > { %v3744_v26 = vld [vmem:[%s6128_s4 + $0x23] ss:$8 sm:$0xf]  ;;  %v3742_v27 = vld [vmem:[%s6128_s4 + $0x21] ss:$8 sm:$0xf] }
  0x17   : > { %v358_v18 = vcombine.low %v350_v16, %v357_v17  ;;  %s6139_s15 = smov 66   ;;  %s3872_s17 = smov 64   ;;  %v3745_v28 = vld [vmem:[%s6128_s4 + $0x24] ss:$8 sm:$0xf]  ;;  %vm374_vm5 = vcmp.lt.s32.totalorder %v347_v3, 585 }
  0x18   : > { %v3734_v29 = vld [vmem:[%s6128_s4 + $0x1] ss:$8 sm:$0xf]  ;;  %s6174_s29 = smov 72   ;;  %s3875_s13 = smov 80   ;;  %vm6183_vm6 = vcmask 596992   ;;  %vm375_vm7 = vmand %vm373_vm4, %vm374_vm5 }
  0x19   : > { %622 = vrot.lane.b32.xlu1 %v3759_v13, %s3864_s18  ;;  %v365_v20 = vrot.slane %v358_v18, %v349_v12  ;;  %v3746_v30 = vld [vmem:[%s6128_s4 + $0x25] ss:$8 sm:$0xf]  ;;  %v3735_v31 = vld [vmem:[%s6128_s4 + $0x2] ss:$8 sm:$0xf] }
  0x1a   : > { %v3747_v32 = vld [vmem:[%s6128_s4 + $0x26] ss:$8 sm:$0xf]  ;;  %v3736_v33 = vld [vmem:[%s6128_s4 + $0x3] ss:$8 sm:$0xf] }
  0x1b   : > { %366 = vrot.lane.b32.xlu0 %v365_v20, %s3866_s24  ;;  %v3738_v34 = vld [vmem:[%s6128_s4 + $0x5] ss:$8 sm:$0xf]  ;;  %v3737_v35 = vld [vmem:[%s6128_s4 + $0x4] ss:$8 sm:$0xf] }
  0x1c   : > { %v3748_v36 = vld [vmem:[%s6128_s4 + $0x27] ss:$8 sm:$0xf]  ;;  %v3739_v37 = vld [vmem:[%s6128_s4 + $0x6] ss:$8 sm:$0xf] }
  0x1d   : > { %595 = vrot.lane.b32.xlu1 %v3756_v19, %s3865_s23  ;;  %v3740_v38 = vld [vmem:[%s6128_s4 + $0x7] ss:$8 sm:$0xf]  ;;  %vm6146_vm8 = vcmask 670720   ;;  %v4100_v55 = vsub.s32 1, %v3975_v8  ;;  %v4103_v56 = vsub.s32 2, %v3975_v8 }
  0x1e   : > { %v4112_v61 = vsub.s32 3, %v3975_v8  ;;  %v4115_v62 = vsub.s32 4, %v3975_v8  ;;  %v3751_v4 = vld [vmem:[%s6128_s4 + $0x42] ss:$8 sm:$0xf]  ;;  %v4129_v5 = vsub.s32 0, %v3975_v8 }
  0x1f   : > { %586 = vrot.lane.b32.xlu0 %v3755_v22, %s3868_s12  ;;  %6195 = vst [vmem:[#allocation6_spill] sm:$0xff] %v4103_v56  ;;  %vm6153_vm9 = vcmask 7168   ;;  %vm397_vm10 = vcmask 15360   ;;  %vm407_vm11 = vcmask 64512   ;;  %vm437_vm12 = vcmask 130048   ;;  %s3877_s11 = smov 79  }
  0x20   : > { %vm427_vm13 = vcmask 80896   ;;  %vm6182_vm14 = vcmask 138240   ;;  %vm457_vm15 = vcmask 146432   ;;  %vm6154_vm2 = vcmask 72704   ;;  %s3879_s19 = smov 71   ;;  %s6168_s20 = smov 126  }
  0x21   : > { %454 = vrot.lane.b32.xlu1 %v3741_v21, %s3864_s18  ;;  %s6197_s18 = smov 65   ;;  %vm6165_vm3 = vcmask 523264   ;;  %vm6181_vm4 = vcmask 531456   ;;  %vm6145_vm5 = vcmask 539648   ;;  %s3883_s27 = smov 56   ;;  %vm6191_vm1 = vcmask 1044480  }
  0x22   : > { %vm6189_vm0 = vcmask 1045504  }
  0x23   : > { %533 = vrot.lane.b32.xlu0 %v3749_v25, %s3870_s26 }
  0x25   : > { %474 = vrot.lane.b32.xlu1 %v3743_v24, %s6137_s25  ;;  %s3881_s25 = smov 62  }
  0x27   : > { %464 = vrot.lane.b32.xlu0 %v3742_v27, %s3872_s17 }
  0x29   : > { %484 = vrot.lane.b32.xlu1 %v3744_v26, %s6139_s15  ;;  %s3876_s15 = smov 127  }
  0x2b   : > { %384 = vrot.lane.b32.xlu0 %v3734_v29, %s6141_s16  ;;  %s3874_s16 = smov 74  }
  0x2d   : > { %494 = vrot.lane.b32.xlu1 %v3745_v28, %s6174_s29 }
  0x2f   : > { %394 = vrot.lane.b32.xlu0 %v3735_v31, %s3860_s22  ;;  %s3878_s22 = smov 63  }
  0x31   : > { %504 = vrot.lane.b32.xlu1 %v3746_v30, %s3866_s24 }
  0x33   : > { %404 = vrot.lane.b32.xlu0 %v3736_v33, %s3862_s28  ;;  %s6172_s28 = smov 110  }
  0x35   : > { %513 = vrot.lane.b32.xlu1 %v3747_v32, %s3874_s16 }
  0x37   : > { %414 = vrot.lane.b32.xlu0 %v3737_v35, %s3868_s12 }
  0x39   : > { %424 = vrot.lane.b32.xlu1 %v3738_v34, %s3865_s23  ;;  %s3885_s23 = smov 55  }
  0x3b   : > { %523 = vrot.lane.b32.xlu0 %v3748_v36, %s3875_s13 }
  0x3f   : > { %434 = vrot.lane.b32.xlu0 %v3739_v37, %s3859_s21  ;;  %s3884_s21 = smov 120  }
  0x43   : > { %444 = vrot.lane.b32.xlu0 %v3740_v38, %s3863_s14 }
  0x7e   : > { %v544_v40 = vpop.permute.xlu0 %543 }
  0x7f   : > { %v560_v39 = vpop.permute.xlu1 %559  ;;  %v545_v52 = vrot.slane %v544_v40, 7 }
  0x80   : > { %v561_v10 = vrot.slane %v560_v39, 7 }
  0x81   : > { %v547_v58 = vsel %vm6146_vm8, %v545_v52, %v544_v40  ;;  %vm6180_vm8 = vcmask 654336  }
  0x82   : > { %v4078_v42 = vpop.permute.xlu0 %604  ;;  %v562_v17 = vsel %vm6153_vm9, %v561_v10, %v560_v39 }
  0x83   : > { %v4076_v41 = vpop.permute.xlu1 %568 }
  0x84   : > { %v570_v28 = vrot.slane %v4076_v41, 7 }
  0x86   : > { %v4084_v45 = vpop.permute.xlu0 %577  ;;  %v571_v33 = vsel %vm397_vm10, %v570_v28, %v4076_v41 }
  0x87   : > { %v4080_v43 = vpop.permute.xlu1 %613 }
  0x8b   : > { %v4082_v44 = vpop.permute.xlu1 %622 }
  0x8d   : > { %v367_v47 = vpop.permute.xlu0 %366 }
  0x8e   : > { %v368_v48 = vrot.slane %v367_v47, 7 }
  0x8f   : > { %v4088_v46 = vpop.permute.xlu1 %595 }
  0x90   : > { %v370_v49 = vsel %vm6183_vm6, %v368_v48, %v367_v47  ;;  %v606_v48 = vrot.slane %v4078_v42, 7 }
  0x91   : > { %376 = vst.msk [vmem:[#allocation2] ss:$4 sm:$0x1f] %vm375_vm7, %v370_v49  ;;  %v4091_v50 = vpop.permute.xlu0 %586  ;;  %vm6179_vm7 = vcmask 588800  }
  0x93   : > { %v4093_v51 = vpop.permute.xlu1 %454 }
  0x95   : > { %v4095_v53 = vpop.permute.xlu0 %533 }
  0x97   : > { %v4097_v54 = vpop.permute.xlu1 %474 }
  0x98   : > { %v4105_v57 = vld [vmem:[#allocation2] ss:$4 sm:$0x1f] }
  0x99   : > { %v4108_v59 = vpop.permute.xlu0 %464  ;;  %v549_v60 = vmul.f32 %v547_v58, %v4105_v57  ;;  %v551_v3 = vld [vmem:[#allocation2 + $0x4] ss:$4 sm:$0xf] }
  0x9a   : > { %v554_v9 = vmul.f32 %v3751_v4, %v551_v3  ;;  %v4140_v18 = vld [vmem:[#allocation2 + $0x4] ss:$4 sm:$0x1f]  ;;  %v607_v4 = vsel %vm437_vm12, %v606_v48, %v4078_v42 }
  0x9b   : > { %v1349_v63 = vrot.slane %v549_v60, %v4103_v56  ;;  %v1345_v0 = vrot.slane %v549_v60, %v4100_v55  ;;  %v4119_v1 = vpop.permute.xlu1 %484  ;;  %v1357_v6 = vrot.slane %v549_v60, %v4115_v62  ;;  %v1353_v7 = vrot.slane %v549_v60, %v4112_v61 }
  0x9c   : > { %v1381_v13 = vrot.slane %v554_v9, %v4129_v5  ;;  %v1341_v16 = vrot.slane %v549_v60, %v4129_v5  ;;  %v1389_v20 = vrot.slane %v554_v9, %v4103_v56  ;;  %v1385_v21 = vrot.slane %v554_v9, %v4100_v55 }
  0x9d   : > { %v4121_v2 = vpop.permute.xlu0 %384  ;;  %1362 = vrot.lane.b32.xlu1 %v1349_v63, %s3876_s15  ;;  %1360 = vrot.lane.b32.xlu0 %v1345_v0, %s3876_s15  ;;  %v564_v22 = vmul.f32 %v562_v17, %v4140_v18  ;;  %v1393_v27 = vrot.slane %v554_v9, %v4112_v61  ;;  %v573_v39 = vmul.f32 %v571_v33, %v4140_v18  ;;  %v579_v33 = vrot.slane %v4084_v45, 7 }
  0x9e   : > { %v609_v10 = vmul.f32 %v607_v4, %v4140_v18 }
  0x9f   : > { %v4135_v12 = vpop.permute.xlu1 %494  ;;  %v1414_v26 = vrot.slane %v564_v22, %v4129_v5  ;;  %v1422_v31 = vrot.slane %v564_v22, %v4103_v56  ;;  %v1418_v32 = vrot.slane %v564_v22, %v4100_v55  ;;  %v1430_v37 = vrot.slane %v564_v22, %v4115_v62 }
  0xa0   : > { %v1426_v38 = vrot.slane %v564_v22, %v4112_v61  ;;  %v1454_v58 = vrot.slane %v573_v39, %v4129_v5  ;;  %v1458_v60 = vrot.slane %v573_v39, %v4100_v55  ;;  %v1466_v9 = vrot.slane %v573_v39, %v4112_v61 }
  0xa1   : > { %v395_v11 = vpop.permute.xlu0 %394  ;;  %1366 = vrot.lane.b32.xlu1 %v1357_v6, %s3876_s15  ;;  %1364 = vrot.lane.b32.xlu0 %v1353_v7, %s3876_s15  ;;  %v1462_v7 = vrot.slane %v573_v39, %v4103_v56  ;;  %v1470_v42 = vrot.slane %v573_v39, %v4115_v62  ;;  %v1616_v17 = vrot.slane %v609_v10, %v4129_v5 }
  0xa2   : > { %v396_v29 = vrot.slane %v395_v11, 7  ;;  %v1620_v22 = vrot.slane %v609_v10, %v4100_v55 }
  0xa3   : > { %v4147_v24 = vpop.permute.xlu1 %504 }
  0xa4   : > { %v398_v36 = vsel %vm397_vm10, %v396_v29, %v395_v11  ;;  %v1628_v29 = vrot.slane %v609_v10, %v4112_v61  ;;  %vm6152_vm10 = vcmask 605184  }
  0xa5   : > { %v405_v19 = vpop.permute.xlu0 %404  ;;  %1394 = vrot.lane.b32.xlu1 %v1381_v13, %s3870_s26  ;;  %1358 = vrot.lane.b32.xlu0 %v1341_v16, %s3876_s15  ;;  %v4171_v47 = vmul.f32 %v398_v36, %v4105_v57  ;;  %v580_v36 = vsel %vm407_vm11, %v579_v33, %v4084_v45 }
  0xa6   : > { %v406_v35 = vrot.slane %v405_v19, 7  ;;  %v582_v39 = vmul.f32 %v580_v36, %v4140_v18 }
  0xa7   : > { %v4158_v30 = vpop.permute.xlu1 %513  ;;  %v709_v3 = vrot.slane %v4171_v47, %v4115_v62 }
  0xa8   : > { %v408_v41 = vsel %vm407_vm11, %v406_v35, %v405_v19  ;;  %v615_v19 = vrot.slane %v4080_v43, 7  ;;  %v1499_v48 = vrot.slane %v582_v39, %v4100_v55  ;;  %v1511_v4 = vrot.slane %v582_v39, %v4115_v62 }
  0xa9   : > { %1398 = vrot.lane.b32.xlu1 %v1389_v20, %s3870_s26  ;;  %1396 = vrot.lane.b32.xlu0 %v1385_v21, %s3870_s26  ;;  %v4151_v25 = vpop.permute.xlu0 %414  ;;  %v4180_v63 = vmul.f32 %v408_v41, %v4105_v57  ;;  %vm6164_vm11 = vcmask 662528  }
  0xab   : > { %v425_v40 = vpop.permute.xlu1 %424  ;;  %v749_v11 = vrot.slane %v4180_v63, %v4115_v62  ;;  %v733_v28 = vrot.slane %v4180_v63, %v4129_v5 }
  0xac   : > { %v426_v52 = vrot.slane %v425_v40, 7 }
  0xad   : > { %1431 = vrot.lane.b32.xlu1 %v1414_v26, %s3875_s13  ;;  %1400 = vrot.lane.b32.xlu0 %v1393_v27, %s3870_s26  ;;  %v4163_v34 = vpop.permute.xlu0 %523  ;;  %v1624_v26 = vrot.slane %v609_v10, %v4103_v56  ;;  %v616_v27 = vsel %vm6182_vm14, %v615_v19, %v4080_v43 }
  0xae   : > { %v428_v6 = vsel %vm427_vm13, %v426_v52, %v425_v40  ;;  %v624_v40 = vrot.slane %v4082_v44, 7  ;;  %v1507_v52 = vrot.slane %v582_v39, %v4112_v61 }
  0xaf   : > { %v4194_v16 = vmul.f32 %v428_v6, %v4105_v57 }
  0xb0   : > { %v625_v45 = vsel %vm457_vm15, %v624_v40, %v4082_v44  ;;  %v588_v44 = vrot.slane %v4091_v50, 7 }
  0xb1   : > { %1435 = vrot.lane.b32.xlu1 %v1422_v31, %s3875_s13  ;;  %1433 = vrot.lane.b32.xlu0 %v1418_v32, %s3875_s13  ;;  %v435_v49 = vpop.permute.xlu0 %434  ;;  %v1632_v31 = vrot.slane %v609_v10, %v4115_v62  ;;  %v618_v32 = vmul.f32 %v616_v27, %v4140_v18 }
  0xb2   : > { %v436_v0 = vrot.slane %v435_v49, 7 }
  0xb3   : > { %v1656_v43 = vrot.slane %v618_v32, %v4129_v5  ;;  %v1660_v35 = vrot.slane %v618_v32, %v4100_v55  ;;  %v1672_v41 = vrot.slane %v618_v32, %v4115_v62 }
  0xb4   : > { %v438_v13 = vsel %vm437_vm12, %v436_v0, %v435_v49  ;;  %v1495_v49 = vrot.slane %v582_v39, %v4129_v5  ;;  %vm1248_vm12 = vcmask 1040384  }
  0xb5   : > { %1439 = vrot.lane.b32.xlu1 %v1430_v37, %s3875_s13  ;;  %1437 = vrot.lane.b32.xlu0 %v1426_v38, %s3875_s13  ;;  %v4200_v20 = vmul.f32 %v438_v13, %v4105_v57  ;;  %v1664_v37 = vrot.slane %v618_v32, %v4103_v56  ;;  %v1668_v38 = vrot.slane %v618_v32, %v4112_v61 }
  0xb7   : > { %6196 = vst [vmem:[#allocation7_spill] sm:$0xff] %v4200_v20 }
  0xb9   : > { %1471 = vrot.lane.b32.xlu1 %v1454_v58, %s3877_s11  ;;  %1473 = vrot.lane.b32.xlu0 %v1458_v60, %s3877_s11  ;;  %v627_v58 = vmul.f32 %v625_v45, %v4140_v18  ;;  %v1503_v60 = vrot.slane %v582_v39, %v4103_v56 }
  0xbb   : > { %v1696_v0 = vrot.slane %v627_v58, %v4129_v5  ;;  %v1704_v6 = vrot.slane %v627_v58, %v4103_v56  ;;  %v1700_v10 = vrot.slane %v627_v58, %v4100_v55  ;;  %v1712_v13 = vrot.slane %v627_v58, %v4115_v62 }
  0xbd   : > { %1475 = vrot.lane.b32.xlu1 %v1462_v7, %s3877_s11  ;;  %1477 = vrot.lane.b32.xlu0 %v1466_v9, %s3877_s11  ;;  %v589_v7 = vsel %vm6154_vm2, %v588_v44, %v4091_v50  ;;  %v4305_v44 = vpop.permute.xlu0 %444 }
  0xbe   : > { %v591_v9 = vmul.f32 %v589_v7, %v4140_v18  ;;  %6198 = vst [vmem:[#allocation8_spill] sm:$0xff] %v4305_v44  ;;  %v386_v7 = vrot.slane %v4121_v2, 7 }
  0xc0   : > { %v1539_v50 = vrot.slane %v591_v9, %v4100_v55  ;;  %v1535_v27 = vrot.slane %v591_v9, %v4129_v5  ;;  %v1551_v32 = vrot.slane %v591_v9, %v4115_v62 }
  0xc1   : > { %1479 = vrot.lane.b32.xlu1 %v1470_v42, %s3877_s11  ;;  %1633 = vrot.lane.b32.xlu0 %v1616_v17, %s6197_s18  ;;  %v597_v42 = vrot.slane %v4088_v46, 7  ;;  %v1708_v17 = vrot.slane %v627_v58, %v4112_v61  ;;  %s6170_s11 = smov 119  }
  0xc3   : > { %v598_v19 = vsel %vm427_vm13, %v597_v42, %v4088_v46  ;;  %v456_v46 = vrot.slane %v4093_v51, 7  ;;  %v388_v42 = vsel %vm6153_vm9, %v386_v7, %v4121_v2  ;;  %vm1039_vm13 = vcmask 515072  }
  0xc4   : > { %vm1481_vm9 = vcmask 646144  }
  0xc5   : > { %1635 = vrot.lane.b32.xlu1 %v1620_v22, %s6197_s18  ;;  %1637 = vrot.lane.b32.xlu0 %v1624_v26, %s6197_s18  ;;  %v600_v22 = vmul.f32 %v598_v19, %v4140_v18  ;;  %v1547_v26 = vrot.slane %v591_v9, %v4112_v61  ;;  %v458_v33 = vsel %vm457_vm15, %v456_v46, %v4093_v51  ;;  %vm6184_vm15 = vcmask 1039360  }
  0xc7   : > { %v1583_v18 = vrot.slane %v600_v22, %v4103_v56  ;;  %v1579_v36 = vrot.slane %v600_v22, %v4100_v55  ;;  %v1587_v39 = vrot.slane %v600_v22, %v4112_v61 }
  0xc9   : > { %1639 = vrot.lane.b32.xlu1 %v1628_v29, %s6197_s18  ;;  %1641 = vrot.lane.b32.xlu0 %v1632_v31, %s6197_s18  ;;  %v1575_v29 = vrot.slane %v600_v22, %v4129_v5  ;;  %v1543_v31 = vrot.slane %v591_v9, %v4103_v56 }
  0xcd   : > { %1673 = vrot.lane.b32.xlu1 %v1656_v43, %s3872_s17  ;;  %1675 = vrot.lane.b32.xlu0 %v1660_v35, %s3872_s17  ;;  %v460_v43 = vmul.f32 %v458_v33, %v4105_v57  ;;  %v1591_v35 = vrot.slane %v600_v22, %v4115_v62 }
  0xcf   : > { %v945_v45 = vrot.slane %v460_v43, %v4112_v61 }
  0xd1   : > { %1677 = vrot.lane.b32.xlu1 %v1664_v37, %s3872_s17  ;;  %1679 = vrot.lane.b32.xlu0 %v1668_v38, %s3872_s17  ;;  %v466_v37 = vrot.slane %v4108_v59, 7  ;;  %v941_v38 = vrot.slane %v460_v43, %v4103_v56 }
  0xd3   : > { %v468_v51 = vsel %vm6165_vm3, %v466_v37, %v4108_v59  ;;  %v476_v59 = vrot.slane %v4097_v54, 7 }
  0xd4   : > { %v470_v40 = vmul.f32 %v468_v51, %v4105_v57 }
  0xd5   : > { %1681 = vrot.lane.b32.xlu1 %v1672_v41, %s3872_s17  ;;  %1514 = vrot.lane.b32.xlu0 %v1499_v48, %s3866_s24  ;;  %v949_v41 = vrot.slane %v460_v43, %v4115_v62  ;;  %v937_v48 = vrot.slane %v460_v43, %v4100_v55 }
  0xd6   : > { %v977_v58 = vrot.slane %v470_v40, %v4100_v55 }
  0xd9   : > { %1512 = vrot.lane.b32.xlu1 %v1495_v49, %s3866_s24  ;;  %1518 = vrot.lane.b32.xlu0 %v1507_v52, %s3866_s24  ;;  %v981_v49 = vrot.slane %v470_v40, %v4103_v56  ;;  %v989_v52 = vrot.slane %v470_v40, %v4115_v62 }
  0xdd   : > { %1516 = vrot.lane.b32.xlu1 %v1503_v60, %s3866_s24  ;;  %1713 = vrot.lane.b32.xlu0 %v1696_v0, %s3878_s22  ;;  %v478_v60 = vsel %vm6181_vm4, %v476_v59, %v4097_v54 }
  0xde   : > { %v480_v0 = vmul.f32 %v478_v60, %v4105_v57 }
  0xe0   : > { %v1016_v22 = vrot.slane %v480_v0, %v4100_v55 }
  0xe1   : > { %1520 = vrot.lane.b32.xlu1 %v1511_v4, %s3866_s24  ;;  %1717 = vrot.lane.b32.xlu0 %v1704_v6, %s3878_s22  ;;  %v985_v4 = vrot.slane %v470_v40, %v4112_v61  ;;  %v973_v6 = vrot.slane %v470_v40, %v4129_v5 }
  0xe5   : > { %1715 = vrot.lane.b32.xlu1 %v1700_v10, %s3878_s22  ;;  %1721 = vrot.lane.b32.xlu0 %v1712_v13, %s3878_s22  ;;  %v933_v10 = vrot.slane %v460_v43, %v4129_v5  ;;  %v1020_v13 = vrot.slane %v480_v0, %v4103_v56 }
  0xe9   : > { %1719 = vrot.lane.b32.xlu1 %v1708_v17, %s3878_s22  ;;  %1554 = vrot.lane.b32.xlu0 %v1539_v50, %s6174_s29  ;;  %v390_v17 = vmul.f32 %v388_v42, %v4105_v57 }
  0xeb   : > { %v661_v46 = vrot.slane %v390_v17, %v4103_v56 }
  0xed   : > { %1558 = vrot.lane.b32.xlu0 %v1547_v26, %s6174_s29  ;;  %1552 = vrot.lane.b32.xlu1 %v1535_v27, %s6174_s29  ;;  %v1028_v26 = vrot.slane %v480_v0, %v4115_v62  ;;  %v486_v27 = vrot.slane %v4119_v1, 7 }
  0xf1   : > { %1592 = vrot.lane.b32.xlu0 %v1575_v29, %s3879_s19  ;;  %1556 = vrot.lane.b32.xlu1 %v1543_v31, %s6174_s29  ;;  %v1024_v31 = vrot.slane %v480_v0, %v4112_v61 }
  0xf5   : > { %1596 = vrot.lane.b32.xlu0 %v1583_v18, %s3879_s19  ;;  %1560 = vrot.lane.b32.xlu1 %v1551_v32, %s6174_s29  ;;  %v488_v18 = vsel %vm6145_vm5, %v486_v27, %v4119_v1  ;;  %v705_v27 = vrot.slane %v4171_v47, %v4112_v61  ;;  %vm1253_vm5 = vcmask 1041408  }
  0xf6   : > { %v490_v32 = vmul.f32 %v488_v18, %v4105_v57 }
  0xf8   : > { %v1060_v59 = vrot.slane %v490_v32, %v4103_v56  ;;  %v1052_v18 = vrot.slane %v490_v32, %v4129_v5 }
  0xf9   : > { %1600 = vrot.lane.b32.xlu0 %v1591_v35, %s3879_s19  ;;  %1594 = vrot.lane.b32.xlu1 %v1579_v36, %s3879_s19  ;;  %v669_v35 = vrot.slane %v390_v17, %v4115_v62  ;;  %v657_v36 = vrot.slane %v390_v17, %v4100_v55 }
  0xfd   : > { %954 = vrot.lane.b32.xlu0 %v941_v38, %s6172_s28  ;;  %1598 = vrot.lane.b32.xlu1 %v1587_v39, %s3879_s19  ;;  %v1056_v38 = vrot.slane %v490_v32, %v4100_v55  ;;  %v665_v39 = vrot.slane %v390_v17, %v4112_v61  ;;  %s3888_s19 = smov 47  }
 0x101   : > { %958 = vrot.lane.b32.xlu0 %v949_v41, %s6172_s28  ;;  %952 = vrot.lane.b32.xlu1 %v937_v48, %s6172_s28  ;;  %v1064_v41 = vrot.slane %v490_v32, %v4112_v61  ;;  %v1012_v48 = vrot.slane %v480_v0, %v4129_v5 }
 0x105   : > { %956 = vrot.lane.b32.xlu1 %v945_v45, %s6172_s28  ;;  %994 = vrot.lane.b32.xlu0 %v981_v49, %s3872_s17 }
 0x109   : > { %998 = vrot.lane.b32.xlu0 %v989_v52, %s3872_s17  ;;  %992 = vrot.lane.b32.xlu1 %v977_v58, %s3872_s17  ;;  %v653_v52 = vrot.slane %v390_v17, %v4129_v5  ;;  %v496_v58 = vrot.slane %v4135_v12, 7  ;;  %v697_v17 = vrot.slane %v4171_v47, %v4100_v55 }
 0x10b   : > { %v498_v7 = vsel %vm6179_vm7, %v496_v58, %v4135_v12 }
 0x10d   : > { %996 = vrot.lane.b32.xlu1 %v985_v4, %s3872_s17  ;;  %990 = vrot.lane.b32.xlu0 %v973_v6, %s3872_s17  ;;  %v1068_v4 = vrot.slane %v490_v32, %v4115_v62  ;;  %v701_v6 = vrot.slane %v4171_v47, %v4103_v56 }
 0x10f   : > { %v4312_v9 = vpop.permute.xlu1 %1362  ;;  %v4314_v54 = vpop.permute.xlu0 %1360 }
 0x110   : > { %6199 = vst [vmem:[#allocation9_spill] sm:$0xff] %v4314_v54 }
 0x111   : > { %950 = vrot.lane.b32.xlu1 %v933_v10, %s6172_s28  ;;  %1033 = vrot.lane.b32.xlu0 %v1020_v13, %s3878_s22  ;;  %v500_v10 = vmul.f32 %v498_v7, %v4105_v57  ;;  %v737_v7 = vrot.slane %v4180_v63, %v4100_v55 }
 0x113   : > { %v4323_v50 = vpop.permute.xlu1 %1366  ;;  %v4325_v19 = vpop.permute.xlu0 %1364 }
 0x114   : > { %v1370_v14 = vsel %vm6184_vm15, %v4312_v9, %v4325_v19 }
 0x115   : > { %1031 = vrot.lane.b32.xlu1 %v1016_v22, %s3878_s22  ;;  %1037 = vrot.lane.b32.xlu0 %v1028_v26, %s3878_s22  ;;  %v1096_v26 = vrot.slane %v500_v10, %v4100_v55 }
 0x117   : > { %v4332_v2 = vpop.permute.xlu1 %1394  ;;  %v4334_v29 = vpop.permute.xlu0 %1358 }
 0x118   : > { %6200 = vst [vmem:[#allocation10_spill] sm:$0xff] %v4332_v2  ;;  %6201 = vst [vmem:[#allocation11_spill] sm:$0xff] %v4334_v29 }
 0x119   : > { %1035 = vrot.lane.b32.xlu1 %v1024_v31, %s3878_s22  ;;  %674 = vrot.lane.b32.xlu0 %v661_v46, %s3876_s15 }
 0x11b   : > { %v4343_v33 = vpop.permute.xlu1 %1398  ;;  %v4345_v43 = vpop.permute.xlu0 %1396 }
 0x11d   : > { %678 = vrot.lane.b32.xlu0 %v669_v35, %s3876_s15  ;;  %672 = vrot.lane.b32.xlu1 %v657_v36, %s3876_s15 }
 0x11f   : > { %v4351_v37 = vpop.permute.xlu1 %1431  ;;  %v4353_v1 = vpop.permute.xlu0 %1400 }
 0x121   : > { %1071 = vrot.lane.b32.xlu0 %v1056_v38, %s3881_s25  ;;  %676 = vrot.lane.b32.xlu1 %v665_v39, %s3876_s15  ;;  %v1100_v38 = vrot.slane %v500_v10, %v4103_v56  ;;  %v693_v39 = vrot.slane %v4171_v47, %v4129_v5 }
 0x123   : > { %v4359_v51 = vpop.permute.xlu1 %1435  ;;  %v4361_v40 = vpop.permute.xlu0 %1433 }
 0x125   : > { %1075 = vrot.lane.b32.xlu0 %v1064_v41, %s3881_s25  ;;  %1029 = vrot.lane.b32.xlu1 %v1012_v48, %s3878_s22  ;;  %v506_v41 = vrot.slane %v4147_v24, 7  ;;  %s3887_s22 = smov 54  }
 0x127   : > { %v4367_v45 = vpop.permute.xlu1 %1439  ;;  %v4369_v49 = vpop.permute.xlu0 %1437  ;;  %v507_v58 = vsel %vm6183_vm6, %v506_v41, %v4147_v24 }
 0x128   : > { %v509_v47 = vmul.f32 %v507_v58, %v4105_v57 }
 0x129   : > { %1073 = vrot.lane.b32.xlu1 %v1060_v59, %s3881_s25  ;;  %670 = vrot.lane.b32.xlu0 %v653_v52, %s3876_s15  ;;  %v1108_v59 = vrot.slane %v500_v10, %v4115_v62  ;;  %v741_v52 = vrot.slane %v4180_v63, %v4103_v56 }
 0x12a   : > { %v1144_v41 = vrot.slane %v509_v47, %v4112_v61  ;;  %v1140_v58 = vrot.slane %v509_v47, %v4103_v56  ;;  %v1132_v21 = vrot.slane %v509_v47, %v4129_v5 }
 0x12b   : > { %v4376_v60 = vpop.permute.xlu1 %1471  ;;  %v4378_v0 = vpop.permute.xlu0 %1473 }
 0x12d   : > { %1077 = vrot.lane.b32.xlu1 %v1068_v4, %s3881_s25  ;;  %714 = vrot.lane.b32.xlu0 %v701_v6, %s6168_s20 }
 0x12f   : > { %v4388_v13 = vpop.permute.xlu1 %1475  ;;  %v4390_v42 = vpop.permute.xlu0 %1477 }
 0x131   : > { %718 = vrot.lane.b32.xlu0 %v709_v3, %s6168_s20  ;;  %712 = vrot.lane.b32.xlu1 %v697_v17, %s6168_s20  ;;  %v1104_v3 = vrot.slane %v500_v10, %v4112_v61  ;;  %v416_v17 = vrot.slane %v4151_v25, 7 }
 0x133   : > { %v4399_v12 = vpop.permute.xlu1 %1479  ;;  %v4401_v22 = vpop.permute.xlu0 %1633 }
 0x135   : > { %1111 = vrot.lane.b32.xlu0 %v1096_v26, %s3883_s27  ;;  %716 = vrot.lane.b32.xlu1 %v705_v27, %s6168_s20  ;;  %v1136_v27 = vrot.slane %v509_v47, %v4100_v55 }
 0x137   : > { %v4408_v31 = vpop.permute.xlu1 %1635  ;;  %v4410_v46 = vpop.permute.xlu0 %1637 }
 0x139   : > { %1115 = vrot.lane.b32.xlu0 %v1104_v3, %s3883_s27  ;;  %1069 = vrot.lane.b32.xlu1 %v1052_v18, %s3881_s25  ;;  %v745_v3 = vrot.slane %v4180_v63, %v4112_v61  ;;  %v418_v18 = vsel %vm6154_vm2, %v416_v17, %v4151_v25  ;;  %v515_v17 = vrot.slane %v4158_v30, 7  ;;  %vm1263_vm2 = vcmask 1043456   ;;  %s6166_s25 = smov 118  }
 0x13b   : > { %v4416_v35 = vpop.permute.xlu1 %1639  ;;  %v4418_v36 = vpop.permute.xlu0 %1641 }
 0x13d   : > { %1113 = vrot.lane.b32.xlu1 %v1100_v38, %s3883_s27  ;;  %710 = vrot.lane.b32.xlu0 %v693_v39, %s6168_s20  ;;  %s6317_s20 = smov 118  }
 0x13f   : > { %v4426_v32 = vpop.permute.xlu1 %1673  ;;  %v4428_v48 = vpop.permute.xlu0 %1675 }
 0x141   : > { %1117 = vrot.lane.b32.xlu1 %v1108_v59, %s3883_s27  ;;  %754 = vrot.lane.b32.xlu0 %v741_v52, %s3884_s21  ;;  %v1092_v59 = vrot.slane %v500_v10, %v4129_v5 }
 0x143   : > { %v4438_v4 = vpop.permute.xlu1 %1677  ;;  %v4440_v6 = vpop.permute.xlu0 %1679 }
 0x145   : > { %758 = vrot.lane.b32.xlu0 %v749_v11, %s3884_s21  ;;  %752 = vrot.lane.b32.xlu1 %v737_v7, %s3884_s21  ;;  %v4462_v11 = vmul.f32 %v418_v18, %v4105_v57 }
 0x147   : > { %v4450_v24 = vpop.permute.xlu1 %1681  ;;  %v4452_v26 = vpop.permute.xlu0 %1514  ;;  %v777_v7 = vrot.slane %v4462_v11, %v4100_v55  ;;  %v785_v18 = vrot.slane %v4462_v11, %v4112_v61 }
 0x149   : > { %1151 = vrot.lane.b32.xlu0 %v1136_v27, %s3885_s23  ;;  %756 = vrot.lane.b32.xlu1 %v745_v3, %s3884_s21  ;;  %v1148_v3 = vrot.slane %v509_v47, %v4115_v62  ;;  %v789_v47 = vrot.slane %v4462_v11, %v4115_v62 }
 0x14b   : > { %v4464_v38 = vpop.permute.xlu1 %1512  ;;  %v4466_v39 = vpop.permute.xlu0 %1518 }
 0x14d   : > { %1155 = vrot.lane.b32.xlu0 %v1144_v41, %s3885_s23  ;;  %1109 = vrot.lane.b32.xlu1 %v1092_v59, %s3883_s27  ;;  %v517_v41 = vsel %vm6152_vm10, %v515_v17, %v4158_v30  ;;  %v535_v59 = vrot.slane %v4095_v53, 7  ;;  %vm1258_vm10 = vcmask 1042432  }
 0x14f   : > { %v4472_v25 = vpop.permute.xlu1 %1516  ;;  %v1714_v52 = vpop.permute.xlu0 %1713  ;;  %v537_v30 = vsel %vm6164_vm11, %v535_v59, %v4095_v53  ;;  %v1767_v53 = vsel %vm1248_vm12, %v4401_v22, %v4426_v32 }
 0x150   : > { %v4515_v63 = vmul.f32 %v537_v30, %v4105_v57 }
 0x151   : > { %1153 = vrot.lane.b32.xlu1 %v1140_v58, %s3885_s23  ;;  %792 = vrot.lane.b32.xlu0 %v777_v7, %s6170_s11  ;;  %v4493_v58 = vmul.f32 %v517_v41, %v4105_v57 }
 0x152   : > { %v1319_v59 = vrot.slane %v4515_v63, %v4100_v55  ;;  %v1331_v30 = vrot.slane %v4515_v63, %v4115_v62  ;;  %v1323_v8 = vrot.slane %v4515_v63, %v4103_v56 }
 0x153   : > { %v4480_v10 = vpop.permute.xlu1 %1520  ;;  %v4482_v27 = vpop.permute.xlu0 %1717  ;;  %v1180_v41 = vrot.slane %v4493_v58, %v4103_v56  ;;  %v1184_v20 = vrot.slane %v4493_v58, %v4112_v61 }
 0x155   : > { %1157 = vrot.lane.b32.xlu1 %v1148_v3, %s3885_s23  ;;  %796 = vrot.lane.b32.xlu0 %v785_v18, %s6170_s11  ;;  %v781_v18 = vrot.slane %v4462_v11, %v4103_v56 }
 0x157   : > { %v4495_v7 = vpop.permute.xlu1 %1715  ;;  %v4497_v23 = vpop.permute.xlu0 %1721 }
 0x158   : > { %v1723_v15 = vsel %vm1039_vm13, %v1714_v52, %v4495_v7 }
 0x159   : > { %750 = vrot.lane.b32.xlu1 %v733_v28, %s3884_s21  ;;  %1149 = vrot.lane.b32.xlu0 %v1132_v21, %s3885_s23  ;;  %s3890_s23 = smov 48  }
 0x15b   : > { %v4506_v17 = vpop.permute.xlu1 %1719  ;;  %v4508_v3 = vpop.permute.xlu0 %1554 }
 0x15d   : > { %794 = vrot.lane.b32.xlu1 %v781_v18, %s6170_s11  ;;  %1193 = vrot.lane.b32.xlu0 %v1180_v41, %s3887_s22  ;;  %v1683_v18 = vsel %vm6165_vm3, %v4426_v32, %v4428_v48  ;;  %v1772_v41 = vsel %vm1253_vm5, %v1767_v53, %v1714_v52  ;;  %v1369_v32 = vsel %vm6184_vm15, %v4314_v54, %v4312_v9 }
 0x15e   : > { %v1643_v53 = vsel %vm6181_vm4, %v4401_v22, %v4408_v31  ;;  %v1402_v22 = vsel %vm6164_vm11, %v4332_v2, %v4345_v43  ;;  %v1685_v9 = vsel %vm6165_vm3, %v4438_v4, %v4440_v6  ;;  %v1188_v54 = vrot.slane %v4493_v58, %v4115_v62 }
 0x15f   : > { %v4522_v21 = vpop.permute.xlu1 %1552  ;;  %v4524_v28 = vpop.permute.xlu0 %1558  ;;  %v1768_v44 = vsel %vm1248_vm12, %v1643_v53, %v1683_v18  ;;  %v1733_v56 = vsel %vm1248_vm12, %v1319_v59, %v1369_v32  ;;  %v1403_v18 = vsel %vm6164_vm11, %v4345_v43, %v4343_v33  ;;  %v1725_v53 = vsel %vm1039_vm13, %v4482_v27, %v4506_v17 }
 0x160   : > { %v1773_v29 = vsel %vm1253_vm5, %v1768_v44, %v1723_v15  ;;  %v1736_v15 = vsel %vm1248_vm12, %v1331_v30, %v4323_v50  ;;  %v1371_v44 = vsel %vm6184_vm15, %v4325_v19, %v4323_v50  ;;  %v1734_v59 = vsel %vm1248_vm12, %v1323_v8, %v1370_v14 }
 0x161   : > { %798 = vrot.lane.b32.xlu1 %v789_v47, %s6170_s11  ;;  %1797 = vrot.lane.b32.xlu0 %v1772_v41, %s3888_s19  ;;  %v1176_v41 = vrot.slane %v4493_v58, %v4100_v55  ;;  %v1645_v43 = vsel %vm6181_vm4, %v4410_v46, %v4416_v35  ;;  %v1738_v32 = vsel %vm1253_vm5, %v1733_v56, %v1402_v22 }
 0x162   : > { %v1442_v30 = vsel %vm6180_vm8, %v4361_v40, %v4359_v51  ;;  %v1770_v8 = vsel %vm1248_vm12, %v1645_v43, %v1685_v9  ;;  %v1739_v14 = vsel %vm1253_vm5, %v1734_v59, %v1403_v18  ;;  %v1404_v50 = vsel %vm6164_vm11, %v4343_v33, %v4353_v1 }
 0x163   : > { %v4553_v52 = vpop.permute.xlu1 %1556  ;;  %v4555_v47 = vpop.permute.xlu0 %1592  ;;  %v1684_v56 = vsel %vm6165_vm3, %v4428_v48, %v4438_v4  ;;  %v1775_v19 = vsel %vm1253_vm5, %v1770_v8, %v1725_v53  ;;  %v1444_v22 = vsel %vm6180_vm8, %v4369_v49, %v4367_v45  ;;  %v1724_v9 = vsel %vm1039_vm13, %v4495_v7, %v4482_v27 }
 0x164   : > { %vm1602_vm11 = vcmask 580608   ;;  %v1744_v48 = vsel %vm1258_vm10, %v1739_v14, %v1442_v30  ;;  %v1644_v45 = vsel %vm6181_vm4, %v4408_v31, %v4410_v46  ;;  %v1443_v4 = vsel %vm6180_vm8, %v4359_v51, %v4369_v49 }
 0x165   : > { %1191 = vrot.lane.b32.xlu1 %v1176_v41, %s3887_s22  ;;  %1799 = vrot.lane.b32.xlu0 %v1773_v29, %s3888_s19  ;;  %v1441_v29 = vsel %vm6180_vm8, %v4351_v37, %v4361_v40  ;;  %v1741_v40 = vsel %vm1253_vm5, %v1736_v15, %v4353_v1  ;;  %v1483_v1 = vsel %vm1481_vm9, %v4378_v0, %v4388_v13 }
 0x166   : > { %v1743_v33 = vsel %vm1258_vm10, %v1738_v32, %v1441_v29  ;;  %v1523_v27 = vsel %vm6183_vm6, %v4452_v26, %v4472_v25  ;;  %v1769_v53 = vsel %vm1248_vm12, %v1644_v45, %v1684_v56  ;;  %v1746_v15 = vsel %vm1258_vm10, %v1741_v40, %v1444_v22 }
 0x167   : > { %v1561_v41 = vpop.permute.xlu1 %1560  ;;  %v4596_v2 = vpop.permute.xlu0 %1596  ;;  %v1686_v31 = vsel %vm6165_vm3, %v4440_v6, %v4450_v24  ;;  %v1563_v51 = vsel %vm6179_vm7, %v4508_v3, %v4553_v52  ;;  %v1774_v49 = vsel %vm1253_vm5, %v1769_v53, %v1724_v9  ;;  %v1726_v46 = vsel %vm1039_vm13, %v4506_v17, %v4497_v23 }
 0x168   : > { %vm6187_vm3 = vcmask 1046528   ;;  %v1485_v24 = vsel %vm1481_vm9, %v4390_v42, %v4399_v12  ;;  %v1646_v43 = vsel %vm6181_vm4, %v4416_v35, %v4418_v36  ;;  %v1525_v32 = vsel %vm6183_vm6, %v4466_v39, %v4480_v10 }
 0x169   : > { %1195 = vrot.lane.b32.xlu1 %v1184_v20, %s3887_s22  ;;  %1803 = vrot.lane.b32.xlu0 %v1775_v19, %s3888_s19  ;;  %v1482_v20 = vsel %vm1481_vm9, %v4376_v60, %v4378_v0  ;;  %v1749_v0 = vsel %vm1263_vm2, %v1744_v48, %v1483_v1  ;;  %v1771_v17 = vsel %vm1248_vm12, %v1646_v43, %v1686_v31 }
 0x16a   : > { %v1748_v6 = vsel %vm1263_vm2, %v1743_v33, %v1482_v20  ;;  %v1754_v23 = vsel %vm6191_vm1, %v1749_v0, %v1523_v27  ;;  %v1562_v35 = vsel %vm6179_vm7, %v4522_v21, %v4508_v3  ;;  %v1565_v36 = vsel %vm6179_vm7, %v4524_v28, %v1561_v41 }
 0x16b   : > { %v1595_v7 = vpop.permute.xlu1 %1594  ;;  %v1601_v18 = vpop.permute.xlu0 %1600  ;;  %v1759_v12 = vsel %vm6189_vm0, %v1754_v23, %v1563_v51  ;;  %v1776_v8 = vsel %vm1253_vm5, %v1771_v17, %v1726_v46  ;;  %v1751_v14 = vsel %vm1263_vm2, %v1746_v15, %v1485_v24  ;;  %v6202_v3 = vrot.slane %v4515_v63, %v4112_v61  ;;  %v6204_v23 = vld [vmem:[#allocation9_spill] sm:$0xff]  ;;  %v6205_v17 = vld [vmem:[#allocation11_spill] sm:$0xff] }
 0x16c   : > { %v1604_v59 = vsel %vm1602_vm11, %v1595_v7, %v4596_v2  ;;  %v1603_v10 = vsel %vm1602_vm11, %v4555_v47, %v1595_v7  ;;  %v1484_v19 = vsel %vm1481_vm9, %v4388_v13, %v4390_v42  ;;  %v1756_v22 = vsel %vm6191_vm1, %v1751_v14, %v1525_v32 }
 0x16d   : > { %1197 = vrot.lane.b32.xlu0 %v1188_v54, %s3887_s22  ;;  %1801 = vrot.lane.b32.xlu1 %v1774_v49, %s3888_s19  ;;  %v1522_v54 = vsel %vm6183_vm6, %v4464_v38, %v4452_v26  ;;  %v1764_v26 = vsel %vm6187_vm3, %v1759_v12, %v1604_v59  ;;  %v1735_v41 = vsel %vm1248_vm12, %v6202_v3, %v1371_v44  ;;  %vm1807_vm9 = vcmask 384000  }
 0x16e   : > { %v1753_v40 = vsel %vm6191_vm1, %v1748_v6, %v1522_v54  ;;  %v1740_v9 = vsel %vm1253_vm5, %v1735_v41, %v1404_v50  ;;  %v1524_v33 = vsel %vm6183_vm6, %v4472_v25, %v4466_v39  ;;  %v1761_v48 = vsel %vm6189_vm0, %v1756_v22, %v1565_v36  ;;  %v6203_v6 = vld [vmem:[#allocation6_spill] sm:$0xff] }
 0x16f   : > { %v1599_v29 = vpop.permute.xlu1 %1598  ;;  %v4666_v30 = vpop.permute.xlu0 %954  ;;  %v1758_v44 = vsel %vm6189_vm0, %v1753_v40, %v1562_v35  ;;  %v1745_v13 = vsel %vm1258_vm10, %v1740_v9, %v1443_v4  ;;  %v1564_v42 = vsel %vm6179_vm7, %v4553_v52, %v4524_v28  ;;  %v817_v52 = vrot.slane %v4194_v16, %v4100_v55 }
 0x170   : > { %v1606_v56 = vsel %vm1602_vm11, %v1599_v29, %v1601_v18  ;;  %v1763_v50 = vsel %vm6187_vm3, %v1758_v44, %v1603_v10  ;;  %v1750_v39 = vsel %vm1263_vm2, %v1745_v13, %v1484_v19  ;;  %v1605_v25 = vsel %vm1602_vm11, %v4596_v2, %v1599_v29 }
 0x171   : > { %1805 = vrot.lane.b32.xlu1 %v1776_v8, %s3888_s19  ;;  %1791 = vrot.lane.b32.xlu0 %v1764_v26, %s3888_s19  ;;  %v1766_v20 = vsel %vm6187_vm3, %v1761_v48, %v1606_v56  ;;  %v1755_v27 = vsel %vm6191_vm1, %v1750_v39, %v1524_v33  ;;  %v525_v18 = vrot.slane %v4163_v34, 7  ;;  %v773_v31 = vrot.slane %v4462_v11, %v4129_v5  ;;  %v6207_v26 = vld [vmem:[#allocation10_spill] sm:$0xff]  ;;  %v6209_v48 = vld [vmem:[#allocation8_spill] sm:$0xff] }
 0x172   : > { %v1760_v28 = vsel %vm6189_vm0, %v1755_v27, %v1564_v42  ;;  %v825_v51 = vrot.slane %v4194_v16, %v4112_v61  ;;  %v821_v24 = vrot.slane %v4194_v16, %v6203_v6  ;;  %v1172_v11 = vrot.slane %v4493_v58, %v4129_v5 }
 0x173   : > { %v4696_v1 = vpop.permute.xlu1 %952  ;;  %v4698_v45 = vpop.permute.xlu0 %958  ;;  %v1765_v53 = vsel %vm6187_vm3, %v1760_v28, %v1605_v25  ;;  %v527_v49 = vsel %vm6180_vm8, %v525_v18, %v4163_v34  ;;  %v1368_v54 = vsel %vm6184_vm15, %v6205_v17, %v6204_v23  ;;  %v6206_v32 = vrot.slane %v4194_v16, %v4115_v62 }
 0x174   : > { %v529_v0 = vmul.f32 %v527_v49, %v4105_v57  ;;  %v1315_v58 = vrot.slane %v4515_v63, %v4129_v5  ;;  %v813_v3 = vrot.slane %v4194_v16, %v4129_v5  ;;  %v6208_v16 = vld [vmem:[#allocation7_spill] sm:$0xff]  ;;  %v446_v44 = vrot.slane %v6209_v48, 7 }
 0x175   : > { %1789 = vrot.lane.b32.xlu1 %v1763_v50, %s3888_s19  ;;  %1795 = vrot.lane.b32.xlu0 %v1766_v20, %s3888_s19  ;;  %v857_v13 = vrot.slane %v6208_v16, %v4100_v55  ;;  %v3848_v50 = vld [vmem:[#allocation2] ss:$4 sm:$0x1f]  ;;  %v865_v27 = vrot.slane %v6208_v16, %v4112_v61  ;;  %v853_v28 = vrot.slane %v6208_v16, %v4129_v5  ;;  %vm6188_vm11 = vcmask 900096  }
 0x176   : > { %v1220_v57 = vrot.slane %v529_v0, %v6203_v6  ;;  %v1216_v35 = vrot.slane %v529_v0, %v4100_v55  ;;  %v1228_v36 = vrot.slane %v529_v0, %v4115_v62  ;;  %v1732_v8 = vsel %vm1248_vm12, %v1315_v58, %v1368_v54  ;;  %v3769_v58 = vld [vmem:[%s6129_s5 + $0x4] ss:$8 sm:$0xf] }
 0x177   : > { %v4713_v4 = vpop.permute.xlu1 %956  ;;  %v4715_v7 = vpop.permute.xlu0 %994  ;;  %v1737_v14 = vsel %vm1253_vm5, %v1732_v8, %v6207_v26  ;;  %v1224_v56 = vrot.slane %v529_v0, %v4112_v61  ;;  %v448_v42 = vsel %vm6182_vm14, %v446_v44, %v6209_v48  ;;  %vm1079_vm7 = vcmask 506880  }
 0x178   : > { %v1742_v41 = vsel %vm1258_vm10, %v1737_v14, %v4351_v37  ;;  %v861_v37 = vrot.slane %v6208_v16, %v6203_v6  ;;  %v450_v20 = vmul.f32 %v3848_v50, %v448_v42  ;;  %vm6220_vm8 = vcmask 523264  }
 0x179   : > { %1793 = vrot.lane.b32.xlu1 %v1765_v53, %s3888_s19  ;;  %832 = vrot.lane.b32.xlu0 %v817_v52, %s6166_s25  ;;  %v1747_v19 = vsel %vm1263_vm2, %v1742_v41, %v4376_v60  ;;  %v1212_v53 = vrot.slane %v529_v0, %v4129_v5  ;;  %v3772_v0 = vld [vmem:[%s6129_s5 + $0x7] ss:$8 sm:$0xf]  ;;  %v2162_v41 = vrot.slane %v3769_v58, %v4100_v55  ;;  %vm6221_vm4 = vmmov %vm6220_vm8  ;;  %vm1119_vm14 = vcmask 457728  }
 0x17a   : > { %v1752_v40 = vsel %vm6191_vm1, %v1747_v19, %v4464_v38  ;;  %v2269_v54 = vrot.slane %v3772_v0, %v4129_v5  ;;  %v905_v8 = vrot.slane %v450_v20, %v4112_v61  ;;  %v3770_v19 = vld [vmem:[%s6129_s5 + $0x5] ss:$8 sm:$0xf]  ;;  %v2277_v48 = vrot.slane %v3772_v0, %v6203_v6 }
 0x17b   : > { %v4724_v2 = vpop.permute.xlu1 %992  ;;  %v4726_v15 = vpop.permute.xlu0 %998  ;;  %v1757_v22 = vsel %vm6189_vm0, %v1752_v40, %v4522_v21  ;;  %v2281_v44 = vrot.slane %v3772_v0, %v4112_v61  ;;  %v2198_v42 = vrot.slane %v3770_v19, %v4100_v55  ;;  %vm1159_vm6 = vcmask 449536  }
 0x17c   : > { %v1762_v60 = vsel %vm6187_vm3, %v1757_v22, %v4555_v47  ;;  %v6210_v47 = vrot.slane %v6208_v16, %v4115_v62  ;;  %v893_v16 = vrot.slane %v450_v20, %v4129_v5  ;;  %vm1199_vm15 = vcmask 441344  }
 0x17d   : > { %790 = vrot.lane.b32.xlu1 %v773_v31, %s6170_s11  ;;  %836 = vrot.lane.b32.xlu0 %v825_v51, %s6166_s25  ;;  %v901_v31 = vrot.slane %v450_v20, %v6203_v6 }
 0x17f   : > { %v4737_v46 = vpop.permute.xlu1 %996  ;;  %v4739_v59 = vpop.permute.xlu0 %990 }
 0x181   : > { %834 = vrot.lane.b32.xlu1 %v821_v24, %s6166_s25  ;;  %1189 = vrot.lane.b32.xlu0 %v1172_v11, %s3887_s22  ;;  %s3891_s22 = smov 112   ;;  %v897_v24 = vrot.slane %v450_v20, %v4100_v55  ;;  %v909_v11 = vrot.slane %v450_v20, %v4115_v62  ;;  %v2273_v62 = vrot.slane %v3772_v0, %v4100_v55 }
 0x183   : > { %v4747_v34 = vpop.permute.xlu1 %950  ;;  %v4749_v43 = vpop.permute.xlu0 %1033 }
 0x185   : > { %838 = vrot.lane.b32.xlu1 %v6206_v32, %s6166_s25  ;;  %1233 = vrot.lane.b32.xlu0 %v1220_v57, %s3890_s23  ;;  %v3773_v57 = vld [vmem:[%s6129_s5 + $0x20] ss:$8 sm:$0xf] }
 0x186   : > { %v2305_v23 = vrot.slane %v3773_v57, %v4129_v5  ;;  %v2309_v17 = vrot.slane %v3773_v57, %v4100_v55  ;;  %v2313_v26 = vrot.slane %v3773_v57, %v6203_v6  ;;  %v2317_v14 = vrot.slane %v3773_v57, %v4112_v61 }
 0x187   : > { %v4762_v29 = vpop.permute.xlu1 %1031  ;;  %v4764_v12 = vpop.permute.xlu0 %1037 }
 0x188   : > { %v2318_v32 = vcombine.low %v2305_v23, %v2309_v17  ;;  %v2202_v17 = vrot.slane %v3770_v19, %v6203_v6 }
 0x189   : > { %1231 = vrot.lane.b32.xlu1 %v1216_v35, %s3890_s23  ;;  %1237 = vrot.lane.b32.xlu0 %v1228_v36, %s3890_s23 }
 0x18b   : > { %v4773_v10 = vpop.permute.xlu1 %1035  ;;  %v4775_v63 = vpop.permute.xlu0 %674 }
 0x18d   : > { %1235 = vrot.lane.b32.xlu1 %v1224_v56, %s3890_s23  ;;  %830 = vrot.lane.b32.xlu0 %v813_v3, %s6166_s25  ;;  %v2282_v56 = vcombine.low %v2269_v54, %v2273_v62  ;;  %v2158_v3 = vrot.slane %v3769_v58, %v4129_v5  ;;  %v2206_v54 = vrot.slane %v3770_v19, %v4112_v61  ;;  %s6313_s25 = smov 126  }
 0x18f   : > { %v4790_v9 = vpop.permute.xlu1 %672  ;;  %v4792_v33 = vpop.permute.xlu0 %678 }
 0x191   : > { %1787 = vrot.lane.b32.xlu1 %v1762_v60, %s3888_s19  ;;  %874 = vrot.lane.b32.xlu0 %v861_v37, %s3891_s22  ;;  %s3892_s19 = smov 111   ;;  %v2319_v37 = vcombine.low %v2313_v26, %v2317_v14  ;;  %v2171_v60 = vcombine.low %v2158_v3, %v2162_v41 }
 0x193   : > { %v4801_v38 = vpop.permute.xlu1 %676  ;;  %v4803_v21 = vpop.permute.xlu0 %1071 }
 0x195   : > { %872 = vrot.lane.b32.xlu1 %v857_v13, %s3891_s22  ;;  %878 = vrot.lane.b32.xlu0 %v6210_v47, %s3891_s22  ;;  %v2194_v13 = vrot.slane %v3770_v19, %v4129_v5  ;;  %v4881_v47 = vld [vmem:[%s6129_s5 + $0x2] ss:$8 sm:$0xf] }
 0x196   : > { %6211 = vst [vmem:[#allocation6_spill] sm:$0xff] %v4881_v47 }
 0x197   : > { %v4814_v39 = vpop.permute.xlu1 %1029  ;;  %v4816_v25 = vpop.permute.xlu0 %1075 }
 0x199   : > { %876 = vrot.lane.b32.xlu1 %v865_v27, %s3891_s22  ;;  %870 = vrot.lane.b32.xlu0 %v853_v28, %s3891_s22  ;;  %v2283_v27 = vcombine.low %v2277_v48, %v2281_v44  ;;  %v2166_v28 = vrot.slane %v3769_v58, %v6203_v6 }
 0x19b   : > { %v4824_v52 = vpop.permute.xlu1 %1073  ;;  %v4826_v18 = vpop.permute.xlu0 %670 }
 0x19d   : > { %1229 = vrot.lane.b32.xlu1 %v1212_v53, %s3890_s23  ;;  %914 = vrot.lane.b32.xlu0 %v901_v31, %s3892_s19  ;;  %v2170_v53 = vrot.slane %v3769_v58, %v4112_v61  ;;  %v2207_v31 = vcombine.low %v2194_v13, %v2198_v42 }
 0x19f   : > { %v4832_v51 = vpop.permute.xlu1 %1077  ;;  %v4834_v49 = vpop.permute.xlu0 %714  ;;  %v2172_v23 = vcombine.low %v2166_v28, %v2170_v53 }
 0x1a1   : > { %912 = vrot.lane.b32.xlu1 %v897_v24, %s3892_s19  ;;  %918 = vrot.lane.b32.xlu0 %v909_v11, %s3892_s19  ;;  %v2086_v24 = vrot.slane %v4881_v47, %v4129_v5  ;;  %v2090_v11 = vrot.slane %v4881_v47, %v4100_v55 }
 0x1a3   : > { %v4853_v35 = vpop.permute.xlu1 %712  ;;  %v4855_v36 = vpop.permute.xlu0 %718 }
 0x1a5   : > { %916 = vrot.lane.b32.xlu1 %v905_v8, %s3892_s19  ;;  %2320 = vrot.lane.b32.xlu0 %v2318_v32, %s3863_s14  ;;  %v2099_v32 = vcombine.low %v2086_v24, %v2090_v11  ;;  %v2208_v8 = vcombine.low %v2202_v17, %v2206_v54 }
 0x1a7   : > { %v4867_v40 = vpop.permute.xlu1 %716  ;;  %v4869_v22 = vpop.permute.xlu0 %1111 }
 0x1a9   : > { %910 = vrot.lane.b32.xlu1 %v893_v16, %s3892_s19  ;;  %2284 = vrot.lane.b32.xlu0 %v2282_v56, %s3868_s12 }
 0x1ab   : > { %v4883_v50 = vpop.permute.xlu1 %1069  ;;  %v4885_v20 = vpop.permute.xlu0 %1115 }
 0x1ad   : > { %2322 = vrot.lane.b32.xlu1 %v2319_v37, %s3863_s14  ;;  %2173 = vrot.lane.b32.xlu0 %v2171_v60, %s3866_s24 }
 0x1af   : > { %v4895_v57 = vpop.permute.xlu1 %1113  ;;  %v4897_v0 = vpop.permute.xlu0 %710 }
 0x1b0   : > { %6212 = vst [vmem:[#allocation9_spill] sm:$0xff] %v4897_v0 }
 0x1b1   : > { %2286 = vrot.lane.b32.xlu1 %v2283_v27, %s3868_s12  ;;  %2209 = vrot.lane.b32.xlu0 %v2207_v31, %s3870_s26 }
 0x1b3   : > { %v4903_v62 = vpop.permute.xlu1 %1117  ;;  %v4905_v58 = vpop.permute.xlu0 %754 }
 0x1b5   : > { %2175 = vrot.lane.b32.xlu1 %v2172_v23, %s3866_s24  ;;  %2101 = vrot.lane.b32.xlu0 %v2099_v32, %s3863_s14 }
 0x1b7   : > { %v4909_v26 = vpop.permute.xlu1 %752  ;;  %v4911_v14 = vpop.permute.xlu0 %758 }
 0x1b8   : > { %6213 = vst [vmem:[#allocation11_spill] sm:$0xff] %v4911_v14 }
 0x1b9   : > { %2211 = vrot.lane.b32.xlu1 %v2208_v8, %s3870_s26 }
 0x1bb   : > { %v4914_v56 = vpop.permute.xlu1 %756  ;;  %v4916_v3 = vpop.permute.xlu0 %1151 }
 0x1bf   : > { %v4918_v41 = vpop.permute.xlu1 %1109  ;;  %v4920_v19 = vpop.permute.xlu0 %1155 }
 0x1c3   : > { %v4922_v16 = vpop.permute.xlu1 %1153  ;;  %v4924_v37 = vpop.permute.xlu0 %792 }
 0x1c7   : > { %v4926_v48 = vpop.permute.xlu1 %1157  ;;  %v4928_v44 = vpop.permute.xlu0 %796 }
 0x1c8   : > { %6214 = vst [vmem:[#allocation10_spill] sm:$0xff] %v4928_v44 }
 0x1cb   : > { %v4930_v60 = vpop.permute.xlu1 %750  ;;  %v4932_v13 = vpop.permute.xlu0 %1149 }
 0x1cc   : > { %6215 = vst [vmem:[#allocation7_spill] sm:$0xff] %v4930_v60 }
 0x1cf   : > { %v4934_v42 = vpop.permute.xlu1 %794  ;;  %v4936_v27 = vpop.permute.xlu0 %1193 }
 0x1d3   : > { %v4938_v28 = vpop.permute.xlu1 %798  ;;  %v1798_v53 = vpop.permute.xlu0 %1797 }
 0x1d4   : > { %6216 = vst [vmem:[#allocation8_spill] sm:$0xff] %v4938_v28 }
 0x1d7   : > { %v4940_v31 = vpop.permute.xlu1 %1191  ;;  %v1800_v24 = vpop.permute.xlu0 %1799 }
 0x1d8   : > { %v1812_v8 = vsel %vm1807_vm9, %v1798_v53, %v1800_v24 }
 0x1db   : > { %v4942_v11 = vpop.permute.xlu1 %1195  ;;  %v1804_v23 = vpop.permute.xlu0 %1803 }
 0x1df   : > { %v1802_v17 = vpop.permute.xlu1 %1801  ;;  %v1198_v54 = vpop.permute.xlu0 %1197 }
 0x1e0   : > { %v1813_v32 = vsel %vm1807_vm9, %v1800_v24, %v1802_v17  ;;  %v1814_v44 = vsel %vm1807_vm9, %v1802_v17, %v1804_v23 }
 0x1e1   : > { %3760 = vmatprep.subr.msk.mxu0 %vm1258_vm10, %v1813_v32 }
 0x1e2   : > { %3761 = vmatpush1.msk.msra.mxu0 %vm1258_vm10, %v1812_v8 }
 0x1e3   : > { %v1806_v47 = vpop.permute.xlu1 %1805  ;;  %v1792_v60 = vpop.permute.xlu0 %1791 }
 0x1e4   : > { %v1815_v28 = vsel %vm1807_vm9, %v1804_v23, %v1806_v47 }
 0x1e5   : > { %3763 = vmatprep.subr.msk.mxu1 %vm1258_vm10, %v1815_v28 }
 0x1e6   : > { %3764 = vmatpush1.msk.msra.mxu1 %vm1258_vm10, %v1814_v44 }
 0x1e7   : > { %v4952_v14 = vpop.permute.xlu1 %1789  ;;  %v1796_v0 = vpop.permute.xlu0 %1795 }
 0x1e8   : > { %v1809_v32 = vsel %vm1807_vm9, %v4952_v14, %v1792_v60 }
 0x1e9   : > { %1859 = vmatprep.subr.mxu0 %v1809_v32  ;;  %v1001_v32 = vsel %vm6220_vm8, %v4724_v2, %v4715_v7  ;;  %vm6223_vm8 = vmmov %vm6221_vm4 }
 0x1eb   : > { %v1794_v53 = vpop.permute.xlu1 %1793  ;;  %v4956_v24 = vpop.permute.xlu0 %832 }
 0x1ec   : > { %6217 = vst [vmem:[#allocation12_spill] sm:$0xff] %v4956_v24  ;;  %v1811_v8 = vsel %vm1807_vm9, %v1794_v53, %v1796_v0  ;;  %v1810_v47 = vsel %vm1807_vm9, %v1792_v60, %v1794_v53  ;;  %v1002_v0 = vsel %vm6221_vm4, %v4715_v7, %v4737_v46  ;;  %v964_v7 = vsel %vm6188_vm11, %v4713_v4, %v4698_v45 }
 0x1ed   : > { %1930 = vmatprep.subr.mxu1 %v1811_v8  ;;  %v962_v8 = vsel %vm6188_vm11, %v4696_v1, %v4666_v30  ;;  %vm6190_vm4 = vcmask 392192   ;;  %v1083_v45 = vsel %vm1079_vm7, %v4816_v25, %v4832_v51  ;;  %v1162_v51 = vsel %vm1159_vm6, %v4922_v16, %v4920_v19 }
 0x1ee   : > { %1931 = vmatpush1.msra.mxu1 %v1810_v47  ;;  %v963_v47 = vsel %vm6188_vm11, %v4666_v30, %v4713_v4  ;;  %v1284_v30 = vsel %vm1248_vm12, %v962_v8, %v1001_v32 }
 0x1ef   : > { %v4960_v28 = vpop.permute.xlu1 %790  ;;  %v4962_v23 = vpop.permute.xlu0 %836  ;;  %v1285_v24 = vsel %vm1248_vm12, %v963_v47, %v1002_v0 }
 0x1f0   : > { %6218 = vst [vmem:[#allocation13_spill] sm:$0xff] %v4960_v28  ;;  %6219 = vst [vmem:[#allocation14_spill] sm:$0xff] %v4962_v23  ;;  %v1003_v28 = vsel %vm6223_vm8, %v4737_v46, %v4726_v15  ;;  %v1043_v23 = vsel %vm1039_vm13, %v4773_v10, %v4764_v12  ;;  %v1082_v15 = vsel %vm1079_vm7, %v4824_v52, %v4816_v25  ;;  %vm720_vm8 = vcmask 1031168  }
 0x1f1   : > { %v1286_v4 = vsel %vm1248_vm12, %v964_v7, %v1003_v28  ;;  %v1041_v46 = vsel %vm1039_vm13, %v4762_v29, %v4749_v43  ;;  %v1122_v12 = vsel %vm1119_vm14, %v4895_v57, %v4885_v20  ;;  %v1161_v7 = vsel %vm1159_vm6, %v4916_v3, %v4922_v16 }
 0x1f2   : > { %v1290_v25 = vsel %vm1253_vm5, %v1286_v4, %v1043_v23  ;;  %v1081_v23 = vsel %vm1079_vm7, %v4803_v21, %v4824_v52  ;;  %v377_v52 = vld [vmem:[#allocation2] ss:$4 sm:$0xf] }
 0x1f3   : > { %v4964_v44 = vpop.permute.xlu1 %834  ;;  %v4966_v17 = vpop.permute.xlu0 %1189  ;;  %v1294_v47 = vsel %vm1258_vm10, %v1290_v25, %v1083_v45  ;;  %v378_v45 = vld [vmem:[%s6128_s4] ss:$8 sm:$0xf] }
 0x1f7   : > { %v4974_v60 = vpop.permute.xlu1 %838  ;;  %v1234_v53 = vpop.permute.xlu0 %1233 }
 0x1f8   : > { %6222 = vst [vmem:[#allocation15_spill] sm:$0xff] %v4974_v60  ;;  %v1042_v60 = vsel %vm1039_vm13, %v4749_v43, %v4773_v10  ;;  %v1123_v10 = vsel %vm1119_vm14, %v4885_v20, %v4903_v62  ;;  %v1163_v43 = vsel %vm1159_vm6, %v4920_v19, %v4926_v48  ;;  %v1202_v20 = vsel %vm1199_vm15, %v4936_v27, %v4942_v11 }
 0x1f9   : > { %v1289_v8 = vsel %vm1253_vm5, %v1285_v24, %v1042_v60  ;;  %v1203_v62 = vsel %vm1199_vm15, %v4942_v11, %v1198_v54  ;;  %v1288_v24 = vsel %vm1253_vm5, %v1284_v30, %v1041_v46  ;;  %v1298_v19 = vsel %vm1263_vm2, %v1294_v47, %v1123_v10 }
 0x1fa   : > { %v1293_v28 = vsel %vm1258_vm10, %v1289_v8, %v1082_v15  ;;  %v1121_v48 = vsel %vm1119_vm14, %v4869_v22, %v4895_v57  ;;  %v1302_v54 = vsel %vm6191_vm1, %v1298_v19, %v1163_v43  ;;  %v1201_v10 = vsel %vm1199_vm15, %v4940_v31, %v4936_v27 }
 0x1fb   : > { %v5012_v32 = vpop.permute.xlu1 %1231  ;;  %v1238_v0 = vpop.permute.xlu0 %1237  ;;  %v1297_v60 = vsel %vm1263_vm2, %v1293_v28, %v1122_v12  ;;  %v1306_v46 = vsel %vm6189_vm0, %v1302_v54, %v1203_v62  ;;  %v1292_v12 = vsel %vm1258_vm10, %v1288_v24, %v1081_v23 }
 0x1fc   : > { %v1301_v11 = vsel %vm6191_vm1, %v1297_v60, %v1162_v51  ;;  %v1296_v51 = vsel %vm1263_vm2, %v1292_v12, %v1121_v48  ;;  %v1241_v43 = vsel %vm6190_vm4, %v5012_v32, %v1234_v53  ;;  %v6230_v12 = vld [vmem:[#allocation12_spill] sm:$0xff] }
 0x1fd   : > { %v1305_v16 = vsel %vm6189_vm0, %v1301_v11, %v1202_v20  ;;  %v1300_v28 = vsel %vm6191_vm1, %v1296_v51, %v1161_v7 }
 0x1fe   : > { %v1304_v62 = vsel %vm6189_vm0, %v1300_v28, %v1201_v10  ;;  %vm800_vm0 = vcmask 973824   ;;  %v6234_v28 = vld [vmem:[#allocation9_spill] sm:$0xff] }
 0x1ff   : > { %v1236_v30 = vpop.permute.xlu1 %1235  ;;  %v5043_v15 = vpop.permute.xlu0 %830  ;;  %v1308_v24 = vsel %vm6187_vm3, %v1304_v62, %v1241_v43 }
 0x200   : > { %v1242_v4 = vsel %vm6190_vm4, %v1234_v53, %v1236_v30  ;;  %v1243_v57 = vsel %vm6190_vm4, %v1236_v30, %v1238_v0  ;;  %v379_v0 = vmul.f32 %v378_v45, %v377_v52  ;;  %v961_v53 = vsel %vm6188_vm11, %v4747_v34, %v4696_v1 }
 0x201   : > { %v1310_v8 = vsel %vm6187_vm3, %v1306_v46, %v1243_v57  ;;  %v1309_v25 = vsel %vm6187_vm3, %v1305_v16, %v1242_v4  ;;  %vm760_vm3 = vcmask 982016   ;;  %vm6225_vm11 = vcmask 523264  }
 0x202   : > { %1932 = vmatprep.subr.mxu1 %v1310_v8  ;;  %v636_v23 = vrot.slane %v379_v0, %v4100_v55  ;;  %v640_v60 = vrot.slane %v379_v0, %v6203_v6  ;;  %v644_v19 = vrot.slane %v379_v0, %v4112_v61  ;;  %v632_v11 = vrot.slane %v379_v0, %v4129_v5 }
 0x203   : > { %v1788_v47 = vpop.permute.xlu1 %1787  ;;  %1933 = vmatpush1.msra.mxu1 %v1309_v25  ;;  %v5062_v20 = vpop.permute.xlu0 %874  ;;  %v1000_v1 = vsel %vm6225_vm11, %v4739_v59, %v4724_v2  ;;  %v1040_v34 = vsel %vm1039_vm13, %v4814_v39, %v4762_v29  ;;  %vm840_vm4 = vcmask 965632   ;;  %v1080_v2 = vsel %vm1079_vm7, %v4883_v50, %v4803_v21 }
 0x204   : > { %v1808_v27 = vsel %vm1807_vm9, %v1788_v47, %v4952_v14  ;;  %vm6224_vm9 = vcmask 1039360   ;;  %v1283_v54 = vsel %vm1248_vm12, %v961_v53, %v1000_v1  ;;  %v1120_v39 = vsel %vm1119_vm14, %v4918_v41, %v4869_v22  ;;  %v6235_v47 = vld [vmem:[#allocation11_spill] sm:$0xff]  ;;  %v6236_v53 = vld [vmem:[#allocation10_spill] sm:$0xff] }
 0x205   : > { %1860 = vmatpush1.msra.mxu0 %v1808_v27  ;;  %v682_v14 = vsel %vm6224_vm9, %v4790_v9, %v4775_v63  ;;  %vm6226_vm1 = vmmov %vm6224_vm9  ;;  %vm880_vm11 = vcmask 916480   ;;  %v1160_v21 = vsel %vm1159_vm6, %v4932_v13, %v4916_v3  ;;  %v1200_v50 = vsel %vm1199_vm15, %v4966_v17, %v4940_v31  ;;  %v6239_v1 = vld [vmem:[#allocation15_spill] sm:$0xff] }
 0x206   : > { %1861 = vmatprep.subr.mxu0 %v1308_v24  ;;  %v683_v30 = vsel %vm6226_vm1, %v4775_v63, %v4801_v38  ;;  %vm6227_vm9 = vmmov %vm6226_vm1  ;;  %v1250_v59 = vsel %vm1248_vm12, %v636_v23, %v682_v14  ;;  %v723_v4 = vsel %vm720_vm8, %v4834_v49, %v4867_v40  ;;  %v762_v3 = vsel %vm760_vm3, %v4909_v26, %v4905_v58 }
 0x207   : > { %v5074_v48 = vpop.permute.xlu1 %872  ;;  %v5076_v7 = vpop.permute.xlu0 %878  ;;  %v684_v52 = vsel %vm6227_vm9, %v4801_v38, %v4792_v33  ;;  %vm6228_vm13 = vmmov %vm6226_vm1  ;;  %v1287_v33 = vsel %vm1253_vm5, %v1283_v54, %v1040_v34  ;;  %v722_v38 = vsel %vm720_vm8, %v4853_v35, %v4834_v49  ;;  %vm920_vm1 = vcmask 908288  }
 0x208   : > { %v681_v29 = vsel %vm6228_vm13, %v4826_v18, %v4790_v9  ;;  %v1251_v9 = vsel %vm1248_vm12, %v640_v60, %v683_v30  ;;  %v1252_v18 = vsel %vm1248_vm12, %v644_v19, %v684_v52  ;;  %v1291_v22 = vsel %vm1258_vm10, %v1287_v33, %v1080_v2  ;;  %v6237_v60 = vld [vmem:[#allocation8_spill] sm:$0xff] }
 0x209   : > { %v1249_v41 = vsel %vm1248_vm12, %v632_v11, %v681_v29  ;;  %v1295_v13 = vsel %vm1263_vm2, %v1291_v22, %v1120_v39  ;;  %v1255_v57 = vsel %vm1253_vm5, %v1250_v59, %v722_v38  ;;  %v724_v46 = vsel %vm720_vm8, %v4867_v40, %v4855_v36  ;;  %v6238_v11 = vld [vmem:[#allocation14_spill] sm:$0xff]  ;;  %v6242_v29 = vld [vmem:[#allocation7_spill] sm:$0xff] }
 0x20a   : > { %vm6229_vm6 = vcmask 1044480   ;;  %v802_v17 = vsel %vm800_vm0, %v4924_v37, %v4934_v42  ;;  %v763_v49 = vsel %vm760_vm3, %v4905_v58, %v4914_v56  ;;  %v842_v10 = vsel %vm840_vm4, %v6230_v12, %v4964_v44 }
 0x20b   : > { %v877_v63 = vpop.permute.xlu1 %876  ;;  %v5105_v45 = vpop.permute.xlu0 %870  ;;  %v1299_v31 = vsel %vm6229_vm6, %v1295_v13, %v1160_v21  ;;  %vm6231_vm7 = vcmask 392192   ;;  %vm6232_vm15 = vcmask 1045504   ;;  %v1256_v40 = vsel %vm1253_vm5, %v1251_v9, %v723_v4  ;;  %v6243_v21 = vld [vmem:[#allocation13_spill] sm:$0xff] }
 0x20c   : > { %v1303_v36 = vsel %vm6232_vm15, %v1299_v31, %v1200_v50  ;;  %v1260_v25 = vsel %vm1258_vm10, %v1255_v57, %v762_v3  ;;  %v882_v51 = vsel %vm880_vm11, %v5074_v48, %v5062_v20  ;;  %vm6233_vm9 = vcmask 1046528   ;;  %v1820_v57 = vld [vmem:[%s6125_s1] sm:$0x1] }
 0x20d   : > { %vm1821_vm13 = vcmask 220160   ;;  %v1257_v0 = vsel %vm1253_vm5, %v1252_v18, %v724_v46  ;;  %v764_v27 = vsel %vm760_vm3, %v4914_v56, %v6235_v47  ;;  %v1265_v62 = vsel %vm1263_vm2, %v1260_v25, %v802_v17 }
 0x20e   : > { %v1261_v24 = vsel %vm1258_vm10, %v1256_v40, %v763_v49  ;;  %v803_v23 = vsel %vm800_vm0, %v4934_v42, %v6236_v53  ;;  %v804_v19 = vsel %vm800_vm0, %v6236_v53, %v6237_v60  ;;  %v1270_v14 = vsel %vm6229_vm6, %v1265_v62, %v842_v10  ;;  %v3768_v40 = vld [vmem:[%s6129_s5 + $0x3] ss:$8 sm:$0xf] }
 0x20f   : > { %v1230_v16 = vpop.permute.xlu1 %1229  ;;  %v915_v43 = vpop.permute.xlu0 %914  ;;  %v843_v56 = vsel %vm840_vm4, %v4964_v44, %v6238_v11  ;;  %v844_v34 = vsel %vm840_vm4, %v6238_v11, %v6239_v1  ;;  %v1262_v42 = vsel %vm1258_vm10, %v1257_v0, %v764_v27  ;;  %v883_v52 = vsel %vm880_vm11, %v5062_v20, %v877_v63 }
 0x210   : > { %v1240_v8 = vsel %vm6231_vm7, %v1230_v16, %v5012_v32  ;;  %v721_v32 = vsel %vm720_vm8, %v6234_v28, %v4853_v35  ;;  %vm6240_vm7 = vmmov %vm6232_vm15  ;;  %v884_v2 = vsel %vm880_vm11, %v877_v63, %v5076_v7  ;;  %v761_v39 = vsel %vm760_vm3, %v6242_v29, %v4909_v26 }
 0x211   : > { %v1307_v58 = vsel %vm6233_vm9, %v1303_v36, %v1240_v8  ;;  %v1275_v30 = vsel %vm6240_vm7, %v1270_v14, %v882_v51  ;;  %vm6241_vm15 = vmmov %vm6233_vm9  ;;  %v1254_v44 = vsel %vm1253_vm5, %v1249_v41, %v721_v32  ;;  %v1266_v33 = vsel %vm1263_vm2, %v1261_v24, %v803_v23  ;;  %v6253_v24 = vld [vmem:[#allocation4_spill] sm:$0xff] }
 0x212   : > { %1862 = vmatpush1.msra.mxu0 %v1307_v58  ;;  %v1267_v38 = vsel %vm1263_vm2, %v1262_v42, %v804_v19  ;;  %v801_v20 = vsel %vm800_vm0, %v6243_v21, %v4924_v37  ;;  %vm6244_vm9 = vmmov %vm6229_vm6  ;;  %v841_v63 = vsel %vm840_vm4, %v5043_v15, %v6230_v12  ;;  %v1259_v37 = vsel %vm1258_vm10, %v1254_v44, %v761_v39  ;;  %v6251_v12 = vld [vmem:[#allocation6_spill] sm:$0xff]  ;;  %v6252_v58 = vld [vmem:[#allocation5_spill] sm:$0xff] }
 0x213   : > { %v913_v35 = vpop.permute.xlu1 %912  ;;  %v1271_v9 = vsel %vm6244_vm9, %v1266_v33, %v843_v56  ;;  %v1272_v7 = vsel %vm6229_vm6, %v1267_v38, %v844_v34  ;;  %v919_v18 = vpop.permute.xlu0 %918  ;;  %vm6245_vm5 = vmmov %vm6240_vm7  ;;  %v881_v3 = vsel %vm880_vm11, %v5105_v45, %v5074_v48  ;;  %v1264_v46 = vsel %vm1263_vm2, %v1259_v37, %v801_v20  ;;  %v3766_v23 = vld [vmem:[%s6129_s5 + $0x1] ss:$8 sm:$0xf]  ;;  %v2009_v21 = vld [vmem:[%s6129_s5] ss:$8 sm:$0xf] }
 0x214   : > { %v922_v54 = vsel %vm920_vm1, %v913_v35, %v915_v43  ;;  %v1277_v41 = vsel %vm6245_vm5, %v1272_v7, %v884_v2  ;;  %vm6246_vm7 = vmmov %vm6245_vm5  ;;  %v1269_v31 = vsel %vm6229_vm6, %v1264_v46, %v841_v63  ;;  %v6250_v49 = vmov 0.0   ;;  %v5276_v37 = vld [vmem:[#allocation2 + $0x14] sm:$0xf] }
 0x215   : > { %v1280_v59 = vsel %vm6241_vm15, %v1275_v30, %v922_v54  ;;  %v1276_v4 = vsel %vm6246_vm7, %v1271_v9, %v883_v52  ;;  %vm6247_vm9 = vmmov %vm6241_vm15  ;;  %v2094_v10 = vrot.slane %v6251_v12, %v6203_v6  ;;  %v2098_v8 = vrot.slane %v6251_v12, %v4112_v61  ;;  %v3771_v52 = vld [vmem:[%s6129_s5 + $0x6] ss:$8 sm:$0xf] }
 0x216   : > { %1863 = vmatprep.subr.mxu0 %v1280_v59  ;;  %vm6248_vm10 = vmmov %vm6245_vm5  ;;  %v2122_v25 = vrot.slane %v3768_v40, %v4129_v5  ;;  %v2126_v51 = vrot.slane %v3768_v40, %v4100_v55  ;;  %v5230_v0 = vcombine.high %v6252_v58, %v6252_v58  ;;  %v2130_v47 = vrot.slane %v3768_v40, %v6203_v6 }
 0x217   : > { %v917_v22 = vpop.permute.xlu1 %916  ;;  %v1274_v48 = vsel %vm6248_vm10, %v1269_v31, %v881_v3  ;;  %vm6249_vm5 = vmmov %vm6247_vm9  ;;  %v2100_v36 = vcombine.low %v2094_v10, %v2098_v8  ;;  %v2134_v27 = vrot.slane %v3768_v40, %v4112_v61  ;;  %v5238_v53 = vcombine.high %v6253_v24, %v6253_v24  ;;  %v5287_v31 = vpop.permute.xlu0 %2320 }
 0x218   : > { %v923_v26 = vsel %vm920_vm1, %v915_v43, %v917_v22  ;;  %v924_v50 = vsel %vm920_vm1, %v917_v22, %v919_v18  ;;  %v2135_v43 = vcombine.low %v2122_v25, %v2126_v51  ;;  %v2050_v56 = vrot.slane %v3766_v23, %v4129_v5 }
 0x219   : > { %v1282_v13 = vsel %vm6241_vm15, %v1277_v41, %v924_v50  ;;  %v1281_v15 = vsel %vm6247_vm9, %v1276_v4, %v923_v26  ;;  %2103 = vrot.lane.b32.xlu1 %v2100_v36, %s3863_s14  ;;  %v2136_v11 = vcombine.low %v2130_v47, %v2134_v27  ;;  %v2054_v1 = vrot.slane %v3766_v23, %v4100_v55  ;;  %s6254_s14 = smov 1  }
 0x21a   : > { %1934 = vmatprep.subr.mxu1 %v1282_v13  ;;  %2137 = vrot.lane.b32.xlu0 %v2135_v43, %s6197_s18  ;;  %v2058_v30 = vrot.slane %v3766_v23, %v6203_v6  ;;  %v2062_v42 = vrot.slane %v3766_v23, %v4112_v61  ;;  %v2233_v44 = vrot.slane %v3771_v52, %v4129_v5  ;;  %vm6256_vm7 = vcmask 1044040  }
 0x21b   : > { %v911_v17 = vpop.permute.xlu1 %910  ;;  %1935 = vmatpush1.msra.mxu1 %v1281_v15  ;;  %v2063_v59 = vcombine.low %v2050_v56, %v2054_v1  ;;  %v2237_v29 = vrot.slane %v3771_v52, %v4100_v55  ;;  %v2241_v33 = vrot.slane %v3771_v52, %v6203_v6  ;;  %v2245_v38 = vrot.slane %v3771_v52, %v4112_v61 }
 0x21c   : > { %v921_v16 = vsel %vm920_vm1, %v911_v17, %v913_v35  ;;  %3765 = vmatmul.mubr.msk.f32.vlgmr.msra.gmra.mxu1 %vm1821_vm13, %v1820_v57  ;;  %v2064_v39 = vcombine.low %v2058_v30, %v2062_v42  ;;  %v2014_v7 = vrot.slane %v2009_v21, %v4129_v5  ;;  %v2018_v63 = vrot.slane %v2009_v21, %v4100_v55  ;;  %v5289_v17 = vpop.permute.xlu0 %2284 }
 0x21d   : > { %v1279_v45 = vsel %vm6249_vm5, %v1274_v48, %v921_v16  ;;  %2788 = vmatprep.mubr.f32.mxu1 %v6250_v49  ;;  %v2246_v9 = vcombine.low %v2233_v44, %v2237_v29  ;;  %v2247_v18 = vcombine.low %v2241_v33, %v2245_v38  ;;  %v2022_v22 = vrot.slane %v2009_v21, %v6203_v6 }
 0x21e   : > { %1864 = vmatpush1.msra.mxu0 %v1279_v45  ;;  %v2026_v26 = vrot.slane %v2009_v21, %v4112_v61  ;;  %v2027_v50 = vcombine.low %v2014_v7, %v2018_v63  ;;  %vm6259_vm9 = vcmask 596992   ;;  %vm6261_vm10 = vcmask 662528  }
 0x21f   : > { %3762 = vmatmul.mubr.msk.f32.vlgmr.msra.gmra.mxu0 %vm1821_vm13, %v1820_v57  ;;  %v2323_v20 = vpop.permute.xlu1 %2322  ;;  %vm6255_vm13 = vcmask 592896   ;;  %vm6260_vm6 = vmmov %vm6259_vm9  ;;  %vm6262_vm5 = vcmask 138240  }
 0x220   : > { %2717 = vmatprep.mubr.f32.mxu0 %v6250_v49  ;;  %v2028_v4 = vcombine.low %v2022_v22, %v2026_v26  ;;  %v2325_v3 = vrot.slane %v2323_v20, 4  ;;  %v2174_v16 = vpop.permute.xlu0 %2173 }
 0x221   : > { %v2177_v56 = vrot.slane %v2174_v16, 4 }
 0x222   : > { %v2334_v15 = vmul.f32 %v2325_v3, %v5276_v37 }
 0x223   : > { %v5273_v41 = vpop.permute.xlu1 %2286 }
 0x224   : > { %v2289_v13 = vrot.slane %v5273_v41, 4  ;;  %v5291_v45 = vpop.permute.xlu0 %2209 }
 0x226   : > { %v2298_v57 = vmul.f32 %v2289_v13, %v5276_v37 }
 0x227   : > { %v2176_v48 = vpop.permute.xlu1 %2175 }
 0x228   : > { %v2475_v46 = vcombine.low %v2298_v57, %v2298_v57  ;;  %v2102_v10 = vpop.permute.xlu0 %2101 }
 0x229   : > { %v2105_v21 = vrot.slane %v2102_v10, 4 }
 0x22b   : > { %v5293_v12 = vpop.permute.xlu1 %2211 }
 0x22c   : > { %v2214_v33 = vrot.slane %v5293_v12, 4 }
 0x28b   : > { %v2104_v8 = vpop.permute.xlu1 %2103 }
 0x28c   : > { %v5295_v36 = vpop.permute.xlu0 %2137 }
 0x2dc   : > { %v1970_v28 = vpop.f32.mrf.mxu1 }
 0x2dd   : > { %v1981_v32 = vsel %vm1248_vm12, %v1970_v28, %v6252_v58 }
 0x2de   : > { %v1972_v62 = vpop.f32.mrf.mxu1 }
 0x2df   : > { %v1982_v60 = vsel %vm1248_vm12, %v1972_v62, %v5230_v0  ;;  %v1899_v19 = vpop.f32.mrf.mxu0  ;;  %v2178_v62 = vrot.slane %v2176_v48, 4 }
 0x2e0   : > { %v1988_v14 = vcombine.low %v1981_v32, %v1982_v60  ;;  %v1979_v34 = vsel %vm1248_vm12, %v1899_v19, %v6253_v24  ;;  %v2213_v60 = vrot.slane %v5291_v45, 4 }
 0x2e1   : > { %v1901_v35 = vpop.f32.mrf.mxu0  ;;  %v2180_v44 = vsel %vm1263_vm2, %v2177_v56, %v2178_v62 }
 0x2e2   : > { %v1980_v54 = vsel %vm1248_vm12, %v1901_v35, %v5238_v53  ;;  %1991 = vrot.lane.b32.xlu1 %v1988_v14, %s3866_s24  ;;  %vm2001_vm12 = vcmask 1047556   ;;  %v2324_v14 = vrot.slane %v5287_v31, 4  ;;  %v2106_v35 = vrot.slane %v2104_v8, 4 }
 0x2e3   : > { %v1987_v2 = vcombine.low %v1979_v34, %v1980_v54  ;;  %vm5299_vm15 = vmor %vm2001_vm12, %vm6256_vm7  ;;  %v2215_v1 = vsel %vm6261_vm10, %v2213_v60, %v5291_v45  ;;  %vm6265_vm7 = vcmask 531456  }
 0x2e4   : > { %v2327_v34 = vsel %vm1263_vm2, %v2324_v14, %v2325_v3  ;;  %vm6263_vm12 = vmmov %vm6260_vm6 }
 0x2e5   : > { %1989 = vrot.lane.b32.xlu0 %v1987_v2, %s3866_s24  ;;  %v2328_v52 = vsel %vm6262_vm5, %v2327_v34, %v2323_v20  ;;  %v2179_v2 = vsel %vm6263_vm12, %v2177_v56, %v2174_v16  ;;  %v2288_v16 = vrot.slane %v5289_v17, 4  ;;  %vm6268_vm10 = vmmov %vm6262_vm5 }
 0x2e6   : > { %2139 = vrot.lane.b32.xlu1 %v2136_v11, %s6197_s18 }
 0x2e9   : > { %2065 = vrot.lane.b32.xlu0 %v2063_v59, %s3868_s12  ;;  %v2141_v59 = vrot.slane %v5295_v36, 4 }
 0x2ea   : > { %2067 = vrot.lane.b32.xlu1 %v2064_v39, %s3868_s12  ;;  %s6288_s12 = smov 72  }
 0x2eb   : > { %v2143_v20 = vsel %vm6265_vm7, %v2141_v59, %v5295_v36  ;;  %vm6272_vm7 = vcmask 662528  }
 0x2ed   : > { %2248 = vrot.lane.b32.xlu0 %v2246_v9, %s6254_s14 }
 0x2ee   : > { %2250 = vrot.lane.b32.xlu1 %v2247_v18, %s6254_s14 }
 0x2f1   : > { %2029 = vrot.lane.b32.xlu0 %v2027_v50, %s6254_s14 }
 0x2f2   : > { %2031 = vrot.lane.b32.xlu1 %v2028_v4, %s6254_s14  ;;  %v2108_v4 = vsel %vm1263_vm2, %v2105_v21, %v2106_v35 }
 0x2f6   : > { %2508 = vrot.lane.b32.xlu1 %v2334_v15, %s3891_s22 }
 0x2fa   : > { %2484 = vrot.lane.b32.xlu1 %v2475_v46, %s3884_s21 }
 0x354   : > { %v1992_v40 = vpop.permute.xlu1 %1991 }
 0x355   : > { %v1994_v25 = vrot.slane %v1992_v40, 4 }
 0x357   : > { %2005 = vst.msk [vmem:[#allocation2 + $0x10] sm:$0xf] %vm6255_vm13, %v1994_v25  ;;  %v1990_v51 = vpop.permute.xlu0 %1989  ;;  %vm6264_vm13 = vmmov %vm6260_vm6 }
 0x358   : > { %v1993_v28 = vrot.slane %v1990_v51, 4  ;;  %v2181_v38 = vsel %vm6264_vm13, %v2180_v44, %v2176_v48  ;;  %v2140_v26 = vpop.permute.xlu1 %2139  ;;  %v2109_v48 = vsel %vm6268_vm10, %v2108_v4, %v2104_v8  ;;  %v2291_v8 = vsel %vm1263_vm2, %v2288_v16, %v2289_v13 }
 0x359   : > { %v2142_v46 = vrot.slane %v2140_v26, 4  ;;  %vm6275_vm10 = vcmask 7168  }
 0x35a   : > { %v1995_v32 = vsel %vm6259_vm9, %v1993_v28, %v1990_v51  ;;  %v1996_v47 = vsel %vm1263_vm2, %v1993_v28, %v1994_v25  ;;  %vm6266_vm9 = vmmov %vm6262_vm5 }
 0x35b   : > { %v5306_v27 = vsel %vm6260_vm6, %v1996_v47, %v1992_v40  ;;  %2003 = vst.msk [vmem:[#allocation2] sm:$0xff] %vm5299_vm15, %v1995_v32  ;;  %v2066_v9 = vpop.permute.xlu0 %2065  ;;  %v2107_v22 = vsel %vm6266_vm9, %v2105_v21, %v2102_v10  ;;  %vm6267_vm6 = vcmask 72704   ;;  %vm6271_vm13 = vmmov %vm6266_vm9  ;;  %vm6273_vm9 = vcmask 531456  }
 0x35c   : > { %2004 = vst [vmem:[#allocation2 + $0x8] sm:$0xff] %v5306_v27  ;;  %v5349_v7 = vmul.f32 %v2181_v38, %v5306_v27  ;;  %v2069_v50 = vrot.slane %v2066_v9, 4  ;;  %v5369_v40 = vmul.f32 %v2109_v48, %v5306_v27  ;;  %vm6269_vm5 = vmmov %vm6267_vm6  ;;  %v2326_v13 = vsel %vm6271_vm13, %v2324_v14, %v5287_v31 }
 0x35d   : > { %v2290_v51 = vsel %vm6269_vm5, %v2288_v16, %v5289_v17  ;;  %vm6270_vm12 = vmmov %vm6269_vm5  ;;  %v2068_v17 = vpop.permute.xlu1 %2067  ;;  %vm6278_vm13 = vcmask 523264  }
 0x35e   : > { %v5311_v23 = vld [vmem:[#allocation2 + $0x10] sm:$0xf]  ;;  %v2071_v57 = vsel %vm6267_vm6, %v2069_v50, %v2066_v9  ;;  %v2292_v47 = vsel %vm6270_vm12, %v2291_v8, %v5273_v41  ;;  %v2144_v41 = vsel %vm1263_vm2, %v2141_v59, %v2142_v46  ;;  %v2070_v34 = vrot.slane %v2068_v17, 4  ;;  %vm6274_vm6 = vmmov %vm6269_vm5 }
 0x35f   : > { %v2187_v19 = vmul.f32 %v2178_v62, %v5311_v23  ;;  %v2115_v54 = vmul.f32 %v2106_v35, %v5311_v23  ;;  %v2223_v18 = vmul.f32 %v2214_v33, %v5311_v23  ;;  %v2151_v10 = vmul.f32 %v2142_v46, %v5311_v23  ;;  %vm6276_vm5 = vmmov %vm6275_vm10 }
 0x360   : > { %v2216_v35 = vsel %vm1263_vm2, %v2213_v60, %v2214_v33  ;;  %v2145_v45 = vsel %vm6273_vm9, %v2144_v41, %v2140_v26  ;;  %v2072_v60 = vsel %vm1263_vm2, %v2069_v50, %v2070_v34  ;;  %vm6277_vm12 = vmmov %vm6276_vm5 }
 0x361   : > { %2428 = vrot.lane.b32.xlu1 %v2187_v19, %s3883_s27  ;;  %v2444_v3 = vcombine.low %v2223_v18, %v2223_v18  ;;  %v2395_v28 = vcombine.low %v2151_v10, %v2151_v10  ;;  %v2150_v14 = vmul.f32 %v2145_v45, %v5306_v27  ;;  %v2251_v59 = vpop.permute.xlu1 %2250 }
 0x362   : > { %v5316_v11 = vld [vmem:[#allocation2] sm:$0xff] }
 0x363   : > { %v2221_v30 = vmul.f32 %v2215_v1, %v5316_v11  ;;  %v5326_v42 = vld [vmem:[#allocation2 + $0xc] sm:$0xff]  ;;  %v5338_v39 = vmul.f32 %v2179_v2, %v5316_v11  ;;  %v2149_v63 = vmul.f32 %v2143_v20, %v5316_v11  ;;  %v2113_v15 = vmul.f32 %v2107_v22, %v5316_v11  ;;  %v5371_v25 = vld [vmem:[#allocation2 + $0x4] sm:$0xff] }
 0x364   : > { %v5335_v29 = vmul.f32 %v2328_v52, %v5326_v42  ;;  %v5366_v36 = vmul.f32 %v2071_v57, %v5316_v11  ;;  %v2296_v32 = vmul.f32 %v2290_v51, %v5371_v25  ;;  %v2297_v19 = vmul.f32 %v2292_v47, %v5326_v42 }
 0x365   : > { %2379 = vrot.lane.b32.xlu1 %v2115_v54, %s3891_s22  ;;  %2447 = vrot.lane.b32.xlu0 %v2221_v30, %s3890_s23  ;;  %v2442_v62 = vcombine.low %v2221_v30, %v2221_v30  ;;  %v2393_v56 = vcombine.low %v2149_v63, %v2149_v63  ;;  %v2332_v1 = vmul.f32 %v2326_v13, %v5371_v25  ;;  %v5413_v38 = vpop.permute.xlu1 %2031  ;;  %v2253_v22 = vrot.slane %v2251_v59, 4 }
 0x366   : > { %v2217_v54 = vsel %vm6272_vm7, %v2216_v35, %v5293_v12  ;;  %v2474_v30 = vcombine.low %v2297_v19, %v2297_v19  ;;  %v2473_v52 = vcombine.low %v2296_v32, %v2296_v32  ;;  %v2073_v2 = vsel %vm6274_vm6, %v2072_v60, %v2068_v17  ;;  %vm6281_vm6 = vmmov %vm6278_vm13 }
 0x367   : > { %v2222_v31 = vmul.f32 %v2217_v54, %v5306_v27  ;;  %v2078_v12 = vmul.f32 %v2073_v2, %v5306_v27  ;;  %v2394_v33 = vcombine.low %v2150_v14, %v2150_v14  ;;  %v2418_v21 = vcombine.high %v5338_v39, %v5338_v39 }
 0x368   : > { %v2079_v20 = vmul.f32 %v2070_v34, %v5311_v23  ;;  %v2262_v26 = vmul.f32 %v2253_v22, %v5276_v37  ;;  %v2498_v4 = vcombine.high %v2332_v1, %v2332_v1  ;;  %v2419_v57 = vcombine.high %v5349_v7, %v5349_v7 }
 0x369   : > { %2504 = vrot.lane.b32.xlu1 %v5335_v29, %s3891_s22  ;;  %2420 = vrot.lane.b32.xlu0 %v5338_v39, %s3883_s27  ;;  %v2443_v44 = vcombine.low %v2222_v31, %v2222_v31  ;;  %v2345_v9 = vcombine.low %v2078_v12, %v2078_v12  ;;  %v5420_v18 = vpop.permute.xlu1 %2508  ;;  %v2370_v37 = vcombine.high %v5369_v40, %v5369_v40  ;;  %vm6279_vm7 = vcmask 392192  }
 0x36a   : > { %v2346_v50 = vcombine.low %v2079_v20, %v2079_v20  ;;  %v2344_v46 = vcombine.low %v5366_v36, %v5366_v36  ;;  %vm6280_vm9 = vmmov %vm6279_vm7 }
 0x36d   : > { %2424 = vrot.lane.b32.xlu1 %v5349_v7, %s3883_s27  ;;  %2398 = vrot.lane.b32.xlu0 %v2149_v63, %s3872_s17  ;;  %v2369_v63 = vcombine.high %v2113_v15, %v2113_v15  ;;  %v2485_v39 = vpop.permute.xlu1 %2484 }
 0x371   : > { %2453 = vrot.lane.b32.xlu1 %v2444_v3, %s3890_s23  ;;  %2371 = vrot.lane.b32.xlu0 %v2113_v15, %s3891_s22  ;;  %v2533_v3 = vsel %vm1263_vm2, %v2262_v26, %v2485_v39  ;;  %v2499_v15 = vcombine.high %v5335_v29, %v5335_v29  ;;  %v2249_v29 = vpop.permute.xlu0 %2248 }
 0x375   : > { %2375 = vrot.lane.b32.xlu1 %v5369_v40, %s3891_s22  ;;  %2349 = vrot.lane.b32.xlu0 %v5366_v36, %s3884_s21  ;;  %v5443_v16 = vpop.permute.xlu0 %2029 }
 0x379   : > { %2404 = vrot.lane.b32.xlu1 %v2395_v28, %s3872_s17  ;;  %2478 = vrot.lane.b32.xlu0 %v2296_v32, %s3884_s21  ;;  %v2252_v28 = vrot.slane %v2249_v29, 4 }
 0x37d   : > { %2445 = vrot.lane.b32.xlu1 %v2442_v62, %s3890_s23  ;;  %2482 = vrot.lane.b32.xlu0 %v2297_v19, %s3884_s21  ;;  %v2255_v19 = vsel %vm1263_vm2, %v2252_v28, %v2253_v22 }
 0x37e   : > { %v2256_v35 = vsel %vm6275_vm10, %v2255_v19, %v2251_v59  ;;  %vm6282_vm10 = vmmov %vm6279_vm7 }
 0x381   : > { %2396 = vrot.lane.b32.xlu1 %v2393_v56, %s3872_s17  ;;  %2500 = vrot.lane.b32.xlu0 %v2332_v1, %s3891_s22  ;;  %v5470_v56 = vmul.f32 %v2256_v35, %v5326_v42 }
 0x383   : > { %v2467_v54 = vcombine.high %v5470_v56, %v5470_v56 }
 0x385   : > { %2480 = vrot.lane.b32.xlu1 %v2474_v30, %s3884_s21  ;;  %2451 = vrot.lane.b32.xlu0 %v2222_v31, %s3890_s23 }
 0x389   : > { %2476 = vrot.lane.b32.xlu1 %v2473_v52, %s3884_s21  ;;  %2402 = vrot.lane.b32.xlu0 %v2150_v14, %s3872_s17 }
 0x38d   : > { %2449 = vrot.lane.b32.xlu1 %v2443_v44, %s3890_s23  ;;  %2353 = vrot.lane.b32.xlu0 %v2078_v12, %s3884_s21  ;;  %v2033_v44 = vrot.slane %v5443_v16, 4 }
 0x391   : > { %2400 = vrot.lane.b32.xlu1 %v2394_v33, %s3872_s17  ;;  %2422 = vrot.lane.b32.xlu0 %v2418_v21, %s3883_s27  ;;  %v2034_v33 = vrot.slane %v5413_v38, 4 }
 0x395   : > { %2351 = vrot.lane.b32.xlu1 %v2345_v9, %s3884_s21  ;;  %2373 = vrot.lane.b32.xlu0 %v2369_v63, %s3891_s22  ;;  %v2036_v9 = vsel %vm1263_vm2, %v2033_v44, %v2034_v33 }
 0x396   : > { %v2037_v26 = vsel %vm6276_vm5, %v2036_v9, %v5413_v38  ;;  %vm6283_vm5 = vmmov %vm6281_vm6 }
 0x399   : > { %2355 = vrot.lane.b32.xlu1 %v2346_v50, %s3884_s21  ;;  %2502 = vrot.lane.b32.xlu0 %v2498_v4, %s3891_s22  ;;  %v5501_v50 = vmul.f32 %v2037_v26, %v5306_v27  ;;  %v2254_v27 = vsel %vm6277_vm12, %v2252_v28, %v2249_v29 }
 0x39d   : > { %2506 = vrot.lane.b32.xlu0 %v2499_v15, %s3891_s22  ;;  %2593 = vrot.lane.b32.xlu1 %v2533_v3, %s3876_s15  ;;  %v2338_v3 = vcombine.high %v5501_v50, %v5501_v50 }
 0x3a1   : > { %2426 = vrot.lane.b32.xlu0 %v2419_v57, %s3883_s27  ;;  %s6286_s27 = smov 82  }
 0x3a5   : > { %2377 = vrot.lane.b32.xlu0 %v2370_v37, %s3891_s22 }
 0x3a9   : > { %2347 = vrot.lane.b32.xlu0 %v2344_v46, %s3884_s21 }
 0x3ad   : > { %2603 = vrot.lane.b32.xlu0 %v5420_v18, %s3876_s15 }
 0x3d3   : > { %v5445_v48 = vpop.permute.xlu1 %2428 }
 0x3d7   : > { %v5447_v7 = vpop.permute.xlu1 %2379  ;;  %v5449_v10 = vpop.permute.xlu0 %2447 }
 0x3db   : > { %v2505_v40 = vpop.permute.xlu1 %2504  ;;  %v5451_v51 = vpop.permute.xlu0 %2420 }
 0x3df   : > { %v5453_v8 = vpop.permute.xlu1 %2424  ;;  %v5455_v36 = vpop.permute.xlu0 %2398 }
 0x3e3   : > { %v5457_v32 = vpop.permute.xlu1 %2453  ;;  %v2372_v47 = vpop.permute.xlu0 %2371 }
 0x3e4   : > { %v2528_v62 = vsel %vm1263_vm2, %v5445_v48, %v5457_v32 }
 0x3e5   : > { %2583 = vrot.lane.b32.xlu0 %v2528_v62, %s3876_s15 }
 0x3e7   : > { %v5464_v13 = vpop.permute.xlu1 %2375  ;;  %v5466_v17 = vpop.permute.xlu0 %2349 }
 0x3eb   : > { %v5472_v1 = vpop.permute.xlu1 %2404  ;;  %v2479_v41 = vpop.permute.xlu0 %2478 }
 0x3ec   : > { %v2523_v34 = vsel %vm1263_vm2, %v5447_v7, %v5472_v1 }
 0x3ed   : > { %2573 = vrot.lane.b32.xlu1 %v2523_v34, %s3876_s15 }
 0x3ef   : > { %v2446_v30 = vpop.permute.xlu1 %2445  ;;  %v2483_v31 = vpop.permute.xlu0 %2482 }
 0x3f0   : > { %v2489_v45 = vsel %vm760_vm3, %v2483_v31, %v2485_v39 }
 0x3f1   : > { %v2532_v60 = vsel %vm1263_vm2, %v2467_v54, %v2489_v45  ;;  %v2260_v54 = vmul.f32 %v2254_v27, %v5371_v25 }
 0x3f2   : > { %2591 = vrot.lane.b32.xlu0 %v2532_v60, %s3876_s15 }
 0x3f3   : > { %v2397_v42 = vpop.permute.xlu1 %2396  ;;  %v2501_v14 = vpop.permute.xlu0 %2500 }
 0x3f4   : > { %v2406_v45 = vsel %vm6278_vm13, %v2397_v42, %v5455_v36  ;;  %vm6284_vm13 = vmmov %vm6279_vm7 }
 0x3f7   : > { %v2481_v52 = vpop.permute.xlu1 %2480  ;;  %v5483_v2 = vpop.permute.xlu0 %2451 }
 0x3f8   : > { %v2487_v29 = vsel %vm760_vm3, %v2479_v41, %v2481_v52 }
 0x3fb   : > { %v2477_v59 = vpop.permute.xlu1 %2476  ;;  %v5485_v12 = vpop.permute.xlu0 %2402 }
 0x3fc   : > { %v2486_v25 = vsel %vm760_vm3, %v2477_v59, %v2479_v41 }
 0x3ff   : > { %v2450_v21 = vpop.permute.xlu1 %2449  ;;  %v5489_v20 = vpop.permute.xlu0 %2353 }
 0x403   : > { %v5496_v63 = vpop.permute.xlu1 %2400  ;;  %v2423_v22 = vpop.permute.xlu0 %2422 }
 0x404   : > { %v2430_v9 = vsel %vm1119_vm14, %v5451_v51, %v2423_v22  ;;  %v2457_v51 = vsel %vm6280_vm9, %v2450_v21, %v5483_v2 }
 0x407   : > { %v5503_v4 = vpop.permute.xlu1 %2351  ;;  %v2374_v39 = vpop.permute.xlu0 %2373 }
 0x408   : > { %v2381_v35 = vsel %vm880_vm11, %v2372_v47, %v2374_v39  ;;  %v2466_v47 = vcombine.high %v2260_v54, %v2260_v54 }
 0x409   : > { %v2519_v60 = vsel %vm1263_vm2, %v2381_v35, %v2406_v45  ;;  %v2795_v35 = vld [vmem:[%s6131_s7] sm:$0xf] }
 0x40b   : > { %v5507_v15 = vpop.permute.xlu1 %2355  ;;  %v2503_v57 = vpop.permute.xlu0 %2502 }
 0x40c   : > { %v2360_v37 = vsel %vm760_vm3, %v5489_v20, %v5507_v15  ;;  %v2511_v34 = vsel %vm880_vm11, %v2503_v57, %v2505_v40  ;;  %v2510_v42 = vsel %vm880_vm11, %v2501_v14, %v2503_v57  ;;  %v2488_v14 = vsel %vm760_vm3, %v2481_v52, %v2483_v31 }
 0x40d   : > { %v2517_v46 = vsel %vm1263_vm2, %v2338_v3, %v2360_v37  ;;  %v2529_v3 = vsel %vm1263_vm2, %v2260_v54, %v2486_v25  ;;  %v2531_v57 = vsel %vm1263_vm2, %v5470_v56, %v2488_v14  ;;  %v2407_v31 = vsel %vm6281_vm6, %v5455_v36, %v5496_v63 }
 0x40e   : > { %2561 = vrot.lane.b32.xlu1 %v2517_v46, %s3876_s15  ;;  %v2431_v46 = vsel %vm1119_vm14, %v2423_v22, %v5453_v8  ;;  %v2456_v52 = vsel %vm6282_vm10, %v5449_v10, %v2450_v21  ;;  %v2409_v36 = vsel %vm6283_vm5, %v5485_v12, %v5472_v1 }
 0x40f   : > { %v2507_v62 = vpop.permute.xlu0 %2506  ;;  %v2525_v56 = vsel %vm1263_vm2, %v2431_v46, %v2456_v52 }
 0x410   : > { %v2512_v19 = vsel %vm880_vm11, %v2505_v40, %v2507_v62  ;;  %v2513_v28 = vsel %vm880_vm11, %v2507_v62, %v5420_v18  ;;  %v2530_v40 = vsel %vm1263_vm2, %v2466_v47, %v2487_v29  ;;  %v2455_v18 = vsel %vm6279_vm7, %v2446_v30, %v5449_v10  ;;  %v2805_v47 = vld [vmem:[%s6132_s8] sm:$0xf] }
 0x411   : > { %2599 = vrot.lane.b32.xlu0 %v2512_v19, %s3876_s15  ;;  %v2524_v41 = vsel %vm1263_vm2, %v2430_v9, %v2455_v18  ;;  %v2382_v30 = vsel %vm880_vm11, %v2374_v39, %v5464_v13  ;;  %v2035_v10 = vsel %vm6277_vm12, %v2033_v44, %v5443_v16  ;;  %v3893_v44 = vmov 0  }
 0x412   : > { %2597 = vrot.lane.b32.xlu1 %v2511_v34, %s3876_s15  ;;  %v2520_v39 = vsel %vm1263_vm2, %v2382_v30, %v2407_v31  ;;  %v2041_v16 = vmul.f32 %v2035_v10, %v5316_v11  ;;  %3846 = vset.pattern.permute.xlu0 %v3893_v44  ;;  %v2358_v11 = vsel %vm760_vm3, %v5466_v17, %v5503_v4  ;;  %vm6289_vm7 = vcmask 1039360  }
 0x413   : > { %v2427_v26 = vpop.permute.xlu0 %2426  ;;  %3847 = vset.pattern.permute.xlu1 %v3893_v44  ;;  %vm6290_vm9 = vmmov %vm6289_vm7 }
 0x414   : > { %v2432_v37 = vsel %vm1119_vm14, %v5453_v8, %v2427_v26  ;;  %v2433_v8 = vsel %vm1119_vm14, %v2427_v26, %v5445_v48  ;;  %v2359_v48 = vsel %vm760_vm3, %v5503_v4, %v5489_v20  ;;  %vm6285_vm14 = vmmov %vm6283_vm5 }
 0x415   : > { %2565 = vrot.lane.b32.xlu0 %v2519_v60, %s3876_s15  ;;  %v2526_v59 = vsel %vm1263_vm2, %v2432_v37, %v2457_v51  ;;  %vm6291_vm6 = vmmov %vm6289_vm7 }
 0x416   : > { %2601 = vrot.lane.b32.xlu1 %v2513_v28, %s3876_s15  ;;  %v3786_v28 = vld [vmem:[%s6130_s6 + $0x7] ss:$8 sm:$0xf]  ;;  %vm6292_vm10 = vmmov %vm6291_vm6 }
 0x417   : > { %v2378_v27 = vpop.permute.xlu0 %2377  ;;  %v3108_v25 = vrot.slane %v3786_v28, %v6203_v6  ;;  %v3104_v30 = vrot.slane %v3786_v28, %v4100_v55  ;;  %vm6293_vm5 = vmmov %vm6291_vm6 }
 0x418   : > { %v2384_v62 = vsel %vm880_vm11, %v2378_v27, %v5447_v7  ;;  %v2458_v7 = vsel %vm6284_vm13, %v5483_v2, %v5457_v32  ;;  %v2383_v1 = vsel %vm880_vm11, %v5464_v13, %v2378_v27  ;;  %v2408_v32 = vsel %vm6285_vm14, %v5496_v63, %v5485_v12  ;;  %v3787_v12 = vld [vmem:[%s6130_s6 + $0x20] ss:$8 sm:$0xf]  ;;  %vm6294_vm12 = vmmov %vm6293_vm5 }
 0x419   : > { %2587 = vrot.lane.b32.xlu0 %v2530_v40, %s3876_s15  ;;  %v2522_v21 = vsel %vm1263_vm2, %v2384_v62, %v2409_v36  ;;  %v2527_v22 = vsel %vm1263_vm2, %v2433_v8, %v2458_v7  ;;  %v2516_v2 = vsel %vm1263_vm2, %v5501_v50, %v2359_v48  ;;  %v2521_v20 = vsel %vm1263_vm2, %v2383_v1, %v2408_v32  ;;  %vm6295_vm13 = vmmov %vm6293_vm5 }
 0x41a   : > { %2595 = vrot.lane.b32.xlu1 %v2510_v42, %s3876_s15  ;;  %v2043_v13 = vmul.f32 %v2034_v33, %v5311_v23  ;;  %v2337_v63 = vcombine.high %v2041_v16, %v2041_v16  ;;  %v3144_v23 = vrot.slane %v3787_v12, %v6203_v6  ;;  %v3148_v33 = vrot.slane %v3787_v12, %v4112_v61  ;;  %vm6296_vm14 = vmmov %vm6293_vm5 }
 0x41b   : > { %v2348_v50 = vpop.permute.xlu0 %2347  ;;  %v3140_v29 = vrot.slane %v3787_v12, %v4100_v55  ;;  %v3112_v42 = vrot.slane %v3786_v28, %v4112_v61 }
 0x41c   : > { %v2518_v19 = vsel %vm1263_vm2, %v2043_v13, %v5507_v15  ;;  %v2515_v38 = vsel %vm1263_vm2, %v2337_v63, %v2358_v11  ;;  %v2357_v4 = vsel %vm760_vm3, %v2348_v50, %v5466_v17  ;;  %v3785_v15 = vld [vmem:[%s6130_s6 + $0x6] ss:$8 sm:$0xf]  ;;  %v3150_v54 = vcombine.low %v3144_v23, %v3148_v33 }
 0x41d   : > { %2585 = vrot.lane.b32.xlu0 %v2529_v3, %s3876_s15  ;;  %v2514_v34 = vsel %vm1263_vm2, %v2041_v16, %v2357_v4  ;;  %v3072_v45 = vrot.slane %v3785_v15, %v6203_v6  ;;  %v3076_v60 = vrot.slane %v3785_v15, %v4112_v61  ;;  %v3136_v17 = vrot.slane %v3787_v12, %v4129_v5  ;;  %v3783_v3 = vld [vmem:[%s6130_s6 + $0x4] ss:$8 sm:$0xf] }
 0x41e   : > { %2575 = vrot.lane.b32.xlu1 %v2524_v41, %s3876_s15  ;;  %v3064_v26 = vrot.slane %v3785_v15, %v4129_v5  ;;  %v3068_v18 = vrot.slane %v3785_v15, %v4100_v55  ;;  %v3114_v37 = vcombine.low %v3108_v25, %v3112_v42  ;;  %v3000_v41 = vrot.slane %v3783_v3, %v6203_v6 }
 0x41f   : > { %v3078_v40 = vcombine.low %v3072_v45, %v3076_v60  ;;  %v3149_v9 = vcombine.low %v3136_v17, %v3140_v29  ;;  %v3004_v14 = vrot.slane %v3783_v3, %v4112_v61  ;;  %v2996_v62 = vrot.slane %v3783_v3, %v4100_v55 }
 0x420   : > { %v3077_v51 = vcombine.low %v3064_v26, %v3068_v18 }
 0x421   : > { %2579 = vrot.lane.b32.xlu0 %v2526_v59, %s3876_s15  ;;  %v3100_v59 = vrot.slane %v3786_v28, %v4129_v5  ;;  %v3006_v46 = vcombine.low %v3000_v41, %v3004_v14 }
 0x422   : > { %2589 = vrot.lane.b32.xlu1 %v2531_v57, %s3876_s15  ;;  %v3784_v57 = vld [vmem:[%s6130_s6 + $0x5] ss:$8 sm:$0xf] }
 0x423   : > { %v3036_v27 = vrot.slane %v3784_v57, %v6203_v6  ;;  %v3040_v31 = vrot.slane %v3784_v57, %v4112_v61  ;;  %v3113_v52 = vcombine.low %v3100_v59, %v3104_v30  ;;  %v3032_v48 = vrot.slane %v3784_v57, %v4100_v55 }
 0x425   : > { %2567 = vrot.lane.b32.xlu0 %v2520_v39, %s3876_s15  ;;  %v2992_v39 = vrot.slane %v3783_v3, %v4129_v5  ;;  %v3042_v8 = vcombine.low %v3036_v27, %v3040_v31 }
 0x426   : > { %2577 = vrot.lane.b32.xlu1 %v2525_v56, %s3876_s15  ;;  %v3781_v56 = vld [vmem:[%s6130_s6 + $0x2] ss:$8 sm:$0xf] }
 0x427   : > { %v2928_v36 = vrot.slane %v3781_v56, %v6203_v6  ;;  %v2932_v10 = vrot.slane %v3781_v56, %v4112_v61  ;;  %v3005_v7 = vcombine.low %v2992_v39, %v2996_v62  ;;  %v2920_v44 = vrot.slane %v3781_v56, %v4129_v5 }
 0x429   : > { %2571 = vrot.lane.b32.xlu0 %v2522_v21, %s3876_s15  ;;  %v3028_v21 = vrot.slane %v3784_v57, %v4129_v5  ;;  %v2934_v1 = vcombine.low %v2928_v36, %v2932_v10 }
 0x42a   : > { %2581 = vrot.lane.b32.xlu1 %v2527_v22, %s3876_s15  ;;  %v3782_v22 = vld [vmem:[%s6130_s6 + $0x3] ss:$8 sm:$0xf] }
 0x42b   : > { %v2964_v16 = vrot.slane %v3782_v22, %v6203_v6  ;;  %v2968_v32 = vrot.slane %v3782_v22, %v4112_v61  ;;  %v2956_v12 = vrot.slane %v3782_v22, %v4129_v5  ;;  %v2960_v63 = vrot.slane %v3782_v22, %v4100_v55 }
 0x42d   : > { %2559 = vrot.lane.b32.xlu0 %v2516_v2, %s3876_s15  ;;  %v3041_v2 = vcombine.low %v3028_v21, %v3032_v48  ;;  %v2970_v13 = vcombine.low %v2964_v16, %v2968_v32  ;;  %v2969_v50 = vcombine.low %v2956_v12, %v2960_v63  ;;  %v2534_v48 = vld [vmem:[%s6126_s2] sm:$0xf] }
 0x42e   : > { %2569 = vrot.lane.b32.xlu1 %v2521_v20, %s3876_s15  ;;  %v2924_v20 = vrot.slane %v3781_v56, %v4100_v55 }
 0x430   : > { %v2933_v11 = vcombine.low %v2920_v44, %v2924_v20 }
 0x431   : > { %2563 = vrot.lane.b32.xlu0 %v2518_v19, %s3876_s15  ;;  %v2604_v19 = vpop.permute.xlu0 %2603 }
 0x432   : > { %2557 = vrot.lane.b32.xlu1 %v2515_v38, %s3876_s15  ;;  %v2594_v38 = vpop.permute.xlu1 %2593 }
 0x435   : > { %2798 = vperm.xlu0 %3846, %v2795_v35  }
 0x436   : > { %2555 = vrot.lane.b32.xlu1 %v2514_v34, %s3876_s15 }
 0x439   : > { %3153 = vrot.lane.b32.xlu0 %v3150_v54, %s6286_s27 }
 0x43a   : > { %2808 = vperm.xlu1 %3847, %v2805_v47  }
 0x43d   : > { %3081 = vrot.lane.b32.xlu0 %v3078_v40, %s3875_s13 }
 0x43e   : > { %3151 = vrot.lane.b32.xlu1 %v3149_v9, %s6286_s27 }
 0x441   : > { %3117 = vrot.lane.b32.xlu0 %v3114_v37, %s3870_s26 }
 0x442   : > { %3079 = vrot.lane.b32.xlu1 %v3077_v51, %s3875_s13 }
 0x445   : > { %3009 = vrot.lane.b32.xlu0 %v3006_v46, %s3866_s24 }
 0x446   : > { %3115 = vrot.lane.b32.xlu1 %v3113_v52, %s3870_s26  ;;  %s6287_s26 = smov 66  }
 0x449   : > { %3045 = vrot.lane.b32.xlu0 %v3042_v8, %s3874_s16 }
 0x44a   : > { %3007 = vrot.lane.b32.xlu1 %v3005_v7, %s3866_s24 }
 0x44d   : > { %2937 = vrot.lane.b32.xlu0 %v2934_v1, %s6287_s26 }
 0x44e   : > { %3043 = vrot.lane.b32.xlu1 %v3041_v2, %s3874_s16  ;;  %v3780_v2 = vld [vmem:[%s6130_s6 + $0x1] ss:$8 sm:$0xf] }
 0x44f   : > { %v2892_v44 = vrot.slane %v3780_v2, %v6203_v6  ;;  %v2896_v20 = vrot.slane %v3780_v2, %v4112_v61 }
 0x451   : > { %2973 = vrot.lane.b32.xlu0 %v2970_v13, %s6288_s12  ;;  %v2884_v13 = vrot.slane %v3780_v2, %v4129_v5  ;;  %v2898_v12 = vcombine.low %v2892_v44, %v2896_v20 }
 0x452   : > { %2935 = vrot.lane.b32.xlu1 %v2933_v11, %s6287_s26  ;;  %v2888_v11 = vrot.slane %v3780_v2, %v4100_v55 }
 0x454   : > { %v2897_v63 = vcombine.low %v2884_v13, %v2888_v11 }
 0x455   : > { %2901 = vrot.lane.b32.xlu0 %v2898_v12, %s6197_s18 }
 0x456   : > { %2971 = vrot.lane.b32.xlu1 %v2969_v50, %s6288_s12 }
 0x457   : > { %v2584_v23 = vpop.permute.xlu0 %2583 }
 0x45a   : > { %2899 = vrot.lane.b32.xlu1 %v2897_v63, %s6197_s18  ;;  %s6311_s18 = smov 119  }
 0x45f   : > { %v2574_v33 = vpop.permute.xlu1 %2573 }
 0x464   : > { %v2592_v4 = vpop.permute.xlu0 %2591 }
 0x465   : > { %v2620_v47 = vsel %vm6292_vm10, %v2592_v4, %v2594_v38  ;;  %vm6300_vm10 = vmmov %vm6293_vm5 }
 0x480   : > { %v2562_v35 = vpop.permute.xlu1 %2561 }
 0x483   : > { %v2600_v15 = vpop.permute.xlu0 %2599 }
 0x484   : > { %v2598_v34 = vpop.permute.xlu1 %2597 }
 0x485   : > { %v2622_v54 = vsel %vm6289_vm7, %v2598_v34, %v2600_v15  ;;  %vm6297_vm7 = vmmov %vm6293_vm5 }
 0x486   : > { %3774 = vmatprep.subr.msk.mxu0 %vm1263_vm2, %v2622_v54 }
 0x487   : > { %v2566_v45 = vpop.permute.xlu0 %2565 }
 0x488   : > { %v2602_v60 = vpop.permute.xlu1 %2601 }
 0x489   : > { %v2623_v17 = vsel %vm6290_vm9, %v2600_v15, %v2602_v60  ;;  %v2624_v29 = vsel %vm6291_vm6, %v2602_v60, %v2604_v19  ;;  %vm6298_vm9 = vmmov %vm6293_vm5 }
 0x48a   : > { %3777 = vmatprep.subr.msk.mxu1 %vm1263_vm2, %v2624_v29  ;;  %vm6299_vm6 = vmmov %vm6293_vm5 }
 0x48b   : > { %3778 = vmatpush1.msk.msra.mxu1 %vm1263_vm2, %v2623_v17  ;;  %v2588_v28 = vpop.permute.xlu0 %2587 }
 0x48c   : > { %v2596_v40 = vpop.permute.xlu1 %2595  ;;  %2748 = vmatprep.subr.mxu1 %v2620_v47 }
 0x48d   : > { %v2621_v25 = vsel %vm6293_vm5, %v2596_v40, %v2598_v34 }
 0x48e   : > { %3775 = vmatpush1.msk.msra.mxu0 %vm1263_vm2, %v2621_v25 }
 0x48f   : > { %v2586_v42 = vpop.permute.xlu0 %2585 }
 0x490   : > { %v2576_v9 = vpop.permute.xlu1 %2575  ;;  %v2617_v41 = vsel %vm6296_vm14, %v2586_v42, %v2588_v28  ;;  %vm6303_vm14 = vmmov %vm6293_vm5 }
 0x493   : > { %v2580_v26 = vpop.permute.xlu0 %2579 }
 0x494   : > { %v2590_v18 = vpop.permute.xlu1 %2589 }
 0x495   : > { %v2618_v3 = vsel %vm6294_vm12, %v2588_v28, %v2590_v18  ;;  %v2619_v37 = vsel %vm6295_vm13, %v2590_v18, %v2592_v4  ;;  %vm6301_vm12 = vmmov %vm6293_vm5 }
 0x496   : > { %2677 = vmatprep.subr.mxu0 %v2618_v3  ;;  %2749 = vmatpush1.msra.mxu1 %v2619_v37  ;;  %vm6302_vm13 = vmmov %vm6293_vm5 }
 0x497   : > { %2678 = vmatpush1.msra.mxu0 %v2617_v41  ;;  %v2568_v14 = vpop.permute.xlu0 %2567 }
 0x498   : > { %v2578_v51 = vpop.permute.xlu1 %2577  ;;  %v2609_v36 = vsel %vm6303_vm14, %v2566_v45, %v2568_v14 }
 0x499   : > { %v2613_v59 = vsel %vm6297_vm7, %v2576_v9, %v2578_v51  ;;  %v2614_v30 = vsel %vm6298_vm9, %v2578_v51, %v2580_v26  ;;  %vm6304_vm7 = vmmov %vm6293_vm5  ;;  %vm2641_vm9 = vcmask 293888  }
 0x49a   : > { %2679 = vmatprep.subr.mxu0 %v2614_v30 }
 0x49b   : > { %2680 = vmatpush1.msra.mxu0 %v2613_v59  ;;  %v2572_v57 = vpop.permute.xlu0 %2571 }
 0x49c   : > { %v2582_v46 = vpop.permute.xlu1 %2581  ;;  %v2612_v39 = vsel %vm6293_vm5, %v2572_v57, %v2574_v33 }
 0x49d   : > { %v2615_v27 = vsel %vm6299_vm6, %v2580_v26, %v2582_v46  ;;  %v2616_v31 = vsel %vm6300_vm10, %v2582_v46, %v2584_v23  ;;  %vm6305_vm6 = vmmov %vm6293_vm5 }
 0x49e   : > { %2750 = vmatprep.subr.mxu1 %v2616_v31  ;;  %vm6306_vm10 = vmmov %vm6293_vm5 }
 0x49f   : > { %2751 = vmatpush1.msra.mxu1 %v2615_v27  ;;  %v2560_v52 = vpop.permute.xlu0 %2559 }
 0x4a0   : > { %v2570_v62 = vpop.permute.xlu1 %2569  ;;  %2752 = vmatprep.subr.mxu1 %v2612_v39  ;;  %v2607_v22 = vsel %vm6305_vm6, %v2560_v52, %v2562_v35  ;;  %vm6315_vm6 = vcmask 605184  }
 0x4a1   : > { %v2611_v56 = vsel %vm6301_vm12, %v2570_v62, %v2572_v57  ;;  %v2610_v8 = vsel %vm6302_vm13, %v2568_v14, %v2570_v62  ;;  %vm6307_vm12 = vcmask 592896   ;;  %vm6308_vm13 = vcmask 596992  }
 0x4a2   : > { %2681 = vmatprep.subr.mxu0 %v2610_v8  ;;  %2753 = vmatpush1.msra.mxu1 %v2611_v56  ;;  %vm6309_vm14 = vmmov %vm6308_vm13 }
 0x4a3   : > { %2682 = vmatpush1.msra.mxu0 %v2609_v36  ;;  %v2564_v10 = vpop.permute.xlu0 %2563 }
 0x4a4   : > { %v2558_v7 = vpop.permute.xlu1 %2557  ;;  %v2608_v21 = vsel %vm6304_vm7, %v2562_v35, %v2564_v10  ;;  %v2843_v35 = vld [vmem:[%s6130_s6] ss:$8 sm:$0xf]  ;;  %vm6314_vm7 = vcmask 662528  }
 0x4a5   : > { %2754 = vmatprep.subr.mxu1 %v2608_v21  ;;  %v2606_v1 = vsel %vm6306_vm10, %v2558_v7, %v2560_v52  ;;  %v2856_v60 = vrot.slane %v2843_v35, %v6203_v6  ;;  %v2860_v17 = vrot.slane %v2843_v35, %v4112_v61  ;;  %v2848_v9 = vrot.slane %v2843_v35, %v4129_v5 }
 0x4a6   : > { %2683 = vmatprep.subr.mxu0 %v2606_v1  ;;  %2755 = vmatpush1.msra.mxu1 %v2607_v22  ;;  %v2852_v37 = vrot.slane %v2843_v35, %v4100_v55  ;;  %vm6316_vm10 = vcmask 670720  }
 0x4a7   : > { %3779 = vmatmul.mubr.msk.f32.vlgmr.msra.gmra.mxu1 %vm2641_vm9, %v2534_v48  ;;  %v2862_v3 = vcombine.low %v2856_v60, %v2860_v17 }
 0x4a8   : > { %v2556_v16 = vpop.permute.xlu1 %2555  ;;  %3636 = vmatprep.mubr.f32.mxu1 %v6250_v49  ;;  %v2861_v61 = vcombine.low %v2848_v9, %v2852_v37 }
 0x4a9   : > { %v2605_v32 = vsel %vm6293_vm5, %v2556_v16, %v2558_v7  ;;  %vm6318_vm5 = vmmov %vm6308_vm13 }
 0x4aa   : > { %2684 = vmatpush1.msra.mxu0 %v2605_v32 }
 0x4ab   : > { %3776 = vmatmul.mubr.msk.f32.vlgmr.msra.gmra.mxu0 %vm2641_vm9, %v2534_v48 }
 0x4ac   : > { %3565 = vmatprep.mubr.f32.mxu0 %v6250_v49 }
 0x4b0   : > { %v2799_v50 = vpop.permute.xlu0 %2798 }
 0x4b4   : > { %v5732_v6 = vpop.permute.xlu0 %3153 }
 0x4b5   : > { %v2809_v19 = vpop.permute.xlu1 %2808  ;;  %v3156_v16 = vrot.slane %v5732_v6, 4 }
 0x4b8   : > { %v5736_v5 = vpop.permute.xlu0 %3081 }
 0x4b9   : > { %v5734_v14 = vpop.permute.xlu1 %3151  ;;  %v3084_v13 = vrot.slane %v5736_v5, 4 }
 0x4bc   : > { %v5740_v59 = vpop.permute.xlu0 %3117 }
 0x4bd   : > { %v5738_v51 = vpop.permute.xlu1 %3079 }
 0x4be   : > { %v3083_v12 = vrot.slane %v5738_v51, 4 }
 0x4c0   : > { %v5742_v55 = vpop.permute.xlu0 %3009 }
 0x4c1   : > { %v3116_v30 = vpop.permute.xlu1 %3115  ;;  %v3012_v32 = vrot.slane %v5742_v55, 4 }
 0x4c4   : > { %v5744_v46 = vpop.permute.xlu0 %3045 }
 0x4c5   : > { %v3008_v57 = vpop.permute.xlu1 %3007 }
 0x4c6   : > { %v3011_v17 = vrot.slane %v3008_v57, 4 }
 0x4c8   : > { %v5748_v31 = vpop.permute.xlu0 %2937 }
 0x4c9   : > { %v5746_v27 = vpop.permute.xlu1 %3043  ;;  %v2940_v11 = vrot.slane %v5748_v31, 4 }
 0x4cc   : > { %v5752_v39 = vpop.permute.xlu0 %2973 }
 0x4cd   : > { %v5750_v52 = vpop.permute.xlu1 %2935 }
 0x4d0   : > { %v5756_v56 = vpop.permute.xlu0 %2901 }
 0x4d1   : > { %v5754_v62 = vpop.permute.xlu1 %2971 }
 0x4d5   : > { %v5758_v8 = vpop.permute.xlu1 %2899 }
 0x567   : > { %v2790_v49 = vpop.f32.mrf.mxu1 }
 0x568   : > { %v2803_v38 = vmul.f32 %v2799_v50, %v2790_v49  ;;  %v3119_v49 = vrot.slane %v3116_v30, 4 }
 0x569   : > { %v2792_v23 = vpop.f32.mrf.mxu1 }
 0x56a   : > { %v2813_v33 = vadd.f32 %v2809_v19, %v2803_v38  ;;  %v2804_v4 = vmul.f32 %v2799_v50, %v2792_v23  ;;  %v3121_v38 = vsel %vm6314_vm7, %v3119_v49, %v3116_v30 }
 0x56b   : > { %v2719_v15 = vpop.f32.mrf.mxu0 }
 0x56c   : > { %v2814_v34 = vadd.f32 %v2809_v19, %v2804_v4  ;;  %v2801_v54 = vmul.f32 %v2799_v50, %v2719_v15  ;;  %v2817_v29 = vmax.f32 %v2813_v33, 0.0  ;;  %v3120_v33 = vrot.slane %v5740_v59, 4 }
 0x56d   : > { %v2721_v45 = vpop.f32.mrf.mxu0  ;;  %v3047_v4 = vrot.slane %v5746_v27, 4  ;;  %v3155_v15 = vrot.slane %v5734_v14, 4 }
 0x56e   : > { %v2818_v28 = vmax.f32 %v2814_v34, 0.0  ;;  %v2811_v47 = vadd.f32 %v2809_v19, %v2801_v54  ;;  %v2802_v40 = vmul.f32 %v2799_v50, %v2721_v45  ;;  %v3122_v60 = vsel %vm1263_vm2, %v3119_v49, %v3120_v33 }
 0x56f   : > { %v3049_v34 = vsel %vm6315_vm6, %v3047_v4, %v5746_v27  ;;  %v3157_v54 = vsel %vm6316_vm10, %v3155_v15, %v5734_v14  ;;  %v2976_v27 = vrot.slane %v5752_v39, 4 }
 0x570   : > { %v2824_v25 = vcombine.low %v2817_v29, %v2818_v28  ;;  %v2812_v42 = vadd.f32 %v2809_v19, %v2802_v40  ;;  %v2815_v26 = vmax.f32 %v2811_v47, 0.0  ;;  %v3013_v28 = vsel %vm6318_vm5, %v3011_v17, %v3008_v57 }
 0x572   : > { %v2816_v18 = vmax.f32 %v2812_v42, 0.0  ;;  %2827 = vrot.lane.b32.xlu0 %v2824_v25, %s3866_s24  ;;  %v3014_v25 = vsel %vm1263_vm2, %v3011_v17, %v3012_v32  ;;  %v2975_v42 = vrot.slane %v5754_v62, 4 }
 0x574   : > { %v2823_v41 = vcombine.low %v2815_v26, %v2816_v18  ;;  %v3048_v26 = vrot.slane %v5744_v46, 4 }
 0x576   : > { %2825 = vrot.lane.b32.xlu1 %v2823_v41, %s3866_s24  ;;  %2865 = vrot.lane.b32.xlu0 %v2862_v3, %s3872_s17  ;;  %s6310_s24 = smov 110   ;;  %v2939_v41 = vrot.slane %v5750_v52, 4 }
 0x578   : > { %v2942_v30 = vsel %vm1263_vm2, %v2939_v41, %v2940_v11 }
 0x57a   : > { %2863 = vrot.lane.b32.xlu1 %v2861_v61, %s3872_s17 }
 0x5e4   : > { %v2828_v36 = vpop.permute.xlu0 %2827 }
 0x5e5   : > { %v2830_v10 = vrot.slane %v2828_v36, 4 }
 0x5e7   : > { %2839 = vst.msk [vmem:[#allocation2 + $0x10] sm:$0xf] %vm6307_vm12, %v2830_v10  ;;  %vm6319_vm12 = vmmov %vm6314_vm7  ;;  %vm6323_vm7 = vcmask 531456  }
 0x5e8   : > { %v2826_v7 = vpop.permute.xlu1 %2825  ;;  %v3123_v47 = vsel %vm6319_vm12, %v3122_v60, %v5740_v59  ;;  %vm6326_vm12 = vcmask 605184  }
 0x5e9   : > { %v2829_v21 = vrot.slane %v2826_v7, 4 }
 0x5eb   : > { %v2831_v48 = vsel %vm6308_vm13, %v2829_v21, %v2826_v7  ;;  %v2832_v22 = vsel %vm1263_vm2, %v2829_v21, %v2830_v10  ;;  %vm6320_vm13 = vcmask 588800  }
 0x5ec   : > { %v5764_v1 = vsel %vm6309_vm14, %v2832_v22, %v2828_v36  ;;  %2837 = vst.msk [vmem:[#allocation2] sm:$0xff] %vm5299_vm15, %v2831_v48  ;;  %vm6312_vm15 = vcmask 654336   ;;  %v2977_v18 = vsel %vm6320_vm13, %v2975_v42, %v5754_v62  ;;  %vm6321_vm14 = vmmov %vm6318_vm5  ;;  %v3086_v48 = vsel %vm1263_vm2, %v3083_v12, %v3084_v13 }
 0x5ed   : > { %2838 = vst [vmem:[#allocation2 + $0x8] sm:$0xff] %v5764_v1  ;;  %v3085_v19 = vsel %vm6312_vm15, %v3083_v12, %v5738_v51  ;;  %v5825_v9 = vmul.f32 %v3123_v47, %v5764_v1  ;;  %v3015_v3 = vsel %vm6321_vm14, %v3014_v25, %v5742_v55  ;;  %vm6322_vm15 = vcmask 539648   ;;  %vm6327_vm14 = vmmov %vm6323_vm7 }
 0x5ee   : > { %v5771_v2 = vld [vmem:[#allocation2 + $0x10] sm:$0xf]  ;;  %v5839_v61 = vmul.f32 %v3015_v3, %v5764_v1  ;;  %v2941_v51 = vsel %vm6322_vm15, %v2939_v41, %v5750_v52  ;;  %v2903_v55 = vrot.slane %v5758_v8, 4  ;;  %v3158_v52 = vsel %vm1263_vm2, %v3155_v15, %v3156_v16  ;;  %vm6324_vm6 = vmmov %vm6322_vm15 }
 0x5ef   : > { %v3165_v44 = vmul.f32 %v3156_v16, %v5771_v2  ;;  %v3021_v20 = vmul.f32 %v3012_v32, %v5771_v2  ;;  %v3093_v43 = vmul.f32 %v3084_v13, %v5771_v2  ;;  %v2949_v50 = vmul.f32 %v2940_v11, %v5771_v2 }
 0x5f0   : > { %v3057_v14 = vmul.f32 %v3048_v26, %v5771_v2  ;;  %v2905_v62 = vsel %vm6323_vm7, %v2903_v55, %v5758_v8  ;;  %v2943_v36 = vsel %vm6324_vm6, %v2942_v30, %v5748_v31  ;;  %v2985_v21 = vmul.f32 %v2976_v27, %v5771_v2 }
 0x5f1   : > { %3357 = vrot.lane.b32.xlu0 %v3165_v44, %s6310_s24  ;;  %3259 = vrot.lane.b32.xlu1 %v3021_v20, %s6311_s18  ;;  %v2948_v7 = vmul.f32 %v2943_v36, %v5764_v1  ;;  %v3159_v8 = vsel %vm6316_vm10, %v3158_v52, %v5732_v6  ;;  %vm6325_vm5 = vcmask 654336   ;;  %v3129_v6 = vmul.f32 %v3120_v33, %v5771_v2 }
 0x5f2   : > { %v3275_v57 = vcombine.low %v3057_v14, %v3057_v14  ;;  %v3164_v31 = vmul.f32 %v3159_v8, %v5764_v1  ;;  %v3226_v22 = vcombine.low %v2985_v21, %v2985_v21  ;;  %v3087_v16 = vsel %vm6325_vm5, %v3086_v48, %v5736_v5 }
 0x5f3   : > { %v5783_v63 = vld [vmem:[#allocation2] sm:$0xff]  ;;  %v3092_v32 = vmul.f32 %v3087_v16, %v5764_v1  ;;  %v3050_v20 = vsel %vm1263_vm2, %v3047_v4, %v3048_v26  ;;  %v3324_v13 = vcombine.low %v3129_v6, %v3129_v6  ;;  %v2904_v12 = vrot.slane %v5756_v56, 4 }
 0x5f4   : > { %v5792_v23 = vmul.f32 %v3085_v19, %v5783_v63  ;;  %v5797_v35 = vmul.f32 %v3121_v38, %v5783_v63  ;;  %v5809_v45 = vmul.f32 %v3049_v34, %v5783_v63  ;;  %v3163_v29 = vmul.f32 %v3157_v54, %v5783_v63 }
 0x5f5   : > { %3308 = vrot.lane.b32.xlu0 %v3093_v43, %s3891_s22  ;;  %3210 = vrot.lane.b32.xlu1 %v2949_v50, %s6313_s25  ;;  %v5820_v40 = vmul.f32 %v3013_v28, %v5783_v63  ;;  %v2983_v37 = vmul.f32 %v2977_v18, %v5783_v63  ;;  %v2947_v59 = vmul.f32 %v2941_v51, %v5783_v63  ;;  %vm6328_vm15 = vcmask 900096  }
 0x5f6   : > { %v5859_v10 = vmul.f32 %v2905_v62, %v5783_v63  ;;  %v3347_v44 = vcombine.high %v3163_v29, %v3163_v29  ;;  %v3298_v11 = vcombine.high %v5792_v23, %v5792_v23  ;;  %v3051_v5 = vsel %vm6326_vm12, %v3050_v20, %v5744_v46  ;;  %vm6329_vm7 = vmmov %vm6328_vm15 }
 0x5f7   : > { %v2978_v43 = vsel %vm1263_vm2, %v2975_v42, %v2976_v27  ;;  %v3056_v50 = vmul.f32 %v3051_v5, %v5764_v1  ;;  %v3322_v49 = vcombine.low %v5797_v35, %v5797_v35  ;;  %v2906_v46 = vsel %vm1263_vm2, %v2903_v55, %v2904_v12  ;;  %v5928_v42 = vpop.permute.xlu0 %2865  ;;  %vm6330_vm6 = vmmov %vm6329_vm7 }
 0x5f8   : > { %v2979_v19 = vsel %vm6320_vm13, %v2978_v43, %v5752_v39  ;;  %v2907_v33 = vsel %vm6327_vm14, %v2906_v46, %v5756_v56  ;;  %v3249_v39 = vcombine.high %v5820_v40, %v5820_v40  ;;  %v3348_v15 = vcombine.high %v3164_v31, %v3164_v31 }
 0x5f9   : > { %3300 = vrot.lane.b32.xlu0 %v5792_v23, %s3891_s22  ;;  %3327 = vrot.lane.b32.xlu1 %v5797_v35, %s3892_s19  ;;  %v2984_v38 = vmul.f32 %v2979_v19, %v5764_v1  ;;  %v3273_v23 = vcombine.low %v5809_v45, %v5809_v45  ;;  %v2912_v4 = vmul.f32 %v2907_v33, %v5764_v1  ;;  %vm6331_vm10 = vcmask 523264  }
 0x5fa   : > { %v3224_v35 = vcombine.low %v2983_v37, %v2983_v37  ;;  %v3200_v34 = vcombine.high %v2947_v59, %v2947_v59  ;;  %v3299_v54 = vcombine.high %v3092_v32, %v3092_v32  ;;  %v3323_v56 = vcombine.low %v5825_v9, %v5825_v9  ;;  %vm6332_vm5 = vmmov %vm6331_vm10 }
 0x5fb   : > { %v3250_v60 = vcombine.high %v5839_v61, %v5839_v61  ;;  %v3225_v17 = vcombine.low %v2984_v38, %v2984_v38  ;;  %v3176_v28 = vcombine.low %v2912_v4, %v2912_v4  ;;  %v2913_v47 = vmul.f32 %v2904_v12, %v5771_v2 }
 0x5fc   : > { %vm6333_vm12 = vcmask 1039360  }
 0x5fd   : > { %3278 = vrot.lane.b32.xlu0 %v5809_v45, %s6317_s20  ;;  %3349 = vrot.lane.b32.xlu1 %v3163_v29, %s6310_s24  ;;  %v3274_v45 = vcombine.low %v3056_v50, %v3056_v50  ;;  %v3201_v29 = vcombine.high %v2948_v7, %v2948_v7  ;;  %v3177_v25 = vcombine.low %v2913_v47, %v2913_v47  ;;  %vm6334_vm13 = vmmov %vm6333_vm12 }
 0x5fe   : > { %vm6335_vm14 = vmmov %vm6333_vm12 }
 0x601   : > { %3251 = vrot.lane.b32.xlu0 %v5820_v40, %s6311_s18  ;;  %3331 = vrot.lane.b32.xlu1 %v5825_v9, %s3892_s19  ;;  %v3175_v40 = vcombine.low %v5859_v10, %v5859_v10  ;;  %v5930_v9 = vpop.permute.xlu1 %2863 }
 0x605   : > { %3229 = vrot.lane.b32.xlu0 %v2983_v37, %s3884_s21  ;;  %3255 = vrot.lane.b32.xlu1 %v5839_v61, %s6311_s18 }
 0x609   : > { %3202 = vrot.lane.b32.xlu0 %v2947_v59, %s6313_s25  ;;  %3284 = vrot.lane.b32.xlu1 %v3275_v57, %s6317_s20 }
 0x60d   : > { %3180 = vrot.lane.b32.xlu0 %v5859_v10, %s3876_s15  ;;  %3206 = vrot.lane.b32.xlu1 %v2948_v7, %s6313_s25 }
 0x611   : > { %3353 = vrot.lane.b32.xlu0 %v3164_v31, %s6310_s24  ;;  %3235 = vrot.lane.b32.xlu1 %v3226_v22, %s3884_s21 }
 0x615   : > { %3304 = vrot.lane.b32.xlu0 %v3092_v32, %s3891_s22  ;;  %3351 = vrot.lane.b32.xlu1 %v3347_v44, %s6310_s24 }
 0x619   : > { %3333 = vrot.lane.b32.xlu0 %v3324_v13, %s3892_s19  ;;  %3302 = vrot.lane.b32.xlu1 %v3298_v11, %s3891_s22 }
 0x61d   : > { %3282 = vrot.lane.b32.xlu0 %v3056_v50, %s6317_s20  ;;  %3325 = vrot.lane.b32.xlu1 %v3322_v49, %s3892_s19 }
 0x621   : > { %3233 = vrot.lane.b32.xlu0 %v2984_v38, %s3884_s21  ;;  %3276 = vrot.lane.b32.xlu1 %v3273_v23, %s6317_s20 }
 0x625   : > { %3184 = vrot.lane.b32.xlu0 %v2912_v4, %s3876_s15  ;;  %3227 = vrot.lane.b32.xlu1 %v3224_v35, %s3884_s21 }
 0x629   : > { %3253 = vrot.lane.b32.xlu0 %v3249_v39, %s6311_s18  ;;  %3355 = vrot.lane.b32.xlu1 %v3348_v15, %s6310_s24 }
 0x62d   : > { %3204 = vrot.lane.b32.xlu0 %v3200_v34, %s6313_s25  ;;  %3306 = vrot.lane.b32.xlu1 %v3299_v54, %s3891_s22  ;;  %v2868_v34 = vrot.slane %v5928_v42, 4  ;;  %v2867_v54 = vrot.slane %v5930_v9, 4 }
 0x631   : > { %3329 = vrot.lane.b32.xlu0 %v3323_v56, %s3892_s19  ;;  %3280 = vrot.lane.b32.xlu1 %v3274_v45, %s6317_s20 }
 0x635   : > { %3257 = vrot.lane.b32.xlu0 %v3250_v60, %s6311_s18  ;;  %3231 = vrot.lane.b32.xlu1 %v3225_v17, %s3884_s21  ;;  %s6359_s21 = sshll.u32 %s6361_s10, 3 }
 0x636   : > { %s332_s13 = scalar_lea.vmem %s6133_s9, %s6359_s21 }
 0x639   : > { %3208 = vrot.lane.b32.xlu0 %v3201_v29, %s6313_s25  ;;  %3182 = vrot.lane.b32.xlu1 %v3176_v28, %s3876_s15  ;;  %v2869_v29 = vsel %vm6331_vm10, %v2867_v54, %v5930_v9 }
 0x63a   : > { %v2875_v9 = vmul.f32 %v2869_v29, %v5783_v63 }
 0x63d   : > { %3178 = vrot.lane.b32.xlu0 %v3175_v40, %s3876_s15  ;;  %3186 = vrot.lane.b32.xlu1 %v3177_v25, %s3876_s15  ;;  %v2870_v25 = vsel %vm1263_vm2, %v2867_v54, %v2868_v34 }
 0x663   : > { %v5932_v26 = vpop.permute.xlu0 %3357  ;;  %v5934_v18 = vpop.permute.xlu1 %3259 }
 0x664   : > { %3452 = vrot.lane.b32.xlu0 %v5932_v26, %s3872_s17 }
 0x667   : > { %v5938_v3 = vpop.permute.xlu0 %3308  ;;  %v5940_v37 = vpop.permute.xlu1 %3210 }
 0x66b   : > { %v3301_v41 = vpop.permute.xlu0 %3300  ;;  %v3328_v61 = vpop.permute.xlu1 %3327 }
 0x66f   : > { %v3279_v14 = vpop.permute.xlu0 %3278  ;;  %v3350_v51 = vpop.permute.xlu1 %3349 }
 0x673   : > { %v3252_v59 = vpop.permute.xlu0 %3251  ;;  %v5942_v30 = vpop.permute.xlu1 %3331 }
 0x677   : > { %v5944_v55 = vpop.permute.xlu0 %3229  ;;  %v5946_v57 = vpop.permute.xlu1 %3255 }
 0x67b   : > { %v3203_v27 = vpop.permute.xlu0 %3202  ;;  %v3285_v62 = vpop.permute.xlu1 %3284 }
 0x67c   : > { %v3377_v52 = vsel %vm1263_vm2, %v5934_v18, %v3285_v62 }
 0x67d   : > { %3432 = vrot.lane.b32.xlu0 %v3377_v52, %s3872_s17 }
 0x67f   : > { %v5951_v36 = vpop.permute.xlu0 %3180  ;;  %v5953_v10 = vpop.permute.xlu1 %3206 }
 0x683   : > { %v3354_v7 = vpop.permute.xlu0 %3353  ;;  %v5955_v21 = vpop.permute.xlu1 %3235 }
 0x684   : > { %v3372_v6 = vsel %vm1263_vm2, %v5940_v37, %v5955_v21 }
 0x687   : > { %v5957_v8 = vpop.permute.xlu0 %3304  ;;  %v3352_v48 = vpop.permute.xlu1 %3351 }
 0x688   : > { %v3360_v13 = vsel %vm6328_vm15, %v3352_v48, %v3354_v7  ;;  %v3359_v43 = vsel %vm6329_vm7, %v3350_v51, %v3352_v48  ;;  %v2871_v48 = vsel %vm6332_vm5, %v2870_v25, %v5928_v42 }
 0x68b   : > { %v3334_v31 = vpop.permute.xlu0 %3333  ;;  %v3303_v22 = vpop.permute.xlu1 %3302 }
 0x68c   : > { %v3382_v16 = vsel %vm1263_vm2, %v5938_v3, %v3334_v31  ;;  %v3310_v35 = vsel %vm880_vm11, %v3301_v41, %v3303_v22 }
 0x68d   : > { %3442 = vrot.lane.b32.xlu1 %v3382_v16, %s3872_s17 }
 0x68f   : > { %v3283_v32 = vpop.permute.xlu0 %3282  ;;  %v3326_v44 = vpop.permute.xlu1 %3325 }
 0x690   : > { %v3335_v33 = vsel %vm920_vm1, %v3326_v44, %v3328_v61 }
 0x691   : > { %3422 = vrot.lane.b32.xlu1 %v3372_v6, %s3872_s17  ;;  %v3378_v15 = vsel %vm1263_vm2, %v3310_v35, %v3335_v33  ;;  %v3168_v6 = vcombine.high %v2875_v9, %v2875_v9 }
 0x693   : > { %v5966_v20 = vpop.permute.xlu0 %3233  ;;  %v3277_v11 = vpop.permute.xlu1 %3276 }
 0x694   : > { %v3286_v49 = vsel %vm840_vm4, %v3277_v11, %v3279_v14 }
 0x695   : > { %3446 = vrot.lane.b32.xlu1 %v3360_v13, %s3872_s17 }
 0x697   : > { %v5970_v5 = vpop.permute.xlu0 %3184  ;;  %v3228_v12 = vpop.permute.xlu1 %3227 }
 0x698   : > { %v3237_v60 = vsel %vm760_vm3, %v3228_v12, %v5944_v55 }
 0x699   : > { %3444 = vrot.lane.b32.xlu1 %v3359_v43, %s3872_s17 }
 0x69b   : > { %v3254_v50 = vpop.permute.xlu0 %3253  ;;  %v3356_v19 = vpop.permute.xlu1 %3355 }
 0x69c   : > { %v3261_v46 = vsel %vm800_vm0, %v3252_v59, %v3254_v50  ;;  %v3361_v38 = vsel %vm6330_vm6, %v3354_v7, %v3356_v19  ;;  %v3262_v28 = vsel %vm800_vm0, %v3254_v50, %v5946_v57 }
 0x69d   : > { %v5978_v23 = vsel %vm1263_vm2, %v3261_v46, %v3286_v49  ;;  %3448 = vrot.lane.b32.xlu0 %v3361_v38, %s3872_s17 }
 0x69f   : > { %v3205_v4 = vpop.permute.xlu0 %3204  ;;  %v5983_v39 = vpop.permute.xlu1 %3306 }
 0x6a0   : > { %v3212_v56 = vsel %vm720_vm8, %v3203_v27, %v3205_v4  ;;  %v3311_v27 = vsel %vm880_vm11, %v3303_v22, %v5957_v8  ;;  %v3313_v63 = vsel %vm880_vm11, %v5983_v39, %v5938_v3 }
 0x6a1   : > { %3434 = vrot.lane.b32.xlu0 %v3378_v15, %s3872_s17  ;;  %v3368_v40 = vsel %vm1263_vm2, %v3212_v56, %v3237_v60 }
 0x6a3   : > { %v3330_v45 = vpop.permute.xlu0 %3329  ;;  %v3281_v17 = vpop.permute.xlu1 %3280 }
 0x6a4   : > { %v3287_v47 = vsel %vm840_vm4, %v3279_v14, %v3281_v17  ;;  %v3336_v41 = vsel %vm920_vm1, %v3328_v61, %v3330_v45  ;;  %v3289_v14 = vsel %vm840_vm4, %v3283_v32, %v3285_v62  ;;  %v2876_v62 = vmul.f32 %v2871_v48, %v5764_v1 }
 0x6a5   : > { %3414 = vrot.lane.b32.xlu0 %v3368_v40, %s3872_s17  ;;  %v3374_v51 = vsel %vm1263_vm2, %v3262_v28, %v3287_v47  ;;  %v3379_v61 = vsel %vm1263_vm2, %v3311_v27, %v3336_v41  ;;  %v3288_v1 = vsel %vm840_vm4, %v3281_v17, %v3283_v32  ;;  %vm6337_vm4 = vmmov %vm6333_vm12 }
 0x6a6   : > { %v3169_v49 = vcombine.high %v2876_v62, %v2876_v62 }
 0x6a7   : > { %v3258_v59 = vpop.permute.xlu0 %3257  ;;  %v3232_v52 = vpop.permute.xlu1 %3231 }
 0x6a8   : > { %v3264_v7 = vsel %vm800_vm0, %v3258_v59, %v5934_v18  ;;  %v3338_v18 = vsel %vm920_vm1, %v5942_v30, %v3334_v31  ;;  %v3263_v43 = vsel %vm800_vm0, %v5946_v57, %v3258_v59  ;;  %v3238_v57 = vsel %vm760_vm3, %v5944_v55, %v3232_v52  ;;  %vm6336_vm0 = vmmov %vm6330_vm6 }
 0x6a9   : > { %v3376_v16 = vsel %vm1263_vm2, %v3264_v7, %v3289_v14  ;;  %3436 = vrot.lane.b32.xlu0 %v3379_v61, %s3872_s17  ;;  %v3381_v11 = vsel %vm1263_vm2, %v3313_v63, %v3338_v18  ;;  %v3375_v38 = vsel %vm1263_vm2, %v3263_v43, %v3288_v1  ;;  %v3362_v15 = vsel %vm6336_vm0, %v3356_v19, %v5932_v26 }
 0x6aa   : > { %v3240_v55 = vsel %vm760_vm3, %v5966_v20, %v5955_v21  ;;  %v3337_v26 = vsel %vm920_vm1, %v3330_v45, %v5942_v30 }
 0x6ab   : > { %v3209_v22 = vpop.permute.xlu0 %3208  ;;  %v3183_v44 = vpop.permute.xlu1 %3182 }
 0x6ac   : > { %v3189_v13 = vsel %vm6333_vm12, %v5951_v36, %v3183_v44  ;;  %v3215_v54 = vsel %vm720_vm8, %v3209_v22, %v5940_v37  ;;  %v3312_v37 = vsel %vm880_vm11, %v5957_v8, %v5983_v39  ;;  %v3214_v8 = vsel %vm720_vm8, %v5953_v10, %v3209_v22  ;;  %vm6339_vm11 = vmmov %vm6332_vm5 }
 0x6ad   : > { %3440 = vrot.lane.b32.xlu0 %v3381_v11, %s3872_s17  ;;  %v3364_v3 = vsel %vm1263_vm2, %v3168_v6, %v3189_v13  ;;  %v3371_v56 = vsel %vm1263_vm2, %v3215_v54, %v3240_v55  ;;  %v3380_v21 = vsel %vm1263_vm2, %v3312_v37, %v3337_v26  ;;  %v3894_v54 = vmov 1983009808  }
 0x6ae   : > { %v3654_v55 = vunpack.c.l.s4 %v3894_v54 }
 0x6af   : > { %v3179_v12 = vpop.permute.xlu0 %3178  ;;  %v3187_v50 = vpop.permute.xlu1 %3186 }
 0x6b0   : > { %v3188_v31 = vsel %vm6334_vm13, %v3179_v12, %v5951_v36  ;;  %v3191_v46 = vsel %vm6335_vm14, %v5970_v5, %v3187_v50  ;;  %v3213_v36 = vsel %vm720_vm8, %v3205_v4, %v5953_v10  ;;  %v3190_v4 = vsel %vm6337_vm4, %v3183_v44, %v5970_v5  ;;  %vm6338_vm8 = vmmov %vm6332_vm5 }
 0x6b1   : > { %v3363_v33 = vsel %vm1263_vm2, %v2875_v9, %v3188_v31  ;;  %3428 = vrot.lane.b32.xlu0 %v3375_v38, %s3872_s17  ;;  %v3366_v35 = vsel %vm1263_vm2, %v3169_v49, %v3191_v46  ;;  %v3369_v32 = vsel %vm1263_vm2, %v3213_v36, %v3238_v57  ;;  %v3365_v19 = vsel %vm1263_vm2, %v2876_v62, %v3190_v4  ;;  %v3383_v38 = vld [vmem:[%s6127_s3] sm:$0xf] }
 0x6b2   : > { %3410 = vrot.lane.b32.xlu1 %v3366_v35, %s3872_s17  ;;  %v2877_v5 = vmul.f32 %v2868_v34, %v5771_v2  ;;  %v3655_v37 = vunpack.c.0.s8 %v3654_v55 }
 0x6b4   : > { %v3367_v30 = vsel %vm1263_vm2, %v2877_v5, %v3187_v50 }
 0x6b5   : > { %3416 = vrot.lane.b32.xlu0 %v3369_v32, %s3872_s17 }
 0x6b6   : > { %3450 = vrot.lane.b32.xlu1 %v3362_v15, %s3872_s17 }
 0x6b9   : > { %3420 = vrot.lane.b32.xlu0 %v3371_v56, %s3872_s17 }
 0x6ba   : > { %3424 = vrot.lane.b32.xlu1 %v5978_v23, %s3872_s17  ;;  %v3239_v23 = vsel %vm760_vm3, %v3232_v52, %v5966_v20  ;;  %vm6340_vm3 = vmmov %vm6332_vm5 }
 0x6bb   : > { %v3370_v39 = vsel %vm1263_vm2, %v3214_v8, %v3239_v23  ;;  %vm6341_vm1 = vmmov %vm6340_vm3  ;;  %v6358_v8 = vld [vmem:[#allocation3_spill] sm:$0xff] }
 0x6bc   : > { %vm6342_vm15 = vmmov %vm6341_vm1  ;;  %v3658_v23 = vsub.s32 %v3655_v37, %v6358_v8 }
 0x6bd   : > { %3408 = vrot.lane.b32.xlu0 %v3365_v19, %s3872_s17  ;;  %vm6343_vm7 = vmmov %vm6341_vm1 }
 0x6be   : > { %3438 = vrot.lane.b32.xlu1 %v3380_v21, %s3872_s17  ;;  %vm6344_vm6 = vmmov %vm6341_vm1 }
 0x6bf   : > { %vm6345_vm10 = vmmov %vm6341_vm1 }
 0x6c0   : > { %vm6346_vm5 = vmmov %vm6341_vm1 }
 0x6c1   : > { %3412 = vrot.lane.b32.xlu0 %v3367_v30, %s3872_s17  ;;  %vm6348_vm12 = vmmov %vm6341_vm1 }
 0x6c2   : > { %3426 = vrot.lane.b32.xlu1 %v3374_v51, %s3872_s17  ;;  %vm6349_vm13 = vmmov %vm6341_vm1 }
 0x6c3   : > { %vm6350_vm14 = vmmov %vm6341_vm1 }
 0x6c4   : > { %vm6351_vm0 = vmmov %vm6341_vm1 }
 0x6c5   : > { %vm6352_vm4 = vmmov %vm6351_vm0 }
 0x6c6   : > { %3430 = vrot.lane.b32.xlu1 %v3376_v16, %s3872_s17 }
 0x6ca   : > { %3418 = vrot.lane.b32.xlu1 %v3370_v39, %s3872_s17 }
 0x6ce   : > { %3406 = vrot.lane.b32.xlu1 %v3364_v3, %s3872_s17 }
 0x6d2   : > { %3404 = vrot.lane.b32.xlu1 %v3363_v33, %s3872_s17 }
 0x6d6   : > { %v3453_v34 = vpop.permute.xlu0 %3452 }
 0x6ef   : > { %v3433_v60 = vpop.permute.xlu0 %3432 }
 0x6ff   : > { %v3443_v2 = vpop.permute.xlu1 %3442 }
 0x703   : > { %v3423_v42 = vpop.permute.xlu1 %3422 }
 0x707   : > { %v3447_v45 = vpop.permute.xlu1 %3446 }
 0x70b   : > { %v3445_v17 = vpop.permute.xlu1 %3444 }
 0x70c   : > { %v3470_v28 = vsel %vm6339_vm11, %v3445_v17, %v3447_v45  ;;  %vm6354_vm11 = vmmov %vm6351_vm0 }
 0x70f   : > { %v3449_v10 = vpop.permute.xlu0 %3448 }
 0x710   : > { %v3471_v29 = vsel %vm6338_vm8, %v3447_v45, %v3449_v10  ;;  %vm6353_vm8 = vmmov %vm6351_vm0 }
 0x711   : > { %3788 = vmatprep.subr.msk.mxu0 %vm1263_vm2, %v3471_v29 }
 0x712   : > { %3789 = vmatpush1.msk.msra.mxu0 %vm1263_vm2, %v3470_v28 }
 0x713   : > { %v3435_v20 = vpop.permute.xlu0 %3434 }
 0x717   : > { %v3415_v47 = vpop.permute.xlu0 %3414 }
 0x71b   : > { %v3437_v40 = vpop.permute.xlu0 %3436 }
 0x71c   : > { %v3466_v22 = vsel %vm6345_vm10, %v3435_v20, %v3437_v40 }
 0x71f   : > { %v3441_v25 = vpop.permute.xlu0 %3440 }
 0x720   : > { %v3469_v52 = vsel %vm6342_vm15, %v3441_v25, %v3443_v2  ;;  %vm6357_vm15 = vmmov %vm6351_vm0 }
 0x723   : > { %v3429_v41 = vpop.permute.xlu0 %3428 }
 0x724   : > { %v3411_v51 = vpop.permute.xlu1 %3410 }
 0x727   : > { %v3417_v9 = vpop.permute.xlu0 %3416 }
 0x728   : > { %v3451_v59 = vpop.permute.xlu1 %3450  ;;  %v3458_v49 = vsel %vm6353_vm8, %v3415_v47, %v3417_v9 }
 0x729   : > { %v3472_v27 = vsel %vm6340_vm3, %v3449_v10, %v3451_v59  ;;  %v3473_v14 = vsel %vm6341_vm1, %v3451_v59, %v3453_v34  ;;  %vm6355_vm3 = vmmov %vm6351_vm0 }
 0x72a   : > { %3791 = vmatprep.subr.msk.mxu1 %vm1263_vm2, %v3473_v14 }
 0x72b   : > { %3792 = vmatpush1.msk.msra.mxu1 %vm1263_vm2, %v3472_v27  ;;  %v3421_v48 = vpop.permute.xlu0 %3420  ;;  %vm6347_vm2 = vmmov %vm6341_vm1 }
 0x72c   : > { %v3425_v7 = vpop.permute.xlu1 %3424  ;;  %3596 = vmatprep.subr.mxu1 %v3469_v52  ;;  %v3461_v12 = vsel %vm6350_vm14, %v3421_v48, %v3423_v42  ;;  %vm6356_vm1 = vmmov %vm6351_vm0 }
 0x72f   : > { %v3409_v6 = vpop.permute.xlu0 %3408 }
 0x730   : > { %v3439_v61 = vpop.permute.xlu1 %3438  ;;  %v3456_v33 = vsel %vm6355_vm3, %v3409_v6, %v3411_v51 }
 0x731   : > { %v3468_v16 = vsel %vm6343_vm7, %v3439_v61, %v3441_v25  ;;  %v3467_v63 = vsel %vm6344_vm6, %v3437_v40, %v3439_v61 }
 0x732   : > { %3525 = vmatprep.subr.mxu0 %v3467_v63  ;;  %3597 = vmatpush1.msra.mxu1 %v3468_v16 }
 0x733   : > { %3526 = vmatpush1.msra.mxu0 %v3466_v22  ;;  %v3413_v3 = vpop.permute.xlu0 %3412 }
 0x734   : > { %v3427_v62 = vpop.permute.xlu1 %3426  ;;  %v3457_v46 = vsel %vm6354_vm11, %v3411_v51, %v3413_v3 }
 0x735   : > { %v3462_v18 = vsel %vm6346_vm5, %v3425_v7, %v3427_v62  ;;  %v3463_v44 = vsel %vm6347_vm2, %v3427_v62, %v3429_v41 }
 0x736   : > { %3527 = vmatprep.subr.mxu0 %v3463_v44 }
 0x737   : > { %3528 = vmatpush1.msra.mxu0 %v3462_v18 }
 0x738   : > { %v3431_v13 = vpop.permute.xlu1 %3430 }
 0x739   : > { %v3464_v11 = vsel %vm6348_vm12, %v3429_v41, %v3431_v13  ;;  %v3465_v43 = vsel %vm6349_vm13, %v3431_v13, %v3433_v60 }
 0x73a   : > { %3598 = vmatprep.subr.mxu1 %v3465_v43 }
 0x73b   : > { %3599 = vmatpush1.msra.mxu1 %v3464_v11 }
 0x73c   : > { %v3419_v1 = vpop.permute.xlu1 %3418  ;;  %3600 = vmatprep.subr.mxu1 %v3461_v12 }
 0x73d   : > { %v3460_v50 = vsel %vm6351_vm0, %v3419_v1, %v3421_v48  ;;  %v3459_v31 = vsel %vm6352_vm4, %v3417_v9, %v3419_v1 }
 0x73e   : > { %3529 = vmatprep.subr.mxu0 %v3459_v31  ;;  %3601 = vmatpush1.msra.mxu1 %v3460_v50 }
 0x73f   : > { %3530 = vmatpush1.msra.mxu0 %v3458_v49  ;;  %3602 = vmatprep.subr.mxu1 %v3457_v46 }
 0x740   : > { %v3407_v57 = vpop.permute.xlu1 %3406  ;;  %3603 = vmatpush1.msra.mxu1 %v3456_v33 }
 0x741   : > { %v3455_v35 = vsel %vm6356_vm1, %v3407_v57, %v3409_v6  ;;  %3793 = vmatmul.mubr.msk.f32.vlgmr.msra.gmra.mxu1 %vm2641_vm9, %v3383_v38 }
 0x742   : > { %3531 = vmatprep.subr.mxu0 %v3455_v35 }
 0x744   : > { %v3405_v36 = vpop.permute.xlu1 %3404 }
 0x745   : > { %v3454_v32 = vsel %vm6357_vm15, %v3405_v36, %v3407_v57 }
 0x746   : > { %3532 = vmatpush1.msra.mxu0 %v3454_v32 }
 0x747   : > { %3790 = vmatmul.mubr.msk.f32.vlgmr.msra.gmra.mxu0 %vm2641_vm9, %v3383_v38 }
 0x801   : > { %v3638_v15 = vpop.f32.mrf.mxu1 }
 0x802   : > { %v3639_v4 = vadd.f32 %v3638_v15, %v6252_v58 }
 0x803   : > { %v3640_v56 = vpop.f32.mrf.mxu1 }
 0x804   : > { %v3641_v26 = vadd.f32 %v3640_v56, %v5230_v0 }
 0x806   : > { %v3795_v30 = vpack.c.bf16 %v3641_v26, %v3639_v4 }
 0x807   : > { %v3567_v19 = vpop.f32.mrf.mxu0 }
 0x808   : > { %v3568_v5 = vadd.f32 %v3567_v19, %v6253_v24  ;;  %v3666_v42 = vrot.slane %v3795_v30, %v3658_v23 }
 0x809   : > { %v3569_v21 = vpop.f32.mrf.mxu0 }
 0x80a   : > { %v3570_v39 = vadd.f32 %v3569_v21, %v5238_v53 }
 0x80c   : > { %v3794_v2 = vpack.c.bf16 %v3570_v39, %v3568_v5 }
 0x80e   : > { %v3659_v34 = vrot.slane %v3794_v2, %v3658_v23 }
 0x810   : > { %v3667_v58 = vcombine.low %v3659_v34, %v3666_v42 }
 0x812   : > { %3669 = vst [vmem:[%s332_s13] sm:$0xff] %v3667_v58 }
 0x813 PF: > { %s19_s30 = sadd.s32 1, %s3855_s30  }
 0x814   : > { %p16_p4 = scmp.ge.s32.totalorder %s19_s30, 4  }
 0x816   :  { %18 = sbr.rel (!%p16_p4) target bundleno = 1 (0x1), region = 129 }

</bundles_post_ra>
